<compile_context>
chip_gen: v7x
topology: tpu7x:2x2x1
jax: 0.10.0
libtpu: 0.0.40
codegen_flags: <defaults>
</compile_context>

<pallas_src>
from functools import partial

import jax
import jax.numpy as jnp
from jax.experimental import pallas as pl
from jax.experimental.pallas import tpu as pltpu

BN_EPS = 1e-5
_VMEM_LIMIT_BYTES = 32 * 1024 * 1024  # safe scoped-VMEM budget on v5e/v6e/v7x


# ----------------------------------------------------------------------------
# helpers
# ----------------------------------------------------------------------------
def _round_up(x, m):
    return (x + m - 1) // m * m


def _round_ch(c):
    """Channel count padded to a multiple of 128 lanes."""
    return max(128, _round_up(c, 128))


def _pick_br(h, wd, cp, tn):
    """Rows of output per conv3x3 grid step, under a ~20 MiB working-set cap."""
    budget = 20 * 1024 * 1024
    cands = sorted({d for d in (h, 256, 128, 64, 32, 16, 8, 4, 2, 1)
                    if d <= h and h % d == 0}, reverse=True)
    for br in cands:
        x_bytes = 2 * (br + 2) * (wd + 2) * cp * 2     # double-buffered input block
        w_bytes = 2 * 9 * cp * tn * 2
        o_bytes = 2 * br * wd * tn * 2
        acc_bytes = br * wd * tn * 4
        tmp_bytes = 2 * br * wd * cp * 2               # shifted-window temporaries
        if x_bytes + w_bytes + o_bytes + acc_bytes + tmp_bytes <= budget:
            return br
    return cands[-1]


# ----------------------------------------------------------------------------
# Pallas kernels
# ----------------------------------------------------------------------------
def _conv3x3_kernel(x_ref, w_ref, scale_ref, shift_ref, o_ref, *,
                    br, wd, cp, apply_relu):
    """3x3 conv (+ folded BN affine, + optional ReLU) on one row block.

    x_ref:  (br+2, wd+2, cp)  input rows with +1 spatial halo (bf16)
    w_ref:  (9*cp, tn)        weight, rows ordered (dh, dw, cin)
    o_ref:  (br, wd, tn)      output block
    """
    acc = None
    for dh in range(3):
        for dw in range(3):
            a = x_ref[dh:dh + br, dw:dw + wd, :].reshape(br * wd, cp)
            wk = w_ref[(dh * 3 + dw) * cp:(dh * 3 + dw + 1) * cp, :]
            d = jnp.dot(a, wk, preferred_element_type=jnp.float32)
            acc = d if acc is None else acc + d
    out = acc * scale_ref[...] + shift_ref[...]
    if apply_relu:
        out = jnp.maximum(out, 0.0)
    o_ref[...] = out.reshape(br, wd, -1).astype(o_ref.dtype)


def _maxpool_kernel(x_ref, o_ref, *, cp):
    """2x2 max pool, lane-dense: x_ref is a (bm, 2, W/2, 2*cp) view."""
    v = jnp.maximum(x_ref[:, 0], x_ref[:, 1])          # vertical max (VPU)
    o_ref[...] = jnp.maximum(v[..., :cp], v[..., cp:])  # horizontal pairs (lane-aligned)


def _convtr_kernel(x_ref, w_ref, shift_ref, o_ref):
    """ConvTranspose(k=2,s=2) for one dh: (bm*W, Cin_p) @ (Cin_p, 2*Cout_p)."""
    bm, wd, cp = x_ref.shape
    a = x_ref[...].reshape(bm * wd, cp)
    out = jnp.dot(a, w_ref[...], preferred_element_type=jnp.float32) + shift_ref[...]
    o_ref[...] = out.reshape(bm, wd, -1).astype(o_ref.dtype)


def _matmul_bias_kernel(a_ref, b_ref, shift_ref, o_ref):
    """Single-dot matmul + bias (final 1x1 conv)."""
    out = jnp.dot(a_ref[...], b_ref[...], preferred_element_type=jnp.float32)
    o_ref[...] = (out + shift_ref[...]).astype(o_ref.dtype)


# ----------------------------------------------------------------------------
# Pallas wrappers
# ----------------------------------------------------------------------------
def conv3x3_bn_relu(x, p):
    """x: (N, H, W, Cin_p) bf16, Cin_p mult of 128 -> (N, H, W, Cout_p) bf16."""
    n, h, wd, cp = x.shape
    coutp = p["w"].shape[1]
    tn = 256 if coutp % 256 == 0 else 128
    br = _pick_br(h, wd, cp, tn)
    rb = h // br

    xp = jnp.pad(x, ((0, 0), (1, 1), (1, 1), (0, 0)))  # +1 spatial zero ring
    if rb == 1:
        xblk = xp                                       # whole image per block
    else:
        # Small (~(br+2)/br x) overlapped row-block duplication (not a 9x slab).
        xblk = jnp.stack([xp[:, i * br:i * br + br + 2] for i in range(rb)], axis=1)
        xblk = xblk.reshape(n * rb, br + 2, wd + 2, cp)
    t = n * rb

    out = pl.pallas_call(
        partial(_conv3x3_kernel, br=br, wd=wd, cp=cp, apply_relu=True),
        out_shape=jax.ShapeDtypeStruct((t, br, wd, coutp), jnp.bfloat16),
        grid=(t, coutp // tn),
        in_specs=[
            pl.BlockSpec((None, br + 2, wd + 2, cp), lambda i, j: (i, 0, 0, 0)),
            pl.BlockSpec((9 * cp, tn), lambda i, j: (0, j)),
            pl.BlockSpec((1, tn), lambda i, j: (0, j)),
            pl.BlockSpec((1, tn), lambda i, j: (0, j)),
        ],
        out_specs=pl.BlockSpec((None, br, wd, tn), lambda i, j: (i, 0, 0, j)),
        compiler_params=pltpu.CompilerParams(
            dimension_semantics=("parallel", "parallel"),
            vmem_limit_bytes=_VMEM_LIMIT_BYTES),
    )(xblk, p["w"], p["scale"], p["shift"])
    return out.reshape(n, h, wd, coutp)


def maxpool2x2(x):
    """x: (N, H, W, Cp) -> (N, H//2, W//2, Cp), one lane-dense Pallas pass."""
    n, h, wd, cp = x.shape
    assert h % 2 == 0 and wd % 2 == 0, "MaxPool2d(2) needs even H and W"
    m2, w2 = n * h // 2, wd // 2
    xv = x.reshape(m2, 2, w2, 2 * cp)  # pure row-major reshape

    itemsize = jnp.dtype(x.dtype).itemsize
    budget = 16 * 1024 * 1024
    bm = 1
    for cand in (1024, 512, 256, 128, 64, 32, 16, 8, 4, 2, 1):
        if m2 % cand == 0 and cand * 2 * w2 * 2 * cp * itemsize * 2 <= budget:
            bm = cand
            break
    while bm > 1 and m2 // bm < 2:     # >=2 parallel steps for dual-core chips
        bm //= 2

    out = pl.pallas_call(
        partial(_maxpool_kernel, cp=cp),
        out_shape=jax.ShapeDtypeStruct((m2, w2, cp), x.dtype),
        grid=(m2 // bm,),
        in_specs=[pl.BlockSpec((bm, 2, w2, 2 * cp), lambda i: (i, 0, 0, 0))],
        out_specs=pl.BlockSpec((bm, w2, cp), lambda i: (i, 0, 0)),
        compiler_params=pltpu.CompilerParams(
            dimension_semantics=("parallel",),
            vmem_limit_bytes=_VMEM_LIMIT_BYTES),
    )(xv)
    return out.reshape(n, h // 2, wd // 2, cp)


def conv_transpose2x2(x, p):
    """ConvTranspose2d(k=2,s=2) with the pixel shuffle fused into the output
    BlockSpec: the kernel writes (N*H, 2, W, 2*Cout_p) directly; the final NHWC
    tensor is a free row-major reshape."""
    n, h, wd, cp = x.shape
    w_mat = p["w"]                       # (2, Cin_p, 2*Cout_p) bf16
    coutp2 = w_mat.shape[2]
    coutp = coutp2 // 2
    tn = 512 if coutp2 % 512 == 0 else 256

    nh = n * h
    xr = x.reshape(nh, wd, cp)
    budget = 8 * 1024 * 1024
    bm = 1
    for cand in (256, 128, 64, 32, 16, 8, 4, 2, 1):
        if nh % cand == 0 and cand * wd * (cp + tn) * 2 * 2 <= budget:
            bm = cand
            break

    out = pl.pallas_call(
        _convtr_kernel,
        out_shape=jax.ShapeDtypeStruct((nh, 2, wd, coutp2), jnp.bfloat16),
        grid=(nh // bm, 2, coutp2 // tn),
        in_specs=[
            pl.BlockSpec((bm, wd, cp), lambda i, dh, j: (i, 0, 0)),
            pl.BlockSpec((None, cp, tn), lambda i, dh, j: (dh, 0, j)),
            pl.BlockSpec((1, tn), lambda i, dh, j: (0, j)),
        ],
        out_specs=pl.BlockSpec((bm, None, wd, tn), lambda i, dh, j: (i, dh, 0, j)),
        compiler_params=pltpu.CompilerParams(
            dimension_semantics=("parallel", "parallel", "parallel"),
            vmem_limit_bytes=_VMEM_LIMIT_BYTES),
    )(xr, w_mat, p["shift"])
    # (nh, 2, W, 2*Cout_p) -> (N, 2H, 2W, Cout_p): pure row-major merges.
    return out.reshape(n, h, 2, wd, 2, coutp).reshape(n, 2 * h, 2 * wd, coutp)


def conv1x1(x, p):
    """Final 1x1 conv: (N,H,W,Cin_p) -> (N,H,W,Ncls_p) f32."""
    n, h, wd, cp = x.shape
    w_mat, shift = p["w"], p["shift"]    # (Cin_p, Ncls_p), (1, Ncls_p)
    nclsp = w_mat.shape[1]
    m = n * h * wd
    a = x.reshape(m, cp)
    tm = 256
    m_pad = _round_up(m, tm)
    if m_pad != m:
        a = jnp.pad(a, ((0, m_pad - m), (0, 0)))
    tn = 128

    out = pl.pallas_call(
        _matmul_bias_kernel,
        out_shape=jax.ShapeDtypeStruct((m_pad, nclsp), jnp.float32),
        grid=(m_pad // tm, nclsp // tn),
        in_specs=[
            pl.BlockSpec((tm, cp), lambda i, j: (i, 0)),
            pl.BlockSpec((cp, tn), lambda i, j: (0, j)),
            pl.BlockSpec((1, tn), lambda i, j: (0, j)),
        ],
        out_specs=pl.BlockSpec((tm, tn), lambda i, j: (i, j)),
        compiler_params=pltpu.CompilerParams(
            dimension_semantics=("parallel", "parallel"),
            vmem_limit_bytes=_VMEM_LIMIT_BYTES),
    )(a, w_mat, shift)
    return out[:m].reshape(n, h, wd, nclsp)


# ----------------------------------------------------------------------------
# Deterministic parameter initialization (synthetic, matches module shapes).
# BatchNorm is eval-mode with PyTorch default stats, folded with the general
# formula so real (gamma, beta, mean, var) could be dropped in.
# ----------------------------------------------------------------------------
def _make_conv3x3_params(key, cin, cout):
    wkey, bkey = jax.random.split(key)
    w = jax.random.normal(wkey, (3, 3, cin, cout), jnp.float32) * (2.0 / (9 * cin)) ** 0.5
    b = jax.random.normal(bkey, (cout,), jnp.float32) * 0.01
    gamma = jnp.ones((cout,), jnp.float32)
    beta = jnp.zeros((cout,), jnp.float32)
    mean = jnp.zeros((cout,), jnp.float32)
    var = jnp.ones((cout,), jnp.float32)
    scale = gamma / jnp.sqrt(var + BN_EPS)
    shift = beta + (b - mean) * scale
    cinp, coutp = _round_ch(cin), _round_ch(cout)
    wp = jnp.zeros((3, 3, cinp, coutp), jnp.float32).at[:, :, :cin, :cout].set(w)
    sp = jnp.zeros((coutp,), jnp.float32).at[:cout].set(scale)   # pad lanes stay 0
    tp = jnp.zeros((coutp,), jnp.float32).at[:cout].set(shift)
    return dict(w=wp.reshape(9 * cinp, coutp).astype(jnp.bfloat16),
                scale=sp.reshape(1, coutp), shift=tp.reshape(1, coutp))


def _init_block_params(key, cin, cout):
    k1, k2 = jax.random.split(key)
    return dict(c1=_make_conv3x3_params(k1, cin, cout),
                c2=_make_conv3x3_params(k2, cout, cout))


def _make_up_params(key, cin, cout):
    wkey, bkey = jax.random.split(key)
    w = jax.random.normal(wkey, (cin, cout, 2, 2), jnp.float32) * (1.0 / cin) ** 0.5
    b = jax.random.normal(bkey, (cout,), jnp.float32) * 0.01
    cinp, coutp = _round_ch(cin), _round_ch(cout)
    wt = jnp.transpose(w, (2, 0, 3, 1))                 # (dh, cin, dw, cout)
    wp = jnp.zeros((2, cinp, 2, coutp), jnp.float32).at[:, :cin, :, :cout].set(wt)
    shift = jnp.zeros((2, coutp), jnp.float32).at[:, :cout].set(
        jnp.broadcast_to(b, (2, cout)))
    return dict(w=wp.reshape(2, cinp, 2 * coutp).astype(jnp.bfloat16),
                shift=shift.reshape(1, 2 * coutp))


def _make_conv1x1_params(key, cin, ncls):
    wkey, bkey = jax.random.split(key)
    w = jax.random.normal(wkey, (cin, ncls), jnp.float32) * (1.0 / cin) ** 0.5
    b = jax.random.normal(bkey, (ncls,), jnp.float32) * 0.01
    cinp, nclsp = _round_ch(cin), _round_ch(ncls)
    wp = jnp.zeros((cinp, nclsp), jnp.float32).at[:cin, :ncls].set(w)
    bp = jnp.zeros((nclsp,), jnp.float32).at[:ncls].set(b)
    return dict(w=wp.astype(jnp.bfloat16), shift=bp.reshape(1, nclsp))


def init_unet_params(key, num_classes, base_channels):
    bc = base_channels
    keys = jax.random.split(key, 14)
    return dict(
        enc1=_init_block_params(keys[0], 3, bc),
        enc2=_init_block_params(keys[1], bc, bc * 2),
        enc3=_init_block_params(keys[2], bc * 2, bc * 4),
        enc4=_init_block_params(keys[3], bc * 4, bc * 8),
        bottleneck=_init_block_params(keys[4], bc * 8, bc * 16),
        up4=_make_up_params(keys[5], bc * 16, bc * 8),
        dec4=_init_block_params(keys[6], bc * 8, bc * 8),
        up3=_make_up_params(keys[7], bc * 8, bc * 4),
        dec3=_init_block_params(keys[8], bc * 4, bc * 4),
        up2=_make_up_params(keys[9], bc * 4, bc * 2),
        dec2=_init_block_params(keys[10], bc * 2, bc * 2),
        up1=_make_up_params(keys[11], bc * 2, bc),
        dec1=_init_block_params(keys[12], bc, bc),
        conv_last=_make_conv1x1_params(keys[13], bc, num_classes),
    )


# ----------------------------------------------------------------------------
# Forward pass (mirrors UNetNoSkip.forward)
# ----------------------------------------------------------------------------
def _apply_block(p, x):
    x = conv3x3_bn_relu(x, p["c1"])
    x = conv3x3_bn_relu(x, p["c2"])
    return x


def unet_noskip_forward(params, x_nchw, num_classes):
    # NCHW (PyTorch convention) -> NHWC bf16, channels zero-padded to 128 lanes.
    x = jnp.transpose(x_nchw, (0, 2, 3, 1)).astype(jnp.bfloat16)
    cin = x.shape[-1]
    cinp = _round_ch(cin)
    if cinp != cin:
        x = jnp.pad(x, ((0, 0), (0, 0), (0, 0), (0, cinp - cin)))

    x = _apply_block(params["enc1"], x)
    x = maxpool2x2(x)
    x = _apply_block(params["enc2"], x)
    x = maxpool2x2(x)
    x = _apply_block(params["enc3"], x)
    x = maxpool2x2(x)
    x = _apply_block(params["enc4"], x)
    x = maxpool2x2(x)
    x = _apply_block(params["bottleneck"], x)

    x = conv_transpose2x2(x, params["up4"])
    x = _apply_block(params["dec4"], x)
    x = conv_transpose2x2(x, params["up3"])
    x = _apply_block(params["dec3"], x)
    x = conv_transpose2x2(x, params["up2"])
    x = _apply_block(params["dec2"], x)
    x = conv_transpose2x2(x, params["up1"])
    x = _apply_block(params["dec1"], x)

    out = conv1x1(x, params["conv_last"])           # (N, H, W, Ncls_p) f32
    out = out[..., :num_classes]                    # single slice at the very end
    return jnp.transpose(out, (0, 3, 1, 2))         # NHWC -> NCHW


# ----------------------------------------------------------------------------
if __name__ == "__main__":
    key = jax.random.PRNGKey(0)
    k_params, k_x = jax.random.split(key)

    NUM_CLASSES = 4
    BASE_CHANNELS = 8          # small synthetic size (module default is 64)
    N, C, H, W = 2, 3, 16, 16  # spatial 16 -> 1x1 bottleneck after 4 pools

    params = init_unet_params(k_params, NUM_CLASSES, BASE_CHANNELS)
    x = jax.random.normal(k_x, (N, C, H, W), jnp.float32)

    fwd = jax.jit(lambda p, xx: unet_noskip_forward(p, xx, NUM_CLASSES))
    out = jax.block_until_ready(fwd(params, x))

    assert out.shape == (N, NUM_CLASSES, H, W), out.shape
    assert out.dtype == jnp.float32
    assert bool(jnp.all(jnp.isfinite(out)))
    print("KERNEL_OK")
</pallas_src>

<mosaic_0001>
module attributes {stable_mosaic.version = 11 : i64} {
  func.func @_conv3x3_kernel(%arg0: i32, %arg1: i32, %arg2: memref<1x18x18x128xbf16, #tpu.memory_space<vmem>>, %arg3: memref<1152x128xbf16, #tpu.memory_space<vmem>>, %arg4: memref<1x128xf32, #tpu.memory_space<vmem>>, %arg5: memref<1x128xf32, #tpu.memory_space<vmem>>, %arg6: memref<1x16x16x128xbf16, #tpu.memory_space<vmem>>) attributes {dimension_semantics = [#tpu.dimension_semantics<parallel>, #tpu.dimension_semantics<parallel>], iteration_bounds = array<i64: 2, 1>, scalar_prefetch = 0 : i64, scratch_operands = 0 : i64, tpu.core_type = #tpu.core_type<tc>, window_params = [{transform_indices = @transform_0, window_bounds = array<i64: 1, 18, 18, 128>}, {transform_indices = @transform_1, window_bounds = array<i64: 1152, 128>}, {transform_indices = @transform_2, window_bounds = array<i64: 1, 128>}, {transform_indices = @transform_3, window_bounds = array<i64: 1, 128>}, {transform_indices = @transform_4, window_bounds = array<i64: 1, 16, 16, 128>}]} {
    %c0 = arith.constant 0 : index
    %c0_0 = arith.constant 0 : index
    %c0_1 = arith.constant 0 : index
    %c0_2 = arith.constant 0 : index
    %0 = vector.load %arg2[%c0, %c0_0, %c0_1, %c0_2] : memref<1x18x18x128xbf16, #tpu.memory_space<vmem>>, vector<1x16x16x128xbf16>
    %1 = vector.shape_cast %0 : vector<1x16x16x128xbf16> to vector<16x16x128xbf16>
    %2 = vector.shape_cast %1 : vector<16x16x128xbf16> to vector<256x128xbf16>
    %c0_3 = arith.constant 0 : index
    %c0_4 = arith.constant 0 : index
    %3 = vector.load %arg3[%c0_3, %c0_4] : memref<1152x128xbf16, #tpu.memory_space<vmem>>, vector<128x128xbf16>
    %cst = arith.constant dense<0.000000e+00> : vector<256x128xf32>
    %4 = tpu.matmul %2, %3, %cst {dimension_numbers = #tpu.dot_dimension_numbers<[1], [0], [0], [1], [0, 0, 1, 1], [], []>} : vector<256x128xbf16>, vector<128x128xbf16>, vector<256x128xf32> -> vector<256x128xf32>
    %c0_5 = arith.constant 0 : index
    %c0_6 = arith.constant 0 : index
    %c1 = arith.constant 1 : index
    %c0_7 = arith.constant 0 : index
    %5 = vector.load %arg2[%c0_5, %c0_6, %c1, %c0_7] : memref<1x18x18x128xbf16, #tpu.memory_space<vmem>>, vector<1x16x16x128xbf16>
    %6 = vector.shape_cast %5 : vector<1x16x16x128xbf16> to vector<16x16x128xbf16>
    %7 = vector.shape_cast %6 : vector<16x16x128xbf16> to vector<256x128xbf16>
    %c128 = arith.constant 128 : index
    %c0_8 = arith.constant 0 : index
    %8 = vector.load %arg3[%c128, %c0_8] : memref<1152x128xbf16, #tpu.memory_space<vmem>>, vector<128x128xbf16>
    %cst_9 = arith.constant dense<0.000000e+00> : vector<256x128xf32>
    %9 = tpu.matmul %7, %8, %cst_9 {dimension_numbers = #tpu.dot_dimension_numbers<[1], [0], [0], [1], [0, 0, 1, 1], [], []>} : vector<256x128xbf16>, vector<128x128xbf16>, vector<256x128xf32> -> vector<256x128xf32>
    %10 = arith.addf %4, %9 : vector<256x128xf32>
    %c0_10 = arith.constant 0 : index
    %c0_11 = arith.constant 0 : index
    %c2 = arith.constant 2 : index
    %c0_12 = arith.constant 0 : index
    %11 = vector.load %arg2[%c0_10, %c0_11, %c2, %c0_12] : memref<1x18x18x128xbf16, #tpu.memory_space<vmem>>, vector<1x16x16x128xbf16>
    %12 = vector.shape_cast %11 : vector<1x16x16x128xbf16> to vector<16x16x128xbf16>
    %13 = vector.shape_cast %12 : vector<16x16x128xbf16> to vector<256x128xbf16>
    %c256 = arith.constant 256 : index
    %c0_13 = arith.constant 0 : index
    %14 = vector.load %arg3[%c256, %c0_13] : memref<1152x128xbf16, #tpu.memory_space<vmem>>, vector<128x128xbf16>
    %cst_14 = arith.constant dense<0.000000e+00> : vector<256x128xf32>
    %15 = tpu.matmul %13, %14, %cst_14 {dimension_numbers = #tpu.dot_dimension_numbers<[1], [0], [0], [1], [0, 0, 1, 1], [], []>} : vector<256x128xbf16>, vector<128x128xbf16>, vector<256x128xf32> -> vector<256x128xf32>
    %16 = arith.addf %10, %15 : vector<256x128xf32>
    %c0_15 = arith.constant 0 : index
    %c1_16 = arith.constant 1 : index
    %c0_17 = arith.constant 0 : index
    %c0_18 = arith.constant 0 : index
    %17 = vector.load %arg2[%c0_15, %c1_16, %c0_17, %c0_18] : memref<1x18x18x128xbf16, #tpu.memory_space<vmem>>, vector<1x16x16x128xbf16>
    %18 = vector.shape_cast %17 : vector<1x16x16x128xbf16> to vector<16x16x128xbf16>
    %19 = vector.shape_cast %18 : vector<16x16x128xbf16> to vector<256x128xbf16>
    %c384 = arith.constant 384 : index
    %c0_19 = arith.constant 0 : index
    %20 = vector.load %arg3[%c384, %c0_19] : memref<1152x128xbf16, #tpu.memory_space<vmem>>, vector<128x128xbf16>
    %cst_20 = arith.constant dense<0.000000e+00> : vector<256x128xf32>
    %21 = tpu.matmul %19, %20, %cst_20 {dimension_numbers = #tpu.dot_dimension_numbers<[1], [0], [0], [1], [0, 0, 1, 1], [], []>} : vector<256x128xbf16>, vector<128x128xbf16>, vector<256x128xf32> -> vector<256x128xf32>
    %22 = arith.addf %16, %21 : vector<256x128xf32>
    %c0_21 = arith.constant 0 : index
    %c1_22 = arith.constant 1 : index
    %c1_23 = arith.constant 1 : index
    %c0_24 = arith.constant 0 : index
    %23 = vector.load %arg2[%c0_21, %c1_22, %c1_23, %c0_24] : memref<1x18x18x128xbf16, #tpu.memory_space<vmem>>, vector<1x16x16x128xbf16>
    %24 = vector.shape_cast %23 : vector<1x16x16x128xbf16> to vector<16x16x128xbf16>
    %25 = vector.shape_cast %24 : vector<16x16x128xbf16> to vector<256x128xbf16>
    %c512 = arith.constant 512 : index
    %c0_25 = arith.constant 0 : index
    %26 = vector.load %arg3[%c512, %c0_25] : memref<1152x128xbf16, #tpu.memory_space<vmem>>, vector<128x128xbf16>
    %cst_26 = arith.constant dense<0.000000e+00> : vector<256x128xf32>
    %27 = tpu.matmul %25, %26, %cst_26 {dimension_numbers = #tpu.dot_dimension_numbers<[1], [0], [0], [1], [0, 0, 1, 1], [], []>} : vector<256x128xbf16>, vector<128x128xbf16>, vector<256x128xf32> -> vector<256x128xf32>
    %28 = arith.addf %22, %27 : vector<256x128xf32>
    %c0_27 = arith.constant 0 : index
    %c1_28 = arith.constant 1 : index
    %c2_29 = arith.constant 2 : index
    %c0_30 = arith.constant 0 : index
    %29 = vector.load %arg2[%c0_27, %c1_28, %c2_29, %c0_30] : memref<1x18x18x128xbf16, #tpu.memory_space<vmem>>, vector<1x16x16x128xbf16>
    %30 = vector.shape_cast %29 : vector<1x16x16x128xbf16> to vector<16x16x128xbf16>
    %31 = vector.shape_cast %30 : vector<16x16x128xbf16> to vector<256x128xbf16>
    %c640 = arith.constant 640 : index
    %c0_31 = arith.constant 0 : index
    %32 = vector.load %arg3[%c640, %c0_31] : memref<1152x128xbf16, #tpu.memory_space<vmem>>, vector<128x128xbf16>
    %cst_32 = arith.constant dense<0.000000e+00> : vector<256x128xf32>
    %33 = tpu.matmul %31, %32, %cst_32 {dimension_numbers = #tpu.dot_dimension_numbers<[1], [0], [0], [1], [0, 0, 1, 1], [], []>} : vector<256x128xbf16>, vector<128x128xbf16>, vector<256x128xf32> -> vector<256x128xf32>
    %34 = arith.addf %28, %33 : vector<256x128xf32>
    %c0_33 = arith.constant 0 : index
    %c2_34 = arith.constant 2 : index
    %c0_35 = arith.constant 0 : index
    %c0_36 = arith.constant 0 : index
    %35 = vector.load %arg2[%c0_33, %c2_34, %c0_35, %c0_36] : memref<1x18x18x128xbf16, #tpu.memory_space<vmem>>, vector<1x16x16x128xbf16>
    %36 = vector.shape_cast %35 : vector<1x16x16x128xbf16> to vector<16x16x128xbf16>
    %37 = vector.shape_cast %36 : vector<16x16x128xbf16> to vector<256x128xbf16>
    %c768 = arith.constant 768 : index
    %c0_37 = arith.constant 0 : index
    %38 = vector.load %arg3[%c768, %c0_37] : memref<1152x128xbf16, #tpu.memory_space<vmem>>, vector<128x128xbf16>
    %cst_38 = arith.constant dense<0.000000e+00> : vector<256x128xf32>
    %39 = tpu.matmul %37, %38, %cst_38 {dimension_numbers = #tpu.dot_dimension_numbers<[1], [0], [0], [1], [0, 0, 1, 1], [], []>} : vector<256x128xbf16>, vector<128x128xbf16>, vector<256x128xf32> -> vector<256x128xf32>
    %40 = arith.addf %34, %39 : vector<256x128xf32>
    %c0_39 = arith.constant 0 : index
    %c2_40 = arith.constant 2 : index
    %c1_41 = arith.constant 1 : index
    %c0_42 = arith.constant 0 : index
    %41 = vector.load %arg2[%c0_39, %c2_40, %c1_41, %c0_42] : memref<1x18x18x128xbf16, #tpu.memory_space<vmem>>, vector<1x16x16x128xbf16>
    %42 = vector.shape_cast %41 : vector<1x16x16x128xbf16> to vector<16x16x128xbf16>
    %43 = vector.shape_cast %42 : vector<16x16x128xbf16> to vector<256x128xbf16>
    %c896 = arith.constant 896 : index
    %c0_43 = arith.constant 0 : index
    %44 = vector.load %arg3[%c896, %c0_43] : memref<1152x128xbf16, #tpu.memory_space<vmem>>, vector<128x128xbf16>
    %cst_44 = arith.constant dense<0.000000e+00> : vector<256x128xf32>
    %45 = tpu.matmul %43, %44, %cst_44 {dimension_numbers = #tpu.dot_dimension_numbers<[1], [0], [0], [1], [0, 0, 1, 1], [], []>} : vector<256x128xbf16>, vector<128x128xbf16>, vector<256x128xf32> -> vector<256x128xf32>
    %46 = arith.addf %40, %45 : vector<256x128xf32>
    %c0_45 = arith.constant 0 : index
    %c2_46 = arith.constant 2 : index
    %c2_47 = arith.constant 2 : index
    %c0_48 = arith.constant 0 : index
    %47 = vector.load %arg2[%c0_45, %c2_46, %c2_47, %c0_48] : memref<1x18x18x128xbf16, #tpu.memory_space<vmem>>, vector<1x16x16x128xbf16>
    %48 = vector.shape_cast %47 : vector<1x16x16x128xbf16> to vector<16x16x128xbf16>
    %49 = vector.shape_cast %48 : vector<16x16x128xbf16> to vector<256x128xbf16>
    %c1024 = arith.constant 1024 : index
    %c0_49 = arith.constant 0 : index
    %50 = vector.load %arg3[%c1024, %c0_49] : memref<1152x128xbf16, #tpu.memory_space<vmem>>, vector<128x128xbf16>
    %cst_50 = arith.constant dense<0.000000e+00> : vector<256x128xf32>
    %51 = tpu.matmul %49, %50, %cst_50 {dimension_numbers = #tpu.dot_dimension_numbers<[1], [0], [0], [1], [0, 0, 1, 1], [], []>} : vector<256x128xbf16>, vector<128x128xbf16>, vector<256x128xf32> -> vector<256x128xf32>
    %52 = arith.addf %46, %51 : vector<256x128xf32>
    %c0_51 = arith.constant 0 : index
    %c0_52 = arith.constant 0 : index
    %53 = vector.load %arg4[%c0_51, %c0_52] : memref<1x128xf32, #tpu.memory_space<vmem>>, vector<1x128xf32>
    %54 = vector.broadcast %53 : vector<1x128xf32> to vector<256x128xf32>
    %55 = arith.mulf %52, %54 : vector<256x128xf32>
    %c0_53 = arith.constant 0 : index
    %c0_54 = arith.constant 0 : index
    %56 = vector.load %arg5[%c0_53, %c0_54] : memref<1x128xf32, #tpu.memory_space<vmem>>, vector<1x128xf32>
    %57 = vector.broadcast %56 : vector<1x128xf32> to vector<256x128xf32>
    %58 = arith.addf %55, %57 : vector<256x128xf32>
    %cst_55 = arith.constant 0.000000e+00 : f32
    %59 = vector.broadcast %cst_55 : f32 to vector<256x128xf32>
    %60 = arith.maximumf %58, %59 : vector<256x128xf32>
    %61 = vector.shape_cast %60 : vector<256x128xf32> to vector<16x16x128xf32>
    %62 = arith.truncf %61 : vector<16x16x128xf32> to vector<16x16x128xbf16>
    %c0_56 = arith.constant 0 : index
    %c0_57 = arith.constant 0 : index
    %c0_58 = arith.constant 0 : index
    %c0_59 = arith.constant 0 : index
    %63 = vector.load %arg6[%c0_56, %c0_57, %c0_58, %c0_59] : memref<1x16x16x128xbf16, #tpu.memory_space<vmem>>, vector<1x16x16x128xbf16>
    %64 = vector.shape_cast %63 : vector<1x16x16x128xbf16> to vector<16x16x128xbf16>
    %65 = vector.shape_cast %62 : vector<16x16x128xbf16> to vector<1x16x16x128xbf16>
    tpu.vector_store %arg6[%c0_56, %c0_57, %c0_58, %c0_59], %65 {strides = array<i32>} : memref<1x16x16x128xbf16, #tpu.memory_space<vmem>>, vector<1x16x16x128xbf16>,
    return
  }
  func.func @transform_0(%arg0: i32, %arg1: i32) -> (i32, i32, i32, i32) {
    %c0_i32 = arith.constant 0 : i32
    %c0_i32_0 = arith.constant 0 : i32
    %c0_i32_1 = arith.constant 0 : i32
    %c0_i32_2 = arith.constant 0 : i32
    return %arg0, %c0_i32, %c0_i32_0, %c0_i32_1 : i32, i32, i32, i32
  }
  func.func @transform_1(%arg0: i32, %arg1: i32) -> (i32, i32) {
    %c0_i32 = arith.constant 0 : i32
    %c0_i32_0 = arith.constant 0 : i32
    return %c0_i32, %arg1 : i32, i32
  }
  func.func @transform_2(%arg0: i32, %arg1: i32) -> (i32, i32) {
    %c0_i32 = arith.constant 0 : i32
    %c0_i32_0 = arith.constant 0 : i32
    return %c0_i32, %arg1 : i32, i32
  }
  func.func @transform_3(%arg0: i32, %arg1: i32) -> (i32, i32) {
    %c0_i32 = arith.constant 0 : i32
    %c0_i32_0 = arith.constant 0 : i32
    return %c0_i32, %arg1 : i32, i32
  }
  func.func @transform_4(%arg0: i32, %arg1: i32) -> (i32, i32, i32, i32) {
    %c0_i32 = arith.constant 0 : i32
    %c0_i32_0 = arith.constant 0 : i32
    %c0_i32_1 = arith.constant 0 : i32
    return %arg0, %c0_i32, %c0_i32_0, %arg1 : i32, i32, i32, i32
  }
}

module attributes {stable_mosaic.version = 11 : i64} {
  func.func @_maxpool_kernel(%arg0: i32, %arg1: memref<8x2x8x256xbf16, #tpu.memory_space<vmem>>, %arg2: memref<8x8x128xbf16, #tpu.memory_space<vmem>>) attributes {dimension_semantics = [#tpu.dimension_semantics<parallel>], iteration_bounds = array<i64: 2>, scalar_prefetch = 0 : i64, scratch_operands = 0 : i64, tpu.core_type = #tpu.core_type<tc>, window_params = [{transform_indices = @transform_0, window_bounds = array<i64: 8, 2, 8, 256>}, {transform_indices = @transform_1, window_bounds = array<i64: 8, 8, 128>}]} {
    %c0 = arith.constant 0 : index
    %c0_0 = arith.constant 0 : index
    %c0_1 = arith.constant 0 : index
    %c0_2 = arith.constant 0 : index
    %0 = vector.load %arg1[%c0, %c0_0, %c0_1, %c0_2] : memref<8x2x8x256xbf16, #tpu.memory_space<vmem>>, vector<8x1x8x256xbf16>
    %1 = vector.shape_cast %0 : vector<8x1x8x256xbf16> to vector<8x8x256xbf16>
    %c0_3 = arith.constant 0 : index
    %c1 = arith.constant 1 : index
    %c0_4 = arith.constant 0 : index
    %c0_5 = arith.constant 0 : index
    %2 = vector.load %arg1[%c0_3, %c1, %c0_4, %c0_5] : memref<8x2x8x256xbf16, #tpu.memory_space<vmem>>, vector<8x1x8x256xbf16>
    %3 = vector.shape_cast %2 : vector<8x1x8x256xbf16> to vector<8x8x256xbf16>
    %4 = arith.maximumf %1, %3 : vector<8x8x256xbf16>
    %5 = vector.extract_strided_slice %4 {offsets = [0, 0, 0], sizes = [8, 8, 128], strides = [1, 1, 1]} : vector<8x8x256xbf16> to vector<8x8x128xbf16>
    %6 = vector.extract_strided_slice %4 {offsets = [0, 0, 128], sizes = [8, 8, 128], strides = [1, 1, 1]} : vector<8x8x256xbf16> to vector<8x8x128xbf16>
    %7 = arith.maximumf %5, %6 : vector<8x8x128xbf16>
    %c0_6 = arith.constant 0 : index
    %c0_7 = arith.constant 0 : index
    %c0_8 = arith.constant 0 : index
    %8 = vector.load %arg2[%c0_6, %c0_7, %c0_8] : memref<8x8x128xbf16, #tpu.memory_space<vmem>>, vector<8x8x128xbf16>
    tpu.vector_store %arg2[%c0_6, %c0_7, %c0_8], %7 {strides = array<i32>} : memref<8x8x128xbf16, #tpu.memory_space<vmem>>, vector<8x8x128xbf16>,
    return
  }
  func.func @transform_0(%arg0: i32) -> (i32, i32, i32, i32) {
    %c0_i32 = arith.constant 0 : i32
    %c0_i32_0 = arith.constant 0 : i32
    %c0_i32_1 = arith.constant 0 : i32
    %c0_i32_2 = arith.constant 0 : i32
    return %arg0, %c0_i32, %c0_i32_0, %c0_i32_1 : i32, i32, i32, i32
  }
  func.func @transform_1(%arg0: i32) -> (i32, i32, i32) {
    %c0_i32 = arith.constant 0 : i32
    %c0_i32_0 = arith.constant 0 : i32
    %c0_i32_1 = arith.constant 0 : i32
    return %arg0, %c0_i32, %c0_i32_0 : i32, i32, i32
  }
}

module attributes {stable_mosaic.version = 11 : i64} {
  func.func @_conv3x3_kernel(%arg0: i32, %arg1: i32, %arg2: memref<1x10x10x128xbf16, #tpu.memory_space<vmem>>, %arg3: memref<1152x128xbf16, #tpu.memory_space<vmem>>, %arg4: memref<1x128xf32, #tpu.memory_space<vmem>>, %arg5: memref<1x128xf32, #tpu.memory_space<vmem>>, %arg6: memref<1x8x8x128xbf16, #tpu.memory_space<vmem>>) attributes {dimension_semantics = [#tpu.dimension_semantics<parallel>, #tpu.dimension_semantics<parallel>], iteration_bounds = array<i64: 2, 1>, scalar_prefetch = 0 : i64, scratch_operands = 0 : i64, tpu.core_type = #tpu.core_type<tc>, window_params = [{transform_indices = @transform_0, window_bounds = array<i64: 1, 10, 10, 128>}, {transform_indices = @transform_1, window_bounds = array<i64: 1152, 128>}, {transform_indices = @transform_2, window_bounds = array<i64: 1, 128>}, {transform_indices = @transform_3, window_bounds = array<i64: 1, 128>}, {transform_indices = @transform_4, window_bounds = array<i64: 1, 8, 8, 128>}]} {
    %c0 = arith.constant 0 : index
    %c0_0 = arith.constant 0 : index
    %c0_1 = arith.constant 0 : index
    %c0_2 = arith.constant 0 : index
    %0 = vector.load %arg2[%c0, %c0_0, %c0_1, %c0_2] : memref<1x10x10x128xbf16, #tpu.memory_space<vmem>>, vector<1x8x8x128xbf16>
    %1 = vector.shape_cast %0 : vector<1x8x8x128xbf16> to vector<8x8x128xbf16>
    %2 = vector.shape_cast %1 : vector<8x8x128xbf16> to vector<64x128xbf16>
    %c0_3 = arith.constant 0 : index
    %c0_4 = arith.constant 0 : index
    %3 = vector.load %arg3[%c0_3, %c0_4] : memref<1152x128xbf16, #tpu.memory_space<vmem>>, vector<128x128xbf16>
    %cst = arith.constant dense<0.000000e+00> : vector<64x128xf32>
    %4 = tpu.matmul %2, %3, %cst {dimension_numbers = #tpu.dot_dimension_numbers<[1], [0], [0], [1], [0, 0, 1, 1], [], []>} : vector<64x128xbf16>, vector<128x128xbf16>, vector<64x128xf32> -> vector<64x128xf32>
    %c0_5 = arith.constant 0 : index
    %c0_6 = arith.constant 0 : index
    %c1 = arith.constant 1 : index
    %c0_7 = arith.constant 0 : index
    %5 = vector.load %arg2[%c0_5, %c0_6, %c1, %c0_7] : memref<1x10x10x128xbf16, #tpu.memory_space<vmem>>, vector<1x8x8x128xbf16>
    %6 = vector.shape_cast %5 : vector<1x8x8x128xbf16> to vector<8x8x128xbf16>
    %7 = vector.shape_cast %6 : vector<8x8x128xbf16> to vector<64x128xbf16>
    %c128 = arith.constant 128 : index
    %c0_8 = arith.constant 0 : index
    %8 = vector.load %arg3[%c128, %c0_8] : memref<1152x128xbf16, #tpu.memory_space<vmem>>, vector<128x128xbf16>
    %cst_9 = arith.constant dense<0.000000e+00> : vector<64x128xf32>
    %9 = tpu.matmul %7, %8, %cst_9 {dimension_numbers = #tpu.dot_dimension_numbers<[1], [0], [0], [1], [0, 0, 1, 1], [], []>} : vector<64x128xbf16>, vector<128x128xbf16>, vector<64x128xf32> -> vector<64x128xf32>
    %10 = arith.addf %4, %9 : vector<64x128xf32>
    %c0_10 = arith.constant 0 : index
    %c0_11 = arith.constant 0 : index
    %c2 = arith.constant 2 : index
    %c0_12 = arith.constant 0 : index
    %11 = vector.load %arg2[%c0_10, %c0_11, %c2, %c0_12] : memref<1x10x10x128xbf16, #tpu.memory_space<vmem>>, vector<1x8x8x128xbf16>
    %12 = vector.shape_cast %11 : vector<1x8x8x128xbf16> to vector<8x8x128xbf16>
    %13 = vector.shape_cast %12 : vector<8x8x128xbf16> to vector<64x128xbf16>
    %c256 = arith.constant 256 : index
    %c0_13 = arith.constant 0 : index
    %14 = vector.load %arg3[%c256, %c0_13] : memref<1152x128xbf16, #tpu.memory_space<vmem>>, vector<128x128xbf16>
    %cst_14 = arith.constant dense<0.000000e+00> : vector<64x128xf32>
    %15 = tpu.matmul %13, %14, %cst_14 {dimension_numbers = #tpu.dot_dimension_numbers<[1], [0], [0], [1], [0, 0, 1, 1], [], []>} : vector<64x128xbf16>, vector<128x128xbf16>, vector<64x128xf32> -> vector<64x128xf32>
    %16 = arith.addf %10, %15 : vector<64x128xf32>
    %c0_15 = arith.constant 0 : index
    %c1_16 = arith.constant 1 : index
    %c0_17 = arith.constant 0 : index
    %c0_18 = arith.constant 0 : index
    %17 = vector.load %arg2[%c0_15, %c1_16, %c0_17, %c0_18] : memref<1x10x10x128xbf16, #tpu.memory_space<vmem>>, vector<1x8x8x128xbf16>
    %18 = vector.shape_cast %17 : vector<1x8x8x128xbf16> to vector<8x8x128xbf16>
    %19 = vector.shape_cast %18 : vector<8x8x128xbf16> to vector<64x128xbf16>
    %c384 = arith.constant 384 : index
    %c0_19 = arith.constant 0 : index
    %20 = vector.load %arg3[%c384, %c0_19] : memref<1152x128xbf16, #tpu.memory_space<vmem>>, vector<128x128xbf16>
    %cst_20 = arith.constant dense<0.000000e+00> : vector<64x128xf32>
    %21 = tpu.matmul %19, %20, %cst_20 {dimension_numbers = #tpu.dot_dimension_numbers<[1], [0], [0], [1], [0, 0, 1, 1], [], []>} : vector<64x128xbf16>, vector<128x128xbf16>, vector<64x128xf32> -> vector<64x128xf32>
    %22 = arith.addf %16, %21 : vector<64x128xf32>
    %c0_21 = arith.constant 0 : index
    %c1_22 = arith.constant 1 : index
    %c1_23 = arith.constant 1 : index
    %c0_24 = arith.constant 0 : index
    %23 = vector.load %arg2[%c0_21, %c1_22, %c1_23, %c0_24] : memref<1x10x10x128xbf16, #tpu.memory_space<vmem>>, vector<1x8x8x128xbf16>
    %24 = vector.shape_cast %23 : vector<1x8x8x128xbf16> to vector<8x8x128xbf16>
    %25 = vector.shape_cast %24 : vector<8x8x128xbf16> to vector<64x128xbf16>
    %c512 = arith.constant 512 : index
    %c0_25 = arith.constant 0 : index
    %26 = vector.load %arg3[%c512, %c0_25] : memref<1152x128xbf16, #tpu.memory_space<vmem>>, vector<128x128xbf16>
    %cst_26 = arith.constant dense<0.000000e+00> : vector<64x128xf32>
    %27 = tpu.matmul %25, %26, %cst_26 {dimension_numbers = #tpu.dot_dimension_numbers<[1], [0], [0], [1], [0, 0, 1, 1], [], []>} : vector<64x128xbf16>, vector<128x128xbf16>, vector<64x128xf32> -> vector<64x128xf32>
    %28 = arith.addf %22, %27 : vector<64x128xf32>
    %c0_27 = arith.constant 0 : index
    %c1_28 = arith.constant 1 : index
    %c2_29 = arith.constant 2 : index
    %c0_30 = arith.constant 0 : index
    %29 = vector.load %arg2[%c0_27, %c1_28, %c2_29, %c0_30] : memref<1x10x10x128xbf16, #tpu.memory_space<vmem>>, vector<1x8x8x128xbf16>
    %30 = vector.shape_cast %29 : vector<1x8x8x128xbf16> to vector<8x8x128xbf16>
    %31 = vector.shape_cast %30 : vector<8x8x128xbf16> to vector<64x128xbf16>
    %c640 = arith.constant 640 : index
    %c0_31 = arith.constant 0 : index
    %32 = vector.load %arg3[%c640, %c0_31] : memref<1152x128xbf16, #tpu.memory_space<vmem>>, vector<128x128xbf16>
    %cst_32 = arith.constant dense<0.000000e+00> : vector<64x128xf32>
    %33 = tpu.matmul %31, %32, %cst_32 {dimension_numbers = #tpu.dot_dimension_numbers<[1], [0], [0], [1], [0, 0, 1, 1], [], []>} : vector<64x128xbf16>, vector<128x128xbf16>, vector<64x128xf32> -> vector<64x128xf32>
    %34 = arith.addf %28, %33 : vector<64x128xf32>
    %c0_33 = arith.constant 0 : index
    %c2_34 = arith.constant 2 : index
    %c0_35 = arith.constant 0 : index
    %c0_36 = arith.constant 0 : index
    %35 = vector.load %arg2[%c0_33, %c2_34, %c0_35, %c0_36] : memref<1x10x10x128xbf16, #tpu.memory_space<vmem>>, vector<1x8x8x128xbf16>
    %36 = vector.shape_cast %35 : vector<1x8x8x128xbf16> to vector<8x8x128xbf16>
    %37 = vector.shape_cast %36 : vector<8x8x128xbf16> to vector<64x128xbf16>
    %c768 = arith.constant 768 : index
    %c0_37 = arith.constant 0 : index
    %38 = vector.load %arg3[%c768, %c0_37] : memref<1152x128xbf16, #tpu.memory_space<vmem>>, vector<128x128xbf16>
    %cst_38 = arith.constant dense<0.000000e+00> : vector<64x128xf32>
    %39 = tpu.matmul %37, %38, %cst_38 {dimension_numbers = #tpu.dot_dimension_numbers<[1], [0], [0], [1], [0, 0, 1, 1], [], []>} : vector<64x128xbf16>, vector<128x128xbf16>, vector<64x128xf32> -> vector<64x128xf32>
    %40 = arith.addf %34, %39 : vector<64x128xf32>
    %c0_39 = arith.constant 0 : index
    %c2_40 = arith.constant 2 : index
    %c1_41 = arith.constant 1 : index
    %c0_42 = arith.constant 0 : index
    %41 = vector.load %arg2[%c0_39, %c2_40, %c1_41, %c0_42] : memref<1x10x10x128xbf16, #tpu.memory_space<vmem>>, vector<1x8x8x128xbf16>
    %42 = vector.shape_cast %41 : vector<1x8x8x128xbf16> to vector<8x8x128xbf16>
    %43 = vector.shape_cast %42 : vector<8x8x128xbf16> to vector<64x128xbf16>
    %c896 = arith.constant 896 : index
    %c0_43 = arith.constant 0 : index
    %44 = vector.load %arg3[%c896, %c0_43] : memref<1152x128xbf16, #tpu.memory_space<vmem>>, vector<128x128xbf16>
    %cst_44 = arith.constant dense<0.000000e+00> : vector<64x128xf32>
    %45 = tpu.matmul %43, %44, %cst_44 {dimension_numbers = #tpu.dot_dimension_numbers<[1], [0], [0], [1], [0, 0, 1, 1], [], []>} : vector<64x128xbf16>, vector<128x128xbf16>, vector<64x128xf32> -> vector<64x128xf32>
    %46 = arith.addf %40, %45 : vector<64x128xf32>
    %c0_45 = arith.constant 0 : index
    %c2_46 = arith.constant 2 : index
    %c2_47 = arith.constant 2 : index
    %c0_48 = arith.constant 0 : index
    %47 = vector.load %arg2[%c0_45, %c2_46, %c2_47, %c0_48] : memref<1x10x10x128xbf16, #tpu.memory_space<vmem>>, vector<1x8x8x128xbf16>
    %48 = vector.shape_cast %47 : vector<1x8x8x128xbf16> to vector<8x8x128xbf16>
    %49 = vector.shape_cast %48 : vector<8x8x128xbf16> to vector<64x128xbf16>
    %c1024 = arith.constant 1024 : index
    %c0_49 = arith.constant 0 : index
    %50 = vector.load %arg3[%c1024, %c0_49] : memref<1152x128xbf16, #tpu.memory_space<vmem>>, vector<128x128xbf16>
    %cst_50 = arith.constant dense<0.000000e+00> : vector<64x128xf32>
    %51 = tpu.matmul %49, %50, %cst_50 {dimension_numbers = #tpu.dot_dimension_numbers<[1], [0], [0], [1], [0, 0, 1, 1], [], []>} : vector<64x128xbf16>, vector<128x128xbf16>, vector<64x128xf32> -> vector<64x128xf32>
    %52 = arith.addf %46, %51 : vector<64x128xf32>
    %c0_51 = arith.constant 0 : index
    %c0_52 = arith.constant 0 : index
    %53 = vector.load %arg4[%c0_51, %c0_52] : memref<1x128xf32, #tpu.memory_space<vmem>>, vector<1x128xf32>
    %54 = vector.broadcast %53 : vector<1x128xf32> to vector<64x128xf32>
    %55 = arith.mulf %52, %54 : vector<64x128xf32>
    %c0_53 = arith.constant 0 : index
    %c0_54 = arith.constant 0 : index
    %56 = vector.load %arg5[%c0_53, %c0_54] : memref<1x128xf32, #tpu.memory_space<vmem>>, vector<1x128xf32>
    %57 = vector.broadcast %56 : vector<1x128xf32> to vector<64x128xf32>
    %58 = arith.addf %55, %57 : vector<64x128xf32>
    %cst_55 = arith.constant 0.000000e+00 : f32
    %59 = vector.broadcast %cst_55 : f32 to vector<64x128xf32>
    %60 = arith.maximumf %58, %59 : vector<64x128xf32>
    %61 = vector.shape_cast %60 : vector<64x128xf32> to vector<8x8x128xf32>
    %62 = arith.truncf %61 : vector<8x8x128xf32> to vector<8x8x128xbf16>
    %c0_56 = arith.constant 0 : index
    %c0_57 = arith.constant 0 : index
    %c0_58 = arith.constant 0 : index
    %c0_59 = arith.constant 0 : index
    %63 = vector.load %arg6[%c0_56, %c0_57, %c0_58, %c0_59] : memref<1x8x8x128xbf16, #tpu.memory_space<vmem>>, vector<1x8x8x128xbf16>
    %64 = vector.shape_cast %63 : vector<1x8x8x128xbf16> to vector<8x8x128xbf16>
    %65 = vector.shape_cast %62 : vector<8x8x128xbf16> to vector<1x8x8x128xbf16>
    tpu.vector_store %arg6[%c0_56, %c0_57, %c0_58, %c0_59], %65 {strides = array<i32>} : memref<1x8x8x128xbf16, #tpu.memory_space<vmem>>, vector<1x8x8x128xbf16>,
    return
  }
  func.func @transform_0(%arg0: i32, %arg1: i32) -> (i32, i32, i32, i32) {
    %c0_i32 = arith.constant 0 : i32
    %c0_i32_0 = arith.constant 0 : i32
    %c0_i32_1 = arith.constant 0 : i32
    %c0_i32_2 = arith.constant 0 : i32
    return %arg0, %c0_i32, %c0_i32_0, %c0_i32_1 : i32, i32, i32, i32
  }
  func.func @transform_1(%arg0: i32, %arg1: i32) -> (i32, i32) {
    %c0_i32 = arith.constant 0 : i32
    %c0_i32_0 = arith.constant 0 : i32
    return %c0_i32, %arg1 : i32, i32
  }
  func.func @transform_2(%arg0: i32, %arg1: i32) -> (i32, i32) {
    %c0_i32 = arith.constant 0 : i32
    %c0_i32_0 = arith.constant 0 : i32
    return %c0_i32, %arg1 : i32, i32
  }
  func.func @transform_3(%arg0: i32, %arg1: i32) -> (i32, i32) {
    %c0_i32 = arith.constant 0 : i32
    %c0_i32_0 = arith.constant 0 : i32
    return %c0_i32, %arg1 : i32, i32
  }
  func.func @transform_4(%arg0: i32, %arg1: i32) -> (i32, i32, i32, i32) {
    %c0_i32 = arith.constant 0 : i32
    %c0_i32_0 = arith.constant 0 : i32
    %c0_i32_1 = arith.constant 0 : i32
    return %arg0, %c0_i32, %c0_i32_0, %arg1 : i32, i32, i32, i32
  }
}

module attributes {stable_mosaic.version = 11 : i64} {
  func.func @_maxpool_kernel(%arg0: i32, %arg1: memref<4x2x4x256xbf16, #tpu.memory_space<vmem>>, %arg2: memref<4x4x128xbf16, #tpu.memory_space<vmem>>) attributes {dimension_semantics = [#tpu.dimension_semantics<parallel>], iteration_bounds = array<i64: 2>, scalar_prefetch = 0 : i64, scratch_operands = 0 : i64, tpu.core_type = #tpu.core_type<tc>, window_params = [{transform_indices = @transform_0, window_bounds = array<i64: 4, 2, 4, 256>}, {transform_indices = @transform_1, window_bounds = array<i64: 4, 4, 128>}]} {
    %c0 = arith.constant 0 : index
    %c0_0 = arith.constant 0 : index
    %c0_1 = arith.constant 0 : index
    %c0_2 = arith.constant 0 : index
    %0 = vector.load %arg1[%c0, %c0_0, %c0_1, %c0_2] : memref<4x2x4x256xbf16, #tpu.memory_space<vmem>>, vector<4x1x4x256xbf16>
    %1 = vector.shape_cast %0 : vector<4x1x4x256xbf16> to vector<4x4x256xbf16>
    %c0_3 = arith.constant 0 : index
    %c1 = arith.constant 1 : index
    %c0_4 = arith.constant 0 : index
    %c0_5 = arith.constant 0 : index
    %2 = vector.load %arg1[%c0_3, %c1, %c0_4, %c0_5] : memref<4x2x4x256xbf16, #tpu.memory_space<vmem>>, vector<4x1x4x256xbf16>
    %3 = vector.shape_cast %2 : vector<4x1x4x256xbf16> to vector<4x4x256xbf16>
    %4 = arith.maximumf %1, %3 : vector<4x4x256xbf16>
    %5 = vector.extract_strided_slice %4 {offsets = [0, 0, 0], sizes = [4, 4, 128], strides = [1, 1, 1]} : vector<4x4x256xbf16> to vector<4x4x128xbf16>
    %6 = vector.extract_strided_slice %4 {offsets = [0, 0, 128], sizes = [4, 4, 128], strides = [1, 1, 1]} : vector<4x4x256xbf16> to vector<4x4x128xbf16>
    %7 = arith.maximumf %5, %6 : vector<4x4x128xbf16>
    %c0_6 = arith.constant 0 : index
    %c0_7 = arith.constant 0 : index
    %c0_8 = arith.constant 0 : index
    %8 = vector.load %arg2[%c0_6, %c0_7, %c0_8] : memref<4x4x128xbf16, #tpu.memory_space<vmem>>, vector<4x4x128xbf16>
    tpu.vector_store %arg2[%c0_6, %c0_7, %c0_8], %7 {strides = array<i32>} : memref<4x4x128xbf16, #tpu.memory_space<vmem>>, vector<4x4x128xbf16>,
    return
  }
  func.func @transform_0(%arg0: i32) -> (i32, i32, i32, i32) {
    %c0_i32 = arith.constant 0 : i32
    %c0_i32_0 = arith.constant 0 : i32
    %c0_i32_1 = arith.constant 0 : i32
    %c0_i32_2 = arith.constant 0 : i32
    return %arg0, %c0_i32, %c0_i32_0, %c0_i32_1 : i32, i32, i32, i32
  }
  func.func @transform_1(%arg0: i32) -> (i32, i32, i32) {
    %c0_i32 = arith.constant 0 : i32
    %c0_i32_0 = arith.constant 0 : i32
    %c0_i32_1 = arith.constant 0 : i32
    return %arg0, %c0_i32, %c0_i32_0 : i32, i32, i32
  }
}

module attributes {stable_mosaic.version = 11 : i64} {
  func.func @_conv3x3_kernel(%arg0: i32, %arg1: i32, %arg2: memref<1x6x6x128xbf16, #tpu.memory_space<vmem>>, %arg3: memref<1152x128xbf16, #tpu.memory_space<vmem>>, %arg4: memref<1x128xf32, #tpu.memory_space<vmem>>, %arg5: memref<1x128xf32, #tpu.memory_space<vmem>>, %arg6: memref<1x4x4x128xbf16, #tpu.memory_space<vmem>>) attributes {dimension_semantics = [#tpu.dimension_semantics<parallel>, #tpu.dimension_semantics<parallel>], iteration_bounds = array<i64: 2, 1>, scalar_prefetch = 0 : i64, scratch_operands = 0 : i64, tpu.core_type = #tpu.core_type<tc>, window_params = [{transform_indices = @transform_0, window_bounds = array<i64: 1, 6, 6, 128>}, {transform_indices = @transform_1, window_bounds = array<i64: 1152, 128>}, {transform_indices = @transform_2, window_bounds = array<i64: 1, 128>}, {transform_indices = @transform_3, window_bounds = array<i64: 1, 128>}, {transform_indices = @transform_4, window_bounds = array<i64: 1, 4, 4, 128>}]} {
    %c0 = arith.constant 0 : index
    %c0_0 = arith.constant 0 : index
    %c0_1 = arith.constant 0 : index
    %c0_2 = arith.constant 0 : index
    %0 = vector.load %arg2[%c0, %c0_0, %c0_1, %c0_2] : memref<1x6x6x128xbf16, #tpu.memory_space<vmem>>, vector<1x4x4x128xbf16>
    %1 = vector.shape_cast %0 : vector<1x4x4x128xbf16> to vector<4x4x128xbf16>
    %2 = vector.shape_cast %1 : vector<4x4x128xbf16> to vector<16x128xbf16>
    %c0_3 = arith.constant 0 : index
    %c0_4 = arith.constant 0 : index
    %3 = vector.load %arg3[%c0_3, %c0_4] : memref<1152x128xbf16, #tpu.memory_space<vmem>>, vector<128x128xbf16>
    %cst = arith.constant dense<0.000000e+00> : vector<16x128xf32>
    %4 = tpu.matmul %2, %3, %cst {dimension_numbers = #tpu.dot_dimension_numbers<[1], [0], [0], [1], [0, 0, 1, 1], [], []>} : vector<16x128xbf16>, vector<128x128xbf16>, vector<16x128xf32> -> vector<16x128xf32>
    %c0_5 = arith.constant 0 : index
    %c0_6 = arith.constant 0 : index
    %c1 = arith.constant 1 : index
    %c0_7 = arith.constant 0 : index
    %5 = vector.load %arg2[%c0_5, %c0_6, %c1, %c0_7] : memref<1x6x6x128xbf16, #tpu.memory_space<vmem>>, vector<1x4x4x128xbf16>
    %6 = vector.shape_cast %5 : vector<1x4x4x128xbf16> to vector<4x4x128xbf16>
    %7 = vector.shape_cast %6 : vector<4x4x128xbf16> to vector<16x128xbf16>
    %c128 = arith.constant 128 : index
    %c0_8 = arith.constant 0 : index
    %8 = vector.load %arg3[%c128, %c0_8] : memref<1152x128xbf16, #tpu.memory_space<vmem>>, vector<128x128xbf16>
    %cst_9 = arith.constant dense<0.000000e+00> : vector<16x128xf32>
    %9 = tpu.matmul %7, %8, %cst_9 {dimension_numbers = #tpu.dot_dimension_numbers<[1], [0], [0], [1], [0, 0, 1, 1], [], []>} : vector<16x128xbf16>, vector<128x128xbf16>, vector<16x128xf32> -> vector<16x128xf32>
    %10 = arith.addf %4, %9 : vector<16x128xf32>
    %c0_10 = arith.constant 0 : index
    %c0_11 = arith.constant 0 : index
    %c2 = arith.constant 2 : index
    %c0_12 = arith.constant 0 : index
    %11 = vector.load %arg2[%c0_10, %c0_11, %c2, %c0_12] : memref<1x6x6x128xbf16, #tpu.memory_space<vmem>>, vector<1x4x4x128xbf16>
    %12 = vector.shape_cast %11 : vector<1x4x4x128xbf16> to vector<4x4x128xbf16>
    %13 = vector.shape_cast %12 : vector<4x4x128xbf16> to vector<16x128xbf16>
    %c256 = arith.constant 256 : index
    %c0_13 = arith.constant 0 : index
    %14 = vector.load %arg3[%c256, %c0_13] : memref<1152x128xbf16, #tpu.memory_space<vmem>>, vector<128x128xbf16>
    %cst_14 = arith.constant dense<0.000000e+00> : vector<16x128xf32>
    %15 = tpu.matmul %13, %14, %cst_14 {dimension_numbers = #tpu.dot_dimension_numbers<[1], [0], [0], [1], [0, 0, 1, 1], [], []>} : vector<16x128xbf16>, vector<128x128xbf16>, vector<16x128xf32> -> vector<16x128xf32>
    %16 = arith.addf %10, %15 : vector<16x128xf32>
    %c0_15 = arith.constant 0 : index
    %c1_16 = arith.constant 1 : index
    %c0_17 = arith.constant 0 : index
    %c0_18 = arith.constant 0 : index
    %17 = vector.load %arg2[%c0_15, %c1_16, %c0_17, %c0_18] : memref<1x6x6x128xbf16, #tpu.memory_space<vmem>>, vector<1x4x4x128xbf16>
    %18 = vector.shape_cast %17 : vector<1x4x4x128xbf16> to vector<4x4x128xbf16>
    %19 = vector.shape_cast %18 : vector<4x4x128xbf16> to vector<16x128xbf16>
    %c384 = arith.constant 384 : index
    %c0_19 = arith.constant 0 : index
    %20 = vector.load %arg3[%c384, %c0_19] : memref<1152x128xbf16, #tpu.memory_space<vmem>>, vector<128x128xbf16>
    %cst_20 = arith.constant dense<0.000000e+00> : vector<16x128xf32>
    %21 = tpu.matmul %19, %20, %cst_20 {dimension_numbers = #tpu.dot_dimension_numbers<[1], [0], [0], [1], [0, 0, 1, 1], [], []>} : vector<16x128xbf16>, vector<128x128xbf16>, vector<16x128xf32> -> vector<16x128xf32>
    %22 = arith.addf %16, %21 : vector<16x128xf32>
    %c0_21 = arith.constant 0 : index
    %c1_22 = arith.constant 1 : index
    %c1_23 = arith.constant 1 : index
    %c0_24 = arith.constant 0 : index
    %23 = vector.load %arg2[%c0_21, %c1_22, %c1_23, %c0_24] : memref<1x6x6x128xbf16, #tpu.memory_space<vmem>>, vector<1x4x4x128xbf16>
    %24 = vector.shape_cast %23 : vector<1x4x4x128xbf16> to vector<4x4x128xbf16>
    %25 = vector.shape_cast %24 : vector<4x4x128xbf16> to vector<16x128xbf16>
    %c512 = arith.constant 512 : index
    %c0_25 = arith.constant 0 : index
    %26 = vector.load %arg3[%c512, %c0_25] : memref<1152x128xbf16, #tpu.memory_space<vmem>>, vector<128x128xbf16>
    %cst_26 = arith.constant dense<0.000000e+00> : vector<16x128xf32>
    %27 = tpu.matmul %25, %26, %cst_26 {dimension_numbers = #tpu.dot_dimension_numbers<[1], [0], [0], [1], [0, 0, 1, 1], [], []>} : vector<16x128xbf16>, vector<128x128xbf16>, vector<16x128xf32> -> vector<16x128xf32>
    %28 = arith.addf %22, %27 : vector<16x128xf32>
    %c0_27 = arith.constant 0 : index
    %c1_28 = arith.constant 1 : index
    %c2_29 = arith.constant 2 : index
    %c0_30 = arith.constant 0 : index
    %29 = vector.load %arg2[%c0_27, %c1_28, %c2_29, %c0_30] : memref<1x6x6x128xbf16, #tpu.memory_space<vmem>>, vector<1x4x4x128xbf16>
    %30 = vector.shape_cast %29 : vector<1x4x4x128xbf16> to vector<4x4x128xbf16>
    %31 = vector.shape_cast %30 : vector<4x4x128xbf16> to vector<16x128xbf16>
    %c640 = arith.constant 640 : index
    %c0_31 = arith.constant 0 : index
    %32 = vector.load %arg3[%c640, %c0_31] : memref<1152x128xbf16, #tpu.memory_space<vmem>>, vector<128x128xbf16>
    %cst_32 = arith.constant dense<0.000000e+00> : vector<16x128xf32>
    %33 = tpu.matmul %31, %32, %cst_32 {dimension_numbers = #tpu.dot_dimension_numbers<[1], [0], [0], [1], [0, 0, 1, 1], [], []>} : vector<16x128xbf16>, vector<128x128xbf16>, vector<16x128xf32> -> vector<16x128xf32>
    %34 = arith.addf %28, %33 : vector<16x128xf32>
    %c0_33 = arith.constant 0 : index
    %c2_34 = arith.constant 2 : index
    %c0_35 = arith.constant 0 : index
    %c0_36 = arith.constant 0 : index
    %35 = vector.load %arg2[%c0_33, %c2_34, %c0_35, %c0_36] : memref<1x6x6x128xbf16, #tpu.memory_space<vmem>>, vector<1x4x4x128xbf16>
    %36 = vector.shape_cast %35 : vector<1x4x4x128xbf16> to vector<4x4x128xbf16>
    %37 = vector.shape_cast %36 : vector<4x4x128xbf16> to vector<16x128xbf16>
    %c768 = arith.constant 768 : index
    %c0_37 = arith.constant 0 : index
    %38 = vector.load %arg3[%c768, %c0_37] : memref<1152x128xbf16, #tpu.memory_space<vmem>>, vector<128x128xbf16>
    %cst_38 = arith.constant dense<0.000000e+00> : vector<16x128xf32>
    %39 = tpu.matmul %37, %38, %cst_38 {dimension_numbers = #tpu.dot_dimension_numbers<[1], [0], [0], [1], [0, 0, 1, 1], [], []>} : vector<16x128xbf16>, vector<128x128xbf16>, vector<16x128xf32> -> vector<16x128xf32>
    %40 = arith.addf %34, %39 : vector<16x128xf32>
    %c0_39 = arith.constant 0 : index
    %c2_40 = arith.constant 2 : index
    %c1_41 = arith.constant 1 : index
    %c0_42 = arith.constant 0 : index
    %41 = vector.load %arg2[%c0_39, %c2_40, %c1_41, %c0_42] : memref<1x6x6x128xbf16, #tpu.memory_space<vmem>>, vector<1x4x4x128xbf16>
    %42 = vector.shape_cast %41 : vector<1x4x4x128xbf16> to vector<4x4x128xbf16>
    %43 = vector.shape_cast %42 : vector<4x4x128xbf16> to vector<16x128xbf16>
    %c896 = arith.constant 896 : index
    %c0_43 = arith.constant 0 : index
    %44 = vector.load %arg3[%c896, %c0_43] : memref<1152x128xbf16, #tpu.memory_space<vmem>>, vector<128x128xbf16>
    %cst_44 = arith.constant dense<0.000000e+00> : vector<16x128xf32>
    %45 = tpu.matmul %43, %44, %cst_44 {dimension_numbers = #tpu.dot_dimension_numbers<[1], [0], [0], [1], [0, 0, 1, 1], [], []>} : vector<16x128xbf16>, vector<128x128xbf16>, vector<16x128xf32> -> vector<16x128xf32>
    %46 = arith.addf %40, %45 : vector<16x128xf32>
    %c0_45 = arith.constant 0 : index
    %c2_46 = arith.constant 2 : index
    %c2_47 = arith.constant 2 : index
    %c0_48 = arith.constant 0 : index
    %47 = vector.load %arg2[%c0_45, %c2_46, %c2_47, %c0_48] : memref<1x6x6x128xbf16, #tpu.memory_space<vmem>>, vector<1x4x4x128xbf16>
    %48 = vector.shape_cast %47 : vector<1x4x4x128xbf16> to vector<4x4x128xbf16>
    %49 = vector.shape_cast %48 : vector<4x4x128xbf16> to vector<16x128xbf16>
    %c1024 = arith.constant 1024 : index
    %c0_49 = arith.constant 0 : index
    %50 = vector.load %arg3[%c1024, %c0_49] : memref<1152x128xbf16, #tpu.memory_space<vmem>>, vector<128x128xbf16>
    %cst_50 = arith.constant dense<0.000000e+00> : vector<16x128xf32>
    %51 = tpu.matmul %49, %50, %cst_50 {dimension_numbers = #tpu.dot_dimension_numbers<[1], [0], [0], [1], [0, 0, 1, 1], [], []>} : vector<16x128xbf16>, vector<128x128xbf16>, vector<16x128xf32> -> vector<16x128xf32>
    %52 = arith.addf %46, %51 : vector<16x128xf32>
    %c0_51 = arith.constant 0 : index
    %c0_52 = arith.constant 0 : index
    %53 = vector.load %arg4[%c0_51, %c0_52] : memref<1x128xf32, #tpu.memory_space<vmem>>, vector<1x128xf32>
    %54 = vector.broadcast %53 : vector<1x128xf32> to vector<16x128xf32>
    %55 = arith.mulf %52, %54 : vector<16x128xf32>
    %c0_53 = arith.constant 0 : index
    %c0_54 = arith.constant 0 : index
    %56 = vector.load %arg5[%c0_53, %c0_54] : memref<1x128xf32, #tpu.memory_space<vmem>>, vector<1x128xf32>
    %57 = vector.broadcast %56 : vector<1x128xf32> to vector<16x128xf32>
    %58 = arith.addf %55, %57 : vector<16x128xf32>
    %cst_55 = arith.constant 0.000000e+00 : f32
    %59 = vector.broadcast %cst_55 : f32 to vector<16x128xf32>
    %60 = arith.maximumf %58, %59 : vector<16x128xf32>
    %61 = vector.shape_cast %60 : vector<16x128xf32> to vector<4x4x128xf32>
    %62 = arith.truncf %61 : vector<4x4x128xf32> to vector<4x4x128xbf16>
    %c0_56 = arith.constant 0 : index
    %c0_57 = arith.constant 0 : index
    %c0_58 = arith.constant 0 : index
    %c0_59 = arith.constant 0 : index
    %63 = vector.load %arg6[%c0_56, %c0_57, %c0_58, %c0_59] : memref<1x4x4x128xbf16, #tpu.memory_space<vmem>>, vector<1x4x4x128xbf16>
    %64 = vector.shape_cast %63 : vector<1x4x4x128xbf16> to vector<4x4x128xbf16>
    %65 = vector.shape_cast %62 : vector<4x4x128xbf16> to vector<1x4x4x128xbf16>
    tpu.vector_store %arg6[%c0_56, %c0_57, %c0_58, %c0_59], %65 {strides = array<i32>} : memref<1x4x4x128xbf16, #tpu.memory_space<vmem>>, vector<1x4x4x128xbf16>,
    return
  }
  func.func @transform_0(%arg0: i32, %arg1: i32) -> (i32, i32, i32, i32) {
    %c0_i32 = arith.constant 0 : i32
    %c0_i32_0 = arith.constant 0 : i32
    %c0_i32_1 = arith.constant 0 : i32
    %c0_i32_2 = arith.constant 0 : i32
    return %arg0, %c0_i32, %c0_i32_0, %c0_i32_1 : i32, i32, i32, i32
  }
  func.func @transform_1(%arg0: i32, %arg1: i32) -> (i32, i32) {
    %c0_i32 = arith.constant 0 : i32
    %c0_i32_0 = arith.constant 0 : i32
    return %c0_i32, %arg1 : i32, i32
  }
  func.func @transform_2(%arg0: i32, %arg1: i32) -> (i32, i32) {
    %c0_i32 = arith.constant 0 : i32
    %c0_i32_0 = arith.constant 0 : i32
    return %c0_i32, %arg1 : i32, i32
  }
  func.func @transform_3(%arg0: i32, %arg1: i32) -> (i32, i32) {
    %c0_i32 = arith.constant 0 : i32
    %c0_i32_0 = arith.constant 0 : i32
    return %c0_i32, %arg1 : i32, i32
  }
  func.func @transform_4(%arg0: i32, %arg1: i32) -> (i32, i32, i32, i32) {
    %c0_i32 = arith.constant 0 : i32
    %c0_i32_0 = arith.constant 0 : i32
    %c0_i32_1 = arith.constant 0 : i32
    return %arg0, %c0_i32, %c0_i32_0, %arg1 : i32, i32, i32, i32
  }
}

module attributes {stable_mosaic.version = 11 : i64} {
  func.func @_maxpool_kernel(%arg0: i32, %arg1: memref<2x2x2x256xbf16, #tpu.memory_space<vmem>>, %arg2: memref<2x2x128xbf16, #tpu.memory_space<vmem>>) attributes {dimension_semantics = [#tpu.dimension_semantics<parallel>], iteration_bounds = array<i64: 2>, scalar_prefetch = 0 : i64, scratch_operands = 0 : i64, tpu.core_type = #tpu.core_type<tc>, window_params = [{transform_indices = @transform_0, window_bounds = array<i64: 2, 2, 2, 256>}, {transform_indices = @transform_1, window_bounds = array<i64: 2, 2, 128>}]} {
    %c0 = arith.constant 0 : index
    %c0_0 = arith.constant 0 : index
    %c0_1 = arith.constant 0 : index
    %c0_2 = arith.constant 0 : index
    %0 = vector.load %arg1[%c0, %c0_0, %c0_1, %c0_2] : memref<2x2x2x256xbf16, #tpu.memory_space<vmem>>, vector<2x1x2x256xbf16>
    %1 = vector.shape_cast %0 : vector<2x1x2x256xbf16> to vector<2x2x256xbf16>
    %c0_3 = arith.constant 0 : index
    %c1 = arith.constant 1 : index
    %c0_4 = arith.constant 0 : index
    %c0_5 = arith.constant 0 : index
    %2 = vector.load %arg1[%c0_3, %c1, %c0_4, %c0_5] : memref<2x2x2x256xbf16, #tpu.memory_space<vmem>>, vector<2x1x2x256xbf16>
    %3 = vector.shape_cast %2 : vector<2x1x2x256xbf16> to vector<2x2x256xbf16>
    %4 = arith.maximumf %1, %3 : vector<2x2x256xbf16>
    %5 = vector.extract_strided_slice %4 {offsets = [0, 0, 0], sizes = [2, 2, 128], strides = [1, 1, 1]} : vector<2x2x256xbf16> to vector<2x2x128xbf16>
    %6 = vector.extract_strided_slice %4 {offsets = [0, 0, 128], sizes = [2, 2, 128], strides = [1, 1, 1]} : vector<2x2x256xbf16> to vector<2x2x128xbf16>
    %7 = arith.maximumf %5, %6 : vector<2x2x128xbf16>
    %c0_6 = arith.constant 0 : index
    %c0_7 = arith.constant 0 : index
    %c0_8 = arith.constant 0 : index
    %8 = vector.load %arg2[%c0_6, %c0_7, %c0_8] : memref<2x2x128xbf16, #tpu.memory_space<vmem>>, vector<2x2x128xbf16>
    tpu.vector_store %arg2[%c0_6, %c0_7, %c0_8], %7 {strides = array<i32>} : memref<2x2x128xbf16, #tpu.memory_space<vmem>>, vector<2x2x128xbf16>,
    return
  }
  func.func @transform_0(%arg0: i32) -> (i32, i32, i32, i32) {
    %c0_i32 = arith.constant 0 : i32
    %c0_i32_0 = arith.constant 0 : i32
    %c0_i32_1 = arith.constant 0 : i32
    %c0_i32_2 = arith.constant 0 : i32
    return %arg0, %c0_i32, %c0_i32_0, %c0_i32_1 : i32, i32, i32, i32
  }
  func.func @transform_1(%arg0: i32) -> (i32, i32, i32) {
    %c0_i32 = arith.constant 0 : i32
    %c0_i32_0 = arith.constant 0 : i32
    %c0_i32_1 = arith.constant 0 : i32
    return %arg0, %c0_i32, %c0_i32_0 : i32, i32, i32
  }
}

module attributes {stable_mosaic.version = 11 : i64} {
  func.func @_conv3x3_kernel(%arg0: i32, %arg1: i32, %arg2: memref<1x4x4x128xbf16, #tpu.memory_space<vmem>>, %arg3: memref<1152x128xbf16, #tpu.memory_space<vmem>>, %arg4: memref<1x128xf32, #tpu.memory_space<vmem>>, %arg5: memref<1x128xf32, #tpu.memory_space<vmem>>, %arg6: memref<1x2x2x128xbf16, #tpu.memory_space<vmem>>) attributes {dimension_semantics = [#tpu.dimension_semantics<parallel>, #tpu.dimension_semantics<parallel>], iteration_bounds = array<i64: 2, 1>, scalar_prefetch = 0 : i64, scratch_operands = 0 : i64, tpu.core_type = #tpu.core_type<tc>, window_params = [{transform_indices = @transform_0, window_bounds = array<i64: 1, 4, 4, 128>}, {transform_indices = @transform_1, window_bounds = array<i64: 1152, 128>}, {transform_indices = @transform_2, window_bounds = array<i64: 1, 128>}, {transform_indices = @transform_3, window_bounds = array<i64: 1, 128>}, {transform_indices = @transform_4, window_bounds = array<i64: 1, 2, 2, 128>}]} {
    %c0 = arith.constant 0 : index
    %c0_0 = arith.constant 0 : index
    %c0_1 = arith.constant 0 : index
    %c0_2 = arith.constant 0 : index
    %0 = vector.load %arg2[%c0, %c0_0, %c0_1, %c0_2] : memref<1x4x4x128xbf16, #tpu.memory_space<vmem>>, vector<1x2x2x128xbf16>
    %1 = vector.shape_cast %0 : vector<1x2x2x128xbf16> to vector<2x2x128xbf16>
    %2 = vector.shape_cast %1 : vector<2x2x128xbf16> to vector<4x128xbf16>
    %c0_3 = arith.constant 0 : index
    %c0_4 = arith.constant 0 : index
    %3 = vector.load %arg3[%c0_3, %c0_4] : memref<1152x128xbf16, #tpu.memory_space<vmem>>, vector<128x128xbf16>
    %cst = arith.constant dense<0.000000e+00> : vector<4x128xf32>
    %4 = tpu.matmul %2, %3, %cst {dimension_numbers = #tpu.dot_dimension_numbers<[1], [0], [0], [1], [0, 0, 1, 1], [], []>} : vector<4x128xbf16>, vector<128x128xbf16>, vector<4x128xf32> -> vector<4x128xf32>
    %c0_5 = arith.constant 0 : index
    %c0_6 = arith.constant 0 : index
    %c1 = arith.constant 1 : index
    %c0_7 = arith.constant 0 : index
    %5 = vector.load %arg2[%c0_5, %c0_6, %c1, %c0_7] : memref<1x4x4x128xbf16, #tpu.memory_space<vmem>>, vector<1x2x2x128xbf16>
    %6 = vector.shape_cast %5 : vector<1x2x2x128xbf16> to vector<2x2x128xbf16>
    %7 = vector.shape_cast %6 : vector<2x2x128xbf16> to vector<4x128xbf16>
    %c128 = arith.constant 128 : index
    %c0_8 = arith.constant 0 : index
    %8 = vector.load %arg3[%c128, %c0_8] : memref<1152x128xbf16, #tpu.memory_space<vmem>>, vector<128x128xbf16>
    %cst_9 = arith.constant dense<0.000000e+00> : vector<4x128xf32>
    %9 = tpu.matmul %7, %8, %cst_9 {dimension_numbers = #tpu.dot_dimension_numbers<[1], [0], [0], [1], [0, 0, 1, 1], [], []>} : vector<4x128xbf16>, vector<128x128xbf16>, vector<4x128xf32> -> vector<4x128xf32>
    %10 = arith.addf %4, %9 : vector<4x128xf32>
    %c0_10 = arith.constant 0 : index
    %c0_11 = arith.constant 0 : index
    %c2 = arith.constant 2 : index
    %c0_12 = arith.constant 0 : index
    %11 = vector.load %arg2[%c0_10, %c0_11, %c2, %c0_12] : memref<1x4x4x128xbf16, #tpu.memory_space<vmem>>, vector<1x2x2x128xbf16>
    %12 = vector.shape_cast %11 : vector<1x2x2x128xbf16> to vector<2x2x128xbf16>
    %13 = vector.shape_cast %12 : vector<2x2x128xbf16> to vector<4x128xbf16>
    %c256 = arith.constant 256 : index
    %c0_13 = arith.constant 0 : index
    %14 = vector.load %arg3[%c256, %c0_13] : memref<1152x128xbf16, #tpu.memory_space<vmem>>, vector<128x128xbf16>
    %cst_14 = arith.constant dense<0.000000e+00> : vector<4x128xf32>
    %15 = tpu.matmul %13, %14, %cst_14 {dimension_numbers = #tpu.dot_dimension_numbers<[1], [0], [0], [1], [0, 0, 1, 1], [], []>} : vector<4x128xbf16>, vector<128x128xbf16>, vector<4x128xf32> -> vector<4x128xf32>
    %16 = arith.addf %10, %15 : vector<4x128xf32>
    %c0_15 = arith.constant 0 : index
    %c1_16 = arith.constant 1 : index
    %c0_17 = arith.constant 0 : index
    %c0_18 = arith.constant 0 : index
    %17 = vector.load %arg2[%c0_15, %c1_16, %c0_17, %c0_18] : memref<1x4x4x128xbf16, #tpu.memory_space<vmem>>, vector<1x2x2x128xbf16>
    %18 = vector.shape_cast %17 : vector<1x2x2x128xbf16> to vector<2x2x128xbf16>
    %19 = vector.shape_cast %18 : vector<2x2x128xbf16> to vector<4x128xbf16>
    %c384 = arith.constant 384 : index
    %c0_19 = arith.constant 0 : index
    %20 = vector.load %arg3[%c384, %c0_19] : memref<1152x128xbf16, #tpu.memory_space<vmem>>, vector<128x128xbf16>
    %cst_20 = arith.constant dense<0.000000e+00> : vector<4x128xf32>
    %21 = tpu.matmul %19, %20, %cst_20 {dimension_numbers = #tpu.dot_dimension_numbers<[1], [0], [0], [1], [0, 0, 1, 1], [], []>} : vector<4x128xbf16>, vector<128x128xbf16>, vector<4x128xf32> -> vector<4x128xf32>
    %22 = arith.addf %16, %21 : vector<4x128xf32>
    %c0_21 = arith.constant 0 : index
    %c1_22 = arith.constant 1 : index
    %c1_23 = arith.constant 1 : index
    %c0_24 = arith.constant 0 : index
    %23 = vector.load %arg2[%c0_21, %c1_22, %c1_23, %c0_24] : memref<1x4x4x128xbf16, #tpu.memory_space<vmem>>, vector<1x2x2x128xbf16>
    %24 = vector.shape_cast %23 : vector<1x2x2x128xbf16> to vector<2x2x128xbf16>
    %25 = vector.shape_cast %24 : vector<2x2x128xbf16> to vector<4x128xbf16>
    %c512 = arith.constant 512 : index
    %c0_25 = arith.constant 0 : index
    %26 = vector.load %arg3[%c512, %c0_25] : memref<1152x128xbf16, #tpu.memory_space<vmem>>, vector<128x128xbf16>
    %cst_26 = arith.constant dense<0.000000e+00> : vector<4x128xf32>
    %27 = tpu.matmul %25, %26, %cst_26 {dimension_numbers = #tpu.dot_dimension_numbers<[1], [0], [0], [1], [0, 0, 1, 1], [], []>} : vector<4x128xbf16>, vector<128x128xbf16>, vector<4x128xf32> -> vector<4x128xf32>
    %28 = arith.addf %22, %27 : vector<4x128xf32>
    %c0_27 = arith.constant 0 : index
    %c1_28 = arith.constant 1 : index
    %c2_29 = arith.constant 2 : index
    %c0_30 = arith.constant 0 : index
    %29 = vector.load %arg2[%c0_27, %c1_28, %c2_29, %c0_30] : memref<1x4x4x128xbf16, #tpu.memory_space<vmem>>, vector<1x2x2x128xbf16>
    %30 = vector.shape_cast %29 : vector<1x2x2x128xbf16> to vector<2x2x128xbf16>
    %31 = vector.shape_cast %30 : vector<2x2x128xbf16> to vector<4x128xbf16>
    %c640 = arith.constant 640 : index
    %c0_31 = arith.constant 0 : index
    %32 = vector.load %arg3[%c640, %c0_31] : memref<1152x128xbf16, #tpu.memory_space<vmem>>, vector<128x128xbf16>
    %cst_32 = arith.constant dense<0.000000e+00> : vector<4x128xf32>
    %33 = tpu.matmul %31, %32, %cst_32 {dimension_numbers = #tpu.dot_dimension_numbers<[1], [0], [0], [1], [0, 0, 1, 1], [], []>} : vector<4x128xbf16>, vector<128x128xbf16>, vector<4x128xf32> -> vector<4x128xf32>
    %34 = arith.addf %28, %33 : vector<4x128xf32>
    %c0_33 = arith.constant 0 : index
    %c2_34 = arith.constant 2 : index
    %c0_35 = arith.constant 0 : index
    %c0_36 = arith.constant 0 : index
    %35 = vector.load %arg2[%c0_33, %c2_34, %c0_35, %c0_36] : memref<1x4x4x128xbf16, #tpu.memory_space<vmem>>, vector<1x2x2x128xbf16>
    %36 = vector.shape_cast %35 : vector<1x2x2x128xbf16> to vector<2x2x128xbf16>
    %37 = vector.shape_cast %36 : vector<2x2x128xbf16> to vector<4x128xbf16>
    %c768 = arith.constant 768 : index
    %c0_37 = arith.constant 0 : index
    %38 = vector.load %arg3[%c768, %c0_37] : memref<1152x128xbf16, #tpu.memory_space<vmem>>, vector<128x128xbf16>
    %cst_38 = arith.constant dense<0.000000e+00> : vector<4x128xf32>
    %39 = tpu.matmul %37, %38, %cst_38 {dimension_numbers = #tpu.dot_dimension_numbers<[1], [0], [0], [1], [0, 0, 1, 1], [], []>} : vector<4x128xbf16>, vector<128x128xbf16>, vector<4x128xf32> -> vector<4x128xf32>
    %40 = arith.addf %34, %39 : vector<4x128xf32>
    %c0_39 = arith.constant 0 : index
    %c2_40 = arith.constant 2 : index
    %c1_41 = arith.constant 1 : index
    %c0_42 = arith.constant 0 : index
    %41 = vector.load %arg2[%c0_39, %c2_40, %c1_41, %c0_42] : memref<1x4x4x128xbf16, #tpu.memory_space<vmem>>, vector<1x2x2x128xbf16>
    %42 = vector.shape_cast %41 : vector<1x2x2x128xbf16> to vector<2x2x128xbf16>
    %43 = vector.shape_cast %42 : vector<2x2x128xbf16> to vector<4x128xbf16>
    %c896 = arith.constant 896 : index
    %c0_43 = arith.constant 0 : index
    %44 = vector.load %arg3[%c896, %c0_43] : memref<1152x128xbf16, #tpu.memory_space<vmem>>, vector<128x128xbf16>
    %cst_44 = arith.constant dense<0.000000e+00> : vector<4x128xf32>
    %45 = tpu.matmul %43, %44, %cst_44 {dimension_numbers = #tpu.dot_dimension_numbers<[1], [0], [0], [1], [0, 0, 1, 1], [], []>} : vector<4x128xbf16>, vector<128x128xbf16>, vector<4x128xf32> -> vector<4x128xf32>
    %46 = arith.addf %40, %45 : vector<4x128xf32>
    %c0_45 = arith.constant 0 : index
    %c2_46 = arith.constant 2 : index
    %c2_47 = arith.constant 2 : index
    %c0_48 = arith.constant 0 : index
    %47 = vector.load %arg2[%c0_45, %c2_46, %c2_47, %c0_48] : memref<1x4x4x128xbf16, #tpu.memory_space<vmem>>, vector<1x2x2x128xbf16>
    %48 = vector.shape_cast %47 : vector<1x2x2x128xbf16> to vector<2x2x128xbf16>
    %49 = vector.shape_cast %48 : vector<2x2x128xbf16> to vector<4x128xbf16>
    %c1024 = arith.constant 1024 : index
    %c0_49 = arith.constant 0 : index
    %50 = vector.load %arg3[%c1024, %c0_49] : memref<1152x128xbf16, #tpu.memory_space<vmem>>, vector<128x128xbf16>
    %cst_50 = arith.constant dense<0.000000e+00> : vector<4x128xf32>
    %51 = tpu.matmul %49, %50, %cst_50 {dimension_numbers = #tpu.dot_dimension_numbers<[1], [0], [0], [1], [0, 0, 1, 1], [], []>} : vector<4x128xbf16>, vector<128x128xbf16>, vector<4x128xf32> -> vector<4x128xf32>
    %52 = arith.addf %46, %51 : vector<4x128xf32>
    %c0_51 = arith.constant 0 : index
    %c0_52 = arith.constant 0 : index
    %53 = vector.load %arg4[%c0_51, %c0_52] : memref<1x128xf32, #tpu.memory_space<vmem>>, vector<1x128xf32>
    %54 = vector.broadcast %53 : vector<1x128xf32> to vector<4x128xf32>
    %55 = arith.mulf %52, %54 : vector<4x128xf32>
    %c0_53 = arith.constant 0 : index
    %c0_54 = arith.constant 0 : index
    %56 = vector.load %arg5[%c0_53, %c0_54] : memref<1x128xf32, #tpu.memory_space<vmem>>, vector<1x128xf32>
    %57 = vector.broadcast %56 : vector<1x128xf32> to vector<4x128xf32>
    %58 = arith.addf %55, %57 : vector<4x128xf32>
    %cst_55 = arith.constant 0.000000e+00 : f32
    %59 = vector.broadcast %cst_55 : f32 to vector<4x128xf32>
    %60 = arith.maximumf %58, %59 : vector<4x128xf32>
    %61 = vector.shape_cast %60 : vector<4x128xf32> to vector<2x2x128xf32>
    %62 = arith.truncf %61 : vector<2x2x128xf32> to vector<2x2x128xbf16>
    %c0_56 = arith.constant 0 : index
    %c0_57 = arith.constant 0 : index
    %c0_58 = arith.constant 0 : index
    %c0_59 = arith.constant 0 : index
    %63 = vector.load %arg6[%c0_56, %c0_57, %c0_58, %c0_59] : memref<1x2x2x128xbf16, #tpu.memory_space<vmem>>, vector<1x2x2x128xbf16>
    %64 = vector.shape_cast %63 : vector<1x2x2x128xbf16> to vector<2x2x128xbf16>
    %65 = vector.shape_cast %62 : vector<2x2x128xbf16> to vector<1x2x2x128xbf16>
    tpu.vector_store %arg6[%c0_56, %c0_57, %c0_58, %c0_59], %65 {strides = array<i32>} : memref<1x2x2x128xbf16, #tpu.memory_space<vmem>>, vector<1x2x2x128xbf16>,
    return
  }
  func.func @transform_0(%arg0: i32, %arg1: i32) -> (i32, i32, i32, i32) {
    %c0_i32 = arith.constant 0 : i32
    %c0_i32_0 = arith.constant 0 : i32
    %c0_i32_1 = arith.constant 0 : i32
    %c0_i32_2 = arith.constant 0 : i32
    return %arg0, %c0_i32, %c0_i32_0, %c0_i32_1 : i32, i32, i32, i32
  }
  func.func @transform_1(%arg0: i32, %arg1: i32) -> (i32, i32) {
    %c0_i32 = arith.constant 0 : i32
    %c0_i32_0 = arith.constant 0 : i32
    return %c0_i32, %arg1 : i32, i32
  }
  func.func @transform_2(%arg0: i32, %arg1: i32) -> (i32, i32) {
    %c0_i32 = arith.constant 0 : i32
    %c0_i32_0 = arith.constant 0 : i32
    return %c0_i32, %arg1 : i32, i32
  }
  func.func @transform_3(%arg0: i32, %arg1: i32) -> (i32, i32) {
    %c0_i32 = arith.constant 0 : i32
    %c0_i32_0 = arith.constant 0 : i32
    return %c0_i32, %arg1 : i32, i32
  }
  func.func @transform_4(%arg0: i32, %arg1: i32) -> (i32, i32, i32, i32) {
    %c0_i32 = arith.constant 0 : i32
    %c0_i32_0 = arith.constant 0 : i32
    %c0_i32_1 = arith.constant 0 : i32
    return %arg0, %c0_i32, %c0_i32_0, %arg1 : i32, i32, i32, i32
  }
}

module attributes {stable_mosaic.version = 11 : i64} {
  func.func @_maxpool_kernel(%arg0: i32, %arg1: memref<1x2x1x256xbf16, #tpu.memory_space<vmem>>, %arg2: memref<1x1x128xbf16, #tpu.memory_space<vmem>>) attributes {dimension_semantics = [#tpu.dimension_semantics<parallel>], iteration_bounds = array<i64: 2>, scalar_prefetch = 0 : i64, scratch_operands = 0 : i64, tpu.core_type = #tpu.core_type<tc>, window_params = [{transform_indices = @transform_0, window_bounds = array<i64: 1, 2, 1, 256>}, {transform_indices = @transform_1, window_bounds = array<i64: 1, 1, 128>}]} {
    %c0 = arith.constant 0 : index
    %c0_0 = arith.constant 0 : index
    %c0_1 = arith.constant 0 : index
    %c0_2 = arith.constant 0 : index
    %0 = vector.load %arg1[%c0, %c0_0, %c0_1, %c0_2] : memref<1x2x1x256xbf16, #tpu.memory_space<vmem>>, vector<1x1x1x256xbf16>
    %1 = vector.shape_cast %0 : vector<1x1x1x256xbf16> to vector<1x1x256xbf16>
    %c0_3 = arith.constant 0 : index
    %c1 = arith.constant 1 : index
    %c0_4 = arith.constant 0 : index
    %c0_5 = arith.constant 0 : index
    %2 = vector.load %arg1[%c0_3, %c1, %c0_4, %c0_5] : memref<1x2x1x256xbf16, #tpu.memory_space<vmem>>, vector<1x1x1x256xbf16>
    %3 = vector.shape_cast %2 : vector<1x1x1x256xbf16> to vector<1x1x256xbf16>
    %4 = arith.maximumf %1, %3 : vector<1x1x256xbf16>
    %5 = vector.extract_strided_slice %4 {offsets = [0, 0, 0], sizes = [1, 1, 128], strides = [1, 1, 1]} : vector<1x1x256xbf16> to vector<1x1x128xbf16>
    %6 = vector.extract_strided_slice %4 {offsets = [0, 0, 128], sizes = [1, 1, 128], strides = [1, 1, 1]} : vector<1x1x256xbf16> to vector<1x1x128xbf16>
    %7 = arith.maximumf %5, %6 : vector<1x1x128xbf16>
    %c0_6 = arith.constant 0 : index
    %c0_7 = arith.constant 0 : index
    %c0_8 = arith.constant 0 : index
    %8 = vector.load %arg2[%c0_6, %c0_7, %c0_8] : memref<1x1x128xbf16, #tpu.memory_space<vmem>>, vector<1x1x128xbf16>
    tpu.vector_store %arg2[%c0_6, %c0_7, %c0_8], %7 {strides = array<i32>} : memref<1x1x128xbf16, #tpu.memory_space<vmem>>, vector<1x1x128xbf16>,
    return
  }
  func.func @transform_0(%arg0: i32) -> (i32, i32, i32, i32) {
    %c0_i32 = arith.constant 0 : i32
    %c0_i32_0 = arith.constant 0 : i32
    %c0_i32_1 = arith.constant 0 : i32
    %c0_i32_2 = arith.constant 0 : i32
    return %arg0, %c0_i32, %c0_i32_0, %c0_i32_1 : i32, i32, i32, i32
  }
  func.func @transform_1(%arg0: i32) -> (i32, i32, i32) {
    %c0_i32 = arith.constant 0 : i32
    %c0_i32_0 = arith.constant 0 : i32
    %c0_i32_1 = arith.constant 0 : i32
    return %arg0, %c0_i32, %c0_i32_0 : i32, i32, i32
  }
}

module attributes {stable_mosaic.version = 11 : i64} {
  func.func @_convtr_kernel(%arg0: i32, %arg1: i32, %arg2: i32, %arg3: memref<2x1x128xbf16, #tpu.memory_space<vmem>>, %arg4: memref<1x128x256xbf16, #tpu.memory_space<vmem>>, %arg5: memref<1x256xf32, #tpu.memory_space<vmem>>, %arg6: memref<2x1x1x256xbf16, #tpu.memory_space<vmem>>) attributes {dimension_semantics = [#tpu.dimension_semantics<parallel>, #tpu.dimension_semantics<parallel>, #tpu.dimension_semantics<parallel>], iteration_bounds = array<i64: 1, 2, 1>, scalar_prefetch = 0 : i64, scratch_operands = 0 : i64, tpu.core_type = #tpu.core_type<tc>, window_params = [{transform_indices = @transform_0, window_bounds = array<i64: 2, 1, 128>}, {transform_indices = @transform_1, window_bounds = array<i64: 1, 128, 256>}, {transform_indices = @transform_2, window_bounds = array<i64: 1, 256>}, {transform_indices = @transform_3, window_bounds = array<i64: 2, 1, 1, 256>}]} {
    %c0 = arith.constant 0 : index
    %c0_0 = arith.constant 0 : index
    %c0_1 = arith.constant 0 : index
    %0 = vector.load %arg3[%c0, %c0_0, %c0_1] : memref<2x1x128xbf16, #tpu.memory_space<vmem>>, vector<2x1x128xbf16>
    %1 = vector.shape_cast %0 : vector<2x1x128xbf16> to vector<2x128xbf16>
    %c0_2 = arith.constant 0 : index
    %c0_3 = arith.constant 0 : index
    %c0_4 = arith.constant 0 : index
    %2 = vector.load %arg4[%c0_2, %c0_3, %c0_4] : memref<1x128x256xbf16, #tpu.memory_space<vmem>>, vector<1x128x256xbf16>
    %3 = vector.shape_cast %2 : vector<1x128x256xbf16> to vector<128x256xbf16>
    %cst = arith.constant dense<0.000000e+00> : vector<2x256xf32>
    %4 = tpu.matmul %1, %3, %cst {dimension_numbers = #tpu.dot_dimension_numbers<[1], [0], [0], [1], [0, 0, 1, 1], [], []>} : vector<2x128xbf16>, vector<128x256xbf16>, vector<2x256xf32> -> vector<2x256xf32>
    %c0_5 = arith.constant 0 : index
    %c0_6 = arith.constant 0 : index
    %5 = vector.load %arg5[%c0_5, %c0_6] : memref<1x256xf32, #tpu.memory_space<vmem>>, vector<1x256xf32>
    %6 = vector.broadcast %5 : vector<1x256xf32> to vector<2x256xf32>
    %7 = arith.addf %4, %6 : vector<2x256xf32>
    %8 = vector.shape_cast %7 : vector<2x256xf32> to vector<2x1x256xf32>
    %9 = arith.truncf %8 : vector<2x1x256xf32> to vector<2x1x256xbf16>
    %c0_7 = arith.constant 0 : index
    %c0_8 = arith.constant 0 : index
    %c0_9 = arith.constant 0 : index
    %c0_10 = arith.constant 0 : index
    %10 = vector.load %arg6[%c0_7, %c0_8, %c0_9, %c0_10] : memref<2x1x1x256xbf16, #tpu.memory_space<vmem>>, vector<2x1x1x256xbf16>
    %11 = vector.shape_cast %10 : vector<2x1x1x256xbf16> to vector<2x1x256xbf16>
    %12 = vector.shape_cast %9 : vector<2x1x256xbf16> to vector<2x1x1x256xbf16>
    tpu.vector_store %arg6[%c0_7, %c0_8, %c0_9, %c0_10], %12 {strides = array<i32>} : memref<2x1x1x256xbf16, #tpu.memory_space<vmem>>, vector<2x1x1x256xbf16>,
    return
  }
  func.func @transform_0(%arg0: i32, %arg1: i32, %arg2: i32) -> (i32, i32, i32) {
    %c0_i32 = arith.constant 0 : i32
    %c0_i32_0 = arith.constant 0 : i32
    %c0_i32_1 = arith.constant 0 : i32
    return %arg0, %c0_i32, %c0_i32_0 : i32, i32, i32
  }
  func.func @transform_1(%arg0: i32, %arg1: i32, %arg2: i32) -> (i32, i32, i32) {
    %c0_i32 = arith.constant 0 : i32
    %c0_i32_0 = arith.constant 0 : i32
    return %arg1, %c0_i32, %arg2 : i32, i32, i32
  }
  func.func @transform_2(%arg0: i32, %arg1: i32, %arg2: i32) -> (i32, i32) {
    %c0_i32 = arith.constant 0 : i32
    %c0_i32_0 = arith.constant 0 : i32
    return %c0_i32, %arg2 : i32, i32
  }
  func.func @transform_3(%arg0: i32, %arg1: i32, %arg2: i32) -> (i32, i32, i32, i32) {
    %c0_i32 = arith.constant 0 : i32
    %c0_i32_0 = arith.constant 0 : i32
    return %arg0, %arg1, %c0_i32, %arg2 : i32, i32, i32, i32
  }
}

module attributes {stable_mosaic.version = 11 : i64} {
  func.func @_conv3x3_kernel(%arg0: i32, %arg1: i32, %arg2: memref<1x3x3x128xbf16, #tpu.memory_space<vmem>>, %arg3: memref<1152x128xbf16, #tpu.memory_space<vmem>>, %arg4: memref<1x128xf32, #tpu.memory_space<vmem>>, %arg5: memref<1x128xf32, #tpu.memory_space<vmem>>, %arg6: memref<1x1x1x128xbf16, #tpu.memory_space<vmem>>) attributes {dimension_semantics = [#tpu.dimension_semantics<parallel>, #tpu.dimension_semantics<parallel>], iteration_bounds = array<i64: 2, 1>, scalar_prefetch = 0 : i64, scratch_operands = 0 : i64, tpu.core_type = #tpu.core_type<tc>, window_params = [{transform_indices = @transform_0, window_bounds = array<i64: 1, 3, 3, 128>}, {transform_indices = @transform_1, window_bounds = array<i64: 1152, 128>}, {transform_indices = @transform_2, window_bounds = array<i64: 1, 128>}, {transform_indices = @transform_3, window_bounds = array<i64: 1, 128>}, {transform_indices = @transform_4, window_bounds = array<i64: 1, 1, 1, 128>}]} {
    %c0 = arith.constant 0 : index
    %c0_0 = arith.constant 0 : index
    %c0_1 = arith.constant 0 : index
    %c0_2 = arith.constant 0 : index
    %0 = vector.load %arg2[%c0, %c0_0, %c0_1, %c0_2] : memref<1x3x3x128xbf16, #tpu.memory_space<vmem>>, vector<1x1x1x128xbf16>
    %1 = vector.shape_cast %0 : vector<1x1x1x128xbf16> to vector<1x1x128xbf16>
    %2 = vector.shape_cast %1 : vector<1x1x128xbf16> to vector<1x128xbf16>
    %c0_3 = arith.constant 0 : index
    %c0_4 = arith.constant 0 : index
    %3 = vector.load %arg3[%c0_3, %c0_4] : memref<1152x128xbf16, #tpu.memory_space<vmem>>, vector<128x128xbf16>
    %cst = arith.constant dense<0.000000e+00> : vector<1x128xf32>
    %4 = tpu.matmul %2, %3, %cst {dimension_numbers = #tpu.dot_dimension_numbers<[1], [0], [0], [1], [0, 0, 1, 1], [], []>} : vector<1x128xbf16>, vector<128x128xbf16>, vector<1x128xf32> -> vector<1x128xf32>
    %c0_5 = arith.constant 0 : index
    %c0_6 = arith.constant 0 : index
    %c1 = arith.constant 1 : index
    %c0_7 = arith.constant 0 : index
    %5 = vector.load %arg2[%c0_5, %c0_6, %c1, %c0_7] : memref<1x3x3x128xbf16, #tpu.memory_space<vmem>>, vector<1x1x1x128xbf16>
    %6 = vector.shape_cast %5 : vector<1x1x1x128xbf16> to vector<1x1x128xbf16>
    %7 = vector.shape_cast %6 : vector<1x1x128xbf16> to vector<1x128xbf16>
    %c128 = arith.constant 128 : index
    %c0_8 = arith.constant 0 : index
    %8 = vector.load %arg3[%c128, %c0_8] : memref<1152x128xbf16, #tpu.memory_space<vmem>>, vector<128x128xbf16>
    %cst_9 = arith.constant dense<0.000000e+00> : vector<1x128xf32>
    %9 = tpu.matmul %7, %8, %cst_9 {dimension_numbers = #tpu.dot_dimension_numbers<[1], [0], [0], [1], [0, 0, 1, 1], [], []>} : vector<1x128xbf16>, vector<128x128xbf16>, vector<1x128xf32> -> vector<1x128xf32>
    %10 = arith.addf %4, %9 : vector<1x128xf32>
    %c0_10 = arith.constant 0 : index
    %c0_11 = arith.constant 0 : index
    %c2 = arith.constant 2 : index
    %c0_12 = arith.constant 0 : index
    %11 = vector.load %arg2[%c0_10, %c0_11, %c2, %c0_12] : memref<1x3x3x128xbf16, #tpu.memory_space<vmem>>, vector<1x1x1x128xbf16>
    %12 = vector.shape_cast %11 : vector<1x1x1x128xbf16> to vector<1x1x128xbf16>
    %13 = vector.shape_cast %12 : vector<1x1x128xbf16> to vector<1x128xbf16>
    %c256 = arith.constant 256 : index
    %c0_13 = arith.constant 0 : index
    %14 = vector.load %arg3[%c256, %c0_13] : memref<1152x128xbf16, #tpu.memory_space<vmem>>, vector<128x128xbf16>
    %cst_14 = arith.constant dense<0.000000e+00> : vector<1x128xf32>
    %15 = tpu.matmul %13, %14, %cst_14 {dimension_numbers = #tpu.dot_dimension_numbers<[1], [0], [0], [1], [0, 0, 1, 1], [], []>} : vector<1x128xbf16>, vector<128x128xbf16>, vector<1x128xf32> -> vector<1x128xf32>
    %16 = arith.addf %10, %15 : vector<1x128xf32>
    %c0_15 = arith.constant 0 : index
    %c1_16 = arith.constant 1 : index
    %c0_17 = arith.constant 0 : index
    %c0_18 = arith.constant 0 : index
    %17 = vector.load %arg2[%c0_15, %c1_16, %c0_17, %c0_18] : memref<1x3x3x128xbf16, #tpu.memory_space<vmem>>, vector<1x1x1x128xbf16>
    %18 = vector.shape_cast %17 : vector<1x1x1x128xbf16> to vector<1x1x128xbf16>
    %19 = vector.shape_cast %18 : vector<1x1x128xbf16> to vector<1x128xbf16>
    %c384 = arith.constant 384 : index
    %c0_19 = arith.constant 0 : index
    %20 = vector.load %arg3[%c384, %c0_19] : memref<1152x128xbf16, #tpu.memory_space<vmem>>, vector<128x128xbf16>
    %cst_20 = arith.constant dense<0.000000e+00> : vector<1x128xf32>
    %21 = tpu.matmul %19, %20, %cst_20 {dimension_numbers = #tpu.dot_dimension_numbers<[1], [0], [0], [1], [0, 0, 1, 1], [], []>} : vector<1x128xbf16>, vector<128x128xbf16>, vector<1x128xf32> -> vector<1x128xf32>
    %22 = arith.addf %16, %21 : vector<1x128xf32>
    %c0_21 = arith.constant 0 : index
    %c1_22 = arith.constant 1 : index
    %c1_23 = arith.constant 1 : index
    %c0_24 = arith.constant 0 : index
    %23 = vector.load %arg2[%c0_21, %c1_22, %c1_23, %c0_24] : memref<1x3x3x128xbf16, #tpu.memory_space<vmem>>, vector<1x1x1x128xbf16>
    %24 = vector.shape_cast %23 : vector<1x1x1x128xbf16> to vector<1x1x128xbf16>
    %25 = vector.shape_cast %24 : vector<1x1x128xbf16> to vector<1x128xbf16>
    %c512 = arith.constant 512 : index
    %c0_25 = arith.constant 0 : index
    %26 = vector.load %arg3[%c512, %c0_25] : memref<1152x128xbf16, #tpu.memory_space<vmem>>, vector<128x128xbf16>
    %cst_26 = arith.constant dense<0.000000e+00> : vector<1x128xf32>
    %27 = tpu.matmul %25, %26, %cst_26 {dimension_numbers = #tpu.dot_dimension_numbers<[1], [0], [0], [1], [0, 0, 1, 1], [], []>} : vector<1x128xbf16>, vector<128x128xbf16>, vector<1x128xf32> -> vector<1x128xf32>
    %28 = arith.addf %22, %27 : vector<1x128xf32>
    %c0_27 = arith.constant 0 : index
    %c1_28 = arith.constant 1 : index
    %c2_29 = arith.constant 2 : index
    %c0_30 = arith.constant 0 : index
    %29 = vector.load %arg2[%c0_27, %c1_28, %c2_29, %c0_30] : memref<1x3x3x128xbf16, #tpu.memory_space<vmem>>, vector<1x1x1x128xbf16>
    %30 = vector.shape_cast %29 : vector<1x1x1x128xbf16> to vector<1x1x128xbf16>
    %31 = vector.shape_cast %30 : vector<1x1x128xbf16> to vector<1x128xbf16>
    %c640 = arith.constant 640 : index
    %c0_31 = arith.constant 0 : index
    %32 = vector.load %arg3[%c640, %c0_31] : memref<1152x128xbf16, #tpu.memory_space<vmem>>, vector<128x128xbf16>
    %cst_32 = arith.constant dense<0.000000e+00> : vector<1x128xf32>
    %33 = tpu.matmul %31, %32, %cst_32 {dimension_numbers = #tpu.dot_dimension_numbers<[1], [0], [0], [1], [0, 0, 1, 1], [], []>} : vector<1x128xbf16>, vector<128x128xbf16>, vector<1x128xf32> -> vector<1x128xf32>
    %34 = arith.addf %28, %33 : vector<1x128xf32>
    %c0_33 = arith.constant 0 : index
    %c2_34 = arith.constant 2 : index
    %c0_35 = arith.constant 0 : index
    %c0_36 = arith.constant 0 : index
    %35 = vector.load %arg2[%c0_33, %c2_34, %c0_35, %c0_36] : memref<1x3x3x128xbf16, #tpu.memory_space<vmem>>, vector<1x1x1x128xbf16>
    %36 = vector.shape_cast %35 : vector<1x1x1x128xbf16> to vector<1x1x128xbf16>
    %37 = vector.shape_cast %36 : vector<1x1x128xbf16> to vector<1x128xbf16>
    %c768 = arith.constant 768 : index
    %c0_37 = arith.constant 0 : index
    %38 = vector.load %arg3[%c768, %c0_37] : memref<1152x128xbf16, #tpu.memory_space<vmem>>, vector<128x128xbf16>
    %cst_38 = arith.constant dense<0.000000e+00> : vector<1x128xf32>
    %39 = tpu.matmul %37, %38, %cst_38 {dimension_numbers = #tpu.dot_dimension_numbers<[1], [0], [0], [1], [0, 0, 1, 1], [], []>} : vector<1x128xbf16>, vector<128x128xbf16>, vector<1x128xf32> -> vector<1x128xf32>
    %40 = arith.addf %34, %39 : vector<1x128xf32>
    %c0_39 = arith.constant 0 : index
    %c2_40 = arith.constant 2 : index
    %c1_41 = arith.constant 1 : index
    %c0_42 = arith.constant 0 : index
    %41 = vector.load %arg2[%c0_39, %c2_40, %c1_41, %c0_42] : memref<1x3x3x128xbf16, #tpu.memory_space<vmem>>, vector<1x1x1x128xbf16>
    %42 = vector.shape_cast %41 : vector<1x1x1x128xbf16> to vector<1x1x128xbf16>
    %43 = vector.shape_cast %42 : vector<1x1x128xbf16> to vector<1x128xbf16>
    %c896 = arith.constant 896 : index
    %c0_43 = arith.constant 0 : index
    %44 = vector.load %arg3[%c896, %c0_43] : memref<1152x128xbf16, #tpu.memory_space<vmem>>, vector<128x128xbf16>
    %cst_44 = arith.constant dense<0.000000e+00> : vector<1x128xf32>
    %45 = tpu.matmul %43, %44, %cst_44 {dimension_numbers = #tpu.dot_dimension_numbers<[1], [0], [0], [1], [0, 0, 1, 1], [], []>} : vector<1x128xbf16>, vector<128x128xbf16>, vector<1x128xf32> -> vector<1x128xf32>
    %46 = arith.addf %40, %45 : vector<1x128xf32>
    %c0_45 = arith.constant 0 : index
    %c2_46 = arith.constant 2 : index
    %c2_47 = arith.constant 2 : index
    %c0_48 = arith.constant 0 : index
    %47 = vector.load %arg2[%c0_45, %c2_46, %c2_47, %c0_48] : memref<1x3x3x128xbf16, #tpu.memory_space<vmem>>, vector<1x1x1x128xbf16>
    %48 = vector.shape_cast %47 : vector<1x1x1x128xbf16> to vector<1x1x128xbf16>
    %49 = vector.shape_cast %48 : vector<1x1x128xbf16> to vector<1x128xbf16>
    %c1024 = arith.constant 1024 : index
    %c0_49 = arith.constant 0 : index
    %50 = vector.load %arg3[%c1024, %c0_49] : memref<1152x128xbf16, #tpu.memory_space<vmem>>, vector<128x128xbf16>
    %cst_50 = arith.constant dense<0.000000e+00> : vector<1x128xf32>
    %51 = tpu.matmul %49, %50, %cst_50 {dimension_numbers = #tpu.dot_dimension_numbers<[1], [0], [0], [1], [0, 0, 1, 1], [], []>} : vector<1x128xbf16>, vector<128x128xbf16>, vector<1x128xf32> -> vector<1x128xf32>
    %52 = arith.addf %46, %51 : vector<1x128xf32>
    %c0_51 = arith.constant 0 : index
    %c0_52 = arith.constant 0 : index
    %53 = vector.load %arg4[%c0_51, %c0_52] : memref<1x128xf32, #tpu.memory_space<vmem>>, vector<1x128xf32>
    %54 = arith.mulf %52, %53 : vector<1x128xf32>
    %c0_53 = arith.constant 0 : index
    %c0_54 = arith.constant 0 : index
    %55 = vector.load %arg5[%c0_53, %c0_54] : memref<1x128xf32, #tpu.memory_space<vmem>>, vector<1x128xf32>
    %56 = arith.addf %54, %55 : vector<1x128xf32>
    %cst_55 = arith.constant 0.000000e+00 : f32
    %57 = vector.broadcast %cst_55 : f32 to vector<1x128xf32>
    %58 = arith.maximumf %56, %57 : vector<1x128xf32>
    %59 = vector.shape_cast %58 : vector<1x128xf32> to vector<1x1x128xf32>
    %60 = arith.truncf %59 : vector<1x1x128xf32> to vector<1x1x128xbf16>
    %c0_56 = arith.constant 0 : index
    %c0_57 = arith.constant 0 : index
    %c0_58 = arith.constant 0 : index
    %c0_59 = arith.constant 0 : index
    %61 = vector.load %arg6[%c0_56, %c0_57, %c0_58, %c0_59] : memref<1x1x1x128xbf16, #tpu.memory_space<vmem>>, vector<1x1x1x128xbf16>
    %62 = vector.shape_cast %61 : vector<1x1x1x128xbf16> to vector<1x1x128xbf16>
    %63 = vector.shape_cast %60 : vector<1x1x128xbf16> to vector<1x1x1x128xbf16>
    tpu.vector_store %arg6[%c0_56, %c0_57, %c0_58, %c0_59], %63 {strides = array<i32>} : memref<1x1x1x128xbf16, #tpu.memory_space<vmem>>, vector<1x1x1x128xbf16>,
    return
  }
  func.func @transform_0(%arg0: i32, %arg1: i32) -> (i32, i32, i32, i32) {
    %c0_i32 = arith.constant 0 : i32
    %c0_i32_0 = arith.constant 0 : i32
    %c0_i32_1 = arith.constant 0 : i32
    %c0_i32_2 = arith.constant 0 : i32
    return %arg0, %c0_i32, %c0_i32_0, %c0_i32_1 : i32, i32, i32, i32
  }
  func.func @transform_1(%arg0: i32, %arg1: i32) -> (i32, i32) {
    %c0_i32 = arith.constant 0 : i32
    %c0_i32_0 = arith.constant 0 : i32
    return %c0_i32, %arg1 : i32, i32
  }
  func.func @transform_2(%arg0: i32, %arg1: i32) -> (i32, i32) {
    %c0_i32 = arith.constant 0 : i32
    %c0_i32_0 = arith.constant 0 : i32
    return %c0_i32, %arg1 : i32, i32
  }
  func.func @transform_3(%arg0: i32, %arg1: i32) -> (i32, i32) {
    %c0_i32 = arith.constant 0 : i32
    %c0_i32_0 = arith.constant 0 : i32
    return %c0_i32, %arg1 : i32, i32
  }
  func.func @transform_4(%arg0: i32, %arg1: i32) -> (i32, i32, i32, i32) {
    %c0_i32 = arith.constant 0 : i32
    %c0_i32_0 = arith.constant 0 : i32
    %c0_i32_1 = arith.constant 0 : i32
    return %arg0, %c0_i32, %c0_i32_0, %arg1 : i32, i32, i32, i32
  }
}

module attributes {stable_mosaic.version = 11 : i64} {
  func.func @_convtr_kernel(%arg0: i32, %arg1: i32, %arg2: i32, %arg3: memref<4x2x128xbf16, #tpu.memory_space<vmem>>, %arg4: memref<1x128x256xbf16, #tpu.memory_space<vmem>>, %arg5: memref<1x256xf32, #tpu.memory_space<vmem>>, %arg6: memref<4x1x2x256xbf16, #tpu.memory_space<vmem>>) attributes {dimension_semantics = [#tpu.dimension_semantics<parallel>, #tpu.dimension_semantics<parallel>, #tpu.dimension_semantics<parallel>], iteration_bounds = array<i64: 1, 2, 1>, scalar_prefetch = 0 : i64, scratch_operands = 0 : i64, tpu.core_type = #tpu.core_type<tc>, window_params = [{transform_indices = @transform_0, window_bounds = array<i64: 4, 2, 128>}, {transform_indices = @transform_1, window_bounds = array<i64: 1, 128, 256>}, {transform_indices = @transform_2, window_bounds = array<i64: 1, 256>}, {transform_indices = @transform_3, window_bounds = array<i64: 4, 1, 2, 256>}]} {
    %c0 = arith.constant 0 : index
    %c0_0 = arith.constant 0 : index
    %c0_1 = arith.constant 0 : index
    %0 = vector.load %arg3[%c0, %c0_0, %c0_1] : memref<4x2x128xbf16, #tpu.memory_space<vmem>>, vector<4x2x128xbf16>
    %1 = vector.shape_cast %0 : vector<4x2x128xbf16> to vector<8x128xbf16>
    %c0_2 = arith.constant 0 : index
    %c0_3 = arith.constant 0 : index
    %c0_4 = arith.constant 0 : index
    %2 = vector.load %arg4[%c0_2, %c0_3, %c0_4] : memref<1x128x256xbf16, #tpu.memory_space<vmem>>, vector<1x128x256xbf16>
    %3 = vector.shape_cast %2 : vector<1x128x256xbf16> to vector<128x256xbf16>
    %cst = arith.constant dense<0.000000e+00> : vector<8x256xf32>
    %4 = tpu.matmul %1, %3, %cst {dimension_numbers = #tpu.dot_dimension_numbers<[1], [0], [0], [1], [0, 0, 1, 1], [], []>} : vector<8x128xbf16>, vector<128x256xbf16>, vector<8x256xf32> -> vector<8x256xf32>
    %c0_5 = arith.constant 0 : index
    %c0_6 = arith.constant 0 : index
    %5 = vector.load %arg5[%c0_5, %c0_6] : memref<1x256xf32, #tpu.memory_space<vmem>>, vector<1x256xf32>
    %6 = vector.broadcast %5 : vector<1x256xf32> to vector<8x256xf32>
    %7 = arith.addf %4, %6 : vector<8x256xf32>
    %8 = vector.shape_cast %7 : vector<8x256xf32> to vector<4x2x256xf32>
    %9 = arith.truncf %8 : vector<4x2x256xf32> to vector<4x2x256xbf16>
    %c0_7 = arith.constant 0 : index
    %c0_8 = arith.constant 0 : index
    %c0_9 = arith.constant 0 : index
    %c0_10 = arith.constant 0 : index
    %10 = vector.load %arg6[%c0_7, %c0_8, %c0_9, %c0_10] : memref<4x1x2x256xbf16, #tpu.memory_space<vmem>>, vector<4x1x2x256xbf16>
    %11 = vector.shape_cast %10 : vector<4x1x2x256xbf16> to vector<4x2x256xbf16>
    %12 = vector.shape_cast %9 : vector<4x2x256xbf16> to vector<4x1x2x256xbf16>
    tpu.vector_store %arg6[%c0_7, %c0_8, %c0_9, %c0_10], %12 {strides = array<i32>} : memref<4x1x2x256xbf16, #tpu.memory_space<vmem>>, vector<4x1x2x256xbf16>,
    return
  }
  func.func @transform_0(%arg0: i32, %arg1: i32, %arg2: i32) -> (i32, i32, i32) {
    %c0_i32 = arith.constant 0 : i32
    %c0_i32_0 = arith.constant 0 : i32
    %c0_i32_1 = arith.constant 0 : i32
    return %arg0, %c0_i32, %c0_i32_0 : i32, i32, i32
  }
  func.func @transform_1(%arg0: i32, %arg1: i32, %arg2: i32) -> (i32, i32, i32) {
    %c0_i32 = arith.constant 0 : i32
    %c0_i32_0 = arith.constant 0 : i32
    return %arg1, %c0_i32, %arg2 : i32, i32, i32
  }
  func.func @transform_2(%arg0: i32, %arg1: i32, %arg2: i32) -> (i32, i32) {
    %c0_i32 = arith.constant 0 : i32
    %c0_i32_0 = arith.constant 0 : i32
    return %c0_i32, %arg2 : i32, i32
  }
  func.func @transform_3(%arg0: i32, %arg1: i32, %arg2: i32) -> (i32, i32, i32, i32) {
    %c0_i32 = arith.constant 0 : i32
    %c0_i32_0 = arith.constant 0 : i32
    return %arg0, %arg1, %c0_i32, %arg2 : i32, i32, i32, i32
  }
}

module attributes {stable_mosaic.version = 11 : i64} {
  func.func @_convtr_kernel(%arg0: i32, %arg1: i32, %arg2: i32, %arg3: memref<8x4x128xbf16, #tpu.memory_space<vmem>>, %arg4: memref<1x128x256xbf16, #tpu.memory_space<vmem>>, %arg5: memref<1x256xf32, #tpu.memory_space<vmem>>, %arg6: memref<8x1x4x256xbf16, #tpu.memory_space<vmem>>) attributes {dimension_semantics = [#tpu.dimension_semantics<parallel>, #tpu.dimension_semantics<parallel>, #tpu.dimension_semantics<parallel>], iteration_bounds = array<i64: 1, 2, 1>, scalar_prefetch = 0 : i64, scratch_operands = 0 : i64, tpu.core_type = #tpu.core_type<tc>, window_params = [{transform_indices = @transform_0, window_bounds = array<i64: 8, 4, 128>}, {transform_indices = @transform_1, window_bounds = array<i64: 1, 128, 256>}, {transform_indices = @transform_2, window_bounds = array<i64: 1, 256>}, {transform_indices = @transform_3, window_bounds = array<i64: 8, 1, 4, 256>}]} {
    %c0 = arith.constant 0 : index
    %c0_0 = arith.constant 0 : index
    %c0_1 = arith.constant 0 : index
    %0 = vector.load %arg3[%c0, %c0_0, %c0_1] : memref<8x4x128xbf16, #tpu.memory_space<vmem>>, vector<8x4x128xbf16>
    %1 = vector.shape_cast %0 : vector<8x4x128xbf16> to vector<32x128xbf16>
    %c0_2 = arith.constant 0 : index
    %c0_3 = arith.constant 0 : index
    %c0_4 = arith.constant 0 : index
    %2 = vector.load %arg4[%c0_2, %c0_3, %c0_4] : memref<1x128x256xbf16, #tpu.memory_space<vmem>>, vector<1x128x256xbf16>
    %3 = vector.shape_cast %2 : vector<1x128x256xbf16> to vector<128x256xbf16>
    %cst = arith.constant dense<0.000000e+00> : vector<32x256xf32>
    %4 = tpu.matmul %1, %3, %cst {dimension_numbers = #tpu.dot_dimension_numbers<[1], [0], [0], [1], [0, 0, 1, 1], [], []>} : vector<32x128xbf16>, vector<128x256xbf16>, vector<32x256xf32> -> vector<32x256xf32>
    %c0_5 = arith.constant 0 : index
    %c0_6 = arith.constant 0 : index
    %5 = vector.load %arg5[%c0_5, %c0_6] : memref<1x256xf32, #tpu.memory_space<vmem>>, vector<1x256xf32>
    %6 = vector.broadcast %5 : vector<1x256xf32> to vector<32x256xf32>
    %7 = arith.addf %4, %6 : vector<32x256xf32>
    %8 = vector.shape_cast %7 : vector<32x256xf32> to vector<8x4x256xf32>
    %9 = arith.truncf %8 : vector<8x4x256xf32> to vector<8x4x256xbf16>
    %c0_7 = arith.constant 0 : index
    %c0_8 = arith.constant 0 : index
    %c0_9 = arith.constant 0 : index
    %c0_10 = arith.constant 0 : index
    %10 = vector.load %arg6[%c0_7, %c0_8, %c0_9, %c0_10] : memref<8x1x4x256xbf16, #tpu.memory_space<vmem>>, vector<8x1x4x256xbf16>
    %11 = vector.shape_cast %10 : vector<8x1x4x256xbf16> to vector<8x4x256xbf16>
    %12 = vector.shape_cast %9 : vector<8x4x256xbf16> to vector<8x1x4x256xbf16>
    tpu.vector_store %arg6[%c0_7, %c0_8, %c0_9, %c0_10], %12 {strides = array<i32>} : memref<8x1x4x256xbf16, #tpu.memory_space<vmem>>, vector<8x1x4x256xbf16>,
    return
  }
  func.func @transform_0(%arg0: i32, %arg1: i32, %arg2: i32) -> (i32, i32, i32) {
    %c0_i32 = arith.constant 0 : i32
    %c0_i32_0 = arith.constant 0 : i32
    %c0_i32_1 = arith.constant 0 : i32
    return %arg0, %c0_i32, %c0_i32_0 : i32, i32, i32
  }
  func.func @transform_1(%arg0: i32, %arg1: i32, %arg2: i32) -> (i32, i32, i32) {
    %c0_i32 = arith.constant 0 : i32
    %c0_i32_0 = arith.constant 0 : i32
    return %arg1, %c0_i32, %arg2 : i32, i32, i32
  }
  func.func @transform_2(%arg0: i32, %arg1: i32, %arg2: i32) -> (i32, i32) {
    %c0_i32 = arith.constant 0 : i32
    %c0_i32_0 = arith.constant 0 : i32
    return %c0_i32, %arg2 : i32, i32
  }
  func.func @transform_3(%arg0: i32, %arg1: i32, %arg2: i32) -> (i32, i32, i32, i32) {
    %c0_i32 = arith.constant 0 : i32
    %c0_i32_0 = arith.constant 0 : i32
    return %arg0, %arg1, %c0_i32, %arg2 : i32, i32, i32, i32
  }
}

module attributes {stable_mosaic.version = 11 : i64} {
  func.func @_convtr_kernel(%arg0: i32, %arg1: i32, %arg2: i32, %arg3: memref<16x8x128xbf16, #tpu.memory_space<vmem>>, %arg4: memref<1x128x256xbf16, #tpu.memory_space<vmem>>, %arg5: memref<1x256xf32, #tpu.memory_space<vmem>>, %arg6: memref<16x1x8x256xbf16, #tpu.memory_space<vmem>>) attributes {dimension_semantics = [#tpu.dimension_semantics<parallel>, #tpu.dimension_semantics<parallel>, #tpu.dimension_semantics<parallel>], iteration_bounds = array<i64: 1, 2, 1>, scalar_prefetch = 0 : i64, scratch_operands = 0 : i64, tpu.core_type = #tpu.core_type<tc>, window_params = [{transform_indices = @transform_0, window_bounds = array<i64: 16, 8, 128>}, {transform_indices = @transform_1, window_bounds = array<i64: 1, 128, 256>}, {transform_indices = @transform_2, window_bounds = array<i64: 1, 256>}, {transform_indices = @transform_3, window_bounds = array<i64: 16, 1, 8, 256>}]} {
    %c0 = arith.constant 0 : index
    %c0_0 = arith.constant 0 : index
    %c0_1 = arith.constant 0 : index
    %0 = vector.load %arg3[%c0, %c0_0, %c0_1] : memref<16x8x128xbf16, #tpu.memory_space<vmem>>, vector<16x8x128xbf16>
    %1 = vector.shape_cast %0 : vector<16x8x128xbf16> to vector<128x128xbf16>
    %c0_2 = arith.constant 0 : index
    %c0_3 = arith.constant 0 : index
    %c0_4 = arith.constant 0 : index
    %2 = vector.load %arg4[%c0_2, %c0_3, %c0_4] : memref<1x128x256xbf16, #tpu.memory_space<vmem>>, vector<1x128x256xbf16>
    %3 = vector.shape_cast %2 : vector<1x128x256xbf16> to vector<128x256xbf16>
    %cst = arith.constant dense<0.000000e+00> : vector<128x256xf32>
    %4 = tpu.matmul %1, %3, %cst {dimension_numbers = #tpu.dot_dimension_numbers<[1], [0], [0], [1], [0, 0, 1, 1], [], []>} : vector<128x128xbf16>, vector<128x256xbf16>, vector<128x256xf32> -> vector<128x256xf32>
    %c0_5 = arith.constant 0 : index
    %c0_6 = arith.constant 0 : index
    %5 = vector.load %arg5[%c0_5, %c0_6] : memref<1x256xf32, #tpu.memory_space<vmem>>, vector<1x256xf32>
    %6 = vector.broadcast %5 : vector<1x256xf32> to vector<128x256xf32>
    %7 = arith.addf %4, %6 : vector<128x256xf32>
    %8 = vector.shape_cast %7 : vector<128x256xf32> to vector<16x8x256xf32>
    %9 = arith.truncf %8 : vector<16x8x256xf32> to vector<16x8x256xbf16>
    %c0_7 = arith.constant 0 : index
    %c0_8 = arith.constant 0 : index
    %c0_9 = arith.constant 0 : index
    %c0_10 = arith.constant 0 : index
    %10 = vector.load %arg6[%c0_7, %c0_8, %c0_9, %c0_10] : memref<16x1x8x256xbf16, #tpu.memory_space<vmem>>, vector<16x1x8x256xbf16>
    %11 = vector.shape_cast %10 : vector<16x1x8x256xbf16> to vector<16x8x256xbf16>
    %12 = vector.shape_cast %9 : vector<16x8x256xbf16> to vector<16x1x8x256xbf16>
    tpu.vector_store %arg6[%c0_7, %c0_8, %c0_9, %c0_10], %12 {strides = array<i32>} : memref<16x1x8x256xbf16, #tpu.memory_space<vmem>>, vector<16x1x8x256xbf16>,
    return
  }
  func.func @transform_0(%arg0: i32, %arg1: i32, %arg2: i32) -> (i32, i32, i32) {
    %c0_i32 = arith.constant 0 : i32
    %c0_i32_0 = arith.constant 0 : i32
    %c0_i32_1 = arith.constant 0 : i32
    return %arg0, %c0_i32, %c0_i32_0 : i32, i32, i32
  }
  func.func @transform_1(%arg0: i32, %arg1: i32, %arg2: i32) -> (i32, i32, i32) {
    %c0_i32 = arith.constant 0 : i32
    %c0_i32_0 = arith.constant 0 : i32
    return %arg1, %c0_i32, %arg2 : i32, i32, i32
  }
  func.func @transform_2(%arg0: i32, %arg1: i32, %arg2: i32) -> (i32, i32) {
    %c0_i32 = arith.constant 0 : i32
    %c0_i32_0 = arith.constant 0 : i32
    return %c0_i32, %arg2 : i32, i32
  }
  func.func @transform_3(%arg0: i32, %arg1: i32, %arg2: i32) -> (i32, i32, i32, i32) {
    %c0_i32 = arith.constant 0 : i32
    %c0_i32_0 = arith.constant 0 : i32
    return %arg0, %arg1, %c0_i32, %arg2 : i32, i32, i32, i32
  }
}

module attributes {stable_mosaic.version = 11 : i64} {
  func.func @_matmul_bias_kernel(%arg0: i32, %arg1: i32, %arg2: memref<256x128xbf16, #tpu.memory_space<vmem>>, %arg3: memref<128x128xbf16, #tpu.memory_space<vmem>>, %arg4: memref<1x128xf32, #tpu.memory_space<vmem>>, %arg5: memref<256x128xf32, #tpu.memory_space<vmem>>) attributes {dimension_semantics = [#tpu.dimension_semantics<parallel>, #tpu.dimension_semantics<parallel>], iteration_bounds = array<i64: 2, 1>, scalar_prefetch = 0 : i64, scratch_operands = 0 : i64, tpu.core_type = #tpu.core_type<tc>, window_params = [{transform_indices = @transform_0, window_bounds = array<i64: 256, 128>}, {transform_indices = @transform_1, window_bounds = array<i64: 128, 128>}, {transform_indices = @transform_2, window_bounds = array<i64: 1, 128>}, {transform_indices = @transform_3, window_bounds = array<i64: 256, 128>}]} {
    %c0 = arith.constant 0 : index
    %c0_0 = arith.constant 0 : index
    %0 = vector.load %arg2[%c0, %c0_0] : memref<256x128xbf16, #tpu.memory_space<vmem>>, vector<256x128xbf16>
    %c0_1 = arith.constant 0 : index
    %c0_2 = arith.constant 0 : index
    %1 = vector.load %arg3[%c0_1, %c0_2] : memref<128x128xbf16, #tpu.memory_space<vmem>>, vector<128x128xbf16>
    %cst = arith.constant dense<0.000000e+00> : vector<256x128xf32>
    %2 = tpu.matmul %0, %1, %cst {dimension_numbers = #tpu.dot_dimension_numbers<[1], [0], [0], [1], [0, 0, 1, 1], [], []>} : vector<256x128xbf16>, vector<128x128xbf16>, vector<256x128xf32> -> vector<256x128xf32>
    %c0_3 = arith.constant 0 : index
    %c0_4 = arith.constant 0 : index
    %3 = vector.load %arg4[%c0_3, %c0_4] : memref<1x128xf32, #tpu.memory_space<vmem>>, vector<1x128xf32>
    %4 = vector.broadcast %3 : vector<1x128xf32> to vector<256x128xf32>
    %5 = arith.addf %2, %4 : vector<256x128xf32>
    %c0_5 = arith.constant 0 : index
    %c0_6 = arith.constant 0 : index
    %6 = vector.load %arg5[%c0_5, %c0_6] : memref<256x128xf32, #tpu.memory_space<vmem>>, vector<256x128xf32>
    tpu.vector_store %arg5[%c0_5, %c0_6], %5 {strides = array<i32>} : memref<256x128xf32, #tpu.memory_space<vmem>>, vector<256x128xf32>,
    return
  }
  func.func @transform_0(%arg0: i32, %arg1: i32) -> (i32, i32) {
    %c0_i32 = arith.constant 0 : i32
    %c0_i32_0 = arith.constant 0 : i32
    return %arg0, %c0_i32 : i32, i32
  }
  func.func @transform_1(%arg0: i32, %arg1: i32) -> (i32, i32) {
    %c0_i32 = arith.constant 0 : i32
    %c0_i32_0 = arith.constant 0 : i32
    return %c0_i32, %arg1 : i32, i32
  }
  func.func @transform_2(%arg0: i32, %arg1: i32) -> (i32, i32) {
    %c0_i32 = arith.constant 0 : i32
    %c0_i32_0 = arith.constant 0 : i32
    return %c0_i32, %arg1 : i32, i32
  }
  func.func @transform_3(%arg0: i32, %arg1: i32) -> (i32, i32) {
    %c0_i32 = arith.constant 0 : i32
    return %arg0, %arg1 : i32, i32
  }
}

</mosaic_0001>

<bundles_post_ra>
// kernel: _lambda_.29
= control target key start
LH: loop header
LB: loop body
LE: loop exit
PB: predicated region body
PF: predicated region fallthrough
CT: control target
= control target key end

     0   :  { %s318_s6 = smov 0   ;;  %s339_s0 = inlined_call_operand.vmem [shape: bf16[16,2,8,256], index: 0, kind: input, shape index: {}]   ;;  %s340_s1 = inlined_call_operand.vmem [shape: bf16[16,8,128], index: 1, kind: output, shape index: {}]  }
   0x1 LB: > { %s244_s7 = sadd.s32 4294967295, %s306_s6   ;;  %p248_p0 = scmp.ge.s32.totalorder %s306_s6, 1  ;;  %s306_s6 = sphi %s318_s6, %s11_s6  }
   0x2   : > { %p89_p1 = scmp.lt.s32.totalorder %s306_s6, 3 }
   0x4   : > { %p90_p2 = pnand %p248_p0, %p89_p1 }
   0x5   : > { %s249_s8 = sshll.u32 (!%p90_p2), %s244_s7, 3 }
   0x6   : > { %93 = sbr.rel (%p90_p2) target bundleno = 31 (0x1f), region = 24  ;;  %p111_p3 = scmp.lt.s32.totalorder (!%p90_p2), %s249_s8, 15 }
   0xd   : > { %s342_s8 = smov (!%p111_p3, %s249_s8), 15 }
   0xe   : > { %s264_s9 = sshll.u32 %s342_s8, 4  ;;  %s253_s13 = sshll.u32 %s342_s8, 2 }
   0xf   : > { %s115_s12 = scalar_lea.vmem %s339_s0, %s264_s9  ;;  %s121_s16 = scalar_lea.vmem %s340_s1, %s253_s13 }
  0x10   : > { %v123_v0 = vld [vmem:[%s115_s12] sm:$0xff]  ;;  %v124_v1 = vld [vmem:[%s115_s12 + $0x10] sm:$0xff]  ;;  %v254_v2 = vld [vmem:[%s115_s12 + $0x8] sm:$0xff] }
  0x11   : > { %v255_v3 = vld [vmem:[%s115_s12 + $0x18] sm:$0xff]  ;;  %v140_v4 = vmax.bf16 %v254_v2, %v123_v0  ;;  %v125_v5 = vld [vmem:[%s115_s12 + $0x20] sm:$0xff]  ;;  %v126_v6 = vld [vmem:[%s115_s12 + $0x30] sm:$0xff] }
  0x12   : > { %v141_v7 = vmax.bf16 %v255_v3, %v124_v1  ;;  %v256_v8 = vld [vmem:[%s115_s12 + $0x28] sm:$0xff]  ;;  %v257_v9 = vld [vmem:[%s115_s12 + $0x38] sm:$0xff]  ;;  %v127_v10 = vld [vmem:[%s115_s12 + $0x40] sm:$0xff] }
  0x13   : > { %v156_v11 = vrot.slane %v140_v4, 4  ;;  %v142_v12 = vmax.bf16 %v256_v8, %v125_v5  ;;  %v143_v13 = vmax.bf16 %v257_v9, %v126_v6  ;;  %v128_v14 = vld [vmem:[%s115_s12 + $0x50] sm:$0xff]  ;;  %v258_v15 = vld [vmem:[%s115_s12 + $0x48] sm:$0xff]  ;;  %v259_v16 = vld [vmem:[%s115_s12 + $0x58] sm:$0xff] }
  0x14   : > { %v157_v17 = vrot.slane %v141_v7, 4  ;;  %v144_v18 = vmax.bf16 %v258_v15, %v127_v10  ;;  %v145_v19 = vmax.bf16 %v259_v16, %v128_v14  ;;  %v129_v20 = vld [vmem:[%s115_s12 + $0x60] sm:$0xff]  ;;  %v130_v21 = vld [vmem:[%s115_s12 + $0x70] sm:$0xff]  ;;  %v260_v22 = vld [vmem:[%s115_s12 + $0x68] sm:$0xff] }
  0x15   : > { %v172_v23 = vmax.bf16 %v156_v11, %v140_v4  ;;  %v158_v24 = vrot.slane %v142_v12, 4  ;;  %v159_v25 = vrot.slane %v143_v13, 4  ;;  %v261_v26 = vld [vmem:[%s115_s12 + $0x78] sm:$0xff]  ;;  %v146_v27 = vmax.bf16 %v260_v22, %v129_v20 }
  0x16   : > { %v173_v28 = vmax.bf16 %v157_v17, %v141_v7  ;;  %v160_v29 = vrot.slane %v144_v18, 4  ;;  %v161_v30 = vrot.slane %v145_v19, 4  ;;  %v147_v31 = vmax.bf16 %v261_v26, %v130_v21 }
  0x17   : > { %v174_v32 = vmax.bf16 %v158_v24, %v142_v12  ;;  %v175_v33 = vmax.bf16 %v159_v25, %v143_v13  ;;  %v162_v34 = vrot.slane %v146_v27, 4 }
  0x18   : > { %v285_v35 = vcombine.low %v172_v23, %v173_v28  ;;  %v176_v36 = vmax.bf16 %v160_v29, %v144_v18  ;;  %v177_v37 = vmax.bf16 %v161_v30, %v145_v19  ;;  %v163_v38 = vrot.slane %v147_v31, 4 }
  0x19   : > { %v286_v39 = vcombine.low %v174_v32, %v175_v33  ;;  %v178_v40 = vmax.bf16 %v162_v34, %v146_v27 }
  0x1a   : > { %269 = vst [vmem:[%s121_s16] sm:$0xff] %v285_v35   ;;  %v288_v41 = vcombine.low %v176_v36, %v177_v37  ;;  %v179_v42 = vmax.bf16 %v163_v38, %v147_v31 }
  0x1b   : > { %287 = vst [vmem:[%s121_s16 + $0x8] sm:$0xff] %v286_v39  }
  0x1c   : > { %289 = vst [vmem:[%s121_s16 + $0x10] sm:$0xff] %v288_v41   ;;  %v290_v43 = vcombine.low %v178_v40, %v179_v42 }
  0x1e   : > { %291 = vst [vmem:[%s121_s16 + $0x18] sm:$0xff] %v290_v43  }
  0x1f PF: > { %s11_s6 = sadd.s32 1, %s306_s6  }
  0x20   : > { %p8_p4 = scmp.ge.s32.totalorder %s11_s6, 4  }
  0x22   :  { %10 = sbr.rel (!%p8_p4) target bundleno = 1 (0x1), region = 55 }

// kernel: _lambda_.32
= control target key start
LH: loop header
LB: loop body
LE: loop exit
PB: predicated region body
PF: predicated region fallthrough
CT: control target
= control target key end

     0   :  { %s255_s6 = smov 0   ;;  %s272_s0 = inlined_call_operand.vmem [shape: bf16[8,2,4,256], index: 0, kind: input, shape index: {}]   ;;  %s273_s1 = inlined_call_operand.vmem [shape: bf16[8,4,128], index: 1, kind: output, shape index: {}]  }
   0x1 LB: > { %s212_s7 = sadd.s32 4294967295, %s243_s6   ;;  %p216_p0 = scmp.ge.s32.totalorder %s243_s6, 1  ;;  %s243_s6 = sphi %s255_s6, %s11_s6  }
   0x2   : > { %p89_p1 = scmp.lt.s32.totalorder %s243_s6, 3 }
   0x4   : > { %p90_p2 = pnand %p216_p0, %p89_p1 }
   0x5   : > { %s217_s8 = sshll.u32 (!%p90_p2), %s212_s7, 2 }
   0x6   : > { %93 = sbr.rel (%p90_p2) target bundleno = 26 (0x1a), region = 24  ;;  %p111_p3 = scmp.lt.s32.totalorder (!%p90_p2), %s217_s8, 7 }
   0xd   : > { %s275_s8 = smov (!%p111_p3, %s217_s8), 7 }
   0xe   : > { %s228_s9 = sshll.u32 %s275_s8, 3  ;;  %s221_s13 = sshll.u32 %s275_s8, 1 }
   0xf   : > { %s115_s12 = scalar_lea.vmem %s272_s0, %s228_s9  ;;  %s121_s16 = scalar_lea.vmem %s273_s1, %s221_s13 }
  0x10   : > { %v123_v0 = vld [vmem:[%s115_s12] sm:$0xf]  ;;  %v222_v1 = vld [vmem:[%s115_s12 + $0x4] sm:$0xf]  ;;  %v124_v2 = vld [vmem:[%s115_s12 + $0x8] sm:$0xf] }
  0x11   : > { %v132_v3 = vmax.bf16 %v222_v1, %v123_v0  ;;  %v223_v4 = vld [vmem:[%s115_s12 + $0xc] sm:$0xf]  ;;  %v125_v5 = vld [vmem:[%s115_s12 + $0x10] sm:$0xf]  ;;  %v224_v6 = vld [vmem:[%s115_s12 + $0x14] sm:$0xf] }
  0x12   : > { %v133_v7 = vmax.bf16 %v223_v4, %v124_v2  ;;  %v134_v8 = vmax.bf16 %v224_v6, %v125_v5  ;;  %v126_v9 = vld [vmem:[%s115_s12 + $0x18] sm:$0xf]  ;;  %v225_v10 = vld [vmem:[%s115_s12 + $0x1c] sm:$0xf] }
  0x13   : > { %v140_v11 = vrot.slane %v132_v3, 2  ;;  %v135_v12 = vmax.bf16 %v225_v10, %v126_v9 }
  0x14   : > { %v141_v13 = vrot.slane %v133_v7, 2  ;;  %v142_v14 = vrot.slane %v134_v8, 2 }
  0x15   : > { %v148_v15 = vmax.bf16 %v140_v11, %v132_v3  ;;  %v143_v16 = vrot.slane %v135_v12, 2 }
  0x16   : > { %v149_v17 = vmax.bf16 %v141_v13, %v133_v7  ;;  %v150_v18 = vmax.bf16 %v142_v14, %v134_v8 }
  0x17   : > { %152 = vst [vmem:[%s121_s16] sm:$0x3] %v148_v15  ;;  %v151_v19 = vmax.bf16 %v143_v16, %v135_v12 }
  0x18   : > { %153 = vst [vmem:[%s121_s16 + $0x2] sm:$0x3] %v149_v17  ;;  %154 = vst [vmem:[%s121_s16 + $0x4] sm:$0x3] %v150_v18 }
  0x19   : > { %155 = vst [vmem:[%s121_s16 + $0x6] sm:$0x3] %v151_v19 }
  0x1a PF: > { %s11_s6 = sadd.s32 1, %s243_s6  }
  0x1b   : > { %p8_p4 = scmp.ge.s32.totalorder %s11_s6, 4  }
  0x1d   :  { %10 = sbr.rel (!%p8_p4) target bundleno = 1 (0x1), region = 55 }

// kernel: _lambda_.35
= control target key start
LH: loop header
LB: loop body
LE: loop exit
PB: predicated region body
PF: predicated region fallthrough
CT: control target
= control target key end

     0   :  { %s223_s6 = smov 0   ;;  %s234_s0 = inlined_call_operand.vmem [shape: bf16[4,2,2,256], index: 0, kind: input, shape index: {}]   ;;  %s235_s1 = inlined_call_operand.vmem [shape: bf16[4,2,128], index: 1, kind: output, shape index: {}]  }
   0x1 LB: > { %s185_s7 = sadd.s32 4294967295, %s211_s6   ;;  %p189_p0 = scmp.ge.s32.totalorder %s211_s6, 1  ;;  %s211_s6 = sphi %s223_s6, %s11_s6  }
   0x2   : > { %p88_p1 = scmp.lt.s32.totalorder %s211_s6, 3 }
   0x4   : > { %p89_p2 = pnand %p189_p0, %p88_p1 }
   0x5   : > { %s190_s8 = sshll.u32 (!%p89_p2), %s185_s7, 1 }
   0x6   : > { %92 = sbr.rel (%p89_p2) target bundleno = 25 (0x19), region = 24  ;;  %p108_p3 = scmp.lt.s32.totalorder (!%p89_p2), %s190_s8, 3 }
   0xd   : > { %s237_s8 = smov (!%p108_p3, %s190_s8), 3 }
   0xe   : > { %s191_s9 = sshll.u32 %s237_s8, 2  ;;  %s116_s15 = scalar_lea.vmem %s235_s1, %s237_s8 }
   0xf   : > { %s111_s12 = scalar_lea.vmem %s234_s0, %s191_s9 }
  0x10   : > { %v118_v0 = vld [vmem:[%s111_s12] sm:$0x3]  ;;  %v193_v1 = vld [vmem:[%s111_s12 + $0x2] sm:$0x3]  ;;  %v119_v2 = vld [vmem:[%s111_s12 + $0x4] sm:$0x3] }
  0x11   : > { %v123_v3 = vmax.bf16 %v193_v1, %v118_v0  ;;  %v194_v4 = vld [vmem:[%s111_s12 + $0x6] sm:$0x3] }
  0x12   : > { %v124_v5 = vmax.bf16 %v194_v4, %v119_v2 }
  0x13   : > { %v127_v6 = vrot.slane %v123_v3, 1 }
  0x14   : > { %v128_v7 = vrot.slane %v124_v5, 1 }
  0x15   : > { %v131_v8 = vmax.bf16 %v127_v6, %v123_v3 }
  0x16   : > { %v132_v9 = vmax.bf16 %v128_v7, %v124_v5 }
  0x17   : > { %133 = vst [vmem:[%s116_s15] sm:$0x1] %v131_v8 }
  0x18   : > { %134 = vst [vmem:[%s116_s15 + $0x1] sm:$0x1] %v132_v9 }
  0x19 PF: > { %s11_s6 = sadd.s32 1, %s211_s6  }
  0x1a   : > { %p8_p4 = scmp.ge.s32.totalorder %s11_s6, 4  }
  0x1c   :  { %10 = sbr.rel (!%p8_p4) target bundleno = 1 (0x1), region = 55 }

// kernel: _lambda_.30
= control target key start
LH: loop header
LB: loop body
LE: loop exit
PB: predicated region body
PF: predicated region fallthrough
CT: control target
= control target key end

     0   :  { %s3193_s15 = smov 0   ;;  %s3195_s16 = smov 0   ;;  %s3784_s0 = inlined_call_operand.vmem [shape: bf16[2,10,10,128], index: 0, kind: input, shape index: {}]   ;;  %s3785_s1 = inlined_call_operand.vmem [shape: bf16[1152,128], index: 1, kind: input, shape index: {}]   ;;  %s3786_s2 = inlined_call_operand.vmem [shape: f32[1,128], index: 2, kind: input, shape index: {}]   ;;  %s3787_s3 = inlined_call_operand.vmem [shape: f32[1,128], index: 3, kind: input, shape index: {}]   ;;  %s3788_s4 = inlined_call_operand.vmem [shape: bf16[2,8,8,128], index: 4, kind: output, shape index: {}]  }
   0x1   :  { %s3197_s17 = smov 0  }
   0x2 LB: > { %s26_s18 = sadd.s32 1, %s3162_s16  ;;  %p2403_p0 = scmp.ge.s32.totalorder %s3166_s17, 1  ;;  %s3166_s17 = sphi %s3197_s17, %s14_s17   ;;  %s3162_s16 = sphi %s3195_s16, %s3794_s16   ;;  %s3158_s15 = sphi %s3193_s15, %s3793_s15  }
   0x3   : > { %p28_p1 = scmp.ge.s32.totalorder %s26_s18, 2  ;;  %p201_p2 = scmp.lt.s32.totalorder %s3166_s17, 3 }
   0x5   : > { %s3796_s18 = smov (%p28_p1, %s26_s18), 0  ;;  %p202_p3 = pnand %p2403_p0, %p201_p2 }
   0x6   : > { %v3060_v0 = vld [vmem:[%s3785_s1 + $0x40] sm:$0xff] (!%p202_p3)   ;;  %p240_p4 = scmp.lt.s32.totalorder (!%p202_p3), %s3158_s15, 1  ;;  %v3062_v2 = vld [vmem:[%s3785_s1 + $0x48] sm:$0xff] (!%p202_p3)   ;;  %v3064_v4 = vld [vmem:[%s3785_s1 + $0x50] sm:$0xff] (!%p202_p3)   ;;  %vm296_vm0 = vsmask.f32 (!%p202_p3), 3328 }
   0x7   : > { %205 = sbr.rel (%p202_p3) target bundleno = 399 (0x18f), region = 36  ;;  %v3061_v1 = vld [vmem:[%s3785_s1 + $0x100] sm:$0xff] (!%p202_p3)   ;;  %2739 = vmatprep.subr.bf16.mxu1 (!%p202_p3), %v3060_v0  ;;  %v3063_v3 = vld [vmem:[%s3785_s1 + $0x108] sm:$0xff] (!%p202_p3)   ;;  %v3065_v5 = vld [vmem:[%s3785_s1 + $0x110] sm:$0xff] (!%p202_p3)   ;;  %vm297_vm1 = vsmask.f32 (!%p202_p3), 7440 }
   0x8   : > { %2835 = vmatprep.subr.bf16.mxu0 (!%p202_p3), %v3061_v1  ;;  %2740 = vmatpush3.bf16.msra.mxu1 (!%p202_p3), %v3060_v0  ;;  %v3066_v6 = vld [vmem:[%s3785_s1 + $0x58] sm:$0xff] (!%p202_p3)   ;;  %v3068_v8 = vld [vmem:[%s3785_s1 + $0x60] sm:$0xff] (!%p202_p3)   ;;  %v3070_v10 = vld [vmem:[%s3785_s1 + $0x68] sm:$0xff] (!%p202_p3)   ;;  %vm717_vm3 = vcmask (!%p202_p3), 1042432   ;;  %vm718_vm4 = vcmask (!%p202_p3), 1046532  }
   0x9   : > { %2836 = vmatpush3.bf16.msra.mxu0 (!%p202_p3), %v3061_v1  ;;  %2741 = vmatprep.subr.bf16.mxu1 (!%p202_p3), %v3062_v2  ;;  %v3067_v7 = vld [vmem:[%s3785_s1 + $0x118] sm:$0xff] (!%p202_p3)   ;;  %v3069_v9 = vld [vmem:[%s3785_s1 + $0x120] sm:$0xff] (!%p202_p3)   ;;  %v3071_v14 = vld [vmem:[%s3785_s1 + $0x128] sm:$0xff] (!%p202_p3)  }
   0xa   : > { %2837 = vmatprep.subr.bf16.mxu0 (!%p202_p3), %v3063_v3  ;;  %v3072_v22 = vld [vmem:[%s3785_s1 + $0x70] sm:$0xff] (!%p202_p3)   ;;  %v3074_v37 = vld [vmem:[%s3785_s1 + $0x78] sm:$0xff] (!%p202_p3)   ;;  %vm3292_vm2 = vmor (!%p202_p3), %vm296_vm0, %vm297_vm1 }
   0xb   : > { %v3073_v23 = vld [vmem:[%s3785_s1 + $0x130] sm:$0xff] (!%p202_p3)   ;;  %v3075_v47 = vld [vmem:[%s3785_s1 + $0x138] sm:$0xff] (!%p202_p3)   ;;  %v3076_v63 = vld [vmem:[%s3785_s1] sm:$0xff] (!%p202_p3)  }
   0xc   : > { %2742 = vmatpush3.bf16.msra.mxu1 (!%p202_p3), %v3062_v2  ;;  %v3324_v1 = vld [vmem:[%s3785_s1 + $0x140] sm:$0xff] (!%p202_p3)   ;;  %vm3466_vm5 = vmor (!%p202_p3), %vm717_vm3, %vm718_vm4 }
   0xd   : > { %2838 = vmatpush3.bf16.msra.mxu0 (!%p202_p3), %v3063_v3  ;;  %2743 = vmatprep.subr.bf16.mxu1 (!%p202_p3), %v3064_v4  ;;  %v3140_v38 = vld [vmem:[%s3785_s1 + $0x220] sm:$0xff] (!%p202_p3)  }
   0xe   : > { %s3798_s15 = smov (!%p240_p4, %s3158_s15), 1  ;;  %2839 = vmatprep.subr.bf16.mxu0 %v3065_v5 }
   0xf   : > { %s3035_s9 = smul.u32 80, %s3798_s15  ;;  %s2607_s22 = sshll.u32 %s3798_s15, 5 }
  0x10   : > { %2744 = vmatpush3.bf16.msra.mxu1 %v3064_v4  ;;  %s262_s25 = scalar_lea.vmem %s3788_s4, %s2607_s22 }
  0x11   : > { %2840 = vmatpush3.bf16.msra.mxu0 %v3065_v5  ;;  %2745 = vmatprep.subr.bf16.mxu1 %v3066_v6  ;;  %s3247_s20 = scalar_lea.vmem %s3784_s0, %s3035_s9 }
  0x12   : > { %2841 = vmatprep.subr.bf16.mxu0 %v3067_v7  ;;  %v3253_v11 = vld [vmem:[%s3247_s20] sm:$0xf]  ;;  %v3256_v12 = vld [vmem:[%s3247_s20 + $0x8] sm:$0xf]  ;;  %v3259_v13 = vld [vmem:[%s3247_s20 + $0x4] sm:$0x1] }
  0x13   : > { %v3265_v15 = vld [vmem:[%s3247_s20 + $0xc] sm:$0x1]  ;;  %v300_v16 = vshrl.u32 %v3253_v11, 16  ;;  %v303_v17 = vshll.u32 %v3253_v11, 16  ;;  %v309_v18 = vshll.u32 %v3259_v13, 16  ;;  %v314_v19 = vshrl.u32 %v3256_v12, 16 }
  0x14   : > { %2746 = vmatpush3.bf16.msra.mxu1 %v3066_v6  ;;  %v317_v20 = vshll.u32 %v3256_v12, 16  ;;  %v323_v21 = vshll.u32 %v3265_v15, 16  ;;  %v2471_v30 = vld [vmem:[%s3247_s20 + $0x8] sm:$0xf]  ;;  %v3281_v31 = vld [vmem:[%s3247_s20 + $0xc] sm:$0x1] }
  0x15   : > { %2842 = vmatpush3.bf16.msra.mxu0 %v3067_v7  ;;  %2747 = vmatprep.subr.bf16.mxu1 %v3068_v8  ;;  %v302_v24 = vrot.slane %v300_v16, 4  ;;  %v305_v25 = vrot.slane %v303_v17, 5  ;;  %v311_v26 = vrot.slane %v309_v18, 5  ;;  %v316_v27 = vrot.slane %v314_v19, 4  ;;  %v2473_v33 = vld [vmem:[%s3247_s20 + $0x10] sm:$0xf] }
  0x16   : > { %2843 = vmatprep.subr.bf16.mxu0 %v3069_v9  ;;  %v319_v28 = vrot.slane %v317_v20, 5  ;;  %v325_v29 = vrot.slane %v323_v21, 5  ;;  %v3285_v34 = vld [vmem:[%s3247_s20 + $0x14] sm:$0x1]  ;;  %v1092_v35 = vshrl.u32 %v2471_v30, 16  ;;  %v1095_v36 = vshll.u32 %v2471_v30, 16 }
  0x17   : > { %v306_v32 = vor.u32 %v305_v25, %v302_v24  ;;  %v1101_v40 = vshll.u32 %v3281_v31, 16  ;;  %v1106_v41 = vshrl.u32 %v2473_v33, 16  ;;  %v1109_v42 = vshll.u32 %v2473_v33, 16  ;;  %v3302_v51 = vld [vmem:[%s3247_s20 + $0x10] sm:$0xf] }
  0x18   : > { %2748 = vmatpush3.bf16.msra.mxu1 %v3068_v8  ;;  %v320_v39 = vor.u32 %v319_v28, %v316_v27  ;;  %v1094_v44 = vrot.slane %v1092_v35, 4  ;;  %v1097_v45 = vrot.slane %v1095_v36, 5  ;;  %v1115_v46 = vshll.u32 %v3285_v34, 16  ;;  %v3307_v55 = vld [vmem:[%s3247_s20 + $0x18] sm:$0xf] }
  0x19   : > { %2844 = vmatpush3.bf16.msra.mxu0 %v3069_v9  ;;  %2749 = vmatprep.subr.bf16.mxu1 %v3070_v10  ;;  %v307_v43 = vrot.slane %v306_v32, 4  ;;  %v1108_v49 = vrot.slane %v1106_v41, 4  ;;  %v1111_v50 = vrot.slane %v1109_v42, 5  ;;  %v1103_v54 = vrot.slane %v1101_v40, 5  ;;  %v3310_v56 = vld [vmem:[%s3247_s20 + $0x14] sm:$0x1] }
  0x1a   : > { %2845 = vmatprep.subr.bf16.mxu0 %v3071_v14  ;;  %v321_v48 = vrot.slane %v320_v39, 4  ;;  %v1098_v53 = vor.u32 %v1097_v45, %v1094_v44  ;;  %v1117_v59 = vrot.slane %v1115_v46, 5  ;;  %v3315_v60 = vld [vmem:[%s3247_s20 + $0x1c] sm:$0x1]  ;;  %v328_v61 = vshrl.u32 %v3302_v51, 16 }
  0x1b   : > { %v312_v52 = vsel %vm3292_vm2, %v307_v43, %v311_v26  ;;  %v1112_v58 = vor.u32 %v1111_v50, %v1108_v49  ;;  %v331_v2 = vshll.u32 %v3302_v51, 16  ;;  %v337_v3 = vshll.u32 %v3310_v56, 16  ;;  %v2475_v8 = vld [vmem:[%s3247_s20 + $0x18] sm:$0xf]  ;;  %v3335_v16 = vld [vmem:[%s3247_s20 + $0x1c] sm:$0x1] }
  0x1c   : > { %2750 = vmatpush3.bf16.msra.mxu1 %v3070_v10  ;;  %v326_v57 = vsel %vm3292_vm2, %v321_v48, %v325_v29  ;;  %v1099_v0 = vrot.slane %v1098_v53, 4  ;;  %v330_v5 = vrot.slane %v328_v61, 4  ;;  %v342_v6 = vshrl.u32 %v3307_v55, 16  ;;  %v2477_v17 = vld [vmem:[%s3247_s20 + $0x20] sm:$0xf]  ;;  %v3078_v43 = vld [vmem:[%s3785_s1 + $0x8] sm:$0xff]  }
  0x1d   : > { %2846 = vmatpush3.bf16.msra.mxu0 %v3071_v14  ;;  %2751 = vmatprep.subr.bf16.mxu1 %v3072_v22  ;;  %v2407_v62 = vcombine.low %v312_v52, %v326_v57  ;;  %v1113_v4 = vrot.slane %v1112_v58, 4  ;;  %v345_v7 = vshll.u32 %v3307_v55, 16  ;;  %v333_v10 = vrot.slane %v331_v2, 5  ;;  %v3341_v21 = vld [vmem:[%s3247_s20 + $0x24] sm:$0x1] }
  0x1e   : > { %2847 = vmatprep.subr.bf16.mxu0 %v3073_v23  ;;  %v1104_v9 = vsel %vm3292_vm2, %v1099_v0, %v1103_v54  ;;  %v351_v14 = vshll.u32 %v3315_v60, 16  ;;  %v344_v19 = vrot.slane %v342_v6, 4  ;;  %v339_v24 = vrot.slane %v337_v3, 5  ;;  %v3079_v54 = vld [vmem:[%s3785_s1 + $0x148] sm:$0xff]   ;;  %v3371_v0 = vld [vmem:[%s3247_s20 + $0x24] sm:$0x1] }
  0x1f   : > { %2755 = vmatprep.mubr.bf16.mxu1 %v2407_v62  ;;  %v1118_v18 = vsel %vm3292_vm2, %v1113_v4, %v1117_v59  ;;  %v347_v20 = vrot.slane %v345_v7, 5  ;;  %v1120_v27 = vshrl.u32 %v2475_v8, 16  ;;  %v1123_v28 = vshll.u32 %v2475_v8, 16  ;;  %v3080_v59 = vld [vmem:[%s3785_s1 + $0x10] sm:$0xff]   ;;  %v3365_v62 = vld [vmem:[%s3247_s20 + $0x20] sm:$0xf] }
  0x20   : > { %2752 = vmatpush3.bf16.msra.mxu1 %v3072_v22  ;;  %v2487_v22 = vcombine.low %v1104_v9, %v1118_v18  ;;  %v353_v25 = vrot.slane %v351_v14, 5  ;;  %v1129_v29 = vshll.u32 %v3335_v16, 16  ;;  %v1134_v32 = vshrl.u32 %v2477_v17, 16  ;;  %v3374_v2 = vld [vmem:[%s3247_s20 + $0x2c] sm:$0x1]  ;;  %v3081_v9 = vld [vmem:[%s3785_s1 + $0x150] sm:$0xff]  }
  0x21   : > { %2848 = vmatpush3.bf16.msra.mxu0 %v3073_v23  ;;  %2753 = vmatprep.subr.bf16.mxu1 %v3074_v37  ;;  %v334_v23 = vor.u32 %v333_v10, %v330_v5  ;;  %v348_v26 = vor.u32 %v347_v20, %v344_v19  ;;  %v1137_v33 = vshll.u32 %v2477_v17, 16  ;;  %v1143_v35 = vshll.u32 %v3341_v21, 16  ;;  %v3082_v10 = vld [vmem:[%s3785_s1 + $0x18] sm:$0xff]  }
  0x22   : > { %2849 = vmatprep.subr.bf16.mxu0 %v3075_v47  ;;  %2851 = vmatprep.mubr.bf16.mxu0 %v2487_v22  ;;  %v1125_v39 = vrot.slane %v1123_v28, 5  ;;  %v1136_v41 = vrot.slane %v1134_v32, 4  ;;  %v1131_v46 = vrot.slane %v1129_v29, 5  ;;  %v1382_v57 = vrot.slane %v3281_v31, 5  ;;  %v3083_v29 = vld [vmem:[%s3785_s1 + $0x158] sm:$0xff]  }
  0x23   : > { %v335_v30 = vrot.slane %v334_v23, 4  ;;  %v349_v36 = vrot.slane %v348_v26, 4  ;;  %v1139_v42 = vrot.slane %v1137_v33, 5  ;;  %v356_v3 = vshrl.u32 %v3365_v62, 16  ;;  %v2479_v23 = vld [vmem:[%s3247_s20 + $0x28] sm:$0xf] }
  0x24   : > { %2754 = vmatpush3.bf16.msra.mxu1 %v3074_v37  ;;  %v1122_v37 = vrot.slane %v1120_v27, 4  ;;  %v359_v4 = vshll.u32 %v3365_v62, 16  ;;  %v365_v5 = vshll.u32 %v3371_v0, 16  ;;  %v379_v8 = vshll.u32 %v3374_v2, 16  ;;  %v3395_v26 = vld [vmem:[%s3247_s20 + $0x34] sm:$0x1] }
  0x25   : > { %2850 = vmatpush3.bf16.msra.mxu0 %v3075_v47  ;;  %2763 = vmatprep.subr.bf16.mxu1 %v3076_v63  ;;  %v340_v40 = vsel %vm3292_vm2, %v335_v30, %v339_v24  ;;  %v354_v44 = vsel %vm3292_vm2, %v349_v36, %v353_v25  ;;  %v1145_v47 = vrot.slane %v1143_v35, 5  ;;  %v1140_v49 = vor.u32 %v1139_v42, %v1136_v41  ;;  %v3391_v24 = vld [vmem:[%s3247_s20 + $0x2c] sm:$0x1]  ;;  %v2481_v25 = vld [vmem:[%s3247_s20 + $0x30] sm:$0xf]  ;;  %v3084_v30 = vld [vmem:[%s3785_s1 + $0x20] sm:$0xff]  }
  0x26   : > { %2859 = vmatprep.subr.bf16.mxu0 %v3324_v1  ;;  %v1126_v45 = vor.u32 %v1125_v39, %v1122_v37  ;;  %v2408_v48 = vcombine.low %v340_v40, %v354_v44  ;;  %v358_v14 = vrot.slane %v356_v3, 4  ;;  %v361_v17 = vrot.slane %v359_v4, 5 }
  0x27   : > { %v1141_v52 = vrot.slane %v1140_v49, 4  ;;  %v367_v18 = vrot.slane %v365_v5, 5  ;;  %v381_v22 = vrot.slane %v379_v8, 5  ;;  %v1148_v27 = vshrl.u32 %v2479_v23, 16  ;;  %v2483_v5 = vld [vmem:[%s3247_s20 + $0x38] sm:$0xf] }
  0x28   : > { %v1127_v50 = vrot.slane %v1126_v45, 4  ;;  %2756 = vmatmul.mubr.bf16.vlgmr.msra.gmra.mrb[0].mxu1 %v2408_v48  ;;  %v1151_v28 = vshll.u32 %v2479_v23, 16  ;;  %v1157_v33 = vshll.u32 %v3391_v24, 16  ;;  %v1162_v35 = vshrl.u32 %v2481_v25, 16 }
  0x29   : > { %2764 = vmatpush3.bf16.msra.mxu1 %v3076_v63  ;;  %v1146_v58 = vsel %vm3292_vm2, %v1141_v52, %v1145_v47  ;;  %v3368_v63 = vld [vmem:[%s3247_s20 + $0x28] sm:$0xf]  ;;  %v1165_v36 = vshll.u32 %v2481_v25, 16  ;;  %v1150_v39 = vrot.slane %v1148_v27, 4  ;;  %v1171_v41 = vshll.u32 %v3395_v26, 16 }
  0x2a   : > { %v1132_v53 = vsel %vm3292_vm2, %v1127_v50, %v1131_v46  ;;  %2765 = vmatprep.subr.bf16.mxu1 %v3078_v43  ;;  %v370_v6 = vshrl.u32 %v3368_v63, 16  ;;  %v373_v7 = vshll.u32 %v3368_v63, 16  ;;  %v1153_v40 = vrot.slane %v1151_v28, 5  ;;  %v3406_v46 = vld [vmem:[%s3247_s20 + $0x30] sm:$0xf] }
  0x2b   : > { %v2488_v61 = vcombine.low %v1132_v53, %v1146_v58  ;;  %v1164_v44 = vrot.slane %v1162_v35, 4  ;;  %v1167_v45 = vrot.slane %v1165_v36, 5  ;;  %v1173_v49 = vrot.slane %v1171_v41, 5  ;;  %v3411_v50 = vld [vmem:[%s3247_s20 + $0x38] sm:$0xf] }
  0x2c   : > { %v372_v19 = vrot.slane %v370_v6, 4  ;;  %v375_v20 = vrot.slane %v373_v7, 5  ;;  %v1154_v48 = vor.u32 %v1153_v40, %v1150_v39  ;;  %v3414_v52 = vld [vmem:[%s3247_s20 + $0x34] sm:$0x1]  ;;  %v384_v53 = vshrl.u32 %v3406_v46, 16  ;;  %v3086_v6 = vld [vmem:[%s3785_s1 + $0x28] sm:$0xff]  }
  0x2d   : > { %2852 = vmatmul.mubr.bf16.vlgmr.msra.gmra.mrb[0].mxu0 %v2488_v61  ;;  %2766 = vmatpush3.bf16.msra.mxu1 %v3078_v43  ;;  %v1159_v43 = vrot.slane %v1157_v33, 5  ;;  %v3423_v61 = vld [vmem:[%s3247_s20 + $0x3c] sm:$0x1]  ;;  %v387_v3 = vshll.u32 %v3406_v46, 16  ;;  %v393_v4 = vshll.u32 %v3414_v52, 16  ;;  %v1176_v28 = vshrl.u32 %v2483_v5, 16 }
  0x2e   : > { %2860 = vmatpush3.bf16.msra.mxu0 %v3324_v1  ;;  %2767 = vmatprep.subr.bf16.mxu1 %v3080_v59  ;;  %v362_v1 = vor.u32 %v361_v17, %v358_v14  ;;  %v376_v32 = vor.u32 %v375_v20, %v372_v19  ;;  %v1155_v8 = vrot.slane %v1154_v48, 4  ;;  %v398_v14 = vshrl.u32 %v3411_v50, 16  ;;  %v3433_v17 = vld [vmem:[%s3247_s20 + $0x3c] sm:$0x1]  ;;  %v3441_v27 = vld [vmem:[%s3247_s20 + $0x44] sm:$0x1] }
  0x2f   : > { %2861 = vmatprep.subr.bf16.mxu0 %v3079_v54  ;;  %v389_v19 = vrot.slane %v387_v3, 5  ;;  %v395_v20 = vrot.slane %v393_v4, 5  ;;  %v407_v25 = vshll.u32 %v3423_v61, 16  ;;  %v1179_v36 = vshll.u32 %v2483_v5, 16 }
  0x30   : > { %v363_v37 = vrot.slane %v362_v1, 4  ;;  %v377_v42 = vrot.slane %v376_v32, 4  ;;  %v1160_v23 = vsel %vm3292_vm2, %v1155_v8, %v1159_v43  ;;  %v400_v1 = vrot.slane %v398_v14, 4 }
  0x31   : > { %2768 = vmatpush3.bf16.msra.mxu1 %v3080_v59  ;;  %v1168_v59 = vor.u32 %v1167_v45, %v1164_v44  ;;  %v409_v40 = vrot.slane %v407_v25, 5  ;;  %v1178_v41 = vrot.slane %v1176_v28, 4  ;;  %v1181_v45 = vrot.slane %v1179_v36, 5  ;;  %v2501_v25 = vld [vmem:[%s3247_s20 + $0x18] sm:$0xe] }
  0x32   : > { %2862 = vmatpush3.bf16.msra.mxu0 %v3079_v54  ;;  %2769 = vmatprep.subr.bf16.mxu1 %v3082_v10  ;;  %v368_v47 = vsel %vm3292_vm2, %v363_v37, %v367_v18  ;;  %v3085_v54 = vld [vmem:[%s3785_s1 + $0x160] sm:$0xff]   ;;  %v382_v58 = vsel %vm3292_vm2, %v377_v42, %v381_v22  ;;  %v401_v22 = vshll.u32 %v3411_v50, 16  ;;  %v3088_v37 = vld [vmem:[%s3785_s1 + $0x30] sm:$0xff]   ;;  %v1185_v42 = vshll.u32 %v3433_v17, 16  ;;  %v3091_v28 = vld [vmem:[%s3785_s1 + $0x178] sm:$0xff]  }
  0x33   : > { %2863 = vmatprep.subr.bf16.mxu0 %v3081_v9  ;;  %v2409_v7 = vcombine.low %v368_v47, %v382_v58  ;;  %v1169_v18 = vrot.slane %v1168_v59, 4  ;;  %v1386_v47 = vrot.slane %v3285_v34, 5  ;;  %v1390_v48 = vrot.slane %v3335_v16, 5  ;;  %v3089_v58 = vld [vmem:[%s3785_s1 + $0x170] sm:$0xff]  }
  0x34   : > { %v403_v35 = vrot.slane %v401_v22, 5  ;;  %v1182_v4 = vor.u32 %v1181_v45, %v1178_v41  ;;  %v1187_v34 = vrot.slane %v1185_v42, 5  ;;  %v1394_v22 = vrot.slane %v3341_v21, 5  ;;  %v3094_v41 = vld [vmem:[%s3785_s1 + $0x180] sm:$0xff]  }
  0x35   : > { %2770 = vmatpush3.bf16.msra.mxu1 %v3082_v10  ;;  %v386_v10 = vrot.slane %v384_v53, 4  ;;  %2759 = vmatprep.mubr.bf16.mxu1 %v2409_v7  ;;  %v1174_v32 = vsel %vm3292_vm2, %v1169_v18, %v1173_v49  ;;  %v1199_v53 = vshll.u32 %v3441_v27, 16  ;;  %v2499_v7 = vld [vmem:[%s3247_s20 + $0x8] sm:$0xe]  ;;  %v2509_v36 = vrot.slane %v2501_v25, 9 }
  0x36   : > { %2864 = vmatpush3.bf16.msra.mxu0 %v3081_v9  ;;  %2771 = vmatprep.subr.bf16.mxu1 %v3084_v30  ;;  %v2485_v9 = vld [vmem:[%s3247_s20 + $0x40] sm:$0xf]  ;;  %v2489_v39 = vcombine.low %v1160_v23, %v1174_v32  ;;  %v404_v44 = vor.u32 %v403_v35, %v400_v1  ;;  %v2507_v14 = vrot.slane %v2499_v7, 9  ;;  %v1183_v18 = vrot.slane %v1182_v4, 4 }
  0x37   : > { %2865 = vmatprep.subr.bf16.mxu0 %v3083_v29  ;;  %v390_v33 = vor.u32 %v389_v19, %v386_v10  ;;  %v1193_v49 = vshll.u32 %v2485_v9, 16  ;;  %v2500_v10 = vld [vmem:[%s3247_s20 + $0x10] sm:$0xe]  ;;  %v2419_v19 = vcombine.low %v3253_v11, %v3256_v12  ;;  %v1201_v1 = vrot.slane %v1199_v53, 5  ;;  %v2502_v12 = vld [vmem:[%s3247_s20 + $0x20] sm:$0xe] }
  0x38   : > { %2855 = vmatprep.mubr.bf16.mxu0 %v2489_v39  ;;  %v405_v3 = vrot.slane %v404_v44, 4  ;;  %v1383_v32 = vsel %vm3466_vm5, %v2507_v14, %v1382_v57  ;;  %v1188_v21 = vsel %vm3292_vm2, %v1183_v18, %v1187_v34  ;;  %v3093_v35 = vld [vmem:[%s3785_s1 + $0x80] sm:$0xff]   ;;  %v1391_v42 = vsel %vm3466_vm5, %v2509_v36, %v1390_v48  ;;  %v3098_v44 = vld [vmem:[%s3785_s1 + $0x90] sm:$0xff]  }
  0x39   : > { %2772 = vmatpush3.bf16.msra.mxu1 %v3084_v30  ;;  %v3087_v30 = vld [vmem:[%s3785_s1 + $0x168] sm:$0xff]   ;;  %v391_v43 = vrot.slane %v390_v33, 4  ;;  %v1195_v16 = vrot.slane %v1193_v49, 5  ;;  %v1398_v45 = vrot.slane %v3391_v24, 5  ;;  %v1406_v53 = vrot.slane %v3433_v17, 5  ;;  %v3102_v18 = vld [vmem:[%s3785_s1 + $0xa0] sm:$0xff]  }
  0x3a   : > { %2866 = vmatpush3.bf16.msra.mxu0 %v3083_v29  ;;  %2773 = vmatprep.subr.bf16.mxu1 %v3086_v6  ;;  %v1190_v29 = vshrl.u32 %v2485_v9, 16  ;;  %v1410_v24 = vrot.slane %v3441_v27, 5  ;;  %v726_v34 = vrot.slane %v3265_v15, 5  ;;  %v730_v17 = vrot.slane %v3310_v56, 5  ;;  %v694_v15 = vld [vmem:[%s3247_s20 + $0x8] sm:$0xe] }
  0x3b   : > { %2867 = vmatprep.subr.bf16.mxu0 %v3085_v54  ;;  %v396_v59 = vsel %vm3292_vm2, %v391_v43, %v395_v20  ;;  %v2508_v20 = vrot.slane %v2500_v10, 9  ;;  %v3096_v43 = vld [vmem:[%s3785_s1 + $0x88] sm:$0xff]   ;;  %v3099_v10 = vld [vmem:[%s3785_s1 + $0x190] sm:$0xff]   ;;  %v2432_v14 = vrot.slane %v694_v15, 9  ;;  %v738_v36 = vrot.slane %v3371_v0, 5  ;;  %v3112_v0 = vld [vmem:[%s3785_s1 + $0xc0] sm:$0xff]  }
  0x3c   : > { %v1192_v5 = vrot.slane %v1190_v29, 4  ;;  %v1402_v29 = vrot.slane %v3395_v26, 5  ;;  %v2422_v26 = vcombine.low %v3406_v46, %v3411_v50  ;;  %v3100_v46 = vld [vmem:[%s3785_s1 + $0x98] sm:$0xff]   ;;  %v3117_v15 = vld [vmem:[%s3785_s1 + $0x1c8] sm:$0xff]  }
  0x3d   : > { %2774 = vmatpush3.bf16.msra.mxu1 %v3086_v6  ;;  %v3090_v6 = vld [vmem:[%s3785_s1 + $0x38] sm:$0xff]   ;;  %v1387_v11 = vsel %vm3466_vm5, %v2508_v20, %v1386_v47 }
  0x3e   : > { %2868 = vmatpush3.bf16.msra.mxu0 %v3085_v54  ;;  %2775 = vmatprep.subr.bf16.mxu1 %v3088_v37  ;;  %v410_v54 = vsel %vm3292_vm2, %v405_v3, %v409_v40  ;;  %v1196_v23 = vor.u32 %v1195_v16, %v1192_v5  ;;  %v2515_v57 = vcombine.low %v1383_v32, %v1387_v11  ;;  %v693_v16 = vld [vmem:[%s3247_s20] sm:$0xe]  ;;  %v3101_v20 = vld [vmem:[%s3785_s1 + $0x198] sm:$0xff]  }
  0x3f   : > { %2869 = vmatprep.subr.bf16.mxu0 %v3087_v30  ;;  %v2410_v9 = vcombine.low %v396_v59, %v410_v54  ;;  %v2420_v40 = vcombine.low %v3302_v51, %v3307_v55  ;;  %v2421_v51 = vcombine.low %v3365_v62, %v3368_v63  ;;  %v722_v55 = vrot.slane %v3259_v13, 5  ;;  %v3097_v62 = vld [vmem:[%s3785_s1 + $0x188] sm:$0xff]   ;;  %v2504_v63 = vld [vmem:[%s3247_s20 + $0x30] sm:$0xe]  ;;  %v2506_v59 = vld [vmem:[%s3247_s20 + $0x40] sm:$0xe] }
  0x40   : > { %v1197_v33 = vrot.slane %v1196_v23, 4  ;;  %v2503_v13 = vld [vmem:[%s3247_s20 + $0x28] sm:$0xe]  ;;  %v2512_v49 = vrot.slane %v2504_v63, 9  ;;  %v2514_v7 = vrot.slane %v2506_v59, 9  ;;  %v2431_v56 = vrot.slane %v693_v16, 9 }
  0x41   : > { %2776 = vmatpush3.bf16.msra.mxu1 %v3088_v37  ;;  %v2510_v37 = vrot.slane %v2502_v12, 9  ;;  %v2511_v48 = vrot.slane %v2503_v13, 9  ;;  %v734_v54 = vrot.slane %v3315_v60, 5  ;;  %v695_v23 = vld [vmem:[%s3247_s20 + $0x10] sm:$0xe] }
  0x42   : > { %2870 = vmatpush3.bf16.msra.mxu0 %v3087_v30  ;;  %2760 = vmatmul.mubr.bf16.gmra.mrb[4].mxu1 %v2410_v9  ;;  %v1202_v31 = vsel %vm3292_vm2, %v1197_v33, %v1201_v1  ;;  %v1403_v4 = vsel %vm3466_vm5, %v2512_v49, %v1402_v29  ;;  %v727_v9 = vsel %vm3466_vm5, %v2432_v14, %v726_v34  ;;  %v696_v60 = vld [vmem:[%s3247_s20 + $0x18] sm:$0xe]  ;;  %v2433_v25 = vrot.slane %v695_v23, 9  ;;  %v3104_v33 = vld [vmem:[%s3785_s1 + $0xa8] sm:$0xff]  }
  0x43   : > { %2871 = vmatprep.subr.bf16.mxu0 %v3089_v58  ;;  %2777 = vmatprep.subr.bf16.mxu1 %v3090_v6  ;;  %v2490_v39 = vcombine.low %v1188_v21, %v1202_v31  ;;  %v1395_v30 = vsel %vm3466_vm5, %v2510_v37, %v1394_v22  ;;  %v1399_v3 = vsel %vm3466_vm5, %v2511_v48, %v1398_v45  ;;  %v3113_v32 = vld [vmem:[%s3247_s20 + $0x10] ss:$8 sps:$4 sm:$0xff]   ;;  %v746_v29 = vrot.slane %v3414_v52, 5  ;;  %v3116_v49 = vld [vmem:[%s3785_s1 + $0xc8] sm:$0xff]  }
  0x44   : > { %2779 = vmatprep.mubr.bf16.mxu1 %v2419_v19  ;;  %v2516_v47 = vcombine.low %v1391_v42, %v1395_v30  ;;  %v2517_v27 = vcombine.low %v1399_v3, %v1403_v4  ;;  %v723_v19 = vsel %vm3466_vm5, %v2431_v56, %v722_v55  ;;  %v731_v11 = vsel %vm3466_vm5, %v2433_v25, %v730_v17  ;;  %v3107_v31 = vld [vmem:[%s3785_s1 + $0xb0] sm:$0xff]   ;;  %v3110_v37 = vld [vmem:[%s3785_s1 + $0xb8] sm:$0xff]   ;;  %v2553_v25 = vld [vmem:[%s3247_s20 + $0x28] sm:$0xf] }
  0x45   : > { %2778 = vmatpush3.bf16.msra.mxu1 %v3090_v6  ;;  %2856 = vmatmul.mubr.bf16.gmra.mrb[4].mxu0 %v2490_v39  ;;  %v1411_v6 = vsel %vm3466_vm5, %v2514_v7, %v1410_v24  ;;  %v2439_v1 = vcombine.low %v723_v19, %v727_v9  ;;  %v697_v39 = vld [vmem:[%s3247_s20 + $0x20] sm:$0xe]  ;;  %v3111_v45 = vld [vmem:[%s3785_s1 + $0x1b8] sm:$0xff]   ;;  %v3605_v24 = vld [vmem:[%s3247_s20 + $0x14] sm:$0x1] }
  0x46   : > { %2872 = vmatpush3.bf16.msra.mxu0 %v3089_v58  ;;  %2787 = vmatprep.subr.bf16.mxu1 %v3093_v35  ;;  %v2505_v58 = vld [vmem:[%s3247_s20 + $0x38] sm:$0xe]  ;;  %v2435_v42 = vrot.slane %v697_v39, 9  ;;  %v1761_v59 = vshll.u32 %v3605_v24, 16  ;;  %v3115_v7 = vld [vmem:[%s3247_s20 + $0x20] ss:$8 sps:$4 sm:$0xff]  }
  0x47   : > { %2873 = vmatprep.subr.bf16.mxu0 %v3091_v28  ;;  %2875 = vmatprep.mubr.bf16.mxu0 %v2515_v57  ;;  %v2513_v5 = vrot.slane %v2505_v58, 9  ;;  %v3105_v57 = vld [vmem:[%s3785_s1 + $0x1a8] sm:$0xff]   ;;  %v2549_v52 = vld [vmem:[%s3247_s20 + $0x18] sm:$0xf]  ;;  %v3119_v9 = vld [vmem:[%s3785_s1 + $0x1d0] sm:$0xff]  }
  0x48   : > { %v1766_v3 = vshrl.u32 %v2549_v52, 16  ;;  %v1769_v4 = vshll.u32 %v2549_v52, 16  ;;  %v3126_v56 = vld [vmem:[%s3247_s20 + $0x30] ss:$8 sps:$4 sm:$0xff]   ;;  %v3125_v52 = vld [vmem:[%s3785_s1 + $0x1e8] sm:$0xff]  }
  0x49   : > { %v1407_v50 = vsel %vm3466_vm5, %v2513_v5, %v1406_v53  ;;  %v2547_v53 = vld [vmem:[%s3247_s20 + $0x10] sm:$0xf]  ;;  %v3120_v23 = vld [vmem:[%s3785_s1 + $0xd8] sm:$0xff]  }
  0x4a   : > { %2874 = vmatpush3.bf16.msra.mxu0 %v3091_v28  ;;  %2780 = vmatmul.mubr.bf16.vlgmr.msra.gmra.mrb[0].mxu1 %v2420_v40  ;;  %v2518_v22 = vcombine.low %v1407_v50, %v1411_v6  ;;  %v2434_v28 = vrot.slane %v696_v60, 9  ;;  %v698_v40 = vld [vmem:[%s3247_s20 + $0x28] sm:$0xe]  ;;  %v1755_v58 = vshll.u32 %v2547_v53, 16  ;;  %v1768_v50 = vrot.slane %v1766_v3, 4 }
  0x4b   : > { %2883 = vmatprep.subr.bf16.mxu0 %v3094_v41  ;;  %2788 = vmatpush3.bf16.msra.mxu1 %v3093_v35  ;;  %v3103_v35 = vld [vmem:[%s3785_s1 + $0x1a0] sm:$0xff]   ;;  %v2436_v30 = vrot.slane %v698_v40, 9  ;;  %v1771_v6 = vrot.slane %v1769_v4, 5 }
  0x4c   : > { %2789 = vmatprep.subr.bf16.mxu1 %v3096_v43  ;;  %2783 = vmatprep.mubr.bf16.mxu1 %v2421_v51  ;;  %v735_v12 = vsel %vm3466_vm5, %v2434_v28, %v734_v54  ;;  %v699_v51 = vld [vmem:[%s3247_s20 + $0x30] sm:$0xe]  ;;  %v1757_v16 = vrot.slane %v1755_v58, 5  ;;  %v1763_v54 = vrot.slane %v1761_v59, 5 }
  0x4d   : > { %2876 = vmatmul.mubr.bf16.vlgmr.msra.gmra.mrb[0].mxu0 %v2516_v47  ;;  %v2440_v21 = vcombine.low %v731_v11, %v735_v12  ;;  %v750_v47 = vrot.slane %v3423_v61, 5  ;;  %v2437_v63 = vrot.slane %v699_v51, 9  ;;  %v3609_v61 = vld [vmem:[%s3247_s20 + $0x1c] sm:$0x1]  ;;  %v3128_v11 = vld [vmem:[%s3247_s20 + $0x40] ss:$8 sps:$4 sm:$0xff]  }
  0x4e   : > { %2884 = vmatpush3.bf16.msra.mxu0 %v3094_v41  ;;  %2879 = vmatprep.mubr.bf16.mxu0 %v2517_v27  ;;  %v742_v41 = vrot.slane %v3374_v2, 5  ;;  %v739_v2 = vsel %vm3466_vm5, %v2435_v42, %v738_v36  ;;  %v1775_v5 = vshll.u32 %v3609_v61, 16  ;;  %v2555_v12 = vld [vmem:[%s3247_s20 + $0x30] sm:$0xf]  ;;  %v1797_v36 = vshll.u32 %v2553_v25, 16 }
  0x4f   : > { %2790 = vmatpush3.bf16.msra.mxu1 %v3096_v43  ;;  %2885 = vmatprep.subr.bf16.mxu0 %v3097_v62  ;;  %v3108_v43 = vld [vmem:[%s3785_s1 + $0x1b0] sm:$0xff]   ;;  %v747_v34 = vsel %vm3466_vm5, %v2437_v63, %v746_v29  ;;  %v1808_v40 = vshrl.u32 %v2555_v12, 16  ;;  %v3654_v51 = vld [vmem:[%s3247_s20 + $0x24] sm:$0x1] }
  0x50   : > { %2791 = vmatprep.subr.bf16.mxu1 %v3098_v44  ;;  %v743_v55 = vsel %vm3466_vm5, %v2436_v30, %v742_v41  ;;  %v1777_v19 = vrot.slane %v1775_v5, 5  ;;  %v1811_v41 = vshll.u32 %v2555_v12, 16  ;;  %v1799_v29 = vrot.slane %v1797_v36, 5  ;;  %v2561_v5 = vld [vmem:[%s3247_s20 + $0x48] sm:$0xf]  ;;  %v3131_v12 = vld [vmem:[%s3785_s1 + $0x1f8] sm:$0xff]  }
  0x51   : > { %v2441_v13 = vcombine.low %v739_v2, %v743_v55  ;;  %v3657_v2 = vld [vmem:[%s3247_s20 + $0x2c] sm:$0x1]  ;;  %v1789_v58 = vshll.u32 %v3654_v51, 16 }
  0x52   : > { %2784 = vmatmul.mubr.bf16.gmra.mrb[4].mxu1 %v2422_v26  ;;  %2886 = vmatpush3.bf16.msra.mxu0 %v3097_v62  ;;  %v3114_v62 = vld [vmem:[%s3785_s1 + $0x1c0] sm:$0xff]   ;;  %v1752_v26 = vshrl.u32 %v2547_v53, 16  ;;  %v1813_v63 = vrot.slane %v1811_v41, 5  ;;  %v1803_v59 = vshll.u32 %v3657_v2, 16 }
  0x53   : > { %2792 = vmatpush3.bf16.msra.mxu1 %v3098_v44  ;;  %2887 = vmatprep.subr.bf16.mxu0 %v3099_v10  ;;  %v700_v44 = vld [vmem:[%s3247_s20 + $0x38] sm:$0xe]  ;;  %v2559_v53 = vld [vmem:[%s3247_s20 + $0x40] sm:$0xf] }
  0x54   : > { %2793 = vmatprep.subr.bf16.mxu1 %v3100_v46  ;;  %2803 = vmatprep.mubr.bf16.mxu1 %v2439_v1  ;;  %v2438_v48 = vrot.slane %v700_v44, 9  ;;  %v1754_v27 = vrot.slane %v1752_v26, 4  ;;  %v2551_v1 = vld [vmem:[%s3247_s20 + $0x20] sm:$0xf]  ;;  %v3127_v26 = vld [vmem:[%s3785_s1 + $0xf0] sm:$0xff]  }
  0x55   : > { %2880 = vmatmul.mubr.bf16.gmra.mrb[4].mxu0 %v2518_v22 }
  0x56   : > { %2888 = vmatpush3.bf16.msra.mxu0 %v3099_v10  ;;  %2899 = vmatprep.mubr.bf16.mxu0 %v3113_v32  ;;  %v751_v17 = vsel %vm3466_vm5, %v2438_v48, %v750_v47  ;;  %v1758_v10 = vor.u32 %v1757_v16, %v1754_v27  ;;  %v3660_v47 = vld [vmem:[%s3247_s20 + $0x34] sm:$0x1]  ;;  %v1839_v27 = vshll.u32 %v2559_v53, 16 }
  0x57   : > { %2794 = vmatpush3.bf16.msra.mxu1 %v3100_v46  ;;  %2889 = vmatprep.subr.bf16.mxu0 %v3101_v20  ;;  %v3118_v46 = vld [vmem:[%s3785_s1 + $0xd0] sm:$0xff]   ;;  %v2442_v14 = vcombine.low %v747_v34, %v751_v17  ;;  %v1817_v3 = vshll.u32 %v3660_v47, 16  ;;  %v1836_v17 = vshrl.u32 %v2559_v53, 16  ;;  %v2576_v53 = vld [vmem:[%s3247_s20 + $0x18] sm:$0xe] }
  0x58   : > { %2795 = vmatprep.subr.bf16.mxu1 %v3102_v18  ;;  %v1759_v22 = vrot.slane %v1758_v10, 4 }
  0x5a   : > { %2890 = vmatpush3.bf16.msra.mxu0 %v3101_v20  ;;  %v3132_v20 = vld [vmem:[%s3247_s20 + $0x8] ss:$8 sps:$4 sm:$0xff]   ;;  %v1764_v28 = vsel %vm3292_vm2, %v1759_v22, %v1763_v54 }
  0x5b   : > { %2796 = vmatpush3.bf16.msra.mxu1 %v3102_v18  ;;  %2891 = vmatprep.subr.bf16.mxu0 %v3103_v35  ;;  %v1772_v18 = vor.u32 %v1771_v6, %v1768_v50  ;;  %v1850_v50 = vshrl.u32 %v2561_v5, 16  ;;  %v1853_v6 = vshll.u32 %v2561_v5, 16  ;;  %v2584_v5 = vrot.slane %v2576_v53, 9 }
  0x5c   : > { %2797 = vmatprep.subr.bf16.mxu1 %v3104_v33 }
  0x5d   : > { %v1773_v60 = vrot.slane %v1772_v18, 4  ;;  %v1805_v18 = vrot.slane %v1803_v59, 5  ;;  %v3137_v59 = vld [vmem:[%s3247_s20 + $0x38] ss:$8 sps:$4 sm:$0xff]  }
  0x5e   : > { %2892 = vmatpush3.bf16.msra.mxu0 %v3103_v35  ;;  %v1780_v35 = vshrl.u32 %v2551_v1, 16 }
  0x5f   : > { %2798 = vmatpush3.bf16.msra.mxu1 %v3104_v33  ;;  %2893 = vmatprep.subr.bf16.mxu0 %v3105_v57  ;;  %v1778_v32 = vsel %vm3292_vm2, %v1773_v60, %v1777_v19  ;;  %v3122_v33 = vld [vmem:[%s3785_s1 + $0xe0] sm:$0xff]   ;;  %v3687_v60 = vld [vmem:[%s3247_s20 + $0x4c] sm:$0x1] }
  0x60   : > { %2799 = vmatprep.subr.bf16.mxu1 %v3107_v31  ;;  %v2563_v39 = vcombine.low %v1764_v28, %v1778_v32  ;;  %v1782_v55 = vrot.slane %v1780_v35, 4  ;;  %v1852_v28 = vrot.slane %v1850_v50, 4  ;;  %v1855_v32 = vrot.slane %v1853_v6, 5  ;;  %v3133_v35 = vld [vmem:[%s3247_s20 + $0x18] ss:$8 sps:$4 sm:$0xff]   ;;  %v3141_v6 = vld [vmem:[%s3785_s1 + $0x228] sm:$0xff]  }
  0x62   : > { %2894 = vmatpush3.bf16.msra.mxu0 %v3105_v57  ;;  %v1794_v57 = vshrl.u32 %v2553_v25, 16  ;;  %v1841_v25 = vrot.slane %v1839_v27, 5 }
  0x63   : > { %2800 = vmatpush3.bf16.msra.mxu1 %v3107_v31  ;;  %2895 = vmatprep.subr.bf16.mxu0 %v3108_v43  ;;  %v1783_v31 = vshll.u32 %v2551_v1, 16  ;;  %v1838_v1 = vrot.slane %v1836_v17, 4 }
  0x64   : > { %2801 = vmatprep.subr.bf16.mxu1 %v3110_v37 }
  0x65   : > { %v1785_v44 = vrot.slane %v1783_v31, 5 }
  0x66   : > { %2896 = vmatpush3.bf16.msra.mxu0 %v3108_v43  ;;  %v3123_v43 = vld [vmem:[%s3785_s1 + $0x1e0] sm:$0xff]  }
  0x67   : > { %2802 = vmatpush3.bf16.msra.mxu1 %v3110_v37  ;;  %2897 = vmatprep.subr.bf16.mxu0 %v3111_v45  ;;  %v3121_v37 = vld [vmem:[%s3785_s1 + $0x1d8] sm:$0xff]  }
  0x68   : > { %2811 = vmatprep.subr.bf16.mxu1 %v3112_v0 }
  0x6a   : > { %2804 = vmatmul.mubr.bf16.vlgmr.msra.gmra.mrb[0].mxu1 %v2440_v21  ;;  %2898 = vmatpush3.bf16.msra.mxu0 %v3111_v45  ;;  %v2557_v21 = vld [vmem:[%s3247_s20 + $0x38] sm:$0xf]  ;;  %v1796_v45 = vrot.slane %v1794_v57, 4 }
  0x6b   : > { %2812 = vmatpush3.bf16.msra.mxu1 %v3112_v0  ;;  %2807 = vmatprep.mubr.bf16.mxu1 %v2441_v13  ;;  %v1822_v42 = vshrl.u32 %v2557_v21, 16  ;;  %v1825_v30 = vshll.u32 %v2557_v21, 16  ;;  %v3124_v0 = vld [vmem:[%s3785_s1 + $0xe8] sm:$0xff]   ;;  %v1810_v13 = vrot.slane %v1808_v40, 4  ;;  %v2579_v21 = vld [vmem:[%s3247_s20 + $0x30] sm:$0xe] }
  0x6c   : > { %2813 = vmatprep.subr.bf16.mxu1 %v3116_v49  ;;  %2907 = vmatprep.subr.bf16.mxu0 %v3114_v62  ;;  %v1800_v34 = vor.u32 %v1799_v29, %v1796_v45 }
  0x6d   : > { %2900 = vmatmul.mubr.bf16.vlgmr.msra.gmra.mrb[0].mxu0 %v3115_v7  ;;  %v1824_v48 = vrot.slane %v1822_v42, 4  ;;  %v1786_v7 = vor.u32 %v1785_v44, %v1782_v55  ;;  %v1814_v16 = vor.u32 %v1813_v63, %v1810_v13  ;;  %v1842_v42 = vor.u32 %v1841_v25, %v1838_v1 }
  0x6e   : > { %2908 = vmatpush3.bf16.msra.mxu0 %v3114_v62  ;;  %2903 = vmatprep.mubr.bf16.mxu0 %v3126_v56  ;;  %v3663_v62 = vld [vmem:[%s3247_s20 + $0x3c] sm:$0x1]  ;;  %v3129_v56 = vld [vmem:[%s3785_s1 + $0x1f0] sm:$0xff]   ;;  %v1801_v54 = vrot.slane %v1800_v34, 4  ;;  %v2058_v55 = vrot.slane %v3660_v47, 5  ;;  %v2050_v25 = vrot.slane %v3654_v51, 5 }
  0x6f   : > { %2814 = vmatpush3.bf16.msra.mxu1 %v3116_v49  ;;  %2909 = vmatprep.subr.bf16.mxu0 %v3117_v15  ;;  %v1827_v49 = vrot.slane %v1825_v30, 5  ;;  %v1831_v4 = vshll.u32 %v3663_v62, 16  ;;  %v1787_v10 = vrot.slane %v1786_v7, 4  ;;  %v1815_v19 = vrot.slane %v1814_v16, 4  ;;  %v3139_v16 = vld [vmem:[%s3785_s1 + $0x218] sm:$0xff]  }
  0x70   : > { %2815 = vmatprep.subr.bf16.mxu1 %v3118_v46  ;;  %v1806_v57 = vsel %vm3292_vm2, %v1801_v54, %v1805_v18  ;;  %v1856_v30 = vor.u32 %v1855_v32, %v1852_v28  ;;  %v2062_v45 = vrot.slane %v3663_v62, 5  ;;  %v2046_v7 = vrot.slane %v3609_v61, 5 }
  0x71   : > { %v2070_v54 = vrot.slane %v3687_v60, 5  ;;  %v2054_v32 = vrot.slane %v3657_v2, 5 }
  0x72   : > { %2808 = vmatmul.mubr.bf16.gmra.mrb[4].mxu1 %v2442_v14  ;;  %2910 = vmatpush3.bf16.msra.mxu0 %v3117_v15  ;;  %v3130_v15 = vld [vmem:[%s3785_s1 + $0xf8] sm:$0xff]   ;;  %v1791_v14 = vrot.slane %v1789_v58, 5  ;;  %v3138_v58 = vld [vmem:[%s3785_s1 + $0x210] sm:$0xff]   ;;  %v2047_v61 = vsel %vm3466_vm5, %v2584_v5, %v2046_v7 }
  0x73   : > { %2816 = vmatpush3.bf16.msra.mxu1 %v3118_v46  ;;  %2827 = vmatprep.mubr.bf16.mxu1 %v3132_v20  ;;  %v1828_v46 = vor.u32 %v1827_v49, %v1824_v48  ;;  %v1819_v20 = vrot.slane %v1817_v3, 5  ;;  %v2575_v49 = vld [vmem:[%s3247_s20 + $0x10] sm:$0xe] }
  0x74   : > { %2817 = vmatprep.subr.bf16.mxu1 %v3120_v23  ;;  %2911 = vmatprep.subr.bf16.mxu0 %v3119_v9  ;;  %v1792_v31 = vsel %vm3292_vm2, %v1787_v10, %v1791_v14  ;;  %v2583_v3 = vrot.slane %v2575_v49, 9  ;;  %v2582_v10 = vld [vmem:[%s3247_s20 + $0x48] sm:$0xe] }
  0x75   : > { %2904 = vmatmul.mubr.bf16.gmra.mrb[4].mxu0 %v3128_v11  ;;  %v1829_v22 = vrot.slane %v1828_v46, 4  ;;  %v3134_v11 = vld [vmem:[%s3785_s1 + $0x200] sm:$0xff]   ;;  %v1820_v40 = vsel %vm3292_vm2, %v1815_v19, %v1819_v20  ;;  %v2564_v29 = vcombine.low %v1792_v31, %v1806_v57  ;;  %v2590_v19 = vrot.slane %v2582_v10, 9  ;;  %v3143_v20 = vld [vmem:[%s3785_s1 + $0x238] sm:$0xff]  }
  0x76   : > { %2912 = vmatpush3.bf16.msra.mxu0 %v3119_v9  ;;  %2923 = vmatprep.mubr.bf16.mxu0 %v2563_v39  ;;  %v1833_v9 = vrot.slane %v1831_v4, 5  ;;  %v3136_v39 = vld [vmem:[%s3247_s20 + $0x28] ss:$8 sps:$4 sm:$0xff]   ;;  %v2042_v4 = vrot.slane %v3605_v24, 5 }
  0x77   : > { %2818 = vmatpush3.bf16.msra.mxu1 %v3120_v23  ;;  %2913 = vmatprep.subr.bf16.mxu0 %v3121_v37  ;;  %v3684_v23 = vld [vmem:[%s3247_s20 + $0x44] sm:$0x1] }
  0x78   : > { %2819 = vmatprep.subr.bf16.mxu1 %v3122_v33  ;;  %v1845_v36 = vshll.u32 %v3684_v23, 16  ;;  %v1834_v41 = vsel %vm3292_vm2, %v1829_v22, %v1833_v9  ;;  %v2043_v24 = vsel %vm3466_vm5, %v2583_v3, %v2042_v4  ;;  %v2066_v14 = vrot.slane %v3684_v23, 5  ;;  %v2577_v22 = vld [vmem:[%s3247_s20 + $0x20] sm:$0xe]  ;;  %v2578_v9 = vld [vmem:[%s3247_s20 + $0x28] sm:$0xe] }
  0x79   : > { %v2565_v13 = vcombine.low %v1820_v40, %v1834_v41  ;;  %v2591_v50 = vcombine.low %v2043_v24, %v2047_v61  ;;  %v2071_v23 = vsel %vm3466_vm5, %v2590_v19, %v2070_v54  ;;  %v2586_v28 = vrot.slane %v2578_v9, 9 }
  0x7a   : > { %2914 = vmatpush3.bf16.msra.mxu0 %v3121_v37  ;;  %v1859_v37 = vshll.u32 %v3687_v60, 16  ;;  %v1847_v63 = vrot.slane %v1845_v36, 5  ;;  %v2585_v60 = vrot.slane %v2577_v22, 9 }
  0x7b   : > { %2820 = vmatpush3.bf16.msra.mxu1 %v3122_v33  ;;  %2915 = vmatprep.subr.bf16.mxu0 %v3123_v43  ;;  %v2580_v33 = vld [vmem:[%s3247_s20 + $0x38] sm:$0xe] }
  0x7c   : > { %2821 = vmatprep.subr.bf16.mxu1 %v3124_v0  ;;  %v2588_v44 = vrot.slane %v2580_v33, 9  ;;  %v1861_v48 = vrot.slane %v1859_v37, 5 }
  0x7e   : > { %2916 = vmatpush3.bf16.msra.mxu0 %v3123_v43  ;;  %v3135_v43 = vld [vmem:[%s3785_s1 + $0x208] sm:$0xff]   ;;  %v2063_v62 = vsel %vm3466_vm5, %v2588_v44, %v2062_v45  ;;  %v2603_v44 = vld [vmem:[%s3786_s2] ss:$0 sm:$0xff] }
  0x7f   : > { %2822 = vmatpush3.bf16.msra.mxu1 %v3124_v0  ;;  %2917 = vmatprep.subr.bf16.mxu0 %v3125_v52  ;;  %v2587_v0 = vrot.slane %v2579_v21, 9  ;;  %v2055_v21 = vsel %vm3466_vm5, %v2586_v28, %v2054_v32 }
  0x80   : > { %2823 = vmatprep.subr.bf16.mxu1 %v3127_v26 }
  0x81   : > { %v2059_v47 = vsel %vm3466_vm5, %v2587_v0, %v2058_v55 }
  0x82   : > { %2918 = vmatpush3.bf16.msra.mxu0 %v3125_v52  ;;  %v1843_v52 = vrot.slane %v1842_v42, 4  ;;  %v2593_v34 = vcombine.low %v2059_v47, %v2063_v62 }
  0x83   : > { %2824 = vmatpush3.bf16.msra.mxu1 %v3127_v26  ;;  %2919 = vmatprep.subr.bf16.mxu0 %v3129_v56  ;;  %v1857_v26 = vrot.slane %v1856_v30, 4 }
  0x84   : > { %2825 = vmatprep.subr.bf16.mxu1 %v3130_v15  ;;  %v1848_v17 = vsel %vm3292_vm2, %v1843_v52, %v1847_v63  ;;  %v2604_v63 = vld [vmem:[%s3787_s3] ss:$0 sm:$0xff] }
  0x85   : > { %v1862_v27 = vsel %vm3292_vm2, %v1857_v26, %v1861_v48 }
  0x86   : > { %2920 = vmatpush3.bf16.msra.mxu0 %v3129_v56  ;;  %v2566_v46 = vcombine.low %v1848_v17, %v1862_v27  ;;  %v2581_v56 = vld [vmem:[%s3247_s20 + $0x40] sm:$0xe] }
  0x87   : > { %2826 = vmatpush3.bf16.msra.mxu1 %v3130_v15  ;;  %2921 = vmatprep.subr.bf16.mxu0 %v3131_v12  ;;  %v3142_v15 = vld [vmem:[%s3785_s1 + $0x230] sm:$0xff]   ;;  %v2589_v18 = vrot.slane %v2581_v56, 9 }
  0x88   : > { %2955 = vmatprep.subr.bf16.mxu1 %v3134_v11 }
  0x89   : > { %v2067_v1 = vsel %vm3466_vm5, %v2589_v18, %v2066_v14 }
  0x8a   : > { %2828 = vmatmul.mubr.bf16.vlgmr.msra.gmra.mrb[0].mxu1 %v3133_v35  ;;  %2922 = vmatpush3.bf16.msra.mxu0 %v3131_v12  ;;  %v2051_v12 = vsel %vm3466_vm5, %v2585_v60, %v2050_v25 }
  0x8b   : > { %2963 = vmatpush3.bf16.msra.mxu1 %v3134_v11  ;;  %2831 = vmatprep.mubr.bf16.mxu1 %v3136_v39  ;;  %v2592_v33 = vcombine.low %v2051_v12, %v2055_v21 }
  0x8c   : > { %2956 = vmatprep.subr.bf16.mxu1 %v3135_v43  ;;  %2931 = vmatprep.subr.bf16.mxu0 %v3134_v11 }
  0x8d   : > { %2924 = vmatmul.mubr.bf16.vlgmr.msra.gmra.mrb[0].mxu0 %v2564_v29 }
  0x8e   : > { %2932 = vmatpush3.bf16.msra.mxu0 %v3134_v11  ;;  %2927 = vmatprep.mubr.bf16.mxu0 %v2565_v13  ;;  %v2594_v11 = vcombine.low %v2067_v1, %v2071_v23 }
  0x8f   : > { %2964 = vmatpush3.bf16.msra.mxu1 %v3135_v43  ;;  %2933 = vmatprep.subr.bf16.mxu0 %v3135_v43 }
  0x90   : > { %2957 = vmatprep.subr.bf16.mxu1 %v3138_v58 }
  0x92   : > { %2832 = vmatmul.mubr.bf16.gmra.mrb[4].mxu1 %v3137_v59  ;;  %2934 = vmatpush3.bf16.msra.mxu0 %v3135_v43 }
  0x93   : > { %2965 = vmatpush3.bf16.msra.mxu1 %v3138_v58  ;;  %2951 = vmatprep.mubr.bf16.mxu1 %v2593_v34 }
  0x94   : > { %2958 = vmatprep.subr.bf16.mxu1 %v3139_v16  ;;  %2935 = vmatprep.subr.bf16.mxu0 %v3138_v58 }
  0x95   : > { %2928 = vmatmul.mubr.bf16.gmra.mrb[4].mxu0 %v2566_v46 }
  0x96   : > { %2936 = vmatpush3.bf16.msra.mxu0 %v3138_v58  ;;  %2947 = vmatprep.mubr.bf16.mxu0 %v2591_v50 }
  0x97   : > { %2966 = vmatpush3.bf16.msra.mxu1 %v3139_v16  ;;  %2937 = vmatprep.subr.bf16.mxu0 %v3139_v16 }
  0x98   : > { %2959 = vmatprep.subr.bf16.mxu1 %v3140_v38 }
  0x9a   : > { %2938 = vmatpush3.bf16.msra.mxu0 %v3139_v16 }
  0x9b   : > { %2967 = vmatpush3.bf16.msra.mxu1 %v3140_v38  ;;  %2939 = vmatprep.subr.bf16.mxu0 %v3140_v38 }
  0x9c   : > { %2960 = vmatprep.subr.bf16.mxu1 %v3141_v6 }
  0x9e   : > { %2940 = vmatpush3.bf16.msra.mxu0 %v3140_v38 }
  0x9f   : > { %2968 = vmatpush3.bf16.msra.mxu1 %v3141_v6  ;;  %2941 = vmatprep.subr.bf16.mxu0 %v3141_v6 }
  0xa0   : > { %2961 = vmatprep.subr.bf16.mxu1 %v3142_v15 }
  0xa2   : > { %2942 = vmatpush3.bf16.msra.mxu0 %v3141_v6 }
  0xa3   : > { %2969 = vmatpush3.bf16.msra.mxu1 %v3142_v15  ;;  %2943 = vmatprep.subr.bf16.mxu0 %v3142_v15 }
  0xa4   : > { %2962 = vmatprep.subr.bf16.mxu1 %v3143_v20 }
  0xa6   : > { %2944 = vmatpush3.bf16.msra.mxu0 %v3142_v15 }
  0xa7   : > { %2970 = vmatpush3.bf16.msra.mxu1 %v3143_v20  ;;  %2945 = vmatprep.subr.bf16.mxu0 %v3143_v20 }
  0xaa   : > { %2952 = vmatmul.mubr.bf16.vlgmr.msra.gmra.mrb[8].mxu1 %v2594_v11  ;;  %2946 = vmatpush3.bf16.msra.mxu0 %v3143_v20 }
  0xad   : > { %2948 = vmatmul.mubr.bf16.vlgmr.msra.gmra.mrb[0].mxu0 %v2592_v33 }
 0x15d   : > { %v2829_v35 = vpop.f32.mrb[0].mxu1 }
 0x15e   : > { %v1036_v51 = vpop.f32.mrb[1].mxu1 }
 0x15f   : > { %v2830_v31 = vpop.f32.mrb[2].mxu1 }
 0x160   : > { %v1039_v57 = vpop.f32.mrb[3].mxu1 }
 0x165   : > { %v2833_v2 = vpop.f32.mrb[4].mxu1 }
 0x166   : > { %v1052_v36 = vpop.f32.mrb[5].mxu1 }
 0x167   : > { %v2834_v37 = vpop.f32.mrb[6].mxu1 }
 0x168   : > { %v1055_v39 = vpop.f32.mrb[7].mxu1  ;;  %v2929_v40 = vpop.f32.mrb[4].mxu0 }
 0x169   : > { %v2975_v41 = vadd.f32 %v2929_v40, %v2833_v2  ;;  %v1993_v42 = vpop.f32.mrb[5].mxu0 }
 0x16a   : > { %v2977_v30 = vadd.f32 %v1993_v42, %v1052_v36  ;;  %v2930_v43 = vpop.f32.mrb[6].mxu0 }
 0x16b   : > { %v2979_v8 = vadd.f32 %v2930_v43, %v2834_v37  ;;  %v1996_v0 = vpop.f32.mrb[7].mxu0 }
 0x16c   : > { %v2981_v55 = vadd.f32 %v1996_v0, %v1055_v39 }
 0x17d   : > { %v2953_v45 = vpop.f32.mrb[8].mxu1 }
 0x17e   : > { %v2976_v29 = vadd.f32 %v2975_v41, %v2953_v45  ;;  %v2202_v13 = vpop.f32.mrb[9].mxu1 }
 0x17f   : > { %v2978_v48 = vadd.f32 %v2977_v30, %v2202_v13  ;;  %v2954_v49 = vpop.f32.mrb[10].mxu1 }
 0x180   : > { %v2238_v53 = vmul.f32 %v2976_v29, %v2603_v44  ;;  %v2980_v52 = vadd.f32 %v2979_v8, %v2954_v49  ;;  %v2205_v26 = vpop.f32.mrb[11].mxu1  ;;  %v2949_v58 = vpop.f32.mrb[0].mxu0 }
 0x181   : > { %v2236_v47 = vmul.f32 %v2978_v48, %v2603_v44  ;;  %v2982_v62 = vadd.f32 %v2981_v55, %v2205_v26  ;;  %v2971_v4 = vadd.f32 %v2949_v58, %v2829_v35  ;;  %v2186_v5 = vpop.f32.mrb[1].mxu0 }
 0x182   : > { %v2253_v59 = vadd.f32 %v2604_v63, %v2238_v53  ;;  %v2239_v3 = vmul.f32 %v2980_v52, %v2603_v44  ;;  %v2972_v17 = vadd.f32 %v2186_v5, %v1036_v51  ;;  %v2950_v27 = vpop.f32.mrb[2].mxu0 }
 0x183   : > { %v2251_v7 = vadd.f32 %v2604_v63, %v2236_v47  ;;  %v2237_v34 = vmul.f32 %v2982_v62, %v2603_v44  ;;  %v2234_v24 = vmul.f32 %v2971_v4, %v2603_v44  ;;  %v2973_v61 = vadd.f32 %v2950_v27, %v2830_v31  ;;  %v2189_v46 = vpop.f32.mrb[3].mxu0 }
 0x184   : > { %v2254_v16 = vadd.f32 %v2604_v63, %v2239_v3  ;;  %v2261_v50 = vmax.f32 %v2253_v59, 0.0  ;;  %v2232_v6 = vmul.f32 %v2972_v17, %v2603_v44  ;;  %v2974_v56 = vadd.f32 %v2189_v46, %v1039_v57 }
 0x185   : > { %v2252_v38 = vadd.f32 %v2604_v63, %v2237_v34  ;;  %v2249_v10 = vadd.f32 %v2604_v63, %v2234_v24  ;;  %v2259_v14 = vmax.f32 %v2251_v7, 0.0  ;;  %v2235_v54 = vmul.f32 %v2973_v61, %v2603_v44 }
 0x186   : > { %v2262_v15 = vmax.f32 %v2254_v16, 0.0  ;;  %v2247_v19 = vadd.f32 %v2604_v63, %v2232_v6  ;;  %v2233_v22 = vmul.f32 %v2974_v56, %v2603_v44 }
 0x187   : > { %v2260_v18 = vmax.f32 %v2252_v38, 0.0  ;;  %v2250_v9 = vadd.f32 %v2604_v63, %v2235_v54  ;;  %v2257_v60 = vmax.f32 %v2249_v10, 0.0 }
 0x188   : > { %v2626_v20 = vpack.c.bf16 %v2262_v15, %v2261_v50  ;;  %v2248_v23 = vadd.f32 %v2604_v63, %v2233_v22  ;;  %v2255_v28 = vmax.f32 %v2247_v19, 0.0 }
 0x189   : > { %v2621_v1 = vpack.c.bf16 %v2260_v18, %v2259_v14  ;;  %v2258_v25 = vmax.f32 %v2250_v9, 0.0 }
 0x18a   : > { %2630 = vst [vmem:[%s262_s25 + $0x18] sm:$0xff] %v2626_v20   ;;  %v2256_v32 = vmax.f32 %v2248_v23, 0.0 }
 0x18b   : > { %2629 = vst [vmem:[%s262_s25 + $0x10] sm:$0xff] %v2621_v1   ;;  %v2616_v11 = vpack.c.bf16 %v2258_v25, %v2257_v60 }
 0x18c   : > { %v2611_v12 = vpack.c.bf16 %v2256_v32, %v2255_v28 }
 0x18d   : > { %2628 = vst [vmem:[%s262_s25 + $0x8] sm:$0xff] %v2616_v11  }
 0x18e   : > { %2612 = vst [vmem:[%s262_s25] sm:$0xff] %v2611_v12  }
 0x18f PF: > { %s14_s17 = sadd.s32 1, %s3166_s17   ;;  %s3793_s15 = smov %s3162_s16 }
 0x190   : > { %p11_p5 = scmp.ge.s32.totalorder %s14_s17, 4   ;;  %s3794_s16 = smov %s3796_s18 }
 0x192   :  { %13 = sbr.rel (!%p11_p5) target bundleno = 2 (0x2), region = 77 }

// kernel: _lambda_.33
= control target key start
LH: loop header
LB: loop body
LE: loop exit
PB: predicated region body
PF: predicated region fallthrough
CT: control target
= control target key end

     0   :  { %s2635_s15 = smov 0   ;;  %s2637_s16 = smov 0   ;;  %s3105_s0 = inlined_call_operand.vmem [shape: bf16[2,6,6,128], index: 0, kind: input, shape index: {}]   ;;  %s3106_s1 = inlined_call_operand.vmem [shape: bf16[1152,128], index: 1, kind: input, shape index: {}]   ;;  %s3107_s2 = inlined_call_operand.vmem [shape: f32[1,128], index: 2, kind: input, shape index: {}]   ;;  %s3108_s3 = inlined_call_operand.vmem [shape: f32[1,128], index: 3, kind: input, shape index: {}]   ;;  %s3109_s4 = inlined_call_operand.vmem [shape: bf16[2,4,4,128], index: 4, kind: output, shape index: {}]  }
   0x1   :  { %s2639_s17 = smov 0  }
   0x2 LB: > { %s26_s18 = sadd.s32 1, %s2601_s16  ;;  %p2039_p0 = scmp.ge.s32.totalorder %s2605_s17, 1  ;;  %s2605_s17 = sphi %s2639_s17, %s14_s17   ;;  %s2601_s16 = sphi %s2637_s16, %s3119_s16   ;;  %s2597_s15 = sphi %s2635_s15, %s3118_s15  }
   0x3   : > { %p28_p1 = scmp.ge.s32.totalorder %s26_s18, 2  ;;  %p201_p2 = scmp.lt.s32.totalorder %s2605_s17, 3 }
   0x5   : > { %s3121_s18 = smov (%p28_p1, %s26_s18), 0  ;;  %p202_p3 = pnand %p2039_p0, %p201_p2 }
   0x6   : > { %v2499_v0 = vld [vmem:[%s3106_s1 + $0x40] sm:$0xff] (!%p202_p3)   ;;  %v2607_v1 = vmov (!%p202_p3), 0.0   ;;  %v2501_v3 = vld [vmem:[%s3106_s1 + $0x48] sm:$0xff] (!%p202_p3)   ;;  %vm2608_vm0 = vmmov (!%p202_p3), 0   ;;  %p240_p4 = scmp.lt.s32.totalorder (!%p202_p3), %s2597_s15, 1  ;;  %v2503_v5 = vld [vmem:[%s3106_s1 + $0x50] sm:$0xff] (!%p202_p3)   ;;  %v408_v21 = vlaneseq (!%p202_p3) }
   0x7   : > { %205 = sbr.rel (%p202_p3) target bundleno = 400 (0x190), region = 36  ;;  %2261 = vmatprep.subr.bf16.mxu1 (!%p202_p3), %v2607_v1  ;;  %2341 = vmatprep.subr.bf16.mxu0 (!%p202_p3), %v2607_v1  ;;  %v2500_v2 = vld [vmem:[%s3106_s1 + $0x100] sm:$0xff] (!%p202_p3)   ;;  %v2502_v4 = vld [vmem:[%s3106_s1 + $0x108] sm:$0xff] (!%p202_p3)   ;;  %v2504_v6 = vld [vmem:[%s3106_s1 + $0x110] sm:$0xff] (!%p202_p3)   ;;  %vm324_vm1 = vsmask.f32 (!%p202_p3), 1280 }
   0x8   : > { %2262 = vmatpush3.bf16.msra.mxu1 (!%p202_p3), %v2499_v0  ;;  %2277 = vmatprep.mubr.msk.bf16.mxu1 (!%p202_p3), %vm2608_vm0, %v2607_v1  ;;  %v2505_v7 = vld [vmem:[%s3106_s1 + $0x58] sm:$0xff] (!%p202_p3)   ;;  %v2507_v9 = vld [vmem:[%s3106_s1 + $0x60] sm:$0xff] (!%p202_p3)   ;;  %v2509_v11 = vld [vmem:[%s3106_s1 + $0x68] sm:$0xff] (!%p202_p3)   ;;  %vm325_vm2 = vsmask.f32 (!%p202_p3), 3336  ;;  %v409_v53 = vshrl.u32 (!%p202_p3), %v408_v21, 7 }
   0x9   : > { %2342 = vmatpush3.bf16.msra.mxu0 (!%p202_p3), %v2500_v2  ;;  %2263 = vmatprep.subr.bf16.mxu1 (!%p202_p3), %v2607_v1  ;;  %v2506_v8 = vld [vmem:[%s3106_s1 + $0x118] sm:$0xff] (!%p202_p3)   ;;  %v2508_v10 = vld [vmem:[%s3106_s1 + $0x120] sm:$0xff] (!%p202_p3)   ;;  %v2510_v13 = vld [vmem:[%s3106_s1 + $0x128] sm:$0xff] (!%p202_p3)   ;;  %vm327_vm3 = vsmask.f32 (!%p202_p3), 5392  ;;  %vm661_vm8 = vcmask (!%p202_p3), 1040384  }
   0xa   : > { %2343 = vmatprep.subr.bf16.mxu0 (!%p202_p3), %v2607_v1  ;;  %2357 = vmatprep.mubr.msk.bf16.mxu0 (!%p202_p3), %vm2608_vm0, %v2607_v1  ;;  %vm2716_vm4 = vmor (!%p202_p3), %vm324_vm1, %vm325_vm2  ;;  %vm329_vm5 = vsmask.f32 (!%p202_p3), 7448  ;;  %v2511_v22 = vld [vmem:[%s3106_s1 + $0x70] sm:$0xff] (!%p202_p3)   ;;  %v2513_v49 = vld [vmem:[%s3106_s1 + $0x78] sm:$0xff] (!%p202_p3)   ;;  %v2609_v58 = vmov (!%p202_p3), 1983009808  }
   0xb   : > { %v2512_v27 = vld [vmem:[%s3106_s1 + $0x130] sm:$0xff] (!%p202_p3)   ;;  %vm2730_vm6 = vmor (!%p202_p3), %vm2716_vm4, %vm327_vm3  ;;  %v2514_v54 = vld [vmem:[%s3106_s1 + $0x138] sm:$0xff] (!%p202_p3)   ;;  %v406_v59 = vunpack.c.l.s4 (!%p202_p3), %v2609_v58  ;;  %vm662_vm9 = vcmask (!%p202_p3), 1042434   ;;  %vm664_vm11 = vcmask (!%p202_p3), 1044484   ;;  %vm666_vm13 = vcmask (!%p202_p3), 1046534  }
   0xc   : > { %2264 = vmatpush3.bf16.msra.mxu1 (!%p202_p3), %v2501_v3  ;;  %vm2739_vm7 = vmor (!%p202_p3), %vm2730_vm6, %vm329_vm5 }
   0xd   : > { %2344 = vmatpush3.bf16.msra.mxu0 (!%p202_p3), %v2502_v4  ;;  %2265 = vmatprep.subr.bf16.mxu1 (!%p202_p3), %v2607_v1  ;;  %v407_v3 = vunpack.c.0.s8 (!%p202_p3), %v406_v59  ;;  %vm663_vm10 = vmor (!%p202_p3), %vm661_vm8, %vm662_vm9 }
   0xe   : > { %s3123_s15 = smov (!%p240_p4, %s2597_s15), 1  ;;  %2345 = vmatprep.subr.bf16.mxu0 %v2607_v1  ;;  %vm665_vm12 = vmor %vm663_vm10, %vm664_vm11 }
   0xf   : > { %s2471_s5 = smul.u32 24, %s3123_s15  ;;  %vm2800_vm14 = vmor %vm665_vm12, %vm666_vm13  ;;  %s2179_s21 = sshll.u32 %s3123_s15, 3 }
  0x10   : > { %2266 = vmatpush3.bf16.msra.mxu1 %v2503_v5  ;;  %s262_s24 = scalar_lea.vmem %s3109_s4, %s2179_s21 }
  0x11   : > { %2346 = vmatpush3.bf16.msra.mxu0 %v2504_v6  ;;  %2267 = vmatprep.subr.bf16.mxu1 %v2607_v1  ;;  %s2695_s12 = scalar_lea.vmem %s3105_s0, %s2471_s5 }
  0x12   : > { %2347 = vmatprep.subr.bf16.mxu0 %v2607_v1  ;;  %v2043_v12 = vld.sshfl [vmem:[%s2695_s12] sm:$0x13 pattern:$0x76325410] }
  0x13   : > { %v2044_v14 = vld.sshfl [vmem:[%s2695_s12 + $0x4] sm:$0x13 pattern:$0x76325410]  ;;  %v299_v15 = vcombine.high %v2043_v12, %v2043_v12  ;;  %v332_v24 = vshrl.u32 %v2043_v12, 16  ;;  %v335_v25 = vshll.u32 %v2043_v12, 16 }
  0x14   : > { %2268 = vmatpush3.bf16.msra.mxu1 %v2505_v7  ;;  %v2045_v16 = vld.sshfl [vmem:[%s2695_s12 + $0x8] sm:$0x13 pattern:$0x76325410]  ;;  %v307_v17 = vcombine.high %v2044_v14, %v2044_v14  ;;  %v346_v28 = vshrl.u32 %v2044_v14, 16  ;;  %v349_v29 = vshll.u32 %v2044_v14, 16 }
  0x15   : > { %2348 = vmatpush3.bf16.msra.mxu0 %v2506_v8  ;;  %2269 = vmatprep.subr.bf16.mxu1 %v2607_v1  ;;  %v2046_v18 = vld.sshfl [vmem:[%s2695_s12 + $0xc] sm:$0x13 pattern:$0x76325410]  ;;  %v315_v19 = vcombine.high %v2045_v16, %v2045_v16  ;;  %v341_v26 = vshll.u32 %v299_v15, 16  ;;  %v360_v31 = vshrl.u32 %v2045_v16, 16 }
  0x16   : > { %2349 = vmatprep.subr.bf16.mxu0 %v2607_v1  ;;  %v323_v23 = vcombine.high %v2046_v18, %v2046_v18  ;;  %v355_v30 = vshll.u32 %v307_v17, 16  ;;  %v334_v33 = vrot.slane %v332_v24, 6  ;;  %v337_v34 = vrot.slane %v335_v25, 7 }
  0x17   : > { %v343_v35 = vrot.slane %v341_v26, 7  ;;  %v363_v36 = vshll.u32 %v2045_v16, 16  ;;  %v348_v37 = vrot.slane %v346_v28, 6  ;;  %v351_v38 = vrot.slane %v349_v29, 7  ;;  %v2517_v28 = vld [vmem:[%s3106_s1 + $0x8] sm:$0xff]   ;;  %v2516_v29 = vld [vmem:[%s3106_s1 + $0x140] sm:$0xff]  }
  0x18   : > { %2270 = vmatpush3.bf16.msra.mxu1 %v2507_v9  ;;  %v357_v39 = vrot.slane %v355_v30, 7  ;;  %v362_v40 = vrot.slane %v360_v31, 6  ;;  %v338_v41 = vor.u32 %v337_v34, %v334_v33  ;;  %v369_v43 = vshll.u32 %v315_v19, 16  ;;  %v2519_v31 = vld [vmem:[%s3106_s1 + $0x10] sm:$0xff]   ;;  %v2518_v33 = vld [vmem:[%s3106_s1 + $0x148] sm:$0xff]  }
  0x19   : > { %2350 = vmatpush3.bf16.msra.mxu0 %v2508_v10  ;;  %2271 = vmatprep.subr.bf16.mxu1 %v2607_v1  ;;  %v365_v42 = vrot.slane %v363_v36, 7  ;;  %v374_v44 = vshrl.u32 %v2046_v18, 16  ;;  %v352_v46 = vor.u32 %v351_v38, %v348_v37  ;;  %v377_v47 = vshll.u32 %v2046_v18, 16 }
  0x1a   : > { %2351 = vmatprep.subr.bf16.mxu0 %v2607_v1  ;;  %v383_v48 = vshll.u32 %v323_v23, 16  ;;  %v339_v50 = vrot.slane %v338_v41, 2  ;;  %v371_v56 = vrot.slane %v369_v43, 7  ;;  %v2759_v10 = vsub.s32 %v407_v3, %v409_v53  ;;  %v2529_v3 = vld [vmem:[%s3106_s1 + $0x38] sm:$0xff]  }
  0x1b   : > { %v366_v51 = vor.u32 %v365_v42, %v362_v40  ;;  %v376_v52 = vrot.slane %v374_v44, 6  ;;  %v353_v55 = vrot.slane %v352_v46, 2  ;;  %v379_v57 = vrot.slane %v377_v47, 7  ;;  %v2521_v42 = vld [vmem:[%s3106_s1 + $0x18] sm:$0xff]   ;;  %v2520_v46 = vld [vmem:[%s3106_s1 + $0x150] sm:$0xff]  }
  0x1c   : > { %2272 = vmatpush3.bf16.msra.mxu1 %v2509_v11  ;;  %v344_v60 = vsel %vm2739_vm7, %v339_v50, %v343_v35  ;;  %v385_v62 = vrot.slane %v383_v48, 7  ;;  %v2098_v63 = vld.sshfl [vmem:[%s2695_s12 + $0x10] sm:$0x13 pattern:$0x76325410]  ;;  %v2523_v50 = vld [vmem:[%s3106_s1 + $0x20] sm:$0xff]  }
  0x1d   : > { %2352 = vmatpush3.bf16.msra.mxu0 %v2510_v13  ;;  %2273 = vmatprep.subr.bf16.mxu1 %v2607_v1  ;;  %v367_v61 = vrot.slane %v366_v51, 2  ;;  %v358_v0 = vsel %vm2739_vm7, %v353_v55, %v357_v39  ;;  %v380_v2 = vor.u32 %v379_v57, %v376_v52  ;;  %v982_v4 = vcombine.high %v2098_v63, %v2098_v63  ;;  %v2112_v32 = vld.sshfl [vmem:[%s2695_s12 + $0x8] sm:$0x12 pattern:$0x76325410]  ;;  %v2522_v52 = vld [vmem:[%s3106_s1 + $0x158] sm:$0xff]  }
  0x1e   : > { %2353 = vmatprep.subr.bf16.mxu0 %v2607_v1  ;;  %v403_v5 = vcombine.low %v344_v60, %v358_v0  ;;  %v1026_v6 = vshrl.u32 %v2098_v63, 16  ;;  %v1029_v7 = vshll.u32 %v2098_v63, 16  ;;  %v2113_v34 = vld.sshfl [vmem:[%s2695_s12 + $0xc] sm:$0x12 pattern:$0x76325410]  ;;  %v1187_v35 = vcombine.high %v2112_v32, %v2112_v32 }
  0x1f   : > { %v372_v8 = vsel %vm2739_vm7, %v367_v61, %v371_v56  ;;  %v381_v9 = vrot.slane %v380_v2, 2  ;;  %v1035_v11 = vshll.u32 %v982_v4, 16  ;;  %v1195_v36 = vcombine.high %v2113_v34, %v2113_v34  ;;  %v2111_v40 = vld.sshfl [vmem:[%s2695_s12 + $0x4] sm:$0x12 pattern:$0x76325410] }
  0x20   : > { %2274 = vmatpush3.bf16.msra.mxu1 %v2511_v22  ;;  %v1028_v12 = vrot.slane %v1026_v6, 6  ;;  %v1031_v13 = vrot.slane %v1029_v7, 7  ;;  %v411_v16 = vrot.slane %v403_v5, %v2759_v10  ;;  %v1055_v19 = vcombine.low %v358_v0, %v372_v8  ;;  %v2515_v22 = vld [vmem:[%s3106_s1] sm:$0xff]   ;;  %v2525_v55 = vld [vmem:[%s3106_s1 + $0x28] sm:$0xff]   ;;  %v2528_v6 = vld [vmem:[%s3106_s1 + $0x170] sm:$0xff]  }
  0x21   : > { %2354 = vmatpush3.bf16.msra.mxu0 %v2512_v27  ;;  %2275 = vmatprep.subr.bf16.mxu1 %v2607_v1  ;;  %v386_v14 = vsel %vm2739_vm7, %v381_v9, %v385_v62  ;;  %v1037_v18 = vrot.slane %v1035_v11, 7  ;;  %v2116_v37 = vrot.slane %v2112_v32, 9  ;;  %v2117_v38 = vrot.slane %v2113_v34, 9  ;;  %v2527_v62 = vld [vmem:[%s3106_s1 + $0x30] sm:$0xff]   ;;  %v2526_v63 = vld [vmem:[%s3106_s1 + $0x168] sm:$0xff]  }
  0x22   : > { %2355 = vmatprep.subr.bf16.mxu0 %v2607_v1  ;;  %v404_v15 = vcombine.low %v372_v8, %v386_v14  ;;  %v1032_v17 = vor.u32 %v1031_v13, %v1028_v12  ;;  %v1063_v26 = vrot.slane %v1055_v19, %v2759_v10  ;;  %v1210_v41 = vrot.slane %v1187_v35, 7  ;;  %v2114_v43 = vld.sshfl [vmem:[%s2695_s12 + $0x10] sm:$0x12 pattern:$0x76325410]  ;;  %v2533_v8 = vld [vmem:[%s3106_s1 + $0x80] sm:$0xff]  }
  0x23   : > { %v1214_v44 = vrot.slane %v1195_v36, 7  ;;  %v1179_v51 = vcombine.high %v2111_v40, %v2111_v40  ;;  %v1203_v53 = vcombine.high %v2114_v43, %v2114_v43  ;;  %v2115_v56 = vrot.slane %v2111_v40, 9  ;;  %v2577_v60 = vld.sshfl [vmem:[%s2695_s12] sm:$0xf pattern:$0x76325410] }
  0x24   : > { %2276 = vmatpush3.bf16.msra.mxu1 %v2513_v49  ;;  %v2766_v20 = vrot.slane %v404_v15, %v2759_v10  ;;  %v1033_v21 = vrot.slane %v1032_v17, 2  ;;  %v2816_v47 = vsel %vm2800_vm14, %v2116_v37, %v1210_v41  ;;  %v2118_v58 = vrot.slane %v2114_v43, 9  ;;  %v2578_v61 = vld.sshfl [vmem:[%s2695_s12 + $0x8] sm:$0xf pattern:$0x76325410] }
  0x25   : > { %2356 = vmatpush3.bf16.msra.mxu0 %v2514_v54  ;;  %2281 = vmatprep.subr.bf16.mxu1 %v2607_v1  ;;  %v2820_v48 = vsel %vm2800_vm14, %v2117_v38, %v1214_v44  ;;  %v2524_v54 = vld [vmem:[%s3106_s1 + $0x160] sm:$0xff]   ;;  %v1206_v57 = vrot.slane %v1179_v51, 7  ;;  %v1218_v59 = vrot.slane %v1203_v53, 7  ;;  %v530_v7 = vcombine.low %v2577_v60, %v2578_v61  ;;  %v2530_v12 = vld [vmem:[%s3106_s1 + $0x178] sm:$0xff]   ;;  %v2537_v17 = vld [vmem:[%s3106_s1 + $0x90] sm:$0xff]  }
  0x26   : > { %2361 = vmatprep.subr.bf16.mxu0 %v2607_v1  ;;  %v419_v23 = vcombine.low %v411_v16, %v2766_v20  ;;  %v2774_v24 = vsel %vm2739_vm7, %v1033_v21, %v1037_v18  ;;  %v1772_v49 = vcombine.low %v2816_v47, %v2820_v48  ;;  %v2534_v15 = vld [vmem:[%s3106_s1 + $0x180] sm:$0xff]   ;;  %v2536_v18 = vld [vmem:[%s3106_s1 + $0x188] sm:$0xff]   ;;  %v2539_v19 = vld [vmem:[%s3106_s1 + $0x98] sm:$0xff]  }
  0x27   : > { %v1056_v25 = vcombine.low %v386_v14, %v2774_v24  ;;  %v2851_v0 = vsel %vm2800_vm14, %v2115_v56, %v1206_v57  ;;  %v2855_v2 = vsel %vm2800_vm14, %v2118_v58, %v1218_v59  ;;  %v2535_v14 = vld [vmem:[%s3106_s1 + $0x88] sm:$0xff]   ;;  %v2063_v16 = vld.sshfl [vmem:[%s2695_s12] sm:$0x12 pattern:$0x76325410] }
  0x28   : > { %2278 = vmatmul.mubr.bf16.vlgmr.msra.gmra.mrb[0].mxu1 %v419_v23  ;;  %v1236_v4 = vcombine.low %v2851_v0, %v2816_v47  ;;  %v1237_v5 = vcombine.low %v2820_v48, %v2855_v2  ;;  %v636_v21 = vcombine.high %v2063_v16, %v2063_v16  ;;  %v2541_v23 = vld [vmem:[%s3106_s1 + $0xa0] sm:$0xff]   ;;  %v2543_v35 = vld [vmem:[%s3106_s1 + $0xa8] sm:$0xff]   ;;  %v2946_v45 = vrot.slane %v1772_v49, %v2759_v10  ;;  %v2580_v59 = vld.sshfl [vmem:[%s2695_s12 + $0x10] sm:$0xf pattern:$0x76325410] }
  0x29   : > { %2282 = vmatpush3.bf16.msra.mxu1 %v2515_v22  ;;  %v1070_v27 = vrot.slane %v1056_v25, %v2759_v10  ;;  %2297 = vmatprep.mubr.msk.bf16.mxu1 %vm2608_vm0, %v2607_v1  ;;  %v2538_v22 = vld [vmem:[%s3106_s1 + $0x190] sm:$0xff]   ;;  %v2542_v40 = vld [vmem:[%s3106_s1 + $0x1a0] sm:$0xff]   ;;  %v2579_v58 = vld.sshfl [vmem:[%s2695_s12 + $0x8] sm:$0xf pattern:$0x76325410] }
  0x2a   : > { %2283 = vmatprep.subr.bf16.mxu1 %v2607_v1  ;;  %v1244_v9 = vrot.slane %v1236_v4, %v2759_v10  ;;  %v1251_v11 = vrot.slane %v1237_v5, %v2759_v10  ;;  %v2146_v25 = vld.sshfl [vmem:[%s2695_s12 + $0x14] sm:$0x13 pattern:$0x76325410]  ;;  %v2549_v61 = vld [vmem:[%s3106_s1 + $0xc0] sm:$0xff]   ;;  %v2554_v4 = vld [vmem:[%s3106_s1 + $0x1c8] sm:$0xff]  }
  0x2b   : > { %v1071_v30 = vcombine.low %v1063_v26, %v1070_v27  ;;  %v2067_v26 = vrot.slane %v2063_v16, 9  ;;  %v1518_v27 = vcombine.high %v2146_v25, %v2146_v25  ;;  %v2546_v47 = vld [vmem:[%s3106_s1 + $0x1b0] sm:$0xff]   ;;  %v2557_v5 = vld [vmem:[%s3106_s1 + $0xd8] sm:$0xff]  }
  0x2c   : > { %v1252_v13 = vcombine.low %v1244_v9, %v1251_v11  ;;  %v2561_v9 = vld [vmem:[%s3106_s1 + $0xe8] sm:$0xff]   ;;  %v2560_v11 = vld [vmem:[%s3106_s1 + $0x1e0] sm:$0xff]   ;;  %v2565_v16 = vld [vmem:[%s3106_s1 + $0xf8] sm:$0xff]  }
  0x2d   : > { %2358 = vmatmul.mubr.bf16.vlgmr.msra.gmra.mrb[0].mxu0 %v1071_v30  ;;  %2284 = vmatpush3.bf16.msra.mxu1 %v2517_v28  ;;  %v1562_v28 = vshrl.u32 %v2146_v25, 16  ;;  %v1565_v30 = vshll.u32 %v2146_v25, 16  ;;  %v2573_v25 = vld [vmem:[%s3106_s1 + $0x220] sm:$0xff]  }
  0x2e   : > { %2362 = vmatpush3.bf16.msra.mxu0 %v2516_v29  ;;  %2285 = vmatprep.subr.bf16.mxu1 %v2607_v1  ;;  %v670_v29 = vrot.slane %v636_v21, 7  ;;  %v2569_v21 = vld [vmem:[%s3106_s1 + $0x200] sm:$0xff]  }
  0x2f   : > { %2363 = vmatprep.subr.bf16.mxu0 %v2607_v1  ;;  %2377 = vmatprep.mubr.msk.bf16.mxu0 %vm2608_vm0, %v2607_v1  ;;  %v1564_v32 = vrot.slane %v1562_v28, 6  ;;  %v1567_v34 = vrot.slane %v1565_v30, 7  ;;  %v2576_v28 = vld [vmem:[%s3106_s1 + $0x238] sm:$0xff]  }
  0x30   : > { %v671_v37 = vsel %vm2800_vm14, %v2067_v26, %v670_v29  ;;  %v2574_v26 = vld [vmem:[%s3106_s1 + $0x228] sm:$0xff]  }
  0x31   : > { %2286 = vmatpush3.bf16.msra.mxu1 %v2519_v31  ;;  %v2540_v31 = vld [vmem:[%s3106_s1 + $0x198] sm:$0xff]   ;;  %v1568_v38 = vor.u32 %v1567_v34, %v1564_v32  ;;  %v700_v43 = vcombine.low %v671_v37, %v2851_v0  ;;  %v2553_v0 = vld [vmem:[%s3106_s1 + $0xc8] sm:$0xff]   ;;  %v2175_v34 = vld [vmem:[%s3107_s2] ss:$0 sm:$0xff] }
  0x32   : > { %2364 = vmatpush3.bf16.msra.mxu0 %v2518_v33  ;;  %2287 = vmatprep.subr.bf16.mxu1 %v2607_v1  ;;  %v1571_v33 = vshll.u32 %v1518_v27, 16  ;;  %v2575_v27 = vld [vmem:[%s3106_s1 + $0x230] sm:$0xff]  }
  0x33   : > { %2365 = vmatprep.subr.bf16.mxu0 %v2607_v1  ;;  %v1569_v41 = vrot.slane %v1568_v38, 2 }
  0x34   : > { %v1573_v36 = vrot.slane %v1571_v33, 7 }
  0x35   : > { %2288 = vmatpush3.bf16.msra.mxu1 %v2521_v42  ;;  %v2162_v42 = vld.sshfl [vmem:[%s2695_s12 + $0x14] sm:$0x12 pattern:$0x76325410] }
  0x36   : > { %2366 = vmatpush3.bf16.msra.mxu0 %v2520_v46  ;;  %2289 = vmatprep.subr.bf16.mxu1 %v2607_v1  ;;  %v1739_v44 = vcombine.high %v2162_v42, %v2162_v42  ;;  %v2166_v46 = vrot.slane %v2162_v42, 9  ;;  %v1574_v51 = vsel %vm2739_vm7, %v1569_v41, %v1573_v36 }
  0x37   : > { %2367 = vmatprep.subr.bf16.mxu0 %v2607_v1  ;;  %v1592_v53 = vcombine.low %v2774_v24, %v1574_v51  ;;  %v2547_v24 = vld [vmem:[%s3106_s1 + $0xb8] sm:$0xff]  }
  0x39   : > { %2290 = vmatpush3.bf16.msra.mxu1 %v2523_v50  ;;  %v2545_v50 = vld [vmem:[%s3106_s1 + $0xb0] sm:$0xff]   ;;  %v2949_v56 = vrot.slane %v1592_v53, %v2759_v10 }
  0x3a   : > { %2368 = vmatpush3.bf16.msra.mxu0 %v2522_v52  ;;  %2291 = vmatprep.subr.bf16.mxu1 %v2607_v1  ;;  %v2544_v52 = vld [vmem:[%s3106_s1 + $0x1a8] sm:$0xff]  }
  0x3b   : > { %2369 = vmatprep.subr.bf16.mxu0 %v2607_v1  ;;  %v1607_v39 = vcombine.low %v2766_v20, %v2949_v56  ;;  %v2572_v20 = vld [vmem:[%s3106_s1 + $0x218] sm:$0xff]  }
  0x3d   : > { %2292 = vmatpush3.bf16.msra.mxu1 %v2525_v55  ;;  %v708_v55 = vrot.slane %v700_v43, %v2759_v10 }
  0x3e   : > { %2370 = vmatpush3.bf16.msra.mxu0 %v2524_v54  ;;  %2293 = vmatprep.subr.bf16.mxu1 %v2607_v1  ;;  %v1754_v54 = vrot.slane %v1739_v44, 7 }
  0x3f   : > { %2371 = vmatprep.subr.bf16.mxu0 %v2607_v1  ;;  %v716_v49 = vcombine.low %v708_v55, %v2946_v45 }
  0x40   : > { %v1755_v57 = vsel %vm2800_vm14, %v2166_v46, %v1754_v54 }
  0x41   : > { %2294 = vmatpush3.bf16.msra.mxu1 %v2527_v62  ;;  %v1773_v60 = vcombine.low %v2855_v2, %v1755_v57  ;;  %v2552_v2 = vld [vmem:[%s3106_s1 + $0x1c0] sm:$0xff]  }
  0x42   : > { %2372 = vmatpush3.bf16.msra.mxu0 %v2526_v63  ;;  %2295 = vmatprep.subr.bf16.mxu1 %v2607_v1  ;;  %v2548_v63 = vld [vmem:[%s3106_s1 + $0x1b8] sm:$0xff]  }
  0x43   : > { %2373 = vmatprep.subr.bf16.mxu0 %v2607_v1  ;;  %v2967_v48 = vrot.slane %v1773_v60, %v2759_v10  ;;  %v1386_v10 = vcombine.low %v2579_v58, %v2580_v59 }
  0x45   : > { %2296 = vmatpush3.bf16.msra.mxu1 %v2529_v3  ;;  %v1788_v62 = vcombine.low %v2946_v45, %v2967_v48  ;;  %v2555_v3 = vld [vmem:[%s3106_s1 + $0xd0] sm:$0xff]  }
  0x46   : > { %2374 = vmatpush3.bf16.msra.mxu0 %v2528_v6  ;;  %2301 = vmatprep.subr.bf16.mxu1 %v2607_v1  ;;  %v2556_v6 = vld [vmem:[%s3106_s1 + $0x1d0] sm:$0xff]  }
  0x47   : > { %2375 = vmatprep.subr.bf16.mxu0 %v2607_v1 }
  0x48   : > { %2298 = vmatmul.mubr.bf16.vlgmr.msra.gmra.mrb[0].mxu1 %v530_v7  ;;  %v2559_v7 = vld [vmem:[%s3106_s1 + $0xe0] sm:$0xff]  }
  0x49   : > { %2302 = vmatpush3.bf16.msra.mxu1 %v2533_v8  ;;  %2317 = vmatprep.mubr.msk.bf16.mxu1 %vm2608_vm0, %v2607_v1  ;;  %v2558_v8 = vld [vmem:[%s3106_s1 + $0x1d8] sm:$0xff]  }
  0x4a   : > { %2376 = vmatpush3.bf16.msra.mxu0 %v2530_v12  ;;  %2303 = vmatprep.subr.bf16.mxu1 %v2607_v1  ;;  %v2581_v12 = vld.sshfl [vmem:[%s2695_s12 + $0x4] sm:$0xf pattern:$0x76325410] }
  0x4b   : > { %2381 = vmatprep.subr.bf16.mxu0 %v2607_v1 }
  0x4d   : > { %2378 = vmatmul.mubr.bf16.vlgmr.msra.gmra.mrb[0].mxu0 %v1252_v13  ;;  %2304 = vmatpush3.bf16.msra.mxu1 %v2535_v14  ;;  %v2582_v13 = vld.sshfl [vmem:[%s2695_s12 + $0xc] sm:$0xf pattern:$0x76325410] }
  0x4e   : > { %2382 = vmatpush3.bf16.msra.mxu0 %v2534_v15  ;;  %2305 = vmatprep.subr.bf16.mxu1 %v2607_v1  ;;  %v2563_v14 = vld [vmem:[%s3106_s1 + $0xf0] sm:$0xff]   ;;  %v2562_v15 = vld [vmem:[%s3106_s1 + $0x1e8] sm:$0xff]  }
  0x4f   : > { %2383 = vmatprep.subr.bf16.mxu0 %v2607_v1  ;;  %2397 = vmatprep.mubr.msk.bf16.mxu0 %vm2608_vm0, %v2607_v1 }
  0x51   : > { %2306 = vmatpush3.bf16.msra.mxu1 %v2537_v17  ;;  %v2564_v17 = vld [vmem:[%s3106_s1 + $0x1f0] sm:$0xff]  }
  0x52   : > { %2384 = vmatpush3.bf16.msra.mxu0 %v2536_v18  ;;  %2307 = vmatprep.subr.bf16.mxu1 %v2607_v1  ;;  %v850_v18 = vcombine.low %v2581_v12, %v2582_v13 }
  0x53   : > { %2385 = vmatprep.subr.bf16.mxu0 %v2607_v1 }
  0x55   : > { %2308 = vmatpush3.bf16.msra.mxu1 %v2539_v19  ;;  %v2566_v19 = vld [vmem:[%s3106_s1 + $0x1f8] sm:$0xff]  }
  0x56   : > { %2386 = vmatpush3.bf16.msra.mxu0 %v2538_v22  ;;  %2309 = vmatprep.subr.bf16.mxu1 %v2607_v1  ;;  %v2570_v22 = vld [vmem:[%s3106_s1 + $0x208] sm:$0xff]  }
  0x57   : > { %2387 = vmatprep.subr.bf16.mxu0 %v2607_v1 }
  0x59   : > { %2310 = vmatpush3.bf16.msra.mxu1 %v2541_v23  ;;  %v2571_v23 = vld [vmem:[%s3106_s1 + $0x210] sm:$0xff]  }
  0x5a   : > { %2388 = vmatpush3.bf16.msra.mxu0 %v2540_v31  ;;  %2311 = vmatprep.subr.bf16.mxu1 %v2607_v1 }
  0x5b   : > { %2389 = vmatprep.subr.bf16.mxu0 %v2607_v1 }
  0x5d   : > { %2312 = vmatpush3.bf16.msra.mxu1 %v2543_v35 }
  0x5e   : > { %2390 = vmatpush3.bf16.msra.mxu0 %v2542_v40  ;;  %2313 = vmatprep.subr.bf16.mxu1 %v2607_v1 }
  0x5f   : > { %2391 = vmatprep.subr.bf16.mxu0 %v2607_v1 }
  0x61   : > { %2314 = vmatpush3.bf16.msra.mxu1 %v2545_v50 }
  0x62   : > { %2392 = vmatpush3.bf16.msra.mxu0 %v2544_v52  ;;  %2315 = vmatprep.subr.bf16.mxu1 %v2607_v1 }
  0x63   : > { %2393 = vmatprep.subr.bf16.mxu0 %v2607_v1 }
  0x65   : > { %2316 = vmatpush3.bf16.msra.mxu1 %v2547_v24 }
  0x66   : > { %2394 = vmatpush3.bf16.msra.mxu0 %v2546_v47  ;;  %2321 = vmatprep.subr.bf16.mxu1 %v2607_v1 }
  0x67   : > { %2395 = vmatprep.subr.bf16.mxu0 %v2607_v1 }
  0x68   : > { %2318 = vmatmul.mubr.bf16.vlgmr.msra.gmra.mrb[0].mxu1 %v716_v49 }
  0x69   : > { %2322 = vmatpush3.bf16.msra.mxu1 %v2549_v61  ;;  %2337 = vmatprep.mubr.msk.bf16.mxu1 %vm2608_vm0, %v2607_v1 }
  0x6a   : > { %2396 = vmatpush3.bf16.msra.mxu0 %v2548_v63  ;;  %2323 = vmatprep.subr.bf16.mxu1 %v2607_v1 }
  0x6b   : > { %2401 = vmatprep.subr.bf16.mxu0 %v2607_v1 }
  0x6d   : > { %2398 = vmatmul.mubr.bf16.vlgmr.msra.gmra.mrb[0].mxu0 %v1386_v10  ;;  %2324 = vmatpush3.bf16.msra.mxu1 %v2553_v0 }
  0x6e   : > { %2402 = vmatpush3.bf16.msra.mxu0 %v2552_v2  ;;  %2325 = vmatprep.subr.bf16.mxu1 %v2607_v1 }
  0x6f   : > { %2403 = vmatprep.subr.bf16.mxu0 %v2607_v1  ;;  %2417 = vmatprep.mubr.msk.bf16.mxu0 %vm2608_vm0, %v2607_v1 }
  0x71   : > { %2326 = vmatpush3.bf16.msra.mxu1 %v2555_v3 }
  0x72   : > { %2404 = vmatpush3.bf16.msra.mxu0 %v2554_v4  ;;  %2327 = vmatprep.subr.bf16.mxu1 %v2607_v1 }
  0x73   : > { %2405 = vmatprep.subr.bf16.mxu0 %v2607_v1 }
  0x75   : > { %2328 = vmatpush3.bf16.msra.mxu1 %v2557_v5 }
  0x76   : > { %2406 = vmatpush3.bf16.msra.mxu0 %v2556_v6  ;;  %2329 = vmatprep.subr.bf16.mxu1 %v2607_v1 }
  0x77   : > { %2407 = vmatprep.subr.bf16.mxu0 %v2607_v1 }
  0x79   : > { %2330 = vmatpush3.bf16.msra.mxu1 %v2559_v7 }
  0x7a   : > { %2408 = vmatpush3.bf16.msra.mxu0 %v2558_v8  ;;  %2331 = vmatprep.subr.bf16.mxu1 %v2607_v1 }
  0x7b   : > { %2409 = vmatprep.subr.bf16.mxu0 %v2607_v1 }
  0x7d   : > { %2332 = vmatpush3.bf16.msra.mxu1 %v2561_v9 }
  0x7e   : > { %2410 = vmatpush3.bf16.msra.mxu0 %v2560_v11  ;;  %2333 = vmatprep.subr.bf16.mxu1 %v2607_v1 }
  0x7f   : > { %2411 = vmatprep.subr.bf16.mxu0 %v2607_v1 }
  0x81   : > { %2334 = vmatpush3.bf16.msra.mxu1 %v2563_v14 }
  0x82   : > { %2412 = vmatpush3.bf16.msra.mxu0 %v2562_v15  ;;  %2335 = vmatprep.subr.bf16.mxu1 %v2607_v1 }
  0x83   : > { %2413 = vmatprep.subr.bf16.mxu0 %v2607_v1 }
  0x85   : > { %2336 = vmatpush3.bf16.msra.mxu1 %v2565_v16 }
  0x86   : > { %2414 = vmatpush3.bf16.msra.mxu0 %v2564_v17 }
  0x87   : > { %2415 = vmatprep.subr.bf16.mxu0 %v2607_v1 }
  0x88   : > { %2338 = vmatmul.mubr.bf16.vlgmr.msra.gmra.mrb[0].mxu1 %v850_v18 }
  0x8a   : > { %2416 = vmatpush3.bf16.msra.mxu0 %v2566_v19 }
  0x8b   : > { %2421 = vmatprep.subr.bf16.mxu0 %v2607_v1 }
  0x8d   : > { %2418 = vmatmul.mubr.bf16.vlgmr.msra.gmra.mrb[0].mxu0 %v1607_v39 }
  0x8e   : > { %2422 = vmatpush3.bf16.msra.mxu0 %v2569_v21  ;;  %2437 = vmatprep.mubr.msk.bf16.mxu0 %vm2608_vm0, %v2607_v1 }
  0x8f   : > { %2423 = vmatprep.subr.bf16.mxu0 %v2607_v1 }
  0x92   : > { %2424 = vmatpush3.bf16.msra.mxu0 %v2570_v22 }
  0x93   : > { %2425 = vmatprep.subr.bf16.mxu0 %v2607_v1 }
  0x96   : > { %2426 = vmatpush3.bf16.msra.mxu0 %v2571_v23 }
  0x97   : > { %2427 = vmatprep.subr.bf16.mxu0 %v2607_v1 }
  0x9a   : > { %2428 = vmatpush3.bf16.msra.mxu0 %v2572_v20 }
  0x9b   : > { %2429 = vmatprep.subr.bf16.mxu0 %v2607_v1 }
  0x9e   : > { %2430 = vmatpush3.bf16.msra.mxu0 %v2573_v25 }
  0x9f   : > { %2431 = vmatprep.subr.bf16.mxu0 %v2607_v1 }
  0xa2   : > { %2432 = vmatpush3.bf16.msra.mxu0 %v2574_v26 }
  0xa3   : > { %2433 = vmatprep.subr.bf16.mxu0 %v2607_v1 }
  0xa6   : > { %2434 = vmatpush3.bf16.msra.mxu0 %v2575_v27 }
  0xa7   : > { %2435 = vmatprep.subr.bf16.mxu0 %v2607_v1  ;;  %v2176_v1 = vld [vmem:[%s3108_s3] ss:$0 sm:$0xff] }
  0xaa   : > { %2436 = vmatpush3.bf16.msra.mxu0 %v2576_v28 }
  0xad   : > { %2438 = vmatmul.mubr.bf16.vlgmr.msra.gmra.mrb[0].mxu0 %v1788_v62 }
 0x15b   : > { %v934_v29 = vpop.f32.mrb[0].mxu1 }
 0x15c   : > { %v2339_v30 = vpop.f32.mrb[1].mxu1 }
 0x15d   : > { %v937_v31 = vpop.f32.mrb[2].mxu1 }
 0x15e   : > { %v2340_v32 = vpop.f32.mrb[3].mxu1 }
 0x180   : > { %v1872_v33 = vpop.f32.mrb[0].mxu0 }
 0x181   : > { %v2441_v35 = vadd.f32 %v1872_v33, %v934_v29  ;;  %v2439_v36 = vpop.f32.mrb[1].mxu0 }
 0x182   : > { %v1875_v37 = vpop.f32.mrb[2].mxu0 }
 0x183   : > { %v1888_v38 = vmul.f32 %v2441_v35, %v2175_v34  ;;  %v2442_v40 = vadd.f32 %v1875_v37, %v937_v31  ;;  %v2440_v41 = vpop.f32.mrb[3].mxu0 }
 0x185   : > { %v1897_v42 = vadd.f32 %v2176_v1, %v1888_v38  ;;  %v1889_v43 = vmul.f32 %v2442_v40, %v2175_v34 }
 0x187   : > { %v1899_v44 = vmax.f32 %v1897_v42, 0.0  ;;  %v1898_v46 = vadd.f32 %v2176_v1, %v1889_v43 }
 0x189   : > { %v1903_v50 = vcombine.high %v1899_v44, %v1899_v44  ;;  %v1907_v51 = vpack.c.bf16 %v1899_v44, %v1899_v44  ;;  %v1900_v52 = vmax.f32 %v1898_v46, 0.0 }
 0x18b   : > { %v1908_v53 = vpack.c.bf16 %v1903_v50, %v1903_v50  ;;  %1911 = vst [vmem:[%s262_s24] sm:$0x3] %v1907_v51  ;;  %v1904_v54 = vcombine.high %v1900_v52, %v1900_v52  ;;  %v1909_v55 = vpack.c.bf16 %v1900_v52, %v1900_v52 }
 0x18d   : > { %1912 = vst [vmem:[%s262_s24 + $0x2] sm:$0x3] %v1908_v53  ;;  %v1910_v45 = vpack.c.bf16 %v1904_v54, %v1904_v54  ;;  %1913 = vst [vmem:[%s262_s24 + $0x4] sm:$0x3] %v1909_v55 }
 0x18f   : > { %1914 = vst [vmem:[%s262_s24 + $0x6] sm:$0x3] %v1910_v45 }
 0x190 PF: > { %s14_s17 = sadd.s32 1, %s2605_s17   ;;  %s3118_s15 = smov %s2601_s16 }
 0x191   : > { %p11_p5 = scmp.ge.s32.totalorder %s14_s17, 4   ;;  %s3119_s16 = smov %s3121_s18 }
 0x193   :  { %13 = sbr.rel (!%p11_p5) target bundleno = 2 (0x2), region = 77 }

// kernel: _lambda_.38
= control target key start
LH: loop header
LB: loop body
LE: loop exit
PB: predicated region body
PF: predicated region fallthrough
CT: control target
= control target key end

     0   :  { %s192_s6 = smov 0   ;;  %s212_s0 = inlined_call_operand.vmem [shape: bf16[2,2,1,256], index: 0, kind: input, shape index: {}]   ;;  %s213_s1 = inlined_call_operand.vmem [shape: bf16[2,1,128], index: 1, kind: output, shape index: {}]  }
   0x1 LB: > { %s171_s7 = sadd.s32 4294967295, %s194_s6   ;;  %p175_p0 = scmp.ge.s32.totalorder %s194_s6, 1  ;;  %s194_s6 = sphi %s192_s6, %s11_s6  }
   0x2   : > { %p86_p1 = scmp.lt.s32.totalorder %s194_s6, 3 }
   0x4   : > { %p87_p2 = pnand %p175_p0, %p86_p1 }
   0x5   : > { %p103_p3 = scmp.lt.s32.totalorder (!%p87_p2), %s171_s7, 1  ;;  %vm118_vm0 = vcmask (!%p87_p2), 1040384   ;;  %vm119_vm1 = vsmask.f32 (!%p87_p2), 256 }
   0x6   : > { %90 = sbr.rel (%p87_p2) target bundleno = 25 (0x19), region = 24  ;;  %vm120_vm2 = vmand (!%p87_p2), %vm118_vm0, %vm119_vm1 }
   0xd   : > { %s215_s7 = smov (!%p103_p3, %s171_s7), 1 }
   0xe   : > { %s176_s8 = sshll.u32 %s215_s7, 2  ;;  %s109_s14 = scalar_lea.vmem %s213_s1, %s215_s7 }
   0xf   : > { %s106_s11 = scalar_lea.vmem %s212_s0, %s176_s8  ;;  %v121_v4 = vld [vmem:[%s109_s14] sm:$0x1] }
  0x10   : > { %v110_v0 = vld [vmem:[%s106_s11] sm:$0x3]  ;;  %v177_v1 = vld [vmem:[%s106_s11 + $0x2] sm:$0x3] }
  0x11   : > { %v113_v2 = vmax.bf16 %v177_v1, %v110_v0 }
  0x13   : > { %v115_v3 = vrot.slane %v113_v2, 1 }
  0x15   : > { %v117_v5 = vmax.bf16 %v115_v3, %v113_v2 }
  0x17   : > { %v122_v6 = vsel %vm120_vm2, %v117_v5, %v121_v4 }
  0x18   : > { %123 = vst [vmem:[%s109_s14] sm:$0x1] %v122_v6 }
  0x19 PF: > { %s11_s6 = sadd.s32 1, %s194_s6  }
  0x1a   : > { %p8_p4 = scmp.ge.s32.totalorder %s11_s6, 4  }
  0x1c   :  { %10 = sbr.rel (!%p8_p4) target bundleno = 1 (0x1), region = 55 }

// kernel: _lambda_.27
= control target key start
LH: loop header
LB: loop body
LE: loop exit
PB: predicated region body
PF: predicated region fallthrough
CT: control target
= control target key end

     0   :  { %s7267_s15 = smov 0   ;;  %s7269_s16 = smov 0   ;;  %s9169_s0 = inlined_call_operand.vmem [shape: bf16[2,18,18,128], index: 0, kind: input, shape index: {}]   ;;  %s9170_s1 = inlined_call_operand.vmem [shape: bf16[1152,128], index: 1, kind: input, shape index: {}]   ;;  %s9171_s2 = inlined_call_operand.vmem [shape: f32[1,128], index: 2, kind: input, shape index: {}]   ;;  %s9172_s3 = inlined_call_operand.vmem [shape: f32[1,128], index: 3, kind: input, shape index: {}]   ;;  %s9173_s4 = inlined_call_operand.vmem [shape: bf16[2,16,16,128], index: 4, kind: output, shape index: {}]  }
   0x1   :  { %s7271_s17 = smov 0  }
   0x2 LB: > { %s26_s18 = sadd.s32 1, %s7236_s16  ;;  %p5459_p0 = scmp.ge.s32.totalorder %s7240_s17, 1  ;;  %s7240_s17 = sphi %s7271_s17, %s14_s17   ;;  %s7236_s16 = sphi %s7269_s16, %s9241_s16   ;;  %s7232_s15 = sphi %s7267_s15, %s9240_s15  }
   0x3   : > { %p28_p1 = scmp.ge.s32.totalorder %s26_s18, 2  ;;  %p201_p2 = scmp.lt.s32.totalorder %s7240_s17, 3 }
   0x5   : > { %s9243_s18 = smov (%p28_p1, %s26_s18), 0  ;;  %p202_p3 = pnand %p5459_p0, %p201_p2 }
   0x7   : > { %205 = sbr.rel (%p202_p3) target bundleno = 592 (0x250), region = 36 }
   0xe   : > { %v7028_v0 = vld [vmem:[%s9170_s1 + $0x40] sm:$0xff]   ;;  %p240_p4 = scmp.lt.s32.totalorder %s7232_s15, 1  ;;  %v7030_v2 = vld [vmem:[%s9170_s1 + $0x48] sm:$0xff]   ;;  %v7032_v4 = vld [vmem:[%s9170_s1 + $0x50] sm:$0xff]   ;;  %vm328_vm0 = vsmask.f32 3328 }
   0xf   : > { %v7029_v1 = vld [vmem:[%s9170_s1 + $0x100] sm:$0xff]   ;;  %6299 = vmatprep.subr.bf16.mxu1 %v7028_v0  ;;  %v7031_v3 = vld [vmem:[%s9170_s1 + $0x108] sm:$0xff]   ;;  %v7033_v5 = vld [vmem:[%s9170_s1 + $0x110] sm:$0xff]   ;;  %vm329_vm1 = vsmask.f32 7440  ;;  %vm1357_vm3 = vcmask 1042432  }
  0x10   : > { %6491 = vmatprep.subr.bf16.mxu0 %v7029_v1  ;;  %6300 = vmatpush3.bf16.msra.mxu1 %v7028_v0  ;;  %s9245_s15 = smov (!%p240_p4, %s7232_s15), 1  ;;  %v7034_v6 = vld [vmem:[%s9170_s1 + $0x58] sm:$0xff]   ;;  %v7036_v8 = vld [vmem:[%s9170_s1 + $0x60] sm:$0xff]   ;;  %v7038_v10 = vld [vmem:[%s9170_s1 + $0x68] sm:$0xff]   ;;  %vm1358_vm4 = vcmask 1046532  }
  0x11   : > { %6492 = vmatpush3.bf16.msra.mxu0 %v7029_v1  ;;  %6301 = vmatprep.subr.bf16.mxu1 %v7030_v2  ;;  %v7035_v7 = vld [vmem:[%s9170_s1 + $0x118] sm:$0xff]   ;;  %s7003_s9 = smul.u32 216, %s9245_s15  ;;  %v7037_v9 = vld [vmem:[%s9170_s1 + $0x120] sm:$0xff]   ;;  %v7039_v11 = vld [vmem:[%s9170_s1 + $0x128] sm:$0xff]   ;;  %s5955_s12 = sshll.u32 %s9245_s15, 7 }
  0x12   : > { %6493 = vmatprep.subr.bf16.mxu0 %v7031_v3  ;;  %v7040_v25 = vld [vmem:[%s9170_s1 + $0x70] sm:$0xff]   ;;  %v7042_v36 = vld [vmem:[%s9170_s1 + $0x78] sm:$0xff]   ;;  %vm7353_vm2 = vmor %vm328_vm0, %vm329_vm1  ;;  %s9081_s19 = scalar_lea.vmem %s9173_s4, %s5955_s12 }
  0x13   : > { %s7321_s20 = scalar_lea.vmem %s9169_s0, %s7003_s9  ;;  %v7041_v30 = vld [vmem:[%s9170_s1 + $0x130] sm:$0xff]   ;;  %v7043_v51 = vld [vmem:[%s9170_s1 + $0x138] sm:$0xff]   ;;  %vm7599_vm5 = vmor %vm1357_vm3, %vm1358_vm4 }
  0x14   : > { %6302 = vmatpush3.bf16.msra.mxu1 %v7030_v2  ;;  %v264_v12 = vld [vmem:[%s7321_s20] sm:$0xf]  ;;  %v265_v13 = vld [vmem:[%s7321_s20 + $0x4] sm:$0xf]  ;;  %v312_v14 = vld [vmem:[%s7321_s20 + $0x8] sm:$0x1] }
  0x15   : > { %6494 = vmatpush3.bf16.msra.mxu0 %v7031_v3  ;;  %6303 = vmatprep.subr.bf16.mxu1 %v7032_v4  ;;  %v332_v15 = vshrl.u32 %v264_v12, 16  ;;  %v335_v16 = vshll.u32 %v264_v12, 16  ;;  %v341_v17 = vshll.u32 %v265_v13, 16  ;;  %v345_v18 = vshrl.u32 %v265_v13, 16  ;;  %v5607_v20 = vld [vmem:[%s7321_s20 + $0xc] sm:$0xf] }
  0x16   : > { %6495 = vmatprep.subr.bf16.mxu0 %v7033_v5  ;;  %v351_v19 = vshll.u32 %v312_v14, 16  ;;  %v7334_v23 = vld [vmem:[%s7321_s20 + $0x10] sm:$0xf]  ;;  %v7337_v24 = vld [vmem:[%s7321_s20 + $0x14] sm:$0x1]  ;;  %v2228_v29 = vshrl.u32 %v5607_v20, 16 }
  0x17   : > { %v334_v21 = vrot.slane %v332_v15, 4  ;;  %v337_v22 = vrot.slane %v335_v16, 5  ;;  %v343_v26 = vrot.slane %v341_v17, 5  ;;  %v347_v27 = vrot.slane %v345_v18, 4  ;;  %v266_v35 = vld [vmem:[%s7321_s20 + $0xc] sm:$0xf] }
  0x18   : > { %6304 = vmatpush3.bf16.msra.mxu1 %v7032_v4  ;;  %v353_v28 = vrot.slane %v351_v19, 5  ;;  %v2231_v32 = vshll.u32 %v5607_v20, 16  ;;  %v2237_v33 = vshll.u32 %v7334_v23, 16  ;;  %v2241_v34 = vshrl.u32 %v7334_v23, 16  ;;  %v267_v42 = vld [vmem:[%s7321_s20 + $0x10] sm:$0xf] }
  0x19   : > { %6496 = vmatpush3.bf16.msra.mxu0 %v7033_v5  ;;  %6305 = vmatprep.subr.bf16.mxu1 %v7034_v6  ;;  %v338_v31 = vor.u32 %v337_v22, %v334_v21  ;;  %v348_v38 = vor.u32 %v347_v27, %v343_v26  ;;  %v2230_v39 = vrot.slane %v2228_v29, 4  ;;  %v2247_v40 = vshll.u32 %v7337_v24, 16  ;;  %v313_v55 = vld [vmem:[%s7321_s20 + $0x14] sm:$0x1]  ;;  %v5610_v57 = vld [vmem:[%s7321_s20 + $0x18] sm:$0xf] }
  0x1a   : > { %6497 = vmatprep.subr.bf16.mxu0 %v7035_v7  ;;  %v3001_v41 = vrot.slane %v7337_v24, 5  ;;  %v2233_v44 = vrot.slane %v2231_v32, 5  ;;  %v2239_v45 = vrot.slane %v2237_v33, 5  ;;  %v2243_v46 = vrot.slane %v2241_v34, 4  ;;  %v7370_v62 = vld [vmem:[%s7321_s20 + $0x1c] sm:$0xf] }
  0x1b   : > { %v339_v43 = vrot.slane %v338_v31, 4  ;;  %v349_v47 = vrot.slane %v348_v38, 4  ;;  %v2249_v48 = vrot.slane %v2247_v40, 5  ;;  %v356_v49 = vshrl.u32 %v266_v35, 16  ;;  %v7044_v3 = vld [vmem:[%s9170_s1] sm:$0xff]  }
  0x1c   : > { %6306 = vmatpush3.bf16.msra.mxu1 %v7034_v6  ;;  %v359_v50 = vshll.u32 %v266_v35, 16  ;;  %v2234_v53 = vor.u32 %v2233_v44, %v2230_v39  ;;  %v2244_v54 = vor.u32 %v2243_v46, %v2239_v45  ;;  %v365_v56 = vshll.u32 %v267_v42, 16  ;;  %v7378_v4 = vld [vmem:[%s9170_s1 + $0x140] sm:$0xff]   ;;  %v268_v21 = vld [vmem:[%s7321_s20 + $0x18] sm:$0xf]  ;;  %v7047_v46 = vld [vmem:[%s9170_s1 + $0x8] sm:$0xff]  }
  0x1d   : > { %6498 = vmatpush3.bf16.msra.mxu0 %v7035_v7  ;;  %6307 = vmatprep.subr.bf16.mxu1 %v7036_v8  ;;  %v344_v52 = vsel %vm7353_vm2, %v339_v43, %v343_v26  ;;  %v354_v58 = vsel %vm7353_vm2, %v349_v47, %v353_v28  ;;  %v358_v59 = vrot.slane %v356_v49, 4  ;;  %v369_v61 = vshrl.u32 %v267_v42, 16  ;;  %v269_v28 = vld [vmem:[%s7321_s20 + $0x1c] sm:$0xf]  ;;  %v314_v33 = vld [vmem:[%s7321_s20 + $0x20] sm:$0x1] }
  0x1e   : > { %6499 = vmatprep.subr.bf16.mxu0 %v7037_v9  ;;  %v361_v60 = vrot.slane %v359_v50, 5  ;;  %v5463_v63 = vcombine.low %v344_v52, %v354_v58  ;;  %v2235_v0 = vrot.slane %v2234_v53, 4  ;;  %v2245_v1 = vrot.slane %v2244_v54, 4  ;;  %v5613_v39 = vld [vmem:[%s7321_s20 + $0x24] sm:$0xf] }
  0x1f   : > { %v367_v2 = vrot.slane %v365_v56, 5  ;;  %v371_v6 = vrot.slane %v369_v61, 4  ;;  %v375_v7 = vshll.u32 %v313_v55, 16  ;;  %v2255_v12 = vshll.u32 %v5610_v57, 16  ;;  %v270_v52 = vld [vmem:[%s7321_s20 + $0x24] sm:$0xf] }
  0x20   : > { %6308 = vmatpush3.bf16.msra.mxu1 %v7036_v8  ;;  %v362_v5 = vor.u32 %v361_v60, %v358_v59  ;;  %v7381_v8 = vld [vmem:[%s7321_s20 + $0x20] sm:$0x1]  ;;  %6315 = vmatprep.mubr.bf16.mxu1 %v5463_v63  ;;  %v2261_v19 = vshll.u32 %v7370_v62, 16  ;;  %v2265_v20 = vshrl.u32 %v7370_v62, 16  ;;  %v3005_v27 = vrot.slane %v7370_v62, 5  ;;  %v7046_v63 = vld [vmem:[%s9170_s1 + $0x148] sm:$0xff]  }
  0x21   : > { %6500 = vmatpush3.bf16.msra.mxu0 %v7037_v9  ;;  %6309 = vmatprep.subr.bf16.mxu1 %v7038_v10  ;;  %v2240_v9 = vsel %vm7353_vm2, %v2235_v0, %v2239_v45  ;;  %v372_v15 = vor.u32 %v371_v6, %v367_v2  ;;  %v377_v16 = vrot.slane %v375_v7, 5  ;;  %v2257_v18 = vrot.slane %v2255_v12, 5  ;;  %v7406_v45 = vld [vmem:[%s7321_s20 + $0x28] sm:$0xf] }
  0x22   : > { %6501 = vmatprep.subr.bf16.mxu0 %v7039_v11  ;;  %v363_v14 = vrot.slane %v362_v5, 4  ;;  %v2271_v26 = vshll.u32 %v7381_v8, 16  ;;  %v2267_v31 = vrot.slane %v2265_v20, 4  ;;  %v3008_v32 = vrot.slane %v7381_v8, 5  ;;  %v271_v5 = vld [vmem:[%s7321_s20 + $0x28] sm:$0xf] }
  0x23   : > { %v380_v38 = vshrl.u32 %v268_v21, 16  ;;  %v383_v44 = vshll.u32 %v268_v21, 16  ;;  %v393_v49 = vshrl.u32 %v269_v28, 16  ;;  %v399_v50 = vshll.u32 %v314_v33, 16  ;;  %v7437_v33 = vld [vmem:[%s7321_s20 + $0x34] sm:$0xf] }
  0x24   : > { %6310 = vmatpush3.bf16.msra.mxu1 %v7038_v10  ;;  %v2250_v10 = vsel %vm7353_vm2, %v2245_v1, %v2249_v48  ;;  %v368_v22 = vsel %vm7353_vm2, %v363_v14, %v367_v2  ;;  %v2273_v35 = vrot.slane %v2271_v26, 5  ;;  %v389_v48 = vshll.u32 %v269_v28, 16 }
  0x25   : > { %6502 = vmatpush3.bf16.msra.mxu0 %v7039_v11  ;;  %6311 = vmatprep.subr.bf16.mxu1 %v7040_v25  ;;  %v2252_v11 = vshrl.u32 %v5610_v57, 16  ;;  %v5655_v13 = vcombine.low %v2240_v9, %v2250_v10  ;;  %v382_v47 = vrot.slane %v380_v38, 4  ;;  %v385_v55 = vrot.slane %v383_v44, 5 }
  0x26   : > { %6503 = vmatprep.subr.bf16.mxu0 %v7041_v30  ;;  %v2276_v56 = vshrl.u32 %v5613_v39, 16  ;;  %v391_v57 = vrot.slane %v389_v48, 5  ;;  %v395_v58 = vrot.slane %v393_v49, 4  ;;  %v401_v59 = vrot.slane %v399_v50, 5  ;;  %v7049_v48 = vld [vmem:[%s9170_s1 + $0x158] sm:$0xff]  }
  0x27   : > { %v2254_v17 = vrot.slane %v2252_v11, 4  ;;  %6507 = vmatprep.mubr.bf16.mxu0 %v5655_v13  ;;  %v2279_v60 = vshll.u32 %v5613_v39, 16  ;;  %v386_v0 = vor.u32 %v385_v55, %v382_v47  ;;  %v2285_v2 = vshll.u32 %v7406_v45, 16  ;;  %v315_v11 = vld [vmem:[%s7321_s20 + $0x2c] sm:$0x1] }
  0x28   : > { %6312 = vmatpush3.bf16.msra.mxu1 %v7040_v25  ;;  %v373_v25 = vrot.slane %v372_v15, 4  ;;  %v2278_v1 = vrot.slane %v2276_v56, 4  ;;  %v396_v7 = vor.u32 %v395_v58, %v391_v57  ;;  %v2289_v10 = vshrl.u32 %v7406_v45, 16 }
  0x29   : > { %6504 = vmatpush3.bf16.msra.mxu0 %v7041_v30  ;;  %6313 = vmatprep.subr.bf16.mxu1 %v7042_v36  ;;  %v2258_v29 = vor.u32 %v2257_v18, %v2254_v17  ;;  %v2263_v30 = vrot.slane %v2261_v19, 5  ;;  %v2281_v9 = vrot.slane %v2279_v60, 5  ;;  %v387_v12 = vrot.slane %v386_v0, 4  ;;  %v7056_v60 = vld [vmem:[%s9170_s1 + $0x20] sm:$0xff]  }
  0x2a   : > { %6505 = vmatprep.subr.bf16.mxu0 %v7043_v51  ;;  %v378_v34 = vsel %vm7353_vm2, %v373_v25, %v377_v16  ;;  %v2287_v13 = vrot.slane %v2285_v2, 5  ;;  %v404_v15 = vshrl.u32 %v270_v52, 16  ;;  %v5616_v16 = vld [vmem:[%s7321_s20 + $0x30] sm:$0xf]  ;;  %v397_v17 = vrot.slane %v396_v7, 4 }
  0x2b   : > { %v5464_v40 = vcombine.low %v368_v22, %v378_v34  ;;  %v2259_v42 = vrot.slane %v2258_v29, 4  ;;  %v2268_v43 = vor.u32 %v2267_v31, %v2263_v30  ;;  %v2282_v18 = vor.u32 %v2281_v9, %v2278_v1  ;;  %v7053_v34 = vld [vmem:[%s9170_s1 + $0x18] sm:$0xff]  }
  0x2c   : > { %6314 = vmatpush3.bf16.msra.mxu1 %v7042_v36  ;;  %v7402_v36 = vrot.slane %v3005_v27, 4  ;;  %v2291_v19 = vrot.slane %v2289_v10, 4  ;;  %v407_v20 = vshll.u32 %v270_v52, 16  ;;  %v392_v21 = vsel %vm7353_vm2, %v387_v12, %v391_v57  ;;  %v316_v2 = vld [vmem:[%s7321_s20 + $0x38] sm:$0x1] }
  0x2d   : > { %6506 = vmatpush3.bf16.msra.mxu0 %v7043_v51  ;;  %6347 = vmatprep.subr.bf16.mxu1 %v7044_v3  ;;  %v7412_v51 = vld [vmem:[%s7321_s20 + $0x2c] sm:$0x1]  ;;  %v2264_v53 = vsel %vm7353_vm2, %v2259_v42, %v2263_v30  ;;  %v2269_v54 = vrot.slane %v2268_v43, 4  ;;  %v406_v25 = vrot.slane %v404_v15, 4  ;;  %v413_v26 = vshll.u32 %v271_v5, 16 }
  0x2e   : > { %6539 = vmatprep.subr.bf16.mxu0 %v7378_v4  ;;  %v2295_v14 = vshll.u32 %v7412_v51, 16  ;;  %v402_v28 = vsel %vm7353_vm2, %v397_v17, %v401_v59  ;;  %v2283_v29 = vrot.slane %v2282_v18, 4  ;;  %v2292_v30 = vor.u32 %v2291_v19, %v2287_v13  ;;  %v273_v59 = vld [vmem:[%s7321_s20 + $0x34] sm:$0xf]  ;;  %v5619_v9 = vld [vmem:[%s7321_s20 + $0x3c] sm:$0xf] }
  0x2f   : > { %6316 = vmatmul.mubr.bf16.vlgmr.msra.gmra.mrb[0].mxu1 %v5464_v40  ;;  %v2274_v61 = vsel %vm7353_vm2, %v2269_v54, %v2273_v35  ;;  %v409_v31 = vrot.slane %v407_v20, 5  ;;  %v5465_v35 = vcombine.low %v392_v21, %v402_v28  ;;  %v415_v38 = vrot.slane %v413_v26, 5  ;;  %v272_v54 = vld [vmem:[%s7321_s20 + $0x30] sm:$0xf]  ;;  %v7471_v19 = vld [vmem:[%s7321_s20 + $0x40] sm:$0xf] }
  0x30   : > { %6348 = vmatpush3.bf16.msra.mxu1 %v7044_v3  ;;  %v7050_v3 = vld [vmem:[%s9170_s1 + $0x10] sm:$0xff]   ;;  %v5656_v6 = vcombine.low %v2264_v53, %v2274_v61  ;;  %v2297_v22 = vrot.slane %v2295_v14, 5  ;;  %v417_v39 = vshrl.u32 %v271_v5, 16  ;;  %v423_v40 = vshll.u32 %v315_v11, 16  ;;  %v7058_v14 = vld [vmem:[%s9170_s1 + $0x28] sm:$0xff]   ;;  %v7051_v20 = vld [vmem:[%s9170_s1 + $0x160] sm:$0xff]  }
  0x31   : > { %6349 = vmatprep.subr.bf16.mxu1 %v7047_v46  ;;  %v2288_v42 = vsel %vm7353_vm2, %v2283_v29, %v2287_v13  ;;  %v2293_v43 = vrot.slane %v2292_v30, 4  ;;  %v410_v44 = vor.u32 %v409_v31, %v406_v25  ;;  %v2300_v47 = vshrl.u32 %v5616_v16, 16  ;;  %6319 = vmatprep.mubr.bf16.mxu1 %v5465_v35  ;;  %v7479_v28 = vld [vmem:[%s7321_s20 + $0x44] sm:$0x1]  ;;  %v7060_v35 = vld [vmem:[%s9170_s1 + $0x30] sm:$0xff]  }
  0x32   : > { %6508 = vmatmul.mubr.bf16.vlgmr.msra.gmra.mrb[0].mxu0 %v5656_v6  ;;  %v419_v49 = vrot.slane %v417_v39, 4  ;;  %v425_v50 = vrot.slane %v423_v40, 5  ;;  %v2303_v52 = vshll.u32 %v5616_v16, 16  ;;  %v2309_v53 = vshll.u32 %v7437_v33, 16 }
  0x33   : > { %6540 = vmatpush3.bf16.msra.mxu0 %v7378_v4  ;;  %v7048_v4 = vld [vmem:[%s9170_s1 + $0x150] sm:$0xff]   ;;  %v2298_v55 = vsel %vm7353_vm2, %v2293_v43, %v2297_v22  ;;  %v411_v56 = vrot.slane %v410_v44, 4  ;;  %v2302_v57 = vrot.slane %v2300_v47, 4  ;;  %v2313_v58 = vshrl.u32 %v7437_v33, 16 }
  0x34   : > { %6350 = vmatpush3.bf16.msra.mxu1 %v7047_v46  ;;  %6541 = vmatprep.subr.bf16.mxu0 %v7046_v63  ;;  %v7448_v46 = vld [vmem:[%s7321_s20 + $0x38] sm:$0x1]  ;;  %v5657_v61 = vcombine.low %v2288_v42, %v2298_v55  ;;  %v2305_v0 = vrot.slane %v2303_v52, 5  ;;  %v2311_v1 = vrot.slane %v2309_v53, 5  ;;  %v428_v7 = vshrl.u32 %v272_v54, 16 }
  0x35   : > { %6351 = vmatprep.subr.bf16.mxu1 %v7050_v3  ;;  %v416_v5 = vsel %vm7353_vm2, %v411_v56, %v415_v38  ;;  %v2319_v6 = vshll.u32 %v7448_v46, 16  ;;  %v431_v12 = vshll.u32 %v272_v54, 16  ;;  %v437_v13 = vshll.u32 %v273_v59, 16  ;;  %v275_v55 = vld [vmem:[%s7321_s20 + $0x40] sm:$0xf] }
  0x36   : > { %6511 = vmatprep.mubr.bf16.mxu0 %v5657_v61  ;;  %v2306_v11 = vor.u32 %v2305_v0, %v2302_v57  ;;  %v430_v17 = vrot.slane %v428_v7, 4  ;;  %v441_v18 = vshrl.u32 %v273_v59, 16  ;;  %v2324_v40 = vshrl.u32 %v5619_v9, 16 }
  0x37   : > { %6542 = vmatpush3.bf16.msra.mxu0 %v7046_v63  ;;  %v420_v63 = vor.u32 %v419_v49, %v415_v38  ;;  %v2321_v16 = vrot.slane %v2319_v6, 5  ;;  %v433_v25 = vrot.slane %v431_v12, 5  ;;  %v439_v26 = vrot.slane %v437_v13, 5 }
  0x38   : > { %6352 = vmatpush3.bf16.msra.mxu1 %v7050_v3  ;;  %6543 = vmatprep.subr.bf16.mxu0 %v7048_v4  ;;  %v2315_v3 = vrot.slane %v2313_v58, 4  ;;  %v2307_v22 = vrot.slane %v2306_v11, 4  ;;  %v443_v31 = vrot.slane %v441_v18, 4  ;;  %v2327_v42 = vshll.u32 %v5619_v9, 16  ;;  %v5622_v9 = vld [vmem:[%s7321_s20 + $0x48] sm:$0xf] }
  0x39   : > { %6353 = vmatprep.subr.bf16.mxu1 %v7053_v34  ;;  %v421_v10 = vrot.slane %v420_v63, 4  ;;  %v434_v39 = vor.u32 %v433_v25, %v430_v17  ;;  %v2333_v49 = vshll.u32 %v7471_v19, 16  ;;  %v2326_v53 = vrot.slane %v2324_v40, 4  ;;  %v317_v63 = vld [vmem:[%s7321_s20 + $0x44] sm:$0x1] }
  0x3a   : > { %v2316_v15 = vor.u32 %v2315_v3, %v2311_v1  ;;  %v2312_v38 = vsel %vm7353_vm2, %v2307_v22, %v2311_v1  ;;  %v444_v44 = vor.u32 %v443_v31, %v439_v26  ;;  %v2329_v54 = vrot.slane %v2327_v42, 5  ;;  %v7512_v22 = vld [vmem:[%s7321_s20 + $0x50] sm:$0x1]  ;;  %v7055_v31 = vld [vmem:[%s9170_s1 + $0x178] sm:$0xff]  }
  0x3b   : > { %6544 = vmatpush3.bf16.msra.mxu0 %v7048_v4  ;;  %v426_v21 = vsel %vm7353_vm2, %v421_v10, %v425_v50  ;;  %v447_v4 = vshll.u32 %v316_v2, 16  ;;  %v435_v52 = vrot.slane %v434_v39, 4  ;;  %v2335_v57 = vrot.slane %v2333_v49, 5  ;;  %v7062_v2 = vld [vmem:[%s9170_s1 + $0x38] sm:$0xff]  }
  0x3c   : > { %6354 = vmatpush3.bf16.msra.mxu1 %v7053_v34  ;;  %6545 = vmatprep.subr.bf16.mxu0 %v7049_v48  ;;  %v5466_v29 = vcombine.low %v416_v5, %v426_v21  ;;  %v2317_v30 = vrot.slane %v2316_v15, 4  ;;  %v274_v34 = vld [vmem:[%s7321_s20 + $0x3c] sm:$0xf]  ;;  %v445_v56 = vrot.slane %v444_v44, 4  ;;  %v2337_v58 = vshrl.u32 %v7471_v19, 16  ;;  %v7054_v15 = vld [vmem:[%s9170_s1 + $0x170] sm:$0xff]  }
  0x3d   : > { %6355 = vmatprep.subr.bf16.mxu1 %v7056_v60  ;;  %v449_v47 = vrot.slane %v447_v4, 5  ;;  %v2343_v59 = vshll.u32 %v7479_v28, 16  ;;  %v2330_v61 = vor.u32 %v2329_v54, %v2326_v53  ;;  %v452_v0 = vshrl.u32 %v274_v34, 16  ;;  %v7523_v4 = vld [vmem:[%s9170_s1 + $0x80] sm:$0xff]   ;;  %v277_v53 = vld [vmem:[%s7321_s20 + $0x4c] sm:$0xf] }
  0x3e   : > { %6320 = vmatmul.mubr.bf16.gmra.mrb[4].mxu1 %v5466_v29  ;;  %v2322_v43 = vsel %vm7353_vm2, %v2317_v30, %v2321_v16  ;;  %v455_v1 = vshll.u32 %v274_v34, 16  ;;  %v2339_v3 = vrot.slane %v2337_v58, 4  ;;  %v461_v7 = vshll.u32 %v275_v55, 16  ;;  %v276_v30 = vld [vmem:[%s7321_s20 + $0x48] sm:$0xf] }
  0x3f   : > { %6546 = vmatpush3.bf16.msra.mxu0 %v7049_v48  ;;  %v5658_v50 = vcombine.low %v2312_v38, %v2322_v43  ;;  %v7052_v48 = vld [vmem:[%s9170_s1 + $0x168] sm:$0xff]   ;;  %v450_v5 = vsel %vm7353_vm2, %v445_v56, %v449_v47  ;;  %v2345_v6 = vrot.slane %v2343_v59, 5  ;;  %v2331_v11 = vrot.slane %v2330_v61, 4  ;;  %v318_v54 = vld [vmem:[%s7321_s20 + $0x50] sm:$0x1] }
  0x40   : > { %6356 = vmatpush3.bf16.msra.mxu1 %v7056_v60  ;;  %6547 = vmatprep.subr.bf16.mxu0 %v7051_v20  ;;  %v440_v60 = vsel %vm7353_vm2, %v435_v52, %v439_v26  ;;  %v454_v12 = vrot.slane %v452_v0, 4  ;;  %v457_v13 = vrot.slane %v455_v1, 5  ;;  %v2340_v16 = vor.u32 %v2339_v3, %v2335_v57  ;;  %v5625_v58 = vld [vmem:[%s7321_s20 + $0x54] sm:$0xf]  ;;  %v7537_v0 = vld [vmem:[%s7321_s20 + $0x58] sm:$0xf] }
  0x41   : > { %6357 = vmatprep.subr.bf16.mxu1 %v7058_v14  ;;  %6512 = vmatmul.mubr.bf16.gmra.mrb[4].mxu0 %v5658_v50  ;;  %v5467_v10 = vcombine.low %v440_v60, %v450_v5  ;;  %v463_v17 = vrot.slane %v461_v7, 5  ;;  %v465_v18 = vshrl.u32 %v275_v55, 16  ;;  %v471_v21 = vshll.u32 %v317_v63, 16 }
  0x42   : > { %v458_v25 = vor.u32 %v457_v13, %v454_v12  ;;  %v2348_v26 = vshrl.u32 %v5622_v9, 16  ;;  %v2351_v29 = vshll.u32 %v5622_v9, 16  ;;  %v2341_v34 = vrot.slane %v2340_v16, 4 }
  0x43   : > { %6548 = vmatpush3.bf16.msra.mxu0 %v7051_v20  ;;  %6323 = vmatprep.mubr.bf16.mxu1 %v5467_v10  ;;  %v2336_v20 = vsel %vm7353_vm2, %v2331_v11, %v2335_v57  ;;  %v473_v38 = vrot.slane %v471_v21, 5  ;;  %v2367_v52 = vshll.u32 %v7512_v22, 16  ;;  %v476_v61 = vshrl.u32 %v276_v30, 16 }
  0x44   : > { %6358 = vmatpush3.bf16.msra.mxu1 %v7058_v14  ;;  %v7506_v14 = vld [vmem:[%s7321_s20 + $0x4c] sm:$0xf]  ;;  %6549 = vmatprep.subr.bf16.mxu0 %v7052_v48  ;;  %v459_v40 = vrot.slane %v458_v25, 4  ;;  %v2350_v42 = vrot.slane %v2348_v26, 4  ;;  %v2353_v43 = vrot.slane %v2351_v29, 5  ;;  %v2346_v47 = vsel %vm7353_vm2, %v2341_v34, %v2345_v6  ;;  %v7542_v6 = vld [vmem:[%s9170_s1 + $0x180] sm:$0xff]  }
  0x45   : > { %6359 = vmatprep.subr.bf16.mxu1 %v7060_v35  ;;  %v2357_v39 = vshll.u32 %v7506_v14, 16  ;;  %v2361_v44 = vshrl.u32 %v7506_v14, 16  ;;  %v5659_v55 = vcombine.low %v2336_v20, %v2346_v47  ;;  %v2369_v60 = vrot.slane %v2367_v52, 5  ;;  %v7549_v20 = vld [vmem:[%s7321_s20 + $0x5c] sm:$0x1] }
  0x46   : > { %v2354_v56 = vor.u32 %v2353_v43, %v2350_v42  ;;  %v479_v63 = vshll.u32 %v276_v30, 16  ;;  %v489_v3 = vshrl.u32 %v277_v53, 16  ;;  %v478_v9 = vrot.slane %v476_v61, 4  ;;  %v279_v43 = vld [vmem:[%s7321_s20 + $0x58] sm:$0xf] }
  0x47   : > { %6550 = vmatpush3.bf16.msra.mxu0 %v7052_v48  ;;  %v2359_v50 = vrot.slane %v2357_v39, 5  ;;  %v464_v48 = vsel %vm7353_vm2, %v459_v40, %v463_v17  ;;  %v2363_v57 = vrot.slane %v2361_v44, 4  ;;  %6515 = vmatprep.mubr.bf16.mxu0 %v5659_v55  ;;  %v495_v11 = vshll.u32 %v318_v54, 16  ;;  %v5628_v52 = vld [vmem:[%s7321_s20 + $0x60] sm:$0xf] }
  0x48   : > { %6360 = vmatpush3.bf16.msra.mxu1 %v7060_v35  ;;  %v467_v35 = vrot.slane %v465_v18, 4  ;;  %6551 = vmatprep.subr.bf16.mxu0 %v7054_v15  ;;  %v2355_v1 = vrot.slane %v2354_v56, 4  ;;  %v481_v10 = vrot.slane %v479_v63, 5  ;;  %v491_v18 = vrot.slane %v489_v3, 4 }
  0x49   : > { %6361 = vmatprep.subr.bf16.mxu1 %v7062_v2  ;;  %v2364_v5 = vor.u32 %v2363_v57, %v2359_v50  ;;  %v497_v21 = vrot.slane %v495_v11, 5  ;;  %v2372_v25 = vshrl.u32 %v5625_v58, 16  ;;  %v2375_v29 = vshll.u32 %v5625_v58, 16 }
  0x4a   : > { %v468_v49 = vor.u32 %v467_v35, %v463_v17  ;;  %v2360_v13 = vsel %vm7353_vm2, %v2355_v1, %v2359_v50  ;;  %v482_v17 = vor.u32 %v481_v10, %v478_v9  ;;  %v2381_v30 = vshll.u32 %v7537_v0, 16  ;;  %v278_v35 = vld [vmem:[%s7321_s20 + $0x54] sm:$0xf]  ;;  %v319_v50 = vld [vmem:[%s7321_s20 + $0x5c] sm:$0x1] }
  0x4b   : > { %6552 = vmatpush3.bf16.msra.mxu0 %v7054_v15  ;;  %v2365_v15 = vrot.slane %v2364_v5, 4  ;;  %v2385_v34 = vshrl.u32 %v7537_v0, 16  ;;  %v2374_v42 = vrot.slane %v2372_v25, 4  ;;  %v500_v55 = vshrl.u32 %v278_v35, 16  ;;  %v7577_v25 = vld [vmem:[%s7321_s20 + $0x60] sm:$0xf] }
  0x4c   : > { %6362 = vmatpush3.bf16.msra.mxu1 %v7062_v2  ;;  %v469_v59 = vrot.slane %v468_v49, 4  ;;  %v485_v2 = vshll.u32 %v277_v53, 16  ;;  %6553 = vmatprep.subr.bf16.mxu0 %v7055_v31  ;;  %v483_v39 = vrot.slane %v482_v17, 4  ;;  %v2383_v44 = vrot.slane %v2381_v30, 5  ;;  %v7573_v17 = vld [vmem:[%s7321_s20 + $0x68] sm:$0x1] }
  0x4d   : > { %6395 = vmatprep.subr.bf16.mxu1 %v7523_v4  ;;  %v2370_v26 = vsel %vm7353_vm2, %v2365_v15, %v2369_v60  ;;  %v2387_v47 = vrot.slane %v2385_v34, 4  ;;  %v2391_v49 = vshll.u32 %v7549_v20, 16  ;;  %v7564_v60 = vld [vmem:[%s7321_s20 + $0x64] sm:$0xf]  ;;  %v502_v63 = vrot.slane %v500_v55, 4 }
  0x4e   : > { %v474_v7 = vsel %vm7353_vm2, %v469_v59, %v473_v38  ;;  %v487_v16 = vrot.slane %v485_v2, 5  ;;  %v5660_v38 = vcombine.low %v2360_v13, %v2370_v26  ;;  %v509_v59 = vshll.u32 %v279_v43, 16 }
  0x4f   : > { %v5468_v12 = vcombine.low %v464_v48, %v474_v7  ;;  %6554 = vmatpush3.bf16.msra.mxu0 %v7055_v31  ;;  %v2377_v31 = vrot.slane %v2375_v29, 5  ;;  %v503_v48 = vshll.u32 %v278_v35, 16  ;;  %v2388_v57 = vor.u32 %v2387_v47, %v2383_v44  ;;  %v7580_v35 = vld [vmem:[%s7321_s20 + $0x64] sm:$0xf] }
  0x50   : > { %6587 = vmatprep.subr.bf16.mxu0 %v7542_v6  ;;  %v492_v40 = vor.u32 %v491_v18, %v487_v16  ;;  %6516 = vmatmul.mubr.bf16.gmra.mrb[8].mxu0 %v5660_v38  ;;  %v488_v53 = vsel %vm7353_vm2, %v483_v39, %v487_v16  ;;  %v2393_v58 = vrot.slane %v2391_v49, 5  ;;  %v513_v5 = vshrl.u32 %v279_v43, 16  ;;  %v320_v43 = vld [vmem:[%s7321_s20 + $0x68] sm:$0x1] }
  0x51   : > { %6324 = vmatmul.mubr.bf16.gmra.mrb[8].mxu1 %v5468_v12  ;;  %v2378_v56 = vor.u32 %v2377_v31, %v2374_v42  ;;  %v505_v1 = vrot.slane %v503_v48, 5  ;;  %v2389_v7 = vrot.slane %v2388_v57, 4  ;;  %v511_v9 = vrot.slane %v509_v59, 5 }
  0x52   : > { %v493_v54 = vrot.slane %v492_v40, 4  ;;  %v515_v11 = vrot.slane %v513_v5, 4  ;;  %v519_v12 = vshll.u32 %v319_v50, 16  ;;  %v2396_v13 = vshrl.u32 %v5628_v52, 16  ;;  %v5679_v50 = vld [vmem:[%s7321_s20 + $0xc] sm:$0xe] }
  0x53   : > { %v2379_v3 = vrot.slane %v2378_v56, 4  ;;  %v506_v10 = vor.u32 %v505_v1, %v502_v63  ;;  %v2394_v16 = vsel %vm7353_vm2, %v2389_v7, %v2393_v58  ;;  %v2399_v18 = vshll.u32 %v5628_v52, 16  ;;  %v7595_v5 = vld [vmem:[%s7321_s20 + $0x6c] sm:$0xf] }
  0x54   : > { %v498_v61 = vsel %vm7353_vm2, %v493_v54, %v497_v21  ;;  %v2405_v21 = vshll.u32 %v7564_v60, 16  ;;  %v516_v30 = vor.u32 %v515_v11, %v511_v9  ;;  %v521_v34 = vrot.slane %v519_v12, 5 }
  0x55   : > { %v5469_v2 = vcombine.low %v488_v53, %v498_v61  ;;  %v2384_v15 = vsel %vm7353_vm2, %v2379_v3, %v2383_v44  ;;  %v507_v29 = vrot.slane %v506_v10, 4  ;;  %v2398_v38 = vrot.slane %v2396_v13, 4 }
  0x56   : > { %v5661_v26 = vcombine.low %v2384_v15, %v2394_v16  ;;  %v2401_v39 = vrot.slane %v2399_v18, 5  ;;  %v2407_v40 = vrot.slane %v2405_v21, 5  ;;  %v2409_v42 = vshrl.u32 %v7564_v60, 16  ;;  %v7607_v21 = vld [vmem:[%s7321_s20 + $0x70] sm:$0xf] }
  0x57   : > { %6327 = vmatprep.mubr.bf16.mxu1 %v5469_v2  ;;  %v512_v31 = vsel %vm7353_vm2, %v507_v29, %v511_v9  ;;  %v517_v44 = vrot.slane %v516_v30, 4  ;;  %v2415_v47 = vshll.u32 %v7573_v17, 16  ;;  %v524_v49 = vshrl.u32 %v7577_v25, 16  ;;  %v7146_v9 = vld [vmem:[%s7321_s20 + $0xb4] sm:$0xff]  }
  0x58   : > { %6519 = vmatprep.mubr.bf16.mxu0 %v5661_v26  ;;  %v2402_v52 = vor.u32 %v2401_v39, %v2398_v38  ;;  %v2411_v53 = vrot.slane %v2409_v42, 4  ;;  %v527_v54 = vshll.u32 %v7577_v25, 16  ;;  %v533_v55 = vshll.u32 %v7580_v35, 16 }
  0x59   : > { %v522_v48 = vsel %vm7353_vm2, %v517_v44, %v521_v34  ;;  %v2417_v56 = vrot.slane %v2415_v47, 5  ;;  %v526_v57 = vrot.slane %v524_v49, 4  ;;  %v537_v58 = vshrl.u32 %v7580_v35, 16  ;;  %v7618_v47 = vld [vmem:[%s7321_s20 + $0x78] sm:$0xf] }
  0x5a   : > { %v5470_v59 = vcombine.low %v512_v31, %v522_v48  ;;  %v2403_v61 = vrot.slane %v2402_v52, 4  ;;  %v2412_v63 = vor.u32 %v2411_v53, %v2407_v40  ;;  %v529_v1 = vrot.slane %v527_v54, 5  ;;  %v7629_v54 = vld [vmem:[%s7321_s20 + $0x7c] sm:$0xf] }
  0x5b   : > { %v535_v2 = vrot.slane %v533_v55, 5  ;;  %v539_v3 = vrot.slane %v537_v58, 4  ;;  %v543_v7 = vshll.u32 %v320_v43, 16  ;;  %v5695_v10 = vrot.slane %v5679_v50, 9  ;;  %v322_v58 = vld [vmem:[%s7321_s20 + $0x80] sm:$0x1] }
  0x5c   : > { %6328 = vmatmul.mubr.bf16.gmra.mrb[12].mxu1 %v5470_v59  ;;  %v2408_v11 = vsel %vm7353_vm2, %v2403_v61, %v2407_v40  ;;  %v2413_v12 = vrot.slane %v2412_v63, 4  ;;  %v530_v13 = vor.u32 %v529_v1, %v526_v57  ;;  %v2998_v15 = vrot.slane %v7334_v23, 5  ;;  %v321_v40 = vld [vmem:[%s7321_s20 + $0x74] sm:$0x1]  ;;  %v5680_v23 = vld [vmem:[%s7321_s20 + $0x18] sm:$0xe] }
  0x5d   : > { %v540_v16 = vor.u32 %v539_v3, %v535_v2  ;;  %v545_v18 = vrot.slane %v543_v7, 5  ;;  %v548_v26 = vshrl.u32 %v7595_v5, 16  ;;  %v551_v29 = vshll.u32 %v7595_v5, 16 }
  0x5e   : > { %v2418_v30 = vsel %vm7353_vm2, %v2413_v12, %v2417_v56  ;;  %v531_v34 = vrot.slane %v530_v13, 4  ;;  %v2999_v38 = vsel %vm7599_vm5, %v5695_v10, %v2998_v15  ;;  %v3000_v39 = vrot.slane %v2998_v15, 4  ;;  %v5681_v13 = vld [vmem:[%s7321_s20 + $0x24] sm:$0xe] }
  0x5f   : > { %v5662_v42 = vcombine.low %v2408_v11, %v2418_v30  ;;  %v541_v43 = vrot.slane %v540_v16, 4  ;;  %v550_v31 = vrot.slane %v548_v26, 4  ;;  %v553_v44 = vrot.slane %v551_v29, 5  ;;  %v7651_v16 = vld [vmem:[%s7321_s20 + $0x84] sm:$0xf]  ;;  %v7059_v29 = vld [vmem:[%s9170_s1 + $0x188] sm:$0xff]  }
  0x60   : > { %v536_v49 = vsel %vm7353_vm2, %v531_v34, %v535_v2  ;;  %v3002_v50 = vsel %vm7599_vm5, %v3000_v39, %v3001_v41  ;;  %v557_v52 = vshll.u32 %v7607_v21, 16  ;;  %v561_v53 = vshrl.u32 %v7607_v21, 16 }
  0x61   : > { %6520 = vmatmul.mubr.bf16.gmra.mrb[12].mxu0 %v5662_v42  ;;  %v546_v55 = vsel %vm7353_vm2, %v541_v43, %v545_v18  ;;  %v5711_v48 = vcombine.low %v2999_v38, %v3002_v50  ;;  %v554_v56 = vor.u32 %v553_v44, %v550_v31  ;;  %v567_v57 = vshll.u32 %v321_v40, 16  ;;  %v7659_v40 = vld [vmem:[%s7321_s20 + $0x88] sm:$0xf]  ;;  %v323_v31 = vld [vmem:[%s7321_s20 + $0x8c] sm:$0x1] }
  0x62   : > { %v5471_v59 = vcombine.low %v536_v49, %v546_v55  ;;  %v559_v24 = vrot.slane %v557_v52, 5  ;;  %v563_v61 = vrot.slane %v561_v53, 4  ;;  %v5696_v63 = vrot.slane %v5680_v23, 9 }
  0x63   : > { %6555 = vmatprep.mubr.bf16.mxu0 %v5711_v48  ;;  %v555_v41 = vrot.slane %v554_v56, 4  ;;  %v569_v1 = vrot.slane %v567_v57, 5  ;;  %v3009_v2 = vsel %vm7599_vm5, %v7402_v36, %v3008_v32  ;;  %v572_v3 = vshrl.u32 %v7618_v47, 16 }
  0x64   : > { %6331 = vmatprep.mubr.bf16.mxu1 %v5471_v59  ;;  %v564_v7 = vor.u32 %v563_v61, %v559_v24  ;;  %v3006_v10 = vsel %vm7599_vm5, %v5696_v63, %v3005_v27  ;;  %v575_v11 = vshll.u32 %v7618_v47, 16  ;;  %v581_v12 = vshll.u32 %v7629_v54, 16 }
  0x65   : > { %v560_v8 = vsel %vm7353_vm2, %v555_v41, %v559_v24  ;;  %v5712_v15 = vcombine.low %v3006_v10, %v3009_v2  ;;  %v574_v32 = vrot.slane %v572_v3, 4  ;;  %v585_v36 = vshrl.u32 %v7629_v54, 16  ;;  %v7680_v2 = vld [vmem:[%s7321_s20 + $0x90] sm:$0xf]  ;;  %v7683_v3 = vld [vmem:[%s7321_s20 + $0x94] sm:$0xf] }
  0x66   : > { %v565_v62 = vrot.slane %v564_v7, 4  ;;  %v577_v18 = vrot.slane %v575_v11, 5  ;;  %v583_v26 = vrot.slane %v581_v12, 5  ;;  %v591_v27 = vshll.u32 %v322_v58, 16 }
  0x67   : > { %v587_v30 = vrot.slane %v585_v36, 4  ;;  %v5697_v34 = vrot.slane %v5681_v13, 9  ;;  %v3012_v38 = vrot.slane %v7406_v45, 5  ;;  %v3015_v39 = vrot.slane %v7412_v51, 5  ;;  %v5682_v45 = vld [vmem:[%s7321_s20 + $0x30] sm:$0xe] }
  0x68   : > { %v570_v23 = vsel %vm7353_vm2, %v565_v62, %v569_v1  ;;  %v578_v42 = vor.u32 %v577_v18, %v574_v32  ;;  %v593_v43 = vrot.slane %v591_v27, 5  ;;  %v596_v44 = vshrl.u32 %v7651_v16, 16  ;;  %v324_v62 = vld [vmem:[%s7321_s20 + $0x98] sm:$0x1] }
  0x69   : > { %v5472_v49 = vcombine.low %v560_v8, %v570_v23  ;;  %6556 = vmatmul.mubr.bf16.vlgmr.msra.gmra.mrb[0].mxu0 %v5712_v15  ;;  %v588_v50 = vor.u32 %v587_v30, %v583_v26  ;;  %v3013_v52 = vsel %vm7599_vm5, %v5697_v34, %v3012_v38  ;;  %v3014_v53 = vrot.slane %v3012_v38, 4  ;;  %v7063_v30 = vld [vmem:[%s9170_s1 + $0x198] sm:$0xff]  }
  0x6a   : > { %6588 = vmatpush3.bf16.msra.mxu0 %v7542_v6  ;;  %v579_v51 = vrot.slane %v578_v42, 4  ;;  %v598_v55 = vrot.slane %v596_v44, 4  ;;  %v599_v48 = vshll.u32 %v7651_v16, 16  ;;  %v605_v56 = vshll.u32 %v7659_v40, 16  ;;  %v7061_v6 = vld [vmem:[%s9170_s1 + $0x190] sm:$0xff]  }
  0x6b   : > { %6332 = vmatmul.mubr.bf16.gmra.mrb[16].mxu1 %v5472_v49  ;;  %v589_v57 = vrot.slane %v588_v50, 4  ;;  %v3016_v58 = vsel %vm7599_vm5, %v3014_v53, %v3015_v39  ;;  %v609_v59 = vshrl.u32 %v7659_v40, 16  ;;  %v615_v24 = vshll.u32 %v323_v31, 16  ;;  %6589 = vmatprep.subr.bf16.mxu0 %v7059_v29  ;;  %v5683_v38 = vld [vmem:[%s7321_s20 + $0x3c] sm:$0xe] }
  0x6c   : > { %v584_v61 = vsel %vm7353_vm2, %v579_v51, %v583_v26  ;;  %v5713_v63 = vcombine.low %v3013_v52, %v3016_v58  ;;  %v601_v41 = vrot.slane %v599_v48, 5  ;;  %v607_v1 = vrot.slane %v605_v56, 5  ;;  %v7701_v31 = vld [vmem:[%s7321_s20 + $0x9c] sm:$0xf]  ;;  %v7710_v48 = vld [vmem:[%s7321_s20 + $0xa0] sm:$0xf] }
  0x6d   : > { %v594_v7 = vsel %vm7353_vm2, %v589_v57, %v593_v43  ;;  %v611_v10 = vrot.slane %v609_v59, 4  ;;  %v617_v11 = vrot.slane %v615_v24, 5  ;;  %v5698_v12 = vrot.slane %v5682_v45, 9  ;;  %v7067_v56 = vld [vmem:[%s9170_s1 + $0x1a0] sm:$0xff]  }
  0x6e   : > { %v5473_v13 = vcombine.low %v584_v61, %v594_v7  ;;  %6559 = vmatprep.mubr.bf16.mxu0 %v5713_v63  ;;  %v602_v8 = vor.u32 %v601_v41, %v598_v55  ;;  %v3019_v15 = vrot.slane %v7437_v33, 5  ;;  %v3022_v32 = vrot.slane %v7448_v46, 5  ;;  %6590 = vmatpush3.bf16.msra.mxu0 %v7059_v29  ;;  %v325_v61 = vld [vmem:[%s7321_s20 + $0xa4] sm:$0x1] }
  0x6f   : > { %v612_v36 = vor.u32 %v611_v10, %v607_v1  ;;  %v620_v18 = vshrl.u32 %v7680_v2, 16  ;;  %v623_v26 = vshll.u32 %v7680_v2, 16  ;;  %v629_v27 = vshll.u32 %v7683_v3, 16  ;;  %6591 = vmatprep.subr.bf16.mxu0 %v7061_v6 }
  0x70   : > { %6335 = vmatprep.mubr.bf16.mxu1 %v5473_v13  ;;  %v603_v34 = vrot.slane %v602_v8, 4  ;;  %v3020_v33 = vsel %vm7599_vm5, %v5698_v12, %v3019_v15  ;;  %v3021_v46 = vrot.slane %v3019_v15, 4  ;;  %v633_v29 = vshrl.u32 %v7683_v3, 16  ;;  %v5684_v15 = vld [vmem:[%s7321_s20 + $0x48] sm:$0xe] }
  0x71   : > { %v613_v39 = vrot.slane %v612_v36, 4  ;;  %v622_v23 = vrot.slane %v620_v18, 4  ;;  %v625_v42 = vrot.slane %v623_v26, 5  ;;  %v631_v43 = vrot.slane %v629_v27, 5  ;;  %v7735_v27 = vld [vmem:[%s7321_s20 + $0xa8] sm:$0xf] }
  0x72   : > { %v608_v44 = vsel %vm7353_vm2, %v603_v34, %v607_v1  ;;  %v3023_v49 = vsel %vm7599_vm5, %v3021_v46, %v3022_v32  ;;  %v635_v50 = vrot.slane %v633_v29, 4  ;;  %v639_v52 = vshll.u32 %v324_v62, 16  ;;  %6592 = vmatpush3.bf16.msra.mxu0 %v7061_v6  ;;  %v7071_v32 = vld [vmem:[%s9170_s1 + $0x1a8] sm:$0xff]  }
  0x73   : > { %v618_v53 = vsel %vm7353_vm2, %v613_v39, %v617_v11  ;;  %v5714_v45 = vcombine.low %v3020_v33, %v3023_v49  ;;  %v626_v51 = vor.u32 %v625_v42, %v622_v23  ;;  %v5699_v55 = vrot.slane %v5683_v38, 9  ;;  %6593 = vmatprep.subr.bf16.mxu0 %v7063_v30  ;;  %v7738_v29 = vld [vmem:[%s7321_s20 + $0xac] sm:$0xf] }
  0x74   : > { %v5474_v57 = vcombine.low %v608_v44, %v618_v53  ;;  %v636_v58 = vor.u32 %v635_v50, %v631_v43  ;;  %v641_v59 = vrot.slane %v639_v52, 5  ;;  %v3026_v24 = vrot.slane %v7471_v19, 5  ;;  %v5685_v53 = vld [vmem:[%s7321_s20 + $0x54] sm:$0xe] }
  0x75   : > { %6560 = vmatmul.mubr.bf16.gmra.mrb[4].mxu0 %v5714_v45  ;;  %v627_v6 = vrot.slane %v626_v51, 4  ;;  %v3029_v63 = vrot.slane %v7479_v28, 5  ;;  %v644_v41 = vshrl.u32 %v7701_v31, 16  ;;  %v647_v1 = vshll.u32 %v7701_v31, 16  ;;  %v7075_v45 = vld [vmem:[%s9170_s1 + $0x1b0] sm:$0xff]  }
  0x76   : > { %6336 = vmatmul.mubr.bf16.gmra.mrb[20].mxu1 %v5474_v57  ;;  %v637_v7 = vrot.slane %v636_v58, 4  ;;  %v3027_v10 = vsel %vm7599_vm5, %v5699_v55, %v3026_v24  ;;  %v3028_v11 = vrot.slane %v3026_v24, 4  ;;  %v653_v12 = vshll.u32 %v7710_v48, 16  ;;  %6594 = vmatpush3.bf16.msra.mxu0 %v7063_v30 }
  0x77   : > { %v632_v19 = vsel %vm7353_vm2, %v627_v6, %v631_v43  ;;  %v646_v13 = vrot.slane %v644_v41, 4  ;;  %v649_v28 = vrot.slane %v647_v1, 5  ;;  %v657_v8 = vshrl.u32 %v7710_v48, 16  ;;  %6595 = vmatprep.subr.bf16.mxu0 %v7067_v56  ;;  %v326_v43 = vld [vmem:[%s7321_s20 + $0xb0] sm:$0x1] }
  0x78   : > { %v642_v36 = vsel %vm7353_vm2, %v637_v7, %v641_v59  ;;  %v3030_v62 = vsel %vm7599_vm5, %v3028_v11, %v3029_v63  ;;  %v655_v18 = vrot.slane %v653_v12, 5  ;;  %v663_v26 = vshll.u32 %v325_v61, 16  ;;  %v7758_v41 = vld [vmem:[%s7321_s20 + $0xb4] sm:$0xf]  ;;  %v7763_v12 = vld [vmem:[%s7321_s20 + $0xb8] sm:$0xf] }
  0x79   : > { %v5475_v30 = vcombine.low %v632_v19, %v642_v36  ;;  %v5715_v34 = vcombine.low %v3027_v10, %v3030_v62  ;;  %v650_v33 = vor.u32 %v649_v28, %v646_v13  ;;  %v659_v46 = vrot.slane %v657_v8, 4  ;;  %v327_v19 = vld [vmem:[%s7321_s20 + $0xbc] sm:$0x1] }
  0x7a   : > { %v665_v38 = vrot.slane %v663_v26, 5  ;;  %v5700_v39 = vrot.slane %v5684_v15, 9  ;;  %v3033_v23 = vrot.slane %v7506_v14, 5  ;;  %v3036_v42 = vrot.slane %v7512_v22, 5  ;;  %6596 = vmatpush3.bf16.msra.mxu0 %v7067_v56  ;;  %v7079_v13 = vld [vmem:[%s9170_s1 + $0x1b8] sm:$0xff]  }
  0x7b   : > { %6339 = vmatprep.mubr.bf16.mxu1 %v5475_v30  ;;  %6563 = vmatprep.mubr.bf16.mxu0 %v5715_v34  ;;  %v651_v44 = vrot.slane %v650_v33, 4  ;;  %v660_v49 = vor.u32 %v659_v46, %v655_v18  ;;  %v668_v50 = vshrl.u32 %v7735_v27, 16  ;;  %v671_v52 = vshll.u32 %v7735_v27, 16  ;;  %v5686_v30 = vld [vmem:[%s7321_s20 + $0x60] sm:$0xe] }
  0x7c   : > { %v3034_v14 = vsel %vm7599_vm5, %v5700_v39, %v3033_v23  ;;  %v3035_v22 = vrot.slane %v3033_v23, 4  ;;  %v677_v51 = vshll.u32 %v7738_v29, 16  ;;  %v681_v55 = vshrl.u32 %v7738_v29, 16  ;;  %6597 = vmatprep.subr.bf16.mxu0 %v7071_v32  ;;  %v5632_v39 = vld [vmem:[%s7321_s20 + $0x70] sm:$0xf] }
  0x7d   : > { %v656_v56 = vsel %vm7353_vm2, %v651_v44, %v655_v18  ;;  %v661_v57 = vrot.slane %v660_v49, 4  ;;  %v670_v58 = vrot.slane %v668_v50, 4  ;;  %v673_v59 = vrot.slane %v671_v52, 5  ;;  %v7785_v44 = vld [vmem:[%s9170_s1 + $0x1c0] sm:$0xff]  }
  0x7e   : > { %v3037_v24 = vsel %vm7599_vm5, %v3035_v22, %v3036_v42  ;;  %v679_v61 = vrot.slane %v677_v51, 5  ;;  %v683_v6 = vrot.slane %v681_v55, 4  ;;  %v687_v63 = vshll.u32 %v326_v43, 16  ;;  %6598 = vmatpush3.bf16.msra.mxu0 %v7071_v32  ;;  %v5687_v43 = vld [vmem:[%s7321_s20 + $0x6c] sm:$0xe] }
  0x7f   : > { %v666_v1 = vsel %vm7353_vm2, %v661_v57, %v665_v38  ;;  %v5716_v7 = vcombine.low %v3034_v14, %v3037_v24  ;;  %v674_v10 = vor.u32 %v673_v59, %v670_v58  ;;  %v5701_v11 = vrot.slane %v5685_v53, 9  ;;  %6599 = vmatprep.subr.bf16.mxu0 %v7075_v45  ;;  %v5633_v55 = vld [vmem:[%s7321_s20 + $0x74] sm:$0x1]  ;;  %v5688_v24 = vld [vmem:[%s7321_s20 + $0x78] sm:$0xe] }
  0x80   : > { %v5476_v28 = vcombine.low %v656_v56, %v666_v1  ;;  %v684_v8 = vor.u32 %v683_v6, %v679_v61  ;;  %v689_v15 = vrot.slane %v687_v63, 5  ;;  %v3040_v32 = vrot.slane %v7537_v0, 5 }
  0x81   : > { %6564 = vmatmul.mubr.bf16.gmra.mrb[8].mxu0 %v5716_v7  ;;  %v675_v36 = vrot.slane %v674_v10, 4  ;;  %v3043_v62 = vrot.slane %v7549_v20, 5  ;;  %v692_v18 = vshrl.u32 %v7758_v41, 16  ;;  %v695_v26 = vshll.u32 %v7758_v41, 16 }
  0x82   : > { %6340 = vmatmul.mubr.bf16.gmra.mrb[24].mxu1 %v5476_v28  ;;  %v685_v34 = vrot.slane %v684_v8, 4  ;;  %v3041_v33 = vsel %vm7599_vm5, %v5701_v11, %v3040_v32  ;;  %v3042_v46 = vrot.slane %v3040_v32, 4  ;;  %v701_v38 = vshll.u32 %v7763_v12, 16  ;;  %6600 = vmatpush3.bf16.msra.mxu0 %v7075_v45  ;;  %v7798_v11 = vld [vmem:[%s7321_s20 + $0x7c] sm:$0xf] }
  0x83   : > { %v680_v0 = vsel %vm7353_vm2, %v675_v36, %v679_v61  ;;  %v694_v20 = vrot.slane %v692_v18, 4  ;;  %v697_v23 = vrot.slane %v695_v26, 5  ;;  %v705_v42 = vshrl.u32 %v7763_v12, 16  ;;  %6601 = vmatprep.subr.bf16.mxu0 %v7079_v13  ;;  %v7148_v36 = vld [vmem:[%s7321_s20] sm:$0xf] }
  0x84   : > { %v690_v49 = vsel %vm7353_vm2, %v685_v34, %v689_v15  ;;  %v3044_v50 = vsel %vm7599_vm5, %v3042_v46, %v3043_v62  ;;  %v703_v52 = vrot.slane %v701_v38, 5  ;;  %v711_v53 = vshll.u32 %v327_v19, 16  ;;  %v5638_v15 = vld [vmem:[%s7321_s20 + $0x88] sm:$0xf]  ;;  %v7813_v62 = vld [vmem:[%s7321_s20 + $0x4] sm:$0xf] }
  0x85   : > { %v5477_v45 = vcombine.low %v680_v0, %v690_v49  ;;  %v5717_v14 = vcombine.low %v3041_v33, %v3044_v50  ;;  %v698_v22 = vor.u32 %v697_v23, %v694_v20  ;;  %v707_v51 = vrot.slane %v705_v42, 4  ;;  %v5639_v26 = vld [vmem:[%s7321_s20 + $0x8c] sm:$0x1]  ;;  %v5642_v23 = vld [vmem:[%s7321_s20 + $0x98] sm:$0x1] }
  0x86   : > { %v713_v56 = vrot.slane %v711_v53, 5  ;;  %v5702_v57 = vrot.slane %v5686_v30, 9  ;;  %v3047_v58 = vrot.slane %v7564_v60, 5  ;;  %v3050_v59 = vrot.slane %v7573_v17, 5  ;;  %6602 = vmatpush3.bf16.msra.mxu0 %v7079_v13  ;;  %v7801_v17 = vld [vmem:[%s7321_s20 + $0x80] sm:$0x1] }
  0x87   : > { %6343 = vmatprep.mubr.bf16.mxu1 %v5477_v45  ;;  %6567 = vmatprep.mubr.bf16.mxu0 %v5717_v14  ;;  %v699_v61 = vrot.slane %v698_v22, 4  ;;  %v708_v6 = vor.u32 %v707_v51, %v703_v52  ;;  %v5703_v63 = vrot.slane %v5687_v43, 9  ;;  %v3054_v1 = vrot.slane %v5632_v39, 5  ;;  %v5689_v30 = vld [vmem:[%s7321_s20 + $0x84] sm:$0xe] }
  0x88   : > { %v3048_v7 = vsel %vm7599_vm5, %v5702_v57, %v3047_v58  ;;  %v3049_v10 = vrot.slane %v3047_v58, 4  ;;  %v3057_v60 = vrot.slane %v5633_v55, 5  ;;  %6635 = vmatprep.subr.bf16.mxu0 %v7785_v44  ;;  %v5487_v18 = vcombine.low %v7148_v36, %v7813_v62  ;;  %v5641_v39 = vld [vmem:[%s7321_s20 + $0x94] sm:$0xf]  ;;  %v5690_v42 = vld [vmem:[%s7321_s20 + $0x90] sm:$0xe] }
  0x89   : > { %v704_v19 = vsel %vm7353_vm2, %v699_v61, %v703_v52  ;;  %v709_v13 = vrot.slane %v708_v6, 4  ;;  %v3055_v28 = vsel %vm7599_vm5, %v5703_v63, %v3054_v1  ;;  %v3056_v8 = vrot.slane %v3054_v1, 4  ;;  %v5691_v50 = vld [vmem:[%s7321_s20 + $0x9c] sm:$0xe]  ;;  %v5644_v14 = vld [vmem:[%s7321_s20 + $0xa0] sm:$0xf] }
  0x8a   : > { %v3051_v32 = vsel %vm7599_vm5, %v3049_v10, %v3050_v59  ;;  %v5704_v38 = vrot.slane %v5688_v24, 9  ;;  %v3061_v43 = vrot.slane %v7798_v11, 5  ;;  %v3064_v49 = vrot.slane %v7801_v17, 5  ;;  %v5645_v22 = vld [vmem:[%s7321_s20 + $0xa4] sm:$0x1] }
  0x8b   : > { %v714_v34 = vsel %vm7353_vm2, %v709_v13, %v713_v56  ;;  %v5718_v33 = vcombine.low %v3048_v7, %v3051_v32  ;;  %v3058_v46 = vsel %vm7599_vm5, %v3056_v8, %v3057_v60  ;;  %v5705_v52 = vrot.slane %v5689_v30, 9  ;;  %v5647_v59 = vld [vmem:[%s7321_s20 + $0xac] sm:$0xf]  ;;  %v7837_v61 = vld [vmem:[%s7321_s20 + $0x10] sm:$0xf] }
  0x8c   : > { %v5478_v0 = vcombine.low %v704_v19, %v714_v34  ;;  %v5719_v20 = vcombine.low %v3055_v28, %v3058_v46  ;;  %v3068_v53 = vrot.slane %v5638_v15, 5  ;;  %v3071_v45 = vrot.slane %v5639_v26, 5  ;;  %v7150_v24 = vld [vmem:[%s7321_s20 + $0xc] sm:$0xf]  ;;  %v7152_v8 = vld [vmem:[%s7321_s20 + $0x18] sm:$0xf] }
  0x8d   : > { %6568 = vmatmul.mubr.bf16.gmra.mrb[12].mxu0 %v5718_v33  ;;  %v3062_v51 = vsel %vm7599_vm5, %v5704_v38, %v3061_v43  ;;  %v3063_v55 = vrot.slane %v3061_v43, 4  ;;  %v3075_v58 = vrot.slane %v5641_v39, 5  ;;  %v5488_v6 = vcombine.low %v7150_v24, %v7837_v61  ;;  %v7070_v19 = vld [vmem:[%s9170_s1 + $0x88] sm:$0xff]   ;;  %v7849_v15 = vld [vmem:[%s7321_s20 + $0x1c] sm:$0xf] }
  0x8e   : > { %6344 = vmatmul.mubr.bf16.gmra.mrb[28].mxu1 %v5478_v0  ;;  %6571 = vmatprep.mubr.bf16.mxu0 %v5719_v20  ;;  %v3069_v56 = vsel %vm7599_vm5, %v5705_v52, %v3068_v53  ;;  %v3070_v57 = vrot.slane %v3068_v53, 4  ;;  %v5706_v1 = vrot.slane %v5690_v42, 9  ;;  %v3078_v7 = vrot.slane %v5642_v23, 5  ;;  %v5648_v30 = vld [vmem:[%s7321_s20 + $0xb0] sm:$0x1] }
  0x8f   : > { %6363 = vmatprep.mubr.bf16.mxu1 %v5487_v18  ;;  %v3065_v63 = vsel %vm7599_vm5, %v3063_v55, %v3064_v49  ;;  %v3077_v13 = vrot.slane %v3075_v58, 4  ;;  %v5707_v28 = vrot.slane %v5691_v50, 9  ;;  %v5489_v32 = vcombine.low %v7152_v8, %v7849_v15  ;;  %v5692_v34 = vld [vmem:[%s7321_s20 + $0xa8] sm:$0xe]  ;;  %v5650_v33 = vld [vmem:[%s7321_s20 + $0xb8] sm:$0xf] }
  0x90   : > { %v5720_v10 = vcombine.low %v3062_v51, %v3065_v63  ;;  %v3072_v60 = vsel %vm7599_vm5, %v3070_v57, %v3071_v45  ;;  %v3082_v18 = vrot.slane %v5644_v14, 5  ;;  %v3085_v26 = vrot.slane %v5645_v22, 5  ;;  %v5651_v20 = vld [vmem:[%s7321_s20 + $0xbc] sm:$0x1]  ;;  %v5693_v23 = vld [vmem:[%s7321_s20 + $0xb4] sm:$0xe] }
  0x91   : > { %v5721_v36 = vcombine.low %v3069_v56, %v3072_v60  ;;  %v3089_v38 = vrot.slane %v5647_v59, 5  ;;  %v3076_v39 = vsel %vm7599_vm5, %v5706_v1, %v3075_v58  ;;  %v3079_v0 = vsel %vm7599_vm5, %v3077_v13, %v3078_v7  ;;  %v7074_v50 = vld [vmem:[%s9170_s1 + $0x90] sm:$0xff]   ;;  %v5653_v53 = vld [vmem:[%s7321_s20 + $0xc4] sm:$0xf]  ;;  %v7872_v51 = vld [vmem:[%s7321_s20 + $0x28] sm:$0xf] }
  0x92   : > { %v3084_v46 = vrot.slane %v3082_v18, 4  ;;  %v3083_v42 = vsel %vm7599_vm5, %v5707_v28, %v3082_v18  ;;  %v3096_v49 = vrot.slane %v5650_v33, 5  ;;  %v5708_v52 = vrot.slane %v5692_v34, 9  ;;  %v7154_v22 = vld [vmem:[%s7321_s20 + $0x24] sm:$0xf]  ;;  %v7078_v1 = vld [vmem:[%s9170_s1 + $0x98] sm:$0xff]  }
  0x93   : > { %v5722_v45 = vcombine.low %v3076_v39, %v3079_v0  ;;  %v3091_v14 = vrot.slane %v3089_v38, 4  ;;  %v5490_v55 = vcombine.low %v7154_v22, %v7872_v51  ;;  %v7156_v57 = vld [vmem:[%s7321_s20 + $0x30] sm:$0xf]  ;;  %v7877_v58 = vld [vmem:[%s7321_s20 + $0x34] sm:$0xf]  ;;  %v5709_v24 = vrot.slane %v5693_v23, 9 }
  0x94   : > { %v3086_v43 = vsel %vm7599_vm5, %v3084_v46, %v3085_v26  ;;  %v5491_v59 = vcombine.low %v7156_v57, %v7877_v58  ;;  %v3099_v63 = vrot.slane %v5651_v20, 5  ;;  %v5694_v7 = vld [vmem:[%s7321_s20 + $0xc0] sm:$0xe]  ;;  %v3090_v60 = vsel %vm7599_vm5, %v5708_v52, %v3089_v38  ;;  %v5654_v8 = vld [vmem:[%s7321_s20 + $0xc8] sm:$0x1]  ;;  %v7081_v22 = vld [vmem:[%s7321_s20 + $0x18] sm:$0xff]  }
  0x95   : > { %6572 = vmatmul.mubr.bf16.gmra.mrb[16].mxu0 %v5720_v10  ;;  %v5723_v56 = vcombine.low %v3083_v42, %v3086_v43  ;;  %v3103_v10 = vrot.slane %v5653_v53, 5  ;;  %v3097_v13 = vsel %vm7599_vm5, %v5709_v24, %v3096_v49  ;;  %v5710_v18 = vrot.slane %v5694_v7, 9  ;;  %v7158_v26 = vld [vmem:[%s7321_s20 + $0x3c] sm:$0xf]  ;;  %v7160_v39 = vld [vmem:[%s7321_s20 + $0x48] sm:$0xf] }
  0x96   : > { %6364 = vmatmul.mubr.bf16.vlgmr.msra.gmra.mrb[0].mxu1 %v5488_v6  ;;  %6575 = vmatprep.mubr.bf16.mxu0 %v5721_v36  ;;  %v3098_v6 = vrot.slane %v3096_v49, 4  ;;  %v3106_v38 = vrot.slane %v5654_v8, 5  ;;  %v7903_v0 = vld [vmem:[%s7321_s20 + $0x4c] sm:$0xf]  ;;  %v7095_v49 = vld [vmem:[%s9170_s1 + $0xb0] sm:$0xff]   ;;  %v2457_v52 = vshrl.u32 %v7798_v11, 16 }
  0x97   : > { %6396 = vmatpush3.bf16.msra.mxu1 %v7523_v4  ;;  %6367 = vmatprep.mubr.bf16.mxu1 %v5489_v32  ;;  %v3092_v4 = vrot.slane %v5648_v30, 5  ;;  %v7083_v32 = vld [vmem:[%s9170_s1 + $0xa0] sm:$0xff]   ;;  %v3105_v46 = vrot.slane %v3103_v10, 4  ;;  %v5493_v20 = vcombine.low %v7160_v39, %v7903_v0  ;;  %v7089_v23 = vld [vmem:[%s9170_s1 + $0xa8] sm:$0xff]   ;;  %v3104_v42 = vsel %vm7599_vm5, %v5710_v18, %v3103_v10  ;;  %v7087_v18 = vld [vmem:[%s7321_s20 + $0x30] sm:$0xff]  }
  0x98   : > { %6397 = vmatprep.subr.bf16.mxu1 %v7070_v19  ;;  %v3100_v28 = vsel %vm7599_vm5, %v3098_v6, %v3099_v63  ;;  %v7898_v30 = vld [vmem:[%s7321_s20 + $0x40] sm:$0xf]  ;;  %v7931_v57 = vrot.slane %v2457_v52, 4  ;;  %v7084_v6 = vld [vmem:[%s7321_s20 + $0x24] sm:$0xff]   ;;  %v1369_v7 = vrot.slane %v7837_v61, 5  ;;  %v2463_v8 = vshll.u32 %v7801_v17, 16 }
  0x99   : > { %v5492_v34 = vcombine.low %v7158_v26, %v7898_v30  ;;  %v5725_v33 = vcombine.low %v3097_v13, %v3100_v28  ;;  %v3107_v43 = vsel %vm7599_vm5, %v3105_v46, %v3106_v38  ;;  %v1309_v63 = vld [vmem:[%s7321_s20] sm:$0xe]  ;;  %v1310_v10 = vld [vmem:[%s7321_s20 + $0xc] sm:$0xe]  ;;  %v1376_v13 = vrot.slane %v7849_v15, 5 }
  0x9a   : > { %v5726_v53 = vcombine.low %v3104_v42, %v3107_v43  ;;  %v1312_v61 = vld [vmem:[%s7321_s20 + $0x24] sm:$0xe]  ;;  %v5498_v15 = vcombine.low %v7651_v16, %v7659_v40  ;;  %v5499_v26 = vcombine.low %v7680_v2, %v7683_v3  ;;  %v5511_v17 = vrot.slane %v1309_v63, 9  ;;  %v7166_v38 = vld [vmem:[%s7321_s20 + $0x20] sm:$0x1]  ;;  %v7096_v2 = vld [vmem:[%s7321_s20 + $0x54] sm:$0xff]  }
  0x9b   : > { %6398 = vmatpush3.bf16.msra.mxu1 %v7070_v19  ;;  %v3093_v19 = vsel %vm7599_vm5, %v3091_v14, %v3092_v4  ;;  %v7920_v14 = vld [vmem:[%s7321_s20 + $0x58] sm:$0xf]  ;;  %v1378_v46 = vrot.slane %v1376_v13, 4  ;;  %v1379_v39 = vrot.slane %v7166_v38, 5  ;;  %v7167_v43 = vld [vmem:[%s7321_s20 + $0x2c] sm:$0x1] }
  0x9c   : > { %6399 = vmatprep.subr.bf16.mxu1 %v7074_v50  ;;  %v5724_v36 = vcombine.low %v3090_v60, %v3093_v19  ;;  %v7946_v60 = vld [vmem:[%s9170_s1 + $0xc0] sm:$0xff]   ;;  %v1311_v19 = vld [vmem:[%s7321_s20 + $0x18] sm:$0xe]  ;;  %v7170_v38 = vld [vmem:[%s7321_s20 + $0x50] sm:$0x1]  ;;  %v1411_v16 = vrot.slane %v7920_v14, 5 }
  0x9d   : > { %6576 = vmatmul.mubr.bf16.gmra.mrb[20].mxu0 %v5722_v45  ;;  %v7162_v45 = vld [vmem:[%s7321_s20 + $0x54] sm:$0xf]  ;;  %v8069_v40 = vld [vmem:[%s7321_s20 + $0x64] sm:$0xf] }
  0x9e   : > { %6368 = vmatmul.mubr.bf16.gmra.mrb[4].mxu1 %v5490_v55  ;;  %6579 = vmatprep.mubr.bf16.mxu0 %v5723_v56  ;;  %v5494_v4 = vcombine.low %v7162_v45, %v7920_v14  ;;  %v5495_v55 = vcombine.low %v7577_v25, %v7580_v35  ;;  %v7101_v56 = vld [vmem:[%s9170_s1 + $0xb8] sm:$0xff]   ;;  %v7165_v25 = vld [vmem:[%s7321_s20 + $0x14] sm:$0x1]  ;;  %v7099_v3 = vld [vmem:[%s7321_s20 + $0x60] sm:$0xff]  }
  0x9f   : > { %6371 = vmatprep.mubr.bf16.mxu1 %v5491_v59  ;;  %6400 = vmatpush3.bf16.msra.mxu1 %v7074_v50  ;;  %v2453_v50 = vshll.u32 %v7798_v11, 16  ;;  %v7934_v59 = vld [vmem:[%s7321_s20 + $0x8] sm:$0x1]  ;;  %v1372_v35 = vrot.slane %v7165_v25, 5 }
  0xa0   : > { %6401 = vmatprep.subr.bf16.mxu1 %v7078_v1  ;;  %v1365_v24 = vrot.slane %v7934_v59, 5 }
  0xa1   : > { %v7929_v11 = vrot.slane %v2453_v50, 5 }
  0xa3   : > { %6402 = vmatpush3.bf16.msra.mxu1 %v7078_v1  ;;  %v1362_v1 = vrot.slane %v7813_v62, 5  ;;  %v5496_v62 = vcombine.low %v7595_v5, %v7607_v21  ;;  %v5512_v21 = vrot.slane %v1310_v10, 9  ;;  %v5791_v10 = vld [vmem:[%s7321_s20 + $0x18] sm:$0xf] }
  0xa4   : > { %6403 = vmatprep.subr.bf16.mxu1 %v7083_v32 }
  0xa5   : > { %6580 = vmatmul.mubr.bf16.gmra.mrb[24].mxu0 %v5724_v36  ;;  %v5497_v36 = vcombine.low %v7618_v47, %v7629_v54  ;;  %v1364_v5 = vrot.slane %v1362_v1, 4  ;;  %v7091_v47 = vld [vmem:[%s9170_s1 + $0x1c8] sm:$0xff]   ;;  %v5513_v54 = vrot.slane %v1311_v19, 9  ;;  %v7989_v59 = vsel %vm7599_vm5, %v5511_v17, %v1362_v1  ;;  %v5792_v19 = vld [vmem:[%s7321_s20 + $0x1c] sm:$0xf] }
  0xa6   : > { %6372 = vmatmul.mubr.bf16.gmra.mrb[8].mxu1 %v5492_v34  ;;  %6583 = vmatprep.mubr.bf16.mxu0 %v5725_v33  ;;  %v1390_v34 = vrot.slane %v7877_v58, 5  ;;  %v1371_v33 = vrot.slane %v1369_v7, 4  ;;  %v5514_v58 = vrot.slane %v1312_v61, 9  ;;  %v1404_v1 = vrot.slane %v7903_v0, 5  ;;  %v7093_v0 = vld [vmem:[%s7321_s20 + $0x48] sm:$0xff]  }
  0xa7   : > { %6375 = vmatprep.mubr.bf16.mxu1 %v5493_v20  ;;  %6404 = vmatpush3.bf16.msra.mxu1 %v7083_v32  ;;  %v1383_v32 = vrot.slane %v7872_v51, 5  ;;  %v1313_v51 = vld [vmem:[%s7321_s20 + $0x30] sm:$0xe]  ;;  %v5500_v20 = vcombine.low %v7701_v31, %v7710_v48  ;;  %v7997_v25 = vsel %vm7599_vm5, %v1364_v5, %v1365_v24  ;;  %v8005_v63 = vsel %vm7599_vm5, %v5513_v54, %v1376_v13  ;;  %v1315_v13 = vld [vmem:[%s7321_s20 + $0x48] sm:$0xe] }
  0xa8   : > { %6405 = vmatprep.subr.bf16.mxu1 %v7089_v23  ;;  %v5515_v50 = vrot.slane %v1313_v51, 9  ;;  %v1392_v52 = vrot.slane %v1390_v34, 4  ;;  %v3864_v5 = vshrl.u32 %v5791_v10, 16  ;;  %v3877_v51 = vshrl.u32 %v5792_v19, 16  ;;  %v7102_v48 = vld [vmem:[%s7321_s20 + $0x6c] sm:$0xff]  }
  0xa9   : > { %v1385_v42 = vrot.slane %v1383_v32, 4  ;;  %v8017_v24 = vsel %vm7599_vm5, %v5514_v58, %v1383_v32  ;;  %v7169_v32 = vld [vmem:[%s7321_s20 + $0x44] sm:$0x1]  ;;  %v5517_v54 = vrot.slane %v1315_v13, 9  ;;  %v5795_v13 = vld [vmem:[%s7321_s20 + $0x28] sm:$0xf] }
  0xaa   : > { %v8027_v61 = vsel %vm7599_vm5, %v5515_v50, %v1390_v34  ;;  %v1400_v17 = vrot.slane %v7169_v32, 5  ;;  %v5793_v50 = vld [vmem:[%s7321_s20 + $0x20] sm:$0x1]  ;;  %v1317_v32 = vld [vmem:[%s7321_s20 + $0x60] sm:$0xe] }
  0xab   : > { %6406 = vmatpush3.bf16.msra.mxu1 %v7089_v23  ;;  %v5501_v23 = vcombine.low %v7735_v27, %v7738_v29 }
  0xac   : > { %6407 = vmatprep.subr.bf16.mxu1 %v7095_v49 }
  0xad   : > { %6584 = vmatmul.mubr.bf16.gmra.mrb[28].mxu0 %v5726_v53  ;;  %v7168_v53 = vld [vmem:[%s7321_s20 + $0x38] sm:$0x1] }
  0xae   : > { %6376 = vmatmul.mubr.bf16.gmra.mrb[12].mxu1 %v5494_v4  ;;  %6603 = vmatprep.mubr.bf16.mxu0 %v7081_v22  ;;  %v1393_v45 = vrot.slane %v7168_v53, 5  ;;  %v1314_v4 = vld [vmem:[%s7321_s20 + $0x3c] sm:$0xe]  ;;  %v1397_v22 = vrot.slane %v7898_v30, 5  ;;  %v7993_v30 = vsel %vm7599_vm5, %v5512_v21, %v1369_v7  ;;  %v3867_v21 = vshll.u32 %v5791_v10, 16  ;;  %v7107_v53 = vld [vmem:[%s9170_s1 + $0x1e0] sm:$0xff]  }
  0xaf   : > { %6379 = vmatprep.mubr.bf16.mxu1 %v5495_v55  ;;  %6408 = vmatpush3.bf16.msra.mxu1 %v7095_v49  ;;  %v1386_v49 = vrot.slane %v7167_v43, 5  ;;  %v7980_v55 = vrot.slane %v2463_v8, 5  ;;  %v7090_v7 = vld [vmem:[%s7321_s20 + $0x3c] sm:$0xff]   ;;  %v8013_v8 = vsel %vm7599_vm5, %v1378_v46, %v1379_v39  ;;  %v1406_v46 = vrot.slane %v1404_v1, 4  ;;  %v5797_v43 = vld [vmem:[%s7321_s20 + $0x30] sm:$0xf] }
  0xb0   : > { %6409 = vmatprep.subr.bf16.mxu1 %v7101_v56  ;;  %v1407_v39 = vrot.slane %v7170_v38, 5  ;;  %v3866_v10 = vrot.slane %v3864_v5, 4 }
  0xb1   : > { %9192 = vst [vmem:[#allocation2_spill] sm:$0xff] %v7980_v55 }
  0xb3   : > { %6410 = vmatpush3.bf16.msra.mxu1 %v7101_v56  ;;  %v7097_v56 = vld [vmem:[%s9170_s1 + $0x1d0] sm:$0xff]  }
  0xb4   : > { %6443 = vmatprep.subr.bf16.mxu1 %v7946_v60 }
  0xb5   : > { %6604 = vmatmul.mubr.bf16.vlgmr.msra.gmra.mrb[0].mxu0 %v7084_v6  ;;  %v8001_v6 = vsel %vm7599_vm5, %v1371_v33, %v1372_v35  ;;  %v8021_v35 = vsel %vm7599_vm5, %v1385_v42, %v1386_v49  ;;  %v3873_v33 = vshll.u32 %v5792_v19, 16  ;;  %v3869_v19 = vrot.slane %v3867_v21, 5  ;;  %v1318_v21 = vld [vmem:[%s7321_s20 + $0x6c] sm:$0xe] }
  0xb6   : > { %6380 = vmatmul.mubr.bf16.gmra.mrb[16].mxu1 %v5496_v62  ;;  %6636 = vmatpush3.bf16.msra.mxu0 %v7785_v44  ;;  %v5516_v62 = vrot.slane %v1314_v4, 9  ;;  %v5520_v58 = vrot.slane %v1318_v21, 9 }
  0xb7   : > { %6383 = vmatprep.mubr.bf16.mxu1 %v5497_v36  ;;  %6607 = vmatprep.mubr.bf16.mxu0 %v7087_v18  ;;  %v8031_v36 = vsel %vm7599_vm5, %v1392_v52, %v1393_v45  ;;  %v1399_v18 = vrot.slane %v1397_v22, 4  ;;  %v5794_v52 = vld [vmem:[%s7321_s20 + $0x24] sm:$0xf]  ;;  %v3901_v45 = vshrl.u32 %v5795_v13, 16 }
  0xb8   : > { %6637 = vmatprep.subr.bf16.mxu0 %v7091_v47  ;;  %v8048_v49 = vsel %vm7599_vm5, %v5516_v62, %v1397_v22  ;;  %v8065_v22 = vld [vmem:[%s7321_s20 + $0x54] sm:$0xe]  ;;  %v3879_v62 = vrot.slane %v3877_v51, 4  ;;  %v3888_v38 = vshrl.u32 %v5794_v52, 16  ;;  %v3891_v28 = vshll.u32 %v5794_v52, 16 }
  0xb9   : > { %v8062_v4 = vsel %vm7599_vm5, %v1399_v18, %v1400_v17  ;;  %v3883_v17 = vshll.u32 %v5793_v50, 16  ;;  %v5518_v5 = vrot.slane %v8065_v22, 9  ;;  %v7111_v50 = vld [vmem:[%s9170_s1 + $0x1e8] sm:$0xff]   ;;  %v1413_v52 = vrot.slane %v1411_v16, 4 }
  0xba   : > { %6638 = vmatpush3.bf16.msra.mxu0 %v7091_v47  ;;  %v7103_v47 = vld [vmem:[%s9170_s1 + $0x1d8] sm:$0xff]   ;;  %v3870_v22 = vor.u32 %v3869_v19, %v3866_v10  ;;  %v3890_v34 = vrot.slane %v3888_v38, 4  ;;  %v3893_v44 = vrot.slane %v3891_v28, 5  ;;  %v7175_v10 = vld [vmem:[%s7321_s20 + $0x74] sm:$0x1]  ;;  %v3903_v28 = vrot.slane %v3901_v45, 4 }
  0xbb   : > { %6639 = vmatprep.subr.bf16.mxu0 %v7097_v56  ;;  %v8103_v42 = vrot.slane %v3883_v17, 5  ;;  %v1428_v19 = vrot.slane %v7175_v10, 5  ;;  %v3912_v38 = vshrl.u32 %v5797_v43, 16  ;;  %v8128_v27 = vsel %vm7599_vm5, %v5518_v5, %v1411_v16 }
  0xbc   : > { %v3871_v21 = vrot.slane %v3870_v22, 4 }
  0xbd   : > { %6608 = vmatmul.mubr.bf16.gmra.mrb[4].mxu0 %v7090_v7  ;;  %v8075_v7 = vrot.slane %v3873_v33, 5  ;;  %v7173_v33 = vld [vmem:[%s7321_s20 + $0x70] sm:$0xf] }
  0xbe   : > { %6384 = vmatmul.mubr.bf16.gmra.mrb[20].mxu1 %v5498_v15  ;;  %6611 = vmatprep.mubr.bf16.mxu0 %v7093_v0  ;;  %v1418_v15 = vrot.slane %v8069_v40, 5  ;;  %v7172_v0 = vld [vmem:[%s7321_s20 + $0x5c] sm:$0x1]  ;;  %v1425_v51 = vrot.slane %v7173_v33, 5 }
  0xbf   : > { %6387 = vmatprep.mubr.bf16.mxu1 %v5499_v26  ;;  %6640 = vmatpush3.bf16.msra.mxu0 %v7097_v56  ;;  %v1414_v18 = vrot.slane %v7172_v0, 5  ;;  %v8084_v26 = vsel %vm7599_vm5, %v5517_v54, %v1404_v1  ;;  %v8088_v56 = vsel %vm7599_vm5, %v1406_v46, %v1407_v39  ;;  %v7174_v1 = vld [vmem:[%s7321_s20 + $0x68] sm:$0x1]  ;;  %v3897_v0 = vshll.u32 %v5795_v13, 16  ;;  %v7119_v40 = vld [vmem:[%s9170_s1 + $0x1f8] sm:$0xff]  }
  0xc0   : > { %6641 = vmatprep.subr.bf16.mxu0 %v7103_v47  ;;  %v1421_v54 = vrot.slane %v7174_v1, 5  ;;  %v5519_v46 = vrot.slane %v1317_v32, 9  ;;  %v1420_v39 = vrot.slane %v1418_v15, 4  ;;  %v3880_v33 = vor.u32 %v3879_v62, %v8075_v7  ;;  %v5798_v1 = vld [vmem:[%s7321_s20 + $0x34] sm:$0xf] }
  0xc1   : > { %v1427_v32 = vrot.slane %v1425_v51, 4  ;;  %v5796_v62 = vld [vmem:[%s7321_s20 + $0x2c] sm:$0x1]  ;;  %v8115_v17 = vrot.slane %v3897_v0, 5  ;;  %v3921_v13 = vshll.u32 %v5798_v1, 16  ;;  %v3925_v31 = vshrl.u32 %v5798_v1, 16 }
  0xc2   : > { %v3881_v10 = vrot.slane %v3880_v33, 4  ;;  %v8132_v29 = vsel %vm7599_vm5, %v1413_v52, %v1414_v18  ;;  %v8139_v45 = vsel %vm7599_vm5, %v5519_v46, %v1418_v15  ;;  %v8143_v14 = vsel %vm7599_vm5, %v1420_v39, %v1421_v54  ;;  %v1319_v18 = vld [vmem:[%s7321_s20 + $0x78] sm:$0xe] }
  0xc3   : > { %6642 = vmatpush3.bf16.msra.mxu0 %v7103_v47  ;;  %v8147_v16 = vsel %vm7599_vm5, %v5520_v58, %v1425_v51  ;;  %v8157_v15 = vsel %vm7599_vm5, %v1427_v32, %v1428_v19  ;;  %v3904_v5 = vor.u32 %v3903_v28, %v8115_v17  ;;  %v3914_v52 = vrot.slane %v3912_v38, 4  ;;  %v5800_v58 = vld [vmem:[%s7321_s20 + $0x3c] sm:$0xf]  ;;  %v5801_v51 = vld [vmem:[%s7321_s20 + $0x40] sm:$0xf] }
  0xc4   : > { %6643 = vmatprep.subr.bf16.mxu0 %v7107_v53  ;;  %v3876_v0 = vsel %vm7353_vm2, %v3871_v21, %v8075_v7  ;;  %v3886_v46 = vsel %vm7353_vm2, %v3881_v10, %v8103_v42  ;;  %v8168_v39 = vrot.slane %v3921_v13, 5  ;;  %v3927_v22 = vrot.slane %v3925_v31, 4  ;;  %v7177_v19 = vld [vmem:[%s7321_s20 + $0x80] sm:$0x1]  ;;  %v8327_v47 = vld [vmem:[%s7321_s20 + $0x68] sm:$0x1] }
  0xc5   : > { %6612 = vmatmul.mubr.bf16.gmra.mrb[8].mxu0 %v7096_v2  ;;  %v3915_v2 = vshll.u32 %v5797_v43, 16  ;;  %v3907_v43 = vshll.u32 %v5796_v62, 16  ;;  %v5521_v32 = vrot.slane %v1319_v18, 9  ;;  %v1320_v62 = vld [vmem:[%s7321_s20 + $0x84] sm:$0xe]  ;;  %v3936_v28 = vshrl.u32 %v5800_v58, 16 }
  0xc6   : > { %6388 = vmatmul.mubr.bf16.gmra.mrb[24].mxu1 %v5500_v20  ;;  %6615 = vmatprep.mubr.bf16.mxu0 %v7099_v3  ;;  %v7115_v20 = vld [vmem:[%s9170_s1 + $0x1f0] sm:$0xff]   ;;  %v7176_v3 = vld [vmem:[%s7321_s20 + $0x7c] sm:$0xf]  ;;  %v3939_v7 = vshll.u32 %v5800_v58, 16  ;;  %v3945_v38 = vshll.u32 %v5801_v51, 16  ;;  %v9193_v42 = vcombine.low %v7758_v41, %v7763_v12  ;;  %v8179_v13 = vrot.slane %v3904_v5, 4 }
  0xc7   : > { %6391 = vmatprep.mubr.bf16.mxu1 %v5501_v23  ;;  %6644 = vmatpush3.bf16.msra.mxu0 %v7107_v53  ;;  %v3894_v23 = vor.u32 %v3893_v44, %v3890_v34  ;;  %v7104_v53 = vld [vmem:[%s7321_s20 + $0x78] sm:$0xff]   ;;  %v1432_v44 = vrot.slane %v7176_v3, 5  ;;  %v3917_v54 = vrot.slane %v3915_v2, 5  ;;  %v8172_v1 = vrot.slane %v3907_v43, 5  ;;  %v8184_v21 = vld [vmem:[%s9170_s1 + $0x200] sm:$0xff]   ;;  %9201 = vst [vmem:[#allocation5_spill] sm:$0xff] %v8327_v47 }
  0xc8   : > { %6645 = vmatprep.subr.bf16.mxu0 %v7111_v50  ;;  %v5799_v34 = vld [vmem:[%s7321_s20 + $0x38] sm:$0x1]  ;;  %v3949_v2 = vshrl.u32 %v5801_v51, 16  ;;  %v7106_v43 = vld [vmem:[%s7321_s20 + $0x84] sm:$0xff]   ;;  %v3928_v12 = vor.u32 %v3927_v22, %v8168_v39  ;;  %v3941_v58 = vrot.slane %v3939_v7, 5  ;;  %v8206_v51 = vrot.slane %v3945_v38, 5 }
  0xc9   : > { %v8170_v33 = vrot.slane %v3894_v23, 4  ;;  %v1434_v10 = vrot.slane %v1432_v44, 4  ;;  %v3918_v31 = vor.u32 %v3917_v54, %v3914_v52  ;;  %v9194_v23 = vcombine.low %v7989_v59, %v7997_v25  ;;  %v7178_v18 = vld [vmem:[%s7321_s20 + $0x88] sm:$0xf]  ;;  %v5802_v5 = vld [vmem:[%s7321_s20 + $0x44] sm:$0x1] }
  0xca   : > { %v1439_v3 = vrot.slane %v7178_v18, 5  ;;  %v8197_v59 = vcombine.low %v3876_v0, %v3886_v46  ;;  %v5803_v52 = vld [vmem:[%s7321_s20 + $0x48] sm:$0xf]  ;;  %v3938_v54 = vrot.slane %v3936_v28, 4  ;;  %v3951_v22 = vrot.slane %v3949_v2, 4 }
  0xcb   : > { %6646 = vmatpush3.bf16.msra.mxu0 %v7111_v50  ;;  %v1435_v50 = vrot.slane %v7177_v19, 5  ;;  %v7108_v19 = vld [vmem:[%s7321_s20 + $0x90] sm:$0xff]   ;;  %v3900_v0 = vsel %vm7353_vm2, %v8170_v33, %v8115_v17  ;;  %v3919_v46 = vrot.slane %v3918_v31, 4  ;;  %v3910_v28 = vsel %vm7353_vm2, %v8179_v13, %v8172_v1  ;;  %v8228_v33 = vld [vmem:[%s7321_s20 + $0x58] sm:$0xf]  ;;  %v7109_v31 = vld [vmem:[%s9170_s1 + $0xc8] sm:$0xff]  }
  0xcc   : > { %6647 = vmatprep.subr.bf16.mxu0 %v7115_v20  ;;  %v3929_v38 = vrot.slane %v3928_v12, 4  ;;  %v1441_v2 = vrot.slane %v1439_v3, 4  ;;  %v5806_v17 = vld [vmem:[%s7321_s20 + $0x54] sm:$0xf]  ;;  %v3955_v1 = vshll.u32 %v5802_v5, 16  ;;  %v3960_v13 = vshrl.u32 %v5803_v52, 16 }
  0xcd   : > { %6616 = vmatmul.mubr.bf16.gmra.mrb[12].mxu0 %v7102_v48  ;;  %v3931_v48 = vshll.u32 %v5799_v34, 16  ;;  %v8224_v7 = vsel %vm7599_vm5, %v1434_v10, %v1435_v50  ;;  %v3963_v50 = vshll.u32 %v5803_v52, 16  ;;  %v3942_v10 = vor.u32 %v3941_v58, %v3938_v54  ;;  %v7110_v54 = vld [vmem:[%s7321_s20 + $0x9c] sm:$0xff]   ;;  %v7184_v41 = vld [vmem:[%s7321_s20 + $0xac] sm:$0xf] }
  0xce   : > { %6392 = vmatmul.mubr.bf16.gmra.mrb[28].mxu1 %v9193_v42  ;;  %6619 = vmatprep.mubr.bf16.mxu0 %v7104_v53  ;;  %v5522_v53 = vrot.slane %v1320_v62, 9  ;;  %v7179_v42 = vld [vmem:[%s7321_s20 + $0x8c] sm:$0x1]  ;;  %v3993_v5 = vshll.u32 %v8228_v33, 16  ;;  %v9196_v52 = vcombine.low %v8005_v63, %v8013_v8  ;;  %v8264_v63 = vld [vmem:[%s7321_s20 + $0x50] sm:$0x1] }
  0xcf   : > { %6411 = vmatprep.mubr.bf16.mxu1 %v9194_v23  ;;  %6648 = vmatpush3.bf16.msra.mxu0 %v7115_v20  ;;  %v8203_v20 = vsel %vm7599_vm5, %v5521_v32, %v1432_v44  ;;  %v3933_v62 = vrot.slane %v3931_v48, 5  ;;  %v1442_v23 = vrot.slane %v7179_v42, 5  ;;  %v1321_v44 = vld [vmem:[%s7321_s20 + $0x90] sm:$0xe]  ;;  %v8216_v32 = vld [vmem:[%s7321_s20 + $0x4c] sm:$0xf]  ;;  %v3952_v48 = vor.u32 %v3951_v22, %v8206_v51 }
  0xd0   : > { %6649 = vmatprep.subr.bf16.mxu0 %v7119_v40  ;;  %v3969_v12 = vshll.u32 %v8216_v32, 16  ;;  %v3973_v18 = vshrl.u32 %v8216_v32, 16  ;;  %v9195_v42 = vcombine.low %v7993_v30, %v8001_v6  ;;  %v7113_v30 = vld [vmem:[%s9170_s1 + $0xd0] sm:$0xff]   ;;  %v3924_v6 = vsel %vm7353_vm2, %v3919_v46, %v8168_v39  ;;  %v7112_v8 = vld [vmem:[%s7321_s20 + $0xa8] sm:$0xff]   ;;  %v8271_v39 = vld [vmem:[%s7321_s20 + $0x5c] sm:$0x1] }
  0xd1   : > { %v3934_v58 = vsel %vm7353_vm2, %v3929_v38, %v3933_v62  ;;  %v5523_v22 = vrot.slane %v1321_v44, 9  ;;  %v3965_v25 = vrot.slane %v3963_v50, 5  ;;  %9197 = vst [vmem:[#allocation3_spill] sm:$0xff] %v8271_v39  ;;  %v3943_v46 = vrot.slane %v3942_v10, 4 }
  0xd2   : > { %v3953_v62 = vrot.slane %v3952_v48, 4  ;;  %v8273_v38 = vrot.slane %v3969_v12, 5  ;;  %v8275_v34 = vrot.slane %v3993_v5, 5  ;;  %v8280_v50 = vcombine.low %v3900_v0, %v3910_v28  ;;  %v5809_v28 = vld [vmem:[%s7321_s20 + $0x60] sm:$0xf] }
  0xd3   : > { %6650 = vmatpush3.bf16.msra.mxu0 %v7119_v40  ;;  %v8236_v40 = vsel %vm7599_vm5, %v5522_v53, %v1439_v3  ;;  %v3984_v53 = vshrl.u32 %v5806_v17, 16  ;;  %v3987_v3 = vshll.u32 %v5806_v17, 16  ;;  %v7180_v17 = vld [vmem:[%s7321_s20 + $0x94] sm:$0xf]  ;;  %v8284_v48 = vcombine.low %v3924_v6, %v3934_v58 }
  0xd4   : > { %6683 = vmatprep.subr.bf16.mxu0 %v8184_v21  ;;  %v3979_v0 = vshll.u32 %v8264_v63, 16  ;;  %v3948_v6 = vsel %vm7353_vm2, %v3943_v46, %v8206_v51  ;;  %v9200_v46 = vcombine.low %v8027_v61, %v8031_v36 }
  0xd5   : > { %6620 = vmatmul.mubr.bf16.gmra.mrb[16].mxu0 %v7106_v43  ;;  %v3997_v43 = vshrl.u32 %v8228_v33, 16  ;;  %v3986_v44 = vrot.slane %v3984_v53, 4  ;;  %v7181_v53 = vld [vmem:[%s7321_s20 + $0x98] sm:$0x1] }
  0xd6   : > { %6412 = vmatmul.mubr.bf16.vlgmr.msra.gmra.mrb[0].mxu1 %v9195_v42  ;;  %6623 = vmatprep.mubr.bf16.mxu0 %v7108_v19  ;;  %v8267_v19 = vrot.slane %v3955_v1, 5  ;;  %v1446_v42 = vrot.slane %v7180_v17, 5  ;;  %v7182_v17 = vld [vmem:[%s7321_s20 + $0xa0] sm:$0xf]  ;;  %v3981_v36 = vrot.slane %v3979_v0, 5 }
  0xd7   : > { %6444 = vmatpush3.bf16.msra.mxu1 %v7946_v60  ;;  %6415 = vmatprep.mubr.bf16.mxu1 %v9196_v52  ;;  %v8261_v60 = vsel %vm7599_vm5, %v1441_v2, %v1442_v23  ;;  %v3962_v52 = vrot.slane %v3960_v13, 4  ;;  %v3975_v23 = vrot.slane %v3973_v18, 4  ;;  %v3989_v2 = vrot.slane %v3987_v3, 5  ;;  %v7117_v13 = vld [vmem:[%s9170_s1 + $0xd8] sm:$0xff]  }
  0xd8   : > { %6445 = vmatprep.subr.bf16.mxu1 %v7109_v31  ;;  %v3999_v1 = vrot.slane %v3997_v43, 4  ;;  %v1322_v18 = vld [vmem:[%s7321_s20 + $0x9c] sm:$0xe]  ;;  %v1449_v3 = vrot.slane %v7181_v53, 5  ;;  %v8297_v43 = vld [vmem:[%s7321_s20 + $0x64] sm:$0xf] }
  0xd9   : > { %v3966_v5 = vor.u32 %v3965_v25, %v3962_v52  ;;  %9198 = vst [vmem:[#allocation4_spill] sm:$0xff] %v8297_v43  ;;  %v3976_v58 = vor.u32 %v3975_v23, %v8273_v38  ;;  %v1453_v12 = vrot.slane %v7182_v17, 5  ;;  %v9199_v25 = vcombine.low %v8017_v24, %v8021_v35  ;;  %v7114_v23 = vld [vmem:[%s7321_s20 + $0xb4] sm:$0xff]   ;;  %v7120_v24 = vld [vmem:[%s9170_s1 + $0xe0] sm:$0xff]   ;;  %v5812_v17 = vld [vmem:[%s7321_s20 + $0x6c] sm:$0xf] }
  0xda   : > { %v1448_v52 = vrot.slane %v1446_v42, 4  ;;  %v3990_v53 = vor.u32 %v3989_v2, %v3986_v44  ;;  %v4000_v51 = vor.u32 %v3999_v1, %v8275_v34  ;;  %v4008_v35 = vshrl.u32 %v5809_v28, 16  ;;  %v7183_v2 = vld [vmem:[%s7321_s20 + $0xa4] sm:$0x1] }
  0xdb   : > { %6446 = vmatpush3.bf16.msra.mxu1 %v7109_v31  ;;  %v8291_v31 = vsel %vm7599_vm5, %v5523_v22, %v1446_v42  ;;  %v4003_v22 = vshll.u32 %v8271_v39, 16  ;;  %v4021_v42 = vshrl.u32 %v8297_v43, 16  ;;  %v3967_v61 = vrot.slane %v3966_v5, 4  ;;  %v8466_v39 = vld [vmem:[%s7321_s20 + $0x98] sm:$0x1] }
  0xdc   : > { %6447 = vmatprep.subr.bf16.mxu1 %v7113_v30  ;;  %v5524_v44 = vrot.slane %v1322_v18, 9  ;;  %v1456_v1 = vrot.slane %v7183_v2, 5  ;;  %v3991_v5 = vrot.slane %v3990_v53, 4  ;;  %v4001_v18 = vrot.slane %v4000_v51, 4  ;;  %9214 = vst [vmem:[#allocation14_spill] sm:$0xff] %v8466_v39 }
  0xdd   : > { %6624 = vmatmul.mubr.bf16.gmra.mrb[20].mxu0 %v7110_v54  ;;  %v3958_v54 = vsel %vm7353_vm2, %v3953_v62, %v8267_v19  ;;  %v4017_v19 = vshll.u32 %v8297_v43, 16  ;;  %v7116_v62 = vld [vmem:[%s7321_s20 + $0xc0] sm:$0xff]   ;;  %v4005_v10 = vrot.slane %v4003_v22, 5  ;;  %v8333_v43 = vsel %vm7599_vm5, %v1448_v52, %v1449_v3 }
  0xde   : > { %6416 = vmatmul.mubr.bf16.gmra.mrb[4].mxu1 %v9199_v25  ;;  %6627 = vmatprep.mubr.bf16.mxu0 %v7112_v8  ;;  %v4011_v8 = vshll.u32 %v5809_v28, 16  ;;  %v3977_v25 = vrot.slane %v3976_v58, 4  ;;  %v1460_v28 = vrot.slane %v7184_v41, 5  ;;  %v8329_v55 = vcombine.low %v3948_v6, %v3958_v54  ;;  %v7122_v41 = vld [vmem:[%s9170_s1 + $0xe8] sm:$0xff]  }
  0xdf   : > { %6419 = vmatprep.mubr.bf16.mxu1 %v9200_v46  ;;  %6448 = vmatpush3.bf16.msra.mxu1 %v7113_v30  ;;  %v1323_v30 = vld [vmem:[%s7321_s20 + $0xa8] sm:$0xe]  ;;  %v1455_v46 = vrot.slane %v1453_v12, 4  ;;  %v4010_v0 = vrot.slane %v4008_v35, 4  ;;  %v8335_v58 = vrot.slane %v4017_v19, 5  ;;  %v4023_v22 = vrot.slane %v4021_v42, 4 }
  0xe0   : > { %6449 = vmatprep.subr.bf16.mxu1 %v7117_v13  ;;  %v4013_v2 = vrot.slane %v4011_v8, 5  ;;  %v3972_v3 = vsel %vm7353_vm2, %v3967_v61, %v8273_v38  ;;  %v8345_v6 = vsel %vm7599_vm5, %v5524_v44, %v1453_v12  ;;  %v4032_v54 = vshrl.u32 %v5812_v17, 16  ;;  %v7185_v38 = vld [vmem:[%s7321_s20 + $0xb0] sm:$0x1]  ;;  %v1324_v19 = vld [vmem:[%s7321_s20 + $0xb4] sm:$0xe] }
  0xe1   : > { %v4035_v52 = vshll.u32 %v5812_v17, 16  ;;  %v3982_v53 = vsel %vm7353_vm2, %v3977_v25, %v3981_v36  ;;  %v8354_v51 = vsel %vm7599_vm5, %v1455_v46, %v1456_v1  ;;  %v5525_v35 = vrot.slane %v1323_v30, 9  ;;  %v8376_v30 = vld [vmem:[%s7321_s20 + $0x74] sm:$0x1]  ;;  %v7186_v25 = vld [vmem:[%s7321_s20 + $0xb8] sm:$0xf] }
  0xe2   : > { %v1463_v8 = vrot.slane %v7185_v38, 5  ;;  %v9203_v12 = vcombine.low %v8048_v49, %v8062_v4  ;;  %v3996_v42 = vsel %vm7353_vm2, %v3991_v5, %v8275_v34  ;;  %v4006_v61 = vsel %vm7353_vm2, %v4001_v18, %v4005_v10  ;;  %v7118_v4 = vld [vmem:[%s7321_s20 + $0xcc] sm:$0xff]   ;;  %9205 = vst [vmem:[#allocation7_spill] sm:$0xff] %v8376_v30  ;;  %v5818_v38 = vld [vmem:[%s7321_s20 + $0x84] sm:$0xf] }
  0xe3   : > { %6450 = vmatpush3.bf16.msra.mxu1 %v7117_v13  ;;  %v8348_v13 = vld [vmem:[%s7321_s20 + $0x70] sm:$0xf]  ;;  %v1462_v36 = vrot.slane %v1460_v28, 4  ;;  %v4027_v44 = vshll.u32 %v8327_v47, 16  ;;  %v9204_v49 = vcombine.low %v8084_v26, %v8088_v56  ;;  %v4024_v1 = vor.u32 %v4023_v22, %v8335_v58  ;;  %v8393_v22 = vld [vmem:[%s7321_s20 + $0x7c] sm:$0xf] }
  0xe4   : > { %6451 = vmatprep.subr.bf16.mxu1 %v7120_v24  ;;  %9202 = vst [vmem:[#allocation6_spill] sm:$0xff] %v8348_v13  ;;  %v4041_v34 = vshll.u32 %v8348_v13, 16  ;;  %v4045_v10 = vshrl.u32 %v8348_v13, 16  ;;  %v5526_v17 = vrot.slane %v1324_v19, 9  ;;  %v1467_v46 = vrot.slane %v7186_v25, 5  ;;  %9206 = vst [vmem:[#allocation8_spill] sm:$0xff] %v8393_v22 }
  0xe5   : > { %6628 = vmatmul.mubr.bf16.gmra.mrb[24].mxu0 %v7114_v23  ;;  %v7124_v23 = vld [vmem:[%s9170_s1 + $0xf0] sm:$0xff]   ;;  %v4034_v26 = vrot.slane %v4032_v54, 4  ;;  %v4037_v56 = vrot.slane %v4035_v52, 5  ;;  %v8384_v18 = vcombine.low %v3972_v3, %v3982_v53  ;;  %v8396_v19 = vcombine.low %v3996_v42, %v4006_v61  ;;  %v7187_v3 = vld [vmem:[%s7321_s20 + $0xbc] sm:$0x1] }
  0xe6   : > { %6420 = vmatmul.mubr.bf16.gmra.mrb[8].mxu1 %v9203_v12  ;;  %6631 = vmatprep.mubr.bf16.mxu0 %v7116_v62  ;;  %v4014_v62 = vor.u32 %v4013_v2, %v4010_v0  ;;  %v8390_v2 = vsel %vm7599_vm5, %v5525_v35, %v1460_v28  ;;  %v8400_v54 = vsel %vm7599_vm5, %v1462_v36, %v1463_v8  ;;  %v8402_v52 = vrot.slane %v4027_v44, 5  ;;  %v7126_v12 = vld [vmem:[%s9170_s1 + $0xf8] sm:$0xff]   ;;  %v8409_v28 = vld [vmem:[%s7321_s20 + $0x88] sm:$0xf] }
  0xe7   : > { %6423 = vmatprep.mubr.bf16.mxu1 %v9204_v49  ;;  %6452 = vmatpush3.bf16.msra.mxu1 %v7120_v24  ;;  %v5815_v24 = vld [vmem:[%s7321_s20 + $0x78] sm:$0xf]  ;;  %v1470_v53 = vrot.slane %v7187_v3, 5  ;;  %9207 = vst [vmem:[#allocation9_spill] sm:$0xff] %v8409_v28  ;;  %v8413_v42 = vrot.slane %v4024_v1, 4  ;;  %v8415_v61 = vrot.slane %v4041_v34, 5  ;;  %v8419_v36 = vsel %vm7599_vm5, %v5526_v17, %v1467_v46 }
  0xe8   : > { %6453 = vmatprep.subr.bf16.mxu1 %v7122_v41  ;;  %v8411_v35 = vrot.slane %v4014_v62, 4  ;;  %v4047_v8 = vrot.slane %v4045_v10, 4  ;;  %v1469_v44 = vrot.slane %v1467_v46, 4  ;;  %v4038_v49 = vor.u32 %v4037_v56, %v4034_v26  ;;  %v5821_v3 = vld [vmem:[%s7321_s20 + $0x90] sm:$0xf] }
  0xe9   : > { %v4051_v25 = vshll.u32 %v8376_v30, 16  ;;  %v4059_v0 = vshll.u32 %v5815_v24, 16  ;;  %v4065_v62 = vshll.u32 %v8393_v22, 16  ;;  %v4069_v1 = vshrl.u32 %v8393_v22, 16  ;;  %v8426_v34 = vld [vmem:[%s7321_s20 + $0x94] sm:$0xf] }
  0xea   : > { %9208 = vst [vmem:[#allocation10_spill] sm:$0xff] %v8426_v34  ;;  %v9209_v10 = vcombine.low %v8128_v27, %v8132_v29  ;;  %v4080_v17 = vshrl.u32 %v5818_v38, 16  ;;  %v4083_v46 = vshll.u32 %v5818_v38, 16  ;;  %v4093_v26 = vshrl.u32 %v8409_v28, 16  ;;  %v5824_v38 = vld [vmem:[%s7321_s20 + $0x9c] sm:$0xf] }
  0xeb   : > { %6454 = vmatpush3.bf16.msra.mxu1 %v7122_v41  ;;  %v4056_v41 = vshrl.u32 %v5815_v24, 16  ;;  %v9210_v56 = vcombine.low %v8139_v45, %v8143_v14  ;;  %v4048_v29 = vor.u32 %v4047_v8, %v8415_v61  ;;  %v4107_v24 = vshll.u32 %v5821_v3, 16  ;;  %v8448_v45 = vld [vmem:[%s7321_s20 + $0x80] sm:$0x1] }
  0xec   : > { %6455 = vmatprep.subr.bf16.mxu1 %v7124_v23  ;;  %v8445_v5 = vrot.slane %v4051_v25, 5  ;;  %9211 = vst [vmem:[#allocation11_spill] sm:$0xff] %v8448_v45  ;;  %v4113_v14 = vshll.u32 %v8426_v34, 16  ;;  %v4061_v27 = vrot.slane %v4059_v0, 5  ;;  %v4071_v8 = vrot.slane %v4069_v1, 4 }
  0xed   : > { %6632 = vmatmul.mubr.bf16.gmra.mrb[28].mxu0 %v7118_v4  ;;  %v4089_v4 = vshll.u32 %v8409_v28, 16  ;;  %v8452_v28 = vrot.slane %v4065_v62, 5  ;;  %v8458_v22 = vld [vmem:[%s7321_s20 + $0xa0] sm:$0xf]  ;;  %v4082_v25 = vrot.slane %v4080_v17, 4  ;;  %v4085_v30 = vrot.slane %v4083_v46, 5 }
  0xee   : > { %6424 = vmatmul.mubr.bf16.gmra.mrb[12].mxu1 %v9209_v10  ;;  %6651 = vmatprep.mubr.bf16.mxu0 %v8197_v59  ;;  %v4104_v59 = vshrl.u32 %v5821_v3, 16  ;;  %v8443_v10 = vrot.slane %v4038_v49, 4  ;;  %v8455_v3 = vld [vmem:[%s7321_s20 + $0x8c] sm:$0x1]  ;;  %9213 = vst [vmem:[#allocation13_spill] sm:$0xff] %v8458_v22  ;;  %v4095_v47 = vrot.slane %v4093_v26, 4  ;;  %v8475_v62 = vsel %vm7599_vm5, %v1469_v44, %v1470_v53 }
  0xef   : > { %6427 = vmatprep.mubr.bf16.mxu1 %v9210_v56  ;;  %6456 = vmatpush3.bf16.msra.mxu1 %v7124_v23  ;;  %v4117_v23 = vshrl.u32 %v8426_v34, 16  ;;  %v4058_v56 = vrot.slane %v4056_v41, 4  ;;  %9212 = vst [vmem:[#allocation12_spill] sm:$0xff] %v8455_v3  ;;  %v7123_v49 = vld [vmem:[%s9170_s1 + $0x208] sm:$0xff]   ;;  %v8463_v13 = vrot.slane %v4089_v4, 5  ;;  %v4109_v34 = vrot.slane %v4107_v24, 5 }
  0xf0   : > { %6457 = vmatprep.subr.bf16.mxu1 %v7126_v12  ;;  %v5827_v41 = vld [vmem:[%s7321_s20 + $0xa8] sm:$0xf]  ;;  %v4106_v1 = vrot.slane %v4104_v59, 4  ;;  %v8480_v17 = vld [vmem:[%s9170_s1 + $0x100] sm:$0xff]   ;;  %v8483_v46 = vrot.slane %v4113_v14, 5  ;;  %v4128_v26 = vshrl.u32 %v5824_v38, 16  ;;  %v9216_v24 = vcombine.low %v8147_v16, %v8157_v15 }
  0xf1   : > { %9215 = vst [vmem:[#allocation15_spill] sm:$0xff] %v8480_v17  ;;  %v4119_v4 = vrot.slane %v4117_v23, 4  ;;  %v4131_v0 = vshll.u32 %v5824_v38, 16  ;;  %v8486_v53 = vrot.slane %v4048_v29, 4  ;;  %v4137_v44 = vshll.u32 %v8458_v22, 16  ;;  %v7125_v16 = vld [vmem:[%s9170_s1 + $0x210] sm:$0xff]  }
  0xf2   : > { %v4141_v59 = vshrl.u32 %v8458_v22, 16  ;;  %v4062_v14 = vor.u32 %v4061_v27, %v4058_v56  ;;  %v4072_v38 = vor.u32 %v4071_v8, %v8452_v28  ;;  %v4086_v23 = vor.u32 %v4085_v30, %v4082_v25  ;;  %v8498_v29 = vld [vmem:[%s7321_s20 + $0xac] sm:$0xf]  ;;  %v8511_v25 = vld [vmem:[%s7321_s20 + $0xa4] sm:$0x1] }
  0xf3   : > { %6458 = vmatpush3.bf16.msra.mxu1 %v7126_v12  ;;  %v4075_v12 = vshll.u32 %v8448_v45, 16  ;;  %9217 = vst [vmem:[#allocation16_spill] sm:$0xff] %v8498_v29  ;;  %v4096_v15 = vor.u32 %v4095_v47, %v8463_v13  ;;  %v4152_v27 = vshrl.u32 %v5827_v41, 16  ;;  %v4155_v30 = vshll.u32 %v5827_v41, 16 }
  0xf4   : > { %6731 = vmatprep.subr.bf16.mxu1 %v8480_v17  ;;  %v9218_v17 = vcombine.low %v8203_v20, %v8224_v7  ;;  %v4110_v56 = vor.u32 %v4109_v34, %v4106_v1  ;;  %v4120_v8 = vor.u32 %v4119_v4, %v8483_v46  ;;  %v4130_v20 = vrot.slane %v4128_v26, 4 }
  0xf5   : > { %6652 = vmatmul.mubr.bf16.vlgmr.msra.gmra.mrb[0].mxu0 %v8280_v50  ;;  %v4099_v50 = vshll.u32 %v8455_v3, 16  ;;  %v4133_v7 = vrot.slane %v4131_v0, 5  ;;  %v4165_v22 = vshrl.u32 %v8498_v29, 16  ;;  %v4063_v47 = vrot.slane %v4062_v14, 4  ;;  %v7127_v0 = vld [vmem:[%s9170_s1 + $0x218] sm:$0xff]  }
  0xf6   : > { %6428 = vmatmul.mubr.bf16.gmra.mrb[16].mxu1 %v9216_v24  ;;  %6684 = vmatpush3.bf16.msra.mxu0 %v8184_v21  ;;  %v4123_v21 = vshll.u32 %v8466_v39, 16  ;;  %v4161_v24 = vshll.u32 %v8498_v29, 16  ;;  %v4073_v39 = vrot.slane %v4072_v38, 4  ;;  %v4077_v3 = vrot.slane %v4075_v12, 5 }
  0xf7   : > { %6431 = vmatprep.mubr.bf16.mxu1 %v9218_v17  ;;  %6655 = vmatprep.mubr.bf16.mxu0 %v8284_v48  ;;  %v8513_v17 = vrot.slane %v4137_v44, 5  ;;  %v4143_v48 = vrot.slane %v4141_v59, 4  ;;  %v4101_v41 = vrot.slane %v4099_v50, 5  ;;  %v4087_v34 = vrot.slane %v4086_v23, 4 }
  0xf8   : > { %6685 = vmatprep.subr.bf16.mxu0 %v7123_v49  ;;  %v4097_v1 = vrot.slane %v4096_v15, 4  ;;  %v4154_v4 = vrot.slane %v4152_v27, 4  ;;  %v4157_v45 = vrot.slane %v4155_v30, 5  ;;  %v4111_v26 = vrot.slane %v4110_v56, 4  ;;  %v8579_v27 = vld [vmem:[%s7321_s20 + $0xbc] sm:$0x1] }
  0xf9   : > { %v4125_v44 = vrot.slane %v4123_v21, 5  ;;  %v4134_v59 = vor.u32 %v4133_v7, %v4130_v20  ;;  %v4147_v29 = vshll.u32 %v8511_v25, 16  ;;  %v4144_v12 = vor.u32 %v4143_v48, %v8513_v17  ;;  %v8546_v21 = vld [vmem:[%s7321_s20 + $0xb0] sm:$0x1] }
  0xfa   : > { %6686 = vmatpush3.bf16.msra.mxu0 %v7123_v49  ;;  %v4121_v49 = vrot.slane %v4120_v8, 4  ;;  %v8523_v14 = vrot.slane %v4161_v24, 5  ;;  %v4167_v38 = vrot.slane %v4165_v22, 4  ;;  %v9219_v23 = vor.u32 %v7931_v57, %v7929_v11 }
  0xfb   : > { %6687 = vmatprep.subr.bf16.mxu0 %v7125_v16  ;;  %v9220_v15 = vcombine.low %v8236_v40, %v8261_v60  ;;  %v4054_v22 = vsel %vm7353_vm2, %v8486_v53, %v8445_v5  ;;  %v4068_v57 = vsel %vm7353_vm2, %v4063_v47, %v8452_v28  ;;  %v9221_v40 = vcombine.low %v8291_v31, %v8333_v43  ;;  %v7130_v31 = vld [vmem:[%s9170_s1 + $0x220] sm:$0xff]  }
  0xfc   : > { %v8528_v50 = vrot.slane %v9219_v23, 4  ;;  %v4078_v60 = vsel %vm7353_vm2, %v4073_v39, %v4077_v3  ;;  %v4158_v5 = vor.u32 %v4157_v45, %v4154_v4  ;;  %v4102_v28 = vsel %vm7353_vm2, %v4097_v1, %v4101_v41  ;;  %v5867_v41 = vld [vmem:[%s7321_s20 + $0x48] sm:$0xe] }
  0xfd   : > { %6656 = vmatmul.mubr.bf16.gmra.mrb[4].mxu0 %v8329_v55  ;;  %v4044_v55 = vsel %vm7353_vm2, %v8443_v10, %v8415_v61  ;;  %v5830_v61 = vld [vmem:[%s7321_s20 + $0xb4] sm:$0xf]  ;;  %v8558_v10 = vld [vmem:[%s7321_s20 + $0xb8] sm:$0xf]  ;;  %v4116_v39 = vsel %vm7353_vm2, %v4111_v26, %v8483_v46  ;;  %v8568_v43 = vrot.slane %v4134_v59, 4  ;;  %v8570_v3 = vrot.slane %v4147_v29, 5 }
  0xfe   : > { %6432 = vmatmul.mubr.bf16.gmra.mrb[20].mxu1 %v9220_v15  ;;  %6659 = vmatprep.mubr.bf16.mxu0 %v8384_v18  ;;  %v4092_v18 = vsel %vm7353_vm2, %v4087_v34, %v8463_v13  ;;  %v4126_v13 = vsel %vm7353_vm2, %v4121_v49, %v4125_v44  ;;  %v8574_v45 = vrot.slane %v4144_v12, 4  ;;  %v4168_v53 = vor.u32 %v4167_v38, %v8523_v14  ;;  %v5868_v26 = vld [vmem:[%s7321_s20 + $0x54] sm:$0xe] }
  0xff   : > { %6435 = vmatprep.mubr.bf16.mxu1 %v9221_v40  ;;  %6688 = vmatpush3.bf16.msra.mxu0 %v7125_v16  ;;  %v4171_v16 = vshll.u32 %v8546_v21, 16  ;;  %v9222_v46 = vsel %vm7353_vm2, %v8413_v42, %v8402_v52  ;;  %v9223_v29 = vsel %vm7353_vm2, %v8411_v35, %v8335_v58  ;;  %v4176_v56 = vshrl.u32 %v5830_v61, 16 }
 0x100   : > { %6689 = vmatprep.subr.bf16.mxu0 %v7127_v0  ;;  %v5845_v30 = vcombine.low %v9223_v29, %v9222_v46  ;;  %v4179_v8 = vshll.u32 %v5830_v61, 16  ;;  %v4185_v20 = vshll.u32 %v8558_v10, 16  ;;  %v5541_v7 = vcombine.low %v8390_v2, %v8400_v54  ;;  %v7133_v2 = vld [vmem:[%s9170_s1 + $0x228] sm:$0xff]   ;;  %v5833_v54 = vld [vmem:[%s7321_s20 + $0xc0] sm:$0xf]  ;;  %v9227_v29 = vld [vmem:[#allocation5_spill] sm:$0xff] }
 0x101   : > { %v5542_v48 = vcombine.low %v8419_v36, %v8475_v62  ;;  %v5846_v24 = vcombine.low %v4044_v55, %v4054_v22  ;;  %v8596_v52 = vrot.slane %v4158_v5, 4  ;;  %v5847_v42 = vcombine.low %v4068_v57, %v4078_v60 }
 0x102   : > { %v8598_v58 = vcombine.low %v4092_v18, %v4102_v28  ;;  %v8600_v35 = vcombine.low %v4116_v39, %v4126_v13  ;;  %v4140_v47 = vsel %vm7353_vm2, %v8568_v43, %v8513_v17  ;;  %v4150_v34 = vsel %vm7353_vm2, %v8574_v45, %v8570_v3  ;;  %v5870_v28 = vld [vmem:[%s7321_s20 + $0x6c] sm:$0xe] }
 0x103   : > { %6690 = vmatpush3.bf16.msra.mxu0 %v7127_v0  ;;  %v8616_v1 = vrot.slane %v4168_v53, 4  ;;  %v8618_v4 = vrot.slane %v4171_v16, 5  ;;  %v4189_v0 = vshrl.u32 %v8558_v10, 16  ;;  %v9224_v44 = vcombine.low %v8345_v6, %v8354_v51  ;;  %v7136_v6 = vld [vmem:[%s9170_s1 + $0x230] sm:$0xff]   ;;  %v8640_v51 = vld [vmem:[%s7321_s20 + $0xc4] sm:$0xf] }
 0x104   : > { %6691 = vmatprep.subr.bf16.mxu0 %v7130_v31  ;;  %v8625_v59 = vrot.slane %v4176_v56, 4  ;;  %v8629_v49 = vrot.slane %v4185_v20, 5  ;;  %v4195_v12 = vshll.u32 %v8579_v27, 16  ;;  %v4164_v38 = vsel %vm7353_vm2, %v8596_v52, %v8523_v14  ;;  %v5869_v14 = vld [vmem:[%s7321_s20 + $0x60] sm:$0xe]  ;;  %v9225_v39 = vld [vmem:[#allocation3_spill] sm:$0xff] }
 0x105   : > { %6660 = vmatmul.mubr.bf16.gmra.mrb[8].mxu0 %v8396_v19  ;;  %v8627_v19 = vrot.slane %v4179_v8, 5  ;;  %v4200_v23 = vshrl.u32 %v5833_v54, 16  ;;  %v5883_v15 = vrot.slane %v5867_v41, 9  ;;  %v4662_v55 = vrot.slane %v8216_v32, 5  ;;  %v7128_v13 = vld [vmem:[%s7321_s20 + $0xc] sm:$0xff]   ;;  %v7139_v56 = vld [vmem:[%s9170_s1 + $0x238] sm:$0xff]  }
 0x106   : > { %6436 = vmatmul.mubr.bf16.gmra.mrb[24].mxu1 %v9224_v44  ;;  %6663 = vmatprep.mubr.bf16.mxu0 %v5845_v30  ;;  %v4203_v22 = vshll.u32 %v5833_v54, 16  ;;  %v4665_v57 = vrot.slane %v8264_v63, 5  ;;  %v5884_v40 = vrot.slane %v5868_v26, 9  ;;  %v4669_v60 = vrot.slane %v8228_v33, 5  ;;  %v9226_v16 = vld [vmem:[#allocation4_spill] sm:$0xff]  ;;  %v9228_v52 = vld [vmem:[#allocation6_spill] sm:$0xff] }
 0x107   : > { %6439 = vmatprep.mubr.bf16.mxu1 %v5541_v7  ;;  %6692 = vmatpush3.bf16.msra.mxu0 %v7130_v31  ;;  %v4174_v18 = vsel %vm7353_vm2, %v8616_v1, %v8618_v4  ;;  %v8650_v5 = vrot.slane %v4189_v0, 4  ;;  %v8654_v61 = vsel %vm7599_vm5, %v5883_v15, %v4662_v55  ;;  %v4664_v32 = vrot.slane %v4662_v55, 4  ;;  %v9229_v4 = vld [vmem:[#allocation7_spill] sm:$0xff] }
 0x108   : > { %6693 = vmatprep.subr.bf16.mxu0 %v7133_v2  ;;  %v4209_v31 = vshll.u32 %v8640_v51, 16  ;;  %v8660_v63 = vsel %vm7599_vm5, %v5884_v40, %v4669_v60  ;;  %v4671_v33 = vrot.slane %v4669_v60, 4  ;;  %v4672_v3 = vrot.slane %v9225_v39, 5  ;;  %v8691_v26 = vld [vmem:[%s7321_s20 + $0xc8] sm:$0x1]  ;;  %v7129_v40 = vld [vmem:[%s7321_s20 + $0x18] sm:$0xff]  }
 0x109   : > { %v8666_v45 = vsel %vm7599_vm5, %v4664_v32, %v4665_v57  ;;  %v5885_v53 = vrot.slane %v5869_v14, 9  ;;  %v4676_v46 = vrot.slane %v9226_v16, 5  ;;  %v4679_v30 = vrot.slane %v9227_v29, 5  ;;  %v7131_v39 = vld [vmem:[%s7321_s20 + $0x24] sm:$0xff]  }
 0x10a   : > { %v5899_v8 = vcombine.low %v8654_v61, %v8666_v45  ;;  %v8677_v20 = vsel %vm7599_vm5, %v4671_v33, %v4672_v3  ;;  %v5886_v7 = vrot.slane %v5870_v28, 9  ;;  %v4686_v0 = vrot.slane %v9229_v4, 5  ;;  %v9231_v28 = vld [vmem:[#allocation11_spill] sm:$0xff]  ;;  %v5640_v61 = vld [vmem:[%s7321_s20 + $0x90] sm:$0xf] }
 0x10b   : > { %6694 = vmatpush3.bf16.msra.mxu0 %v7133_v2  ;;  %v4683_v2 = vrot.slane %v9228_v52, 5  ;;  %v5900_v54 = vcombine.low %v8660_v63, %v8677_v20  ;;  %v8684_v41 = vsel %vm7599_vm5, %v5885_v53, %v4676_v46  ;;  %v4678_v1 = vrot.slane %v4676_v46, 4  ;;  %v9232_v53 = vld [vmem:[#allocation2_spill] sm:$0xff]  ;;  %v7145_v45 = vld [vmem:[%s7321_s20 + $0xa8] sm:$0xff]  }
 0x10c   : > { %6695 = vmatprep.subr.bf16.mxu0 %v7136_v6  ;;  %v8693_v44 = vrot.slane %v4200_v23, 4  ;;  %v8706_v36 = vcombine.low %v4140_v47, %v4150_v34  ;;  %v4182_v62 = vor.u32 %v8627_v19, %v8625_v59  ;;  %v5871_v23 = vld [vmem:[%s7321_s20 + $0x78] sm:$0xe]  ;;  %v8718_v57 = vrot.slane %v4195_v12, 5  ;;  %v5836_v12 = vld [vmem:[%s7321_s20 + $0xcc] sm:$0xf] }
 0x10d   : > { %6664 = vmatmul.mubr.bf16.gmra.mrb[12].mxu0 %v5846_v24  ;;  %v8695_v24 = vrot.slane %v4203_v22, 5  ;;  %v8699_v15 = vsel %vm7599_vm5, %v5886_v7, %v4683_v2  ;;  %v4685_v55 = vrot.slane %v4683_v2, 4  ;;  %v8716_v22 = vcombine.low %v4164_v38, %v4174_v18  ;;  %v5634_v47 = vld [vmem:[%s7321_s20 + $0x78] sm:$0xf]  ;;  %v9230_v18 = vld [vmem:[#allocation8_spill] sm:$0xff] }
 0x10e   : > { %6440 = vmatmul.mubr.bf16.gmra.mrb[28].mxu1 %v5542_v48  ;;  %6667 = vmatprep.mubr.bf16.mxu0 %v5847_v42  ;;  %v4213_v48 = vshrl.u32 %v8640_v51, 16  ;;  %v8713_v42 = vsel %vm7599_vm5, %v4678_v1, %v4679_v30  ;;  %v4192_v34 = vor.u32 %v8650_v5, %v8629_v49  ;;  %v8729_v59 = vrot.slane %v4209_v31, 5  ;;  %v8743_v31 = vld [vmem:[%s7321_s20 + $0xd0] sm:$0xf]  ;;  %v9233_v1 = vld [vmem:[#allocation9_spill] sm:$0xff] }
 0x10f   : > { %6459 = vmatprep.mubr.bf16.mxu1 %v7128_v13  ;;  %6696 = vmatpush3.bf16.msra.mxu0 %v7136_v6  ;;  %v5901_v17 = vcombine.low %v8684_v41, %v8713_v42  ;;  %v8724_v43 = vsel %vm7599_vm5, %v4685_v55, %v4686_v0  ;;  %v4219_v19 = vshll.u32 %v8691_v26, 16  ;;  %v5872_v6 = vld [vmem:[%s7321_s20 + $0x84] sm:$0xe]  ;;  %v4206_v60 = vor.u32 %v8695_v24, %v8693_v44  ;;  %v9234_v24 = vld [vmem:[#allocation12_spill] sm:$0xff]  ;;  %v7209_v63 = vld [vmem:[%s7321_s20 + $0x8c] sm:$0x1] }
 0x110   : > { %6697 = vmatprep.subr.bf16.mxu0 %v7139_v56  ;;  %v5902_v38 = vcombine.low %v8699_v15, %v8724_v43  ;;  %v5887_v14 = vrot.slane %v5871_v23, 9  ;;  %v4690_v32 = vrot.slane %v9230_v18, 5  ;;  %v4693_v33 = vrot.slane %v9231_v28, 5 }
 0x111   : > { %v4215_v5 = vrot.slane %v4213_v48, 4  ;;  %v2444_v3 = vshrl.u32 %v5634_v47, 16  ;;  %v2447_v13 = vshll.u32 %v5634_v47, 16  ;;  %v2466_v16 = vsel %vm7353_vm2, %v8528_v50, %v9232_v53 }
 0x112   : > { %v4224_v46 = vshrl.u32 %v5836_v12, 16  ;;  %v8751_v29 = vsel %vm7599_vm5, %v5887_v14, %v4690_v32  ;;  %v4692_v30 = vrot.slane %v4690_v32, 4  ;;  %v5888_v7 = vrot.slane %v5872_v6, 9  ;;  %v7189_v6 = vld [vmem:[%s9170_s1 + $0x108] sm:$0xff]  }
 0x113   : > { %6698 = vmatpush3.bf16.msra.mxu0 %v7139_v56  ;;  %v4227_v52 = vshll.u32 %v5836_v12, 16  ;;  %v2446_v2 = vrot.slane %v2444_v3, 4  ;;  %v2449_v56 = vrot.slane %v2447_v13, 5  ;;  %v4697_v4 = vrot.slane %v9233_v1, 5  ;;  %v5873_v12 = vld [vmem:[%s7321_s20 + $0x90] sm:$0xe] }
 0x114   : > { %v4233_v50 = vshll.u32 %v8743_v31, 16  ;;  %v4237_v0 = vshrl.u32 %v8743_v31, 16  ;;  %v8760_v44 = vsel %vm7599_vm5, %v4692_v30, %v4693_v33  ;;  %v4700_v55 = vrot.slane %v9234_v24, 5  ;;  %v7132_v3 = vld [vmem:[%s7321_s20 + $0x30] sm:$0xff]  }
 0x115   : > { %6668 = vmatmul.mubr.bf16.gmra.mrb[16].mxu0 %v8598_v58  ;;  %v9235_v58 = vld [vmem:[#allocation15_spill] sm:$0xff]  ;;  %v4216_v48 = vor.u32 %v4215_v5, %v8729_v59  ;;  %v2450_v23 = vor.u32 %v2449_v56, %v2446_v2  ;;  %v4699_v47 = vrot.slane %v4697_v4, 4  ;;  %v4193_v14 = vrot.slane %v4192_v34, 4  ;;  %v8781_v13 = vld [vmem:[%s7321_s20 + $0xd4] sm:$0x1]  ;;  %v9236_v2 = vld [vmem:[#allocation10_spill] sm:$0xff] }
 0x116   : > { %6460 = vmatmul.mubr.bf16.vlgmr.msra.gmra.mrb[0].mxu1 %v7129_v40  ;;  %6671 = vmatprep.mubr.bf16.mxu0 %v8600_v35  ;;  %v5903_v35 = vcombine.low %v8751_v29, %v8760_v44  ;;  %v4183_v40 = vrot.slane %v4182_v62, 4  ;;  %v4221_v18 = vrot.slane %v4219_v19, 5  ;;  %v8773_v32 = vsel %vm7599_vm5, %v5888_v7, %v4697_v4  ;;  %v7134_v19 = vld [vmem:[%s7321_s20 + $0x3c] sm:$0xff]   ;;  %v7190_v1 = vld [vmem:[%s9170_s1 + $0x110] sm:$0xff]  }
 0x117   : > { %6739 = vmatpush3.bf16.msra.mxu1 %v9235_v58  ;;  %6463 = vmatprep.mubr.bf16.mxu1 %v7131_v39  ;;  %v4226_v28 = vrot.slane %v4224_v46, 4  ;;  %v4229_v33 = vrot.slane %v4227_v52, 5  ;;  %v2451_v39 = vrot.slane %v2450_v23, 4  ;;  %v8777_v5 = vsel %vm7599_vm5, %v4699_v47, %v4700_v55  ;;  %v7191_v47 = vld [vmem:[%s7321_s20 + $0x1c] sm:$0xf] }
 0x118   : > { %6732 = vmatprep.subr.bf16.mxu1 %v7189_v6  ;;  %v8783_v53 = vrot.slane %v4233_v50, 5  ;;  %v4239_v30 = vrot.slane %v4237_v0, 4  ;;  %v5904_v62 = vcombine.low %v8773_v32, %v8777_v5  ;;  %v5889_v34 = vrot.slane %v5873_v12, 9 }
 0x119   : > { %v4207_v7 = vrot.slane %v4206_v60, 4  ;;  %v4217_v46 = vrot.slane %v4216_v48, 4  ;;  %v2456_v52 = vsel %vm7353_vm2, %v2451_v39, %v7929_v11  ;;  %v4704_v56 = vrot.slane %v9236_v2, 5  ;;  %v9237_v11 = vld [vmem:[#allocation14_spill] sm:$0xff]  ;;  %v7135_v39 = vld [vmem:[%s7321_s20 + $0x48] sm:$0xff]  }
 0x11a   : > { %v4188_v4 = vsel %vm7353_vm2, %v4183_v40, %v8629_v49  ;;  %v4198_v60 = vsel %vm7353_vm2, %v4193_v14, %v8718_v57  ;;  %v8801_v50 = vcombine.low %v2456_v52, %v2466_v16  ;;  %v4707_v0 = vrot.slane %v9237_v11, 5  ;;  %v5863_v57 = vld [vmem:[%s7321_s20 + $0x18] sm:$0xe]  ;;  %v5874_v16 = vld [vmem:[%s7321_s20 + $0x9c] sm:$0xe] }
 0x11b   : > { %6740 = vmatpush3.bf16.msra.mxu1 %v7189_v6  ;;  %v4230_v24 = vor.u32 %v4229_v33, %v4226_v28  ;;  %v4243_v55 = vshll.u32 %v8781_v13, 16  ;;  %v8808_v58 = vsel %vm7599_vm5, %v5889_v34, %v4704_v56  ;;  %v4706_v48 = vrot.slane %v4704_v56, 4  ;;  %v7192_v40 = vld [vmem:[%s9170_s1 + $0x118] sm:$0xff]   ;;  %v7193_v2 = vld [vmem:[%s7321_s20 + $0x20] sm:$0x1] }
 0x11c   : > { %6733 = vmatprep.subr.bf16.mxu1 %v7190_v1  ;;  %v4240_v49 = vor.u32 %v4239_v30, %v8783_v53  ;;  %v4222_v23 = vsel %vm7353_vm2, %v4217_v46, %v4221_v18  ;;  %v4634_v12 = vrot.slane %v7191_v47, 5  ;;  %v5852_v6 = vcombine.low %v4188_v4, %v4198_v60  ;;  %v9238_v34 = vld [vmem:[#allocation13_spill] sm:$0xff]  ;;  %v5875_v11 = vld [vmem:[%s7321_s20 + $0xa8] sm:$0xe] }
 0x11d   : > { %6672 = vmatmul.mubr.bf16.gmra.mrb[20].mxu0 %v8706_v36  ;;  %v4212_v36 = vsel %vm7353_vm2, %v4207_v7, %v8729_v59  ;;  %v4231_v14 = vrot.slane %v4230_v24, 4  ;;  %v4245_v28 = vrot.slane %v4243_v55, 5  ;;  %v5879_v18 = vrot.slane %v5863_v57, 9  ;;  %v7137_v46 = vld [vmem:[%s7321_s20 + $0x54] sm:$0xff]   ;;  %v5864_v55 = vld [vmem:[%s7321_s20 + $0x24] sm:$0xe] }
 0x11e   : > { %6464 = vmatmul.mubr.bf16.gmra.mrb[4].mxu1 %v7132_v3  ;;  %6675 = vmatprep.mubr.bf16.mxu0 %v8716_v22  ;;  %v8822_v22 = vsel %vm7599_vm5, %v4706_v48, %v4707_v0  ;;  %v5890_v33 = vrot.slane %v5874_v16, 9  ;;  %v5853_v3 = vcombine.low %v4212_v36, %v4222_v23  ;;  %v4241_v30 = vrot.slane %v4240_v49, 4  ;;  %v7195_v48 = vld [vmem:[%s7321_s20 + $0x28] sm:$0xf]  ;;  %v7196_v36 = vld [vmem:[%s7321_s20 + $0x34] sm:$0xf] }
 0x11f   : > { %6467 = vmatprep.mubr.bf16.mxu1 %v7134_v19  ;;  %6741 = vmatpush3.bf16.msra.mxu1 %v7190_v1  ;;  %v5905_v59 = vcombine.low %v8808_v58, %v8822_v22  ;;  %v4711_v19 = vrot.slane %v9238_v34, 5  ;;  %v4714_v7 = vrot.slane %v8511_v25, 5  ;;  %v4636_v52 = vrot.slane %v4634_v12, 4  ;;  %v7194_v1 = vld [vmem:[%s9170_s1 + $0x120] sm:$0xff]  }
 0x120   : > { %6734 = vmatprep.subr.bf16.mxu1 %v7192_v40  ;;  %v4637_v56 = vrot.slane %v7193_v2, 5  ;;  %v4635_v25 = vsel %vm7599_vm5, %v5879_v18, %v4634_v12  ;;  %v4236_v0 = vsel %vm7353_vm2, %v4231_v14, %v8783_v53  ;;  %v4246_v24 = vsel %vm7353_vm2, %v4241_v30, %v4245_v28  ;;  %v5865_v12 = vld [vmem:[%s7321_s20 + $0x30] sm:$0xe]  ;;  %v7138_v30 = vld [vmem:[%s7321_s20 + $0x60] sm:$0xff]  }
 0x121   : > { %v8839_v4 = vsel %vm7599_vm5, %v5890_v33, %v4711_v19  ;;  %v4713_v60 = vrot.slane %v4711_v19, 4  ;;  %v4641_v49 = vrot.slane %v7195_v48, 5  ;;  %v4648_v23 = vrot.slane %v7196_v36, 5  ;;  %v7198_v33 = vld [vmem:[%s7321_s20 + $0x2c] sm:$0x1] }
 0x122   : > { %v4638_v16 = vsel %vm7599_vm5, %v4636_v52, %v4637_v56  ;;  %v5891_v47 = vrot.slane %v5875_v11, 9  ;;  %v5854_v28 = vcombine.low %v4236_v0, %v4246_v24  ;;  %v5880_v18 = vrot.slane %v5864_v55, 9  ;;  %v7140_v52 = vld [vmem:[%s7321_s20 + $0x6c] sm:$0xff]   ;;  %v5876_v11 = vld [vmem:[%s7321_s20 + $0xb4] sm:$0xe] }
 0x123   : > { %6742 = vmatpush3.bf16.msra.mxu1 %v7192_v40  ;;  %v8853_v57 = vsel %vm7599_vm5, %v4713_v60, %v4714_v7  ;;  %v9239_v40 = vld [vmem:[#allocation16_spill] sm:$0xff]  ;;  %v5895_v34 = vcombine.low %v4635_v25, %v4638_v16  ;;  %v4643_v19 = vrot.slane %v4641_v49, 4  ;;  %v5881_v2 = vrot.slane %v5865_v12, 9  ;;  %v5866_v0 = vld [vmem:[%s7321_s20 + $0x3c] sm:$0xe] }
 0x124   : > { %6735 = vmatprep.subr.bf16.mxu1 %v7194_v1  ;;  %v5906_v53 = vcombine.low %v8839_v4, %v8853_v57  ;;  %v4718_v14 = vrot.slane %v9239_v40, 5  ;;  %v4650_v56 = vrot.slane %v4648_v23, 4  ;;  %v7200_v24 = vld [vmem:[%s7321_s20 + $0x40] sm:$0xf]  ;;  %v4642_v48 = vsel %vm7599_vm5, %v5880_v18, %v4641_v49  ;;  %v7202_v18 = vld [vmem:[%s7321_s20 + $0x44] sm:$0x1] }
 0x125   : > { %6676 = vmatmul.mubr.bf16.gmra.mrb[24].mxu0 %v5852_v6  ;;  %v7197_v6 = vld [vmem:[%s9170_s1 + $0x128] sm:$0xff]   ;;  %v4655_v55 = vrot.slane %v7200_v24, 5  ;;  %v4725_v12 = vrot.slane %v8558_v10, 5  ;;  %v4649_v49 = vsel %vm7599_vm5, %v5881_v2, %v4648_v23  ;;  %v7203_v10 = vld [vmem:[%s9170_s1 + $0x138] sm:$0xff]   ;;  %v5877_v23 = vld [vmem:[%s7321_s20 + $0xc0] sm:$0xe] }
 0x126   : > { %6468 = vmatmul.mubr.bf16.gmra.mrb[8].mxu1 %v7135_v39  ;;  %6679 = vmatprep.mubr.bf16.mxu0 %v5853_v3  ;;  %v4644_v39 = vrot.slane %v7198_v33, 5  ;;  %v4721_v3 = vrot.slane %v8546_v21, 5  ;;  %v8870_v7 = vsel %vm7599_vm5, %v5891_v47, %v4718_v14  ;;  %v7201_v21 = vld [vmem:[%s9170_s1 + $0x130] sm:$0xff]   ;;  %v5892_v47 = vrot.slane %v5876_v11, 9 }
 0x127   : > { %6471 = vmatprep.mubr.bf16.mxu1 %v7137_v46  ;;  %6743 = vmatpush3.bf16.msra.mxu1 %v7194_v1  ;;  %v4720_v46 = vrot.slane %v4718_v14, 4  ;;  %v7199_v1 = vld [vmem:[%s7321_s20 + $0x38] sm:$0x1]  ;;  %v5882_v14 = vrot.slane %v5866_v0, 9  ;;  %v4658_v33 = vrot.slane %v7202_v18, 5  ;;  %v4732_v11 = vrot.slane %v8640_v51, 5 }
 0x128   : > { %6736 = vmatprep.subr.bf16.mxu1 %v7197_v6  ;;  %v4651_v60 = vrot.slane %v7199_v1, 5  ;;  %v4645_v36 = vsel %vm7599_vm5, %v4643_v19, %v4644_v39  ;;  %v4727_v39 = vrot.slane %v4725_v12, 4  ;;  %v5631_v19 = vld [vmem:[%s7321_s20 + $0x6c] sm:$0xf]  ;;  %v7143_v18 = vld [vmem:[%s7321_s20 + $0x90] sm:$0xff]   ;;  %v2487_v20 = vshll.u32 %v7209_v63, 16 }
 0x129   : > { %v8882_v25 = vsel %vm7599_vm5, %v4720_v46, %v4721_v3  ;;  %v5896_v3 = vcombine.low %v4642_v48, %v4645_v36  ;;  %v4656_v1 = vsel %vm7599_vm5, %v5882_v14, %v4655_v55  ;;  %v2420_v0 = vshrl.u32 %v5631_v19, 16  ;;  %v5878_v51 = vld [vmem:[%s7321_s20 + $0xcc] sm:$0xe] }
 0x12a   : > { %v5907_v16 = vcombine.low %v8870_v7, %v8882_v25  ;;  %v4652_v40 = vsel %vm7599_vm5, %v4650_v56, %v4651_v60  ;;  %v5893_v56 = vrot.slane %v5877_v23, 9  ;;  %v2423_v24 = vshll.u32 %v5631_v19, 16 }
 0x12b   : > { %6744 = vmatpush3.bf16.msra.mxu1 %v7197_v6  ;;  %v4728_v6 = vrot.slane %v8579_v27, 5  ;;  %v8902_v27 = vsel %vm7599_vm5, %v5892_v47, %v4725_v12  ;;  %v4735_v36 = vrot.slane %v8691_v26, 5  ;;  %v4734_v12 = vrot.slane %v4732_v11, 4 }
 0x12c   : > { %6737 = vmatprep.subr.bf16.mxu1 %v7201_v21  ;;  %v2425_v26 = vrot.slane %v2423_v24, 5  ;;  %v4742_v23 = vrot.slane %v8781_v13, 5 }
 0x12d   : > { %6680 = vmatmul.mubr.bf16.gmra.mrb[28].mxu0 %v5854_v28  ;;  %v4657_v28 = vrot.slane %v4655_v55, 4  ;;  %v8909_v46 = vsel %vm7599_vm5, %v4727_v39, %v4728_v6  ;;  %v8923_v55 = vsel %vm7599_vm5, %v5893_v56, %v4732_v11  ;;  %v4739_v39 = vrot.slane %v8743_v31, 5  ;;  %v7205_v56 = vld [vmem:[%s7321_s20 + $0x74] sm:$0x1] }
 0x12e   : > { %6472 = vmatmul.mubr.bf16.gmra.mrb[12].mxu1 %v7138_v30  ;;  %6699 = vmatprep.mubr.bf16.mxu0 %v5895_v34  ;;  %v7141_v30 = vld [vmem:[%s7321_s20 + $0x78] sm:$0xff]   ;;  %v5897_v34 = vcombine.low %v4649_v49, %v4652_v40  ;;  %v5908_v2 = vcombine.low %v8902_v27, %v8909_v46  ;;  %v8928_v49 = vsel %vm7599_vm5, %v4734_v12, %v4735_v36  ;;  %v2422_v40 = vrot.slane %v2420_v0, 4  ;;  %v7206_v0 = vld [vmem:[%s7321_s20 + $0x88] sm:$0xf] }
 0x12f   : > { %6475 = vmatprep.mubr.bf16.mxu1 %v7140_v52  ;;  %6745 = vmatpush3.bf16.msra.mxu1 %v7201_v21  ;;  %v7142_v52 = vld [vmem:[%s7321_s20 + $0x84] sm:$0xff]   ;;  %v4659_v60 = vsel %vm7599_vm5, %v4657_v28, %v4658_v33  ;;  %v7204_v21 = vld [vmem:[%s7321_s20 + $0x70] sm:$0xf]  ;;  %v5909_v28 = vcombine.low %v8923_v55, %v8928_v49  ;;  %v4741_v19 = vrot.slane %v4739_v39, 4  ;;  %v2477_v24 = vshll.u32 %v7206_v0, 16 }
 0x130   : > { %6738 = vmatprep.subr.bf16.mxu1 %v7203_v10  ;;  %v2429_v48 = vshll.u32 %v7204_v21, 16  ;;  %v2433_v47 = vshrl.u32 %v7204_v21, 16  ;;  %v5898_v6 = vcombine.low %v4656_v1, %v4659_v60  ;;  %v2439_v1 = vshll.u32 %v7205_v56, 16 }
 0x131   : > { %v8950_v11 = vsel %vm7599_vm5, %v4741_v19, %v4742_v23  ;;  %v2481_v21 = vshrl.u32 %v7206_v0, 16  ;;  %v7208_v19 = vld [vmem:[%s7321_s20 + $0xa0] sm:$0xf] }
 0x132   : > { %v8930_v14 = vrot.slane %v2429_v48, 5  ;;  %v2435_v33 = vrot.slane %v2433_v47, 4  ;;  %v2529_v56 = vshrl.u32 %v7208_v19, 16 }
 0x133   : > { %6746 = vmatpush3.bf16.msra.mxu1 %v7203_v10  ;;  %v5894_v10 = vrot.slane %v5878_v51, 9 }
 0x134   : > { %v2436_v31 = vor.u32 %v2435_v33, %v8930_v14  ;;  %v2495_v33 = vshll.u32 %v5640_v61, 16 }
 0x135   : > { %6700 = vmatmul.mubr.bf16.vlgmr.msra.gmra.mrb[0].mxu0 %v5896_v3  ;;  %v7144_v3 = vld [vmem:[%s7321_s20 + $0x9c] sm:$0xff]  }
 0x136   : > { %6476 = vmatmul.mubr.bf16.gmra.mrb[16].mxu1 %v7141_v30  ;;  %6703 = vmatprep.mubr.bf16.mxu0 %v5897_v34  ;;  %v5637_v30 = vld [vmem:[%s7321_s20 + $0x84] sm:$0xf]  ;;  %v8941_v34 = vsel %vm7599_vm5, %v5894_v10, %v4739_v39  ;;  %v2437_v47 = vrot.slane %v2436_v31, 4  ;;  %v7207_v10 = vld [vmem:[%s7321_s20 + $0x94] sm:$0xf]  ;;  %v2497_v0 = vrot.slane %v2495_v33, 5 }
 0x137   : > { %6479 = vmatprep.mubr.bf16.mxu1 %v7142_v52  ;;  %v2426_v52 = vor.u32 %v2425_v26, %v2422_v40  ;;  %v2468_v13 = vshrl.u32 %v5637_v30, 16  ;;  %v2471_v60 = vshll.u32 %v5637_v30, 16  ;;  %v5910_v48 = vcombine.low %v8941_v34, %v8950_v11 }
 0x138   : > { %v8959_v40 = vrot.slane %v2477_v24, 5  ;;  %v2483_v26 = vrot.slane %v2481_v21, 4  ;;  %v2501_v39 = vshll.u32 %v7207_v10, 16  ;;  %v2505_v23 = vshrl.u32 %v7207_v10, 16  ;;  %v7211_v10 = vld [vmem:[%s7321_s20 + $0xa4] sm:$0x1] }
 0x139   : > { %v2427_v36 = vrot.slane %v2426_v52, 4  ;;  %v2470_v12 = vrot.slane %v2468_v13, 4  ;;  %v2473_v51 = vrot.slane %v2471_v60, 5  ;;  %v2525_v52 = vshll.u32 %v7208_v19, 16  ;;  %v7212_v19 = vld [vmem:[%s7321_s20 + $0xac] sm:$0xf] }
 0x13a   : > { %v2484_v13 = vor.u32 %v2483_v26, %v8959_v40  ;;  %v8976_v41 = vrot.slane %v2501_v39, 5  ;;  %v2507_v42 = vrot.slane %v2505_v23, 4  ;;  %v2531_v21 = vrot.slane %v2529_v56, 4  ;;  %v5649_v23 = vld [vmem:[%s7321_s20 + $0xb4] sm:$0xf] }
 0x13b   : > { %v2535_v39 = vshll.u32 %v7211_v10, 16  ;;  %v2553_v15 = vshrl.u32 %v7212_v19, 16  ;;  %v2567_v63 = vshll.u32 %v5649_v23, 16 }
 0x13c   : > { %v2508_v26 = vor.u32 %v2507_v42, %v8976_v41 }
 0x13d   : > { %6704 = vmatmul.mubr.bf16.gmra.mrb[4].mxu0 %v5898_v6  ;;  %v5643_v6 = vld [vmem:[%s7321_s20 + $0x9c] sm:$0xf] }
 0x13e   : > { %6480 = vmatmul.mubr.bf16.gmra.mrb[20].mxu1 %v7143_v18  ;;  %6707 = vmatprep.mubr.bf16.mxu0 %v5899_v8  ;;  %v2441_v8 = vrot.slane %v2439_v1, 5  ;;  %v2492_v18 = vshrl.u32 %v5640_v61, 16  ;;  %v2519_v30 = vshll.u32 %v5643_v6, 16  ;;  %v2432_v1 = vsel %vm7353_vm2, %v2427_v36, %v8930_v14  ;;  %v7147_v61 = vld [vmem:[%s7321_s20 + $0xc0] sm:$0xff]  }
 0x13f   : > { %6483 = vmatprep.mubr.bf16.mxu1 %v7144_v3  ;;  %v2516_v3 = vshrl.u32 %v5643_v6, 16  ;;  %v8978_v14 = vrot.slane %v2525_v52, 5  ;;  %v2549_v52 = vshll.u32 %v7212_v19, 16 }
 0x140   : > { %v2442_v31 = vsel %vm7353_vm2, %v2437_v47, %v2441_v8  ;;  %v2494_v60 = vrot.slane %v2492_v18, 4  ;;  %v2521_v24 = vrot.slane %v2519_v30, 5  ;;  %v2489_v8 = vrot.slane %v2487_v20, 5  ;;  %v7213_v20 = vld [vmem:[%s7321_s20 + $0xb8] sm:$0xf] }
 0x141   : > { %v2485_v47 = vrot.slane %v2484_v13, 4  ;;  %v2532_v33 = vor.u32 %v2531_v21, %v8978_v14  ;;  %v2573_v29 = vshll.u32 %v7213_v20, 16  ;;  %v2577_v44 = vshrl.u32 %v7213_v20, 16 }
 0x143   : > { %v2533_v13 = vrot.slane %v2532_v33, 4 }
 0x145   : > { %6708 = vmatmul.mubr.bf16.gmra.mrb[8].mxu0 %v5900_v54  ;;  %v2474_v54 = vor.u32 %v2473_v51, %v2470_v12  ;;  %v2498_v12 = vor.u32 %v2497_v0, %v2494_v60  ;;  %v7210_v51 = vld [vmem:[%s7321_s20 + $0x98] sm:$0x1]  ;;  %v2537_v60 = vrot.slane %v2535_v39, 5 }
 0x146   : > { %6484 = vmatmul.mubr.bf16.gmra.mrb[24].mxu1 %v7145_v45  ;;  %6711 = vmatprep.mubr.bf16.mxu0 %v5901_v17  ;;  %v2518_v17 = vrot.slane %v2516_v3, 4  ;;  %v5663_v45 = vcombine.low %v2432_v1, %v2442_v31  ;;  %v2511_v6 = vshll.u32 %v7210_v51, 16  ;;  %v2564_v31 = vshrl.u32 %v5649_v23, 16 }
 0x147   : > { %6487 = vmatprep.mubr.bf16.mxu1 %v7146_v9  ;;  %v2475_v36 = vrot.slane %v2474_v54, 4  ;;  %v5646_v9 = vld [vmem:[%s7321_s20 + $0xa8] sm:$0xf]  ;;  %v2499_v56 = vrot.slane %v2498_v12, 4  ;;  %v2538_v32 = vsel %vm7353_vm2, %v2533_v13, %v2537_v60 }
 0x148   : > { %v2522_v18 = vor.u32 %v2521_v24, %v2518_v17  ;;  %v2540_v3 = vshrl.u32 %v5646_v9, 16  ;;  %v2543_v30 = vshll.u32 %v5646_v9, 16  ;;  %v2513_v1 = vrot.slane %v2511_v6, 5 }
 0x149   : > { %v2480_v43 = vsel %vm7353_vm2, %v2475_v36, %v8959_v40  ;;  %v2551_v17 = vrot.slane %v2549_v52, 5  ;;  %v2555_v24 = vrot.slane %v2553_v15, 4  ;;  %v2566_v21 = vrot.slane %v2564_v31, 4  ;;  %v5652_v36 = vld [vmem:[%s7321_s20 + $0xc0] sm:$0xf] }
 0x14a   : > { %v2523_v54 = vrot.slane %v2522_v18, 4  ;;  %v2542_v0 = vrot.slane %v2540_v3, 4  ;;  %v2545_v42 = vrot.slane %v2543_v30, 5  ;;  %v2588_v9 = vshrl.u32 %v5652_v36, 16  ;;  %v7215_v18 = vld [vmem:[%s7321_s20 + $0xc4] sm:$0xf] }
 0x14b   : > { %v2597_v33 = vshll.u32 %v7215_v18, 16 }
 0x14c   : > { %v2528_v51 = vsel %vm7353_vm2, %v2523_v54, %v8978_v14  ;;  %v2546_v5 = vor.u32 %v2545_v42, %v2542_v0  ;;  %v2601_v14 = vshrl.u32 %v7215_v18, 16  ;;  %v2590_v19 = vrot.slane %v2588_v9, 4 }
 0x14d   : > { %6712 = vmatmul.mubr.bf16.gmra.mrb[12].mxu0 %v5902_v38  ;;  %v2490_v38 = vsel %vm7353_vm2, %v2485_v47, %v2489_v8  ;;  %v2579_v8 = vrot.slane %v2577_v44, 4  ;;  %v2504_v47 = vsel %vm7353_vm2, %v2499_v56, %v8976_v41  ;;  %v7214_v41 = vld [vmem:[%s7321_s20 + $0xb0] sm:$0x1]  ;;  %v5667_v58 = vcombine.low %v2528_v51, %v2538_v32  ;;  %v7217_v44 = vld [vmem:[%s7321_s20 + $0xc8] sm:$0x1] }
 0x14e   : > { %6488 = vmatmul.mubr.bf16.gmra.mrb[28].mxu1 %v7147_v61  ;;  %6715 = vmatprep.mubr.bf16.mxu0 %v5903_v35  ;;  %v2509_v35 = vrot.slane %v2508_v26, 4  ;;  %v5665_v40 = vcombine.low %v2480_v43, %v2490_v38  ;;  %v2569_v61 = vrot.slane %v2567_v63, 5  ;;  %v2559_v6 = vshll.u32 %v7214_v41, 16 }
 0x14f   : > { %6523 = vmatprep.mubr.bf16.mxu1 %v5663_v45  ;;  %v2575_v45 = vrot.slane %v2573_v29, 5  ;;  %v2591_v26 = vshll.u32 %v5652_v36, 16  ;;  %v2547_v22 = vrot.slane %v2546_v5, 4  ;;  %v2599_v15 = vrot.slane %v2597_v33, 5 }
 0x150   : > { %v2514_v12 = vsel %vm7353_vm2, %v2509_v35, %v2513_v1  ;;  %v2570_v10 = vor.u32 %v2569_v61, %v2566_v21  ;;  %v2561_v30 = vrot.slane %v2559_v6, 5  ;;  %v2603_v43 = vrot.slane %v2601_v14, 4 }
 0x151   : > { %v2580_v39 = vor.u32 %v2579_v8, %v2575_v45  ;;  %v5666_v3 = vcombine.low %v2504_v47, %v2514_v12  ;;  %v2593_v52 = vrot.slane %v2591_v26, 5  ;;  %v2552_v31 = vsel %vm7353_vm2, %v2547_v22, %v2551_v17  ;;  %v9062_v8 = vld [vmem:[%s9171_s2] ss:$0 sm:$0xff] }
 0x152   : > { %v2571_v38 = vrot.slane %v2570_v10, 4  ;;  %v2604_v29 = vor.u32 %v2603_v43, %v2599_v15  ;;  %v2607_v35 = vshll.u32 %v7217_v44, 16  ;;  %v9067_v12 = vld [vmem:[%s9172_s3] ss:$0 sm:$0xff] }
 0x153   : > { %v2581_v56 = vrot.slane %v2580_v39, 4  ;;  %v2594_v20 = vor.u32 %v2593_v52, %v2590_v19 }
 0x154   : > { %v2576_v4 = vsel %vm7353_vm2, %v2571_v38, %v2575_v45  ;;  %v2609_v54 = vrot.slane %v2607_v35, 5 }
 0x155   : > { %6716 = vmatmul.mubr.bf16.gmra.mrb[16].mxu0 %v5904_v62  ;;  %v2556_v62 = vor.u32 %v2555_v24, %v2551_v17  ;;  %v2595_v25 = vrot.slane %v2594_v20, 4 }
 0x156   : > { %6524 = vmatmul.mubr.bf16.vlgmr.msra.gmra.mrb[16].mxu1 %v8801_v50  ;;  %6719 = vmatprep.mubr.bf16.mxu0 %v5905_v59  ;;  %v7216_v50 = vld [vmem:[%s7321_s20 + $0xbc] sm:$0x1] }
 0x157   : > { %6527 = vmatprep.mubr.bf16.mxu1 %v5665_v40  ;;  %v2583_v23 = vshll.u32 %v7216_v50, 16  ;;  %v2557_v59 = vrot.slane %v2556_v62, 4  ;;  %v2600_v13 = vsel %vm7353_vm2, %v2595_v25, %v2599_v15 }
 0x159   : > { %v2585_v1 = vrot.slane %v2583_v23, 5  ;;  %v2562_v63 = vsel %vm7353_vm2, %v2557_v59, %v2561_v30 }
 0x15b   : > { %v2586_v57 = vsel %vm7353_vm2, %v2581_v56, %v2585_v1 }
 0x15c   : > { %v5669_v7 = vcombine.low %v2576_v4, %v2586_v57 }
 0x15d   : > { %6720 = vmatmul.mubr.bf16.gmra.mrb[20].mxu0 %v5906_v53  ;;  %v5668_v53 = vcombine.low %v2552_v31, %v2562_v63 }
 0x15e   : > { %6528 = vmatmul.mubr.bf16.gmra.mrb[20].mxu1 %v5666_v3  ;;  %6723 = vmatprep.mubr.bf16.mxu0 %v5907_v16  ;;  %v2605_v16 = vrot.slane %v2604_v29, 4 }
 0x15f   : > { %6531 = vmatprep.mubr.bf16.mxu1 %v5667_v58 }
 0x160   : > { %v2610_v60 = vsel %vm7353_vm2, %v2605_v16, %v2609_v54 }
 0x161   : > { %v5670_v0 = vcombine.low %v2600_v13, %v2610_v60 }
 0x165   : > { %6724 = vmatmul.mubr.bf16.gmra.mrb[24].mxu0 %v5908_v2 }
 0x166   : > { %6532 = vmatmul.mubr.bf16.gmra.mrb[24].mxu1 %v5668_v53  ;;  %6727 = vmatprep.mubr.bf16.mxu0 %v5909_v28 }
 0x167   : > { %6535 = vmatprep.mubr.bf16.mxu1 %v5669_v7 }
 0x16d   : > { %6728 = vmatmul.mubr.bf16.gmra.mrb[28].mxu0 %v5910_v48 }
 0x16e   : > { %6536 = vmatmul.mubr.bf16.gmra.mrb[28].mxu1 %v5670_v0 }
 0x1e9   : > { %v6461_v27 = vpop.f32.mrb[0].mxu1 }
 0x1ea   : > { %v2020_v46 = vpop.f32.mrb[1].mxu1 }
 0x1eb   : > { %v6462_v2 = vpop.f32.mrb[2].mxu1 }
 0x1ec   : > { %v2023_v42 = vpop.f32.mrb[3].mxu1 }
 0x1f1   : > { %v6465_v17 = vpop.f32.mrb[4].mxu1 }
 0x1f2   : > { %v2036_v55 = vpop.f32.mrb[5].mxu1 }
 0x1f3   : > { %v6466_v49 = vpop.f32.mrb[6].mxu1 }
 0x1f4   : > { %v2039_v28 = vpop.f32.mrb[7].mxu1 }
 0x1f9   : > { %v6469_v24 = vpop.f32.mrb[8].mxu1 }
 0x1fa   : > { %v2052_v40 = vpop.f32.mrb[9].mxu1 }
 0x1fb   : > { %v6470_v21 = vpop.f32.mrb[10].mxu1 }
 0x1fc   : > { %v9049_v61 = vpop.f32.mrb[11].mxu1 }
 0x201   : > { %v9051_v37 = vpop.f32.mrb[12].mxu1 }
 0x202   : > { %v9053_v45 = vpop.f32.mrb[13].mxu1 }
 0x203   : > { %v9055_v34 = vpop.f32.mrb[14].mxu1 }
 0x204   : > { %v9057_v11 = vpop.f32.mrb[15].mxu1 }
 0x208   : > { %v6701_v48 = vpop.f32.mrb[0].mxu0 }
 0x209   : > { %v6747_v36 = vadd.f32 %v6701_v48, %v6461_v27  ;;  %v4906_v47 = vpop.f32.mrb[1].mxu0 }
 0x20a   : > { %v6748_v51 = vadd.f32 %v4906_v47, %v2020_v46  ;;  %v6702_v32 = vpop.f32.mrb[2].mxu0 }
 0x20b   : > { %v5074_v5 = vmul.f32 %v6747_v36, %v9062_v8  ;;  %v6749_v62 = vadd.f32 %v6702_v32, %v6462_v2  ;;  %v4909_v41 = vpop.f32.mrb[3].mxu0 }
 0x20c   : > { %v5072_v6 = vmul.f32 %v6748_v51, %v9062_v8  ;;  %v6750_v9 = vadd.f32 %v4909_v41, %v2023_v42 }
 0x20d   : > { %v5113_v26 = vadd.f32 %v9067_v12, %v5074_v5  ;;  %v5075_v18 = vmul.f32 %v6749_v62, %v9062_v8 }
 0x20e   : > { %v5111_v33 = vadd.f32 %v9067_v12, %v5072_v6  ;;  %v5073_v14 = vmul.f32 %v6750_v9, %v9062_v8 }
 0x20f   : > { %v5114_v10 = vadd.f32 %v9067_v12, %v5075_v18  ;;  %v5145_v23 = vmax.f32 %v5113_v26, 0.0 }
 0x210   : > { %v5112_v39 = vadd.f32 %v9067_v12, %v5073_v14  ;;  %v6705_v50 = vpop.f32.mrb[4].mxu0  ;;  %v5143_v59 = vmax.f32 %v5111_v33, 0.0 }
 0x211   : > { %v5146_v3 = vmax.f32 %v5114_v10, 0.0  ;;  %v6751_v58 = vadd.f32 %v6705_v50, %v6465_v17  ;;  %v4922_v22 = vpop.f32.mrb[5].mxu0 }
 0x212   : > { %v5144_v30 = vmax.f32 %v5112_v39, 0.0  ;;  %v6752_v19 = vadd.f32 %v4922_v22, %v2036_v55  ;;  %v6706_v52 = vpop.f32.mrb[6].mxu0 }
 0x213   : > { %v5996_v15 = vpack.c.bf16 %v5146_v3, %v5145_v23  ;;  %v5078_v43 = vmul.f32 %v6751_v58, %v9062_v8  ;;  %v6753_v38 = vadd.f32 %v6706_v52, %v6466_v49  ;;  %v4925_v56 = vpop.f32.mrb[7].mxu0 }
 0x214   : > { %v5991_v1 = vpack.c.bf16 %v5144_v30, %v5143_v59  ;;  %v5076_v31 = vmul.f32 %v6752_v19, %v9062_v8  ;;  %v6754_v63 = vadd.f32 %v4925_v56, %v2039_v28 }
 0x215   : > { %6068 = vst [vmem:[%s9081_s19 + $0x8] sm:$0xff] %v5996_v15   ;;  %v5117_v20 = vadd.f32 %v9067_v12, %v5078_v43  ;;  %v5079_v29 = vmul.f32 %v6753_v38, %v9062_v8 }
 0x216   : > { %5992 = vst [vmem:[%s9081_s19] sm:$0xff] %v5991_v1   ;;  %v5115_v44 = vadd.f32 %v9067_v12, %v5076_v31  ;;  %v5077_v35 = vmul.f32 %v6754_v63, %v9062_v8 }
 0x217   : > { %v5118_v4 = vadd.f32 %v9067_v12, %v5079_v29  ;;  %v5149_v7 = vmax.f32 %v5117_v20, 0.0 }
 0x218   : > { %v5116_v57 = vadd.f32 %v9067_v12, %v5077_v35  ;;  %v6709_v53 = vpop.f32.mrb[8].mxu0  ;;  %v5147_v13 = vmax.f32 %v5115_v44, 0.0 }
 0x219   : > { %v5150_v25 = vmax.f32 %v5118_v4, 0.0  ;;  %v6755_v16 = vadd.f32 %v6709_v53, %v6469_v24  ;;  %v4938_v54 = vpop.f32.mrb[9].mxu0 }
 0x21a   : > { %v5148_v60 = vmax.f32 %v5116_v57, 0.0  ;;  %v6756_v0 = vadd.f32 %v4938_v54, %v2052_v40  ;;  %v6710_v27 = vpop.f32.mrb[10].mxu0 }
 0x21b   : > { %v6006_v46 = vpack.c.bf16 %v5150_v25, %v5149_v7  ;;  %v5082_v2 = vmul.f32 %v6755_v16, %v9062_v8  ;;  %v6757_v42 = vadd.f32 %v6710_v27, %v6470_v21  ;;  %v4941_v17 = vpop.f32.mrb[11].mxu0 }
 0x21c   : > { %v6001_v55 = vpack.c.bf16 %v5148_v60, %v5147_v13  ;;  %v5080_v49 = vmul.f32 %v6756_v0, %v9062_v8  ;;  %v6758_v28 = vadd.f32 %v4941_v17, %v9049_v61 }
 0x21d   : > { %6070 = vst [vmem:[%s9081_s19 + $0x18] sm:$0xff] %v6006_v46   ;;  %v5121_v48 = vadd.f32 %v9067_v12, %v5082_v2  ;;  %v5083_v24 = vmul.f32 %v6757_v42, %v9062_v8 }
 0x21e   : > { %6069 = vst [vmem:[%s9081_s19 + $0x10] sm:$0xff] %v6001_v55   ;;  %v5119_v36 = vadd.f32 %v9067_v12, %v5080_v49  ;;  %v5081_v40 = vmul.f32 %v6758_v28, %v9062_v8 }
 0x21f   : > { %v5122_v47 = vadd.f32 %v9067_v12, %v5083_v24  ;;  %v5153_v32 = vmax.f32 %v5121_v48, 0.0 }
 0x220   : > { %v5120_v21 = vadd.f32 %v9067_v12, %v5081_v40  ;;  %v6713_v51 = vpop.f32.mrb[12].mxu0  ;;  %v5151_v41 = vmax.f32 %v5119_v36, 0.0 }
 0x221   : > { %v5154_v5 = vmax.f32 %v5122_v47, 0.0  ;;  %v6759_v61 = vadd.f32 %v6713_v51, %v9051_v37  ;;  %v4954_v62 = vpop.f32.mrb[13].mxu0 }
 0x222   : > { %v5152_v6 = vmax.f32 %v5120_v21, 0.0  ;;  %v6760_v9 = vadd.f32 %v4954_v62, %v9053_v45  ;;  %v6714_v26 = vpop.f32.mrb[14].mxu0 }
 0x223   : > { %v6016_v18 = vpack.c.bf16 %v5154_v5, %v5153_v32  ;;  %v5086_v33 = vmul.f32 %v6759_v61, %v9062_v8  ;;  %v6761_v14 = vadd.f32 %v6714_v26, %v9055_v34  ;;  %v4957_v10 = vpop.f32.mrb[15].mxu0 }
 0x224   : > { %v6011_v39 = vpack.c.bf16 %v5152_v6, %v5151_v41  ;;  %v5084_v50 = vmul.f32 %v6760_v9, %v9062_v8  ;;  %v6762_v23 = vadd.f32 %v4957_v10, %v9057_v11 }
 0x225   : > { %6072 = vst [vmem:[%s9081_s19 + $0x28] sm:$0xff] %v6016_v18   ;;  %v5125_v37 = vadd.f32 %v9067_v12, %v5086_v33  ;;  %v5087_v3 = vmul.f32 %v6761_v14, %v9062_v8 }
 0x226   : > { %6071 = vst [vmem:[%s9081_s19 + $0x20] sm:$0xff] %v6011_v39   ;;  %v5123_v45 = vadd.f32 %v9067_v12, %v5084_v50  ;;  %v5085_v58 = vmul.f32 %v6762_v23, %v9062_v8 }
 0x227   : > { %v5126_v22 = vadd.f32 %v9067_v12, %v5087_v3  ;;  %v5157_v30 = vmax.f32 %v5125_v37, 0.0 }
 0x228   : > { %v5124_v34 = vadd.f32 %v9067_v12, %v5085_v58  ;;  %v6717_v59 = vpop.f32.mrb[16].mxu0  ;;  %v5155_v15 = vmax.f32 %v5123_v45, 0.0 }
 0x229   : > { %v5158_v19 = vmax.f32 %v5126_v22, 0.0  ;;  %v6525_v52 = vpop.f32.mrb[16].mxu1  ;;  %v4970_v11 = vpop.f32.mrb[17].mxu0 }
 0x22a   : > { %v5156_v43 = vmax.f32 %v5124_v34, 0.0  ;;  %v6763_v38 = vadd.f32 %v6717_v59, %v6525_v52  ;;  %v2837_v56 = vpop.f32.mrb[17].mxu1  ;;  %v6718_v1 = vpop.f32.mrb[18].mxu0 }
 0x22b   : > { %v6026_v31 = vpack.c.bf16 %v5158_v19, %v5157_v30  ;;  %v6764_v63 = vadd.f32 %v4970_v11, %v2837_v56  ;;  %v6526_v20 = vpop.f32.mrb[18].mxu1  ;;  %v4973_v29 = vpop.f32.mrb[19].mxu0 }
 0x22c   : > { %v6021_v44 = vpack.c.bf16 %v5156_v43, %v5155_v15  ;;  %v5090_v35 = vmul.f32 %v6763_v38, %v9062_v8  ;;  %v6765_v4 = vadd.f32 %v6718_v1, %v6526_v20  ;;  %v2840_v57 = vpop.f32.mrb[19].mxu1 }
 0x22d   : > { %6074 = vst [vmem:[%s9081_s19 + $0x38] sm:$0xff] %v6026_v31   ;;  %v5088_v53 = vmul.f32 %v6764_v63, %v9062_v8  ;;  %v6766_v7 = vadd.f32 %v4973_v29, %v2840_v57 }
 0x22e   : > { %6073 = vst [vmem:[%s9081_s19 + $0x30] sm:$0xff] %v6021_v44   ;;  %v5129_v25 = vadd.f32 %v9067_v12, %v5090_v35  ;;  %v5091_v16 = vmul.f32 %v6765_v4, %v9062_v8 }
 0x22f   : > { %v5127_v54 = vadd.f32 %v9067_v12, %v5088_v53  ;;  %v5089_v13 = vmul.f32 %v6766_v7, %v9062_v8 }
 0x230   : > { %v5130_v60 = vadd.f32 %v9067_v12, %v5091_v16  ;;  %v6721_v0 = vpop.f32.mrb[20].mxu0  ;;  %v5161_v42 = vmax.f32 %v5129_v25, 0.0 }
 0x231   : > { %v5128_v27 = vadd.f32 %v9067_v12, %v5089_v13  ;;  %v6529_v46 = vpop.f32.mrb[20].mxu1  ;;  %v4986_v2 = vpop.f32.mrb[21].mxu0  ;;  %v5159_v48 = vmax.f32 %v5127_v54, 0.0 }
 0x232   : > { %v5162_v17 = vmax.f32 %v5130_v60, 0.0  ;;  %v6767_v55 = vadd.f32 %v6721_v0, %v6529_v46  ;;  %v2853_v49 = vpop.f32.mrb[21].mxu1  ;;  %v6722_v28 = vpop.f32.mrb[22].mxu0 }
 0x233   : > { %v5160_v24 = vmax.f32 %v5128_v27, 0.0  ;;  %v6768_v36 = vadd.f32 %v4986_v2, %v2853_v49  ;;  %v6530_v40 = vpop.f32.mrb[22].mxu1  ;;  %v4989_v47 = vpop.f32.mrb[23].mxu0 }
 0x234   : > { %v6036_v21 = vpack.c.bf16 %v5162_v17, %v5161_v42  ;;  %v5094_v51 = vmul.f32 %v6767_v55, %v9062_v8  ;;  %v6769_v32 = vadd.f32 %v6722_v28, %v6530_v40  ;;  %v2856_v5 = vpop.f32.mrb[23].mxu1 }
 0x235   : > { %v6031_v61 = vpack.c.bf16 %v5160_v24, %v5159_v48  ;;  %v5092_v62 = vmul.f32 %v6768_v36, %v9062_v8  ;;  %v6770_v41 = vadd.f32 %v4989_v47, %v2856_v5 }
 0x236   : > { %6076 = vst [vmem:[%s9081_s19 + $0x48] sm:$0xff] %v6036_v21   ;;  %v5133_v6 = vadd.f32 %v9067_v12, %v5094_v51  ;;  %v5095_v9 = vmul.f32 %v6769_v32, %v9062_v8 }
 0x237   : > { %6075 = vst [vmem:[%s9081_s19 + $0x40] sm:$0xff] %v6031_v61   ;;  %v5131_v26 = vadd.f32 %v9067_v12, %v5092_v62  ;;  %v5093_v18 = vmul.f32 %v6770_v41, %v9062_v8 }
 0x238   : > { %v5134_v33 = vadd.f32 %v9067_v12, %v5095_v9  ;;  %v6725_v14 = vpop.f32.mrb[24].mxu0  ;;  %v5165_v23 = vmax.f32 %v5133_v6, 0.0 }
 0x239   : > { %v5132_v10 = vadd.f32 %v9067_v12, %v5093_v18  ;;  %v6533_v39 = vpop.f32.mrb[24].mxu1  ;;  %v5002_v50 = vpop.f32.mrb[25].mxu0  ;;  %v5163_v22 = vmax.f32 %v5131_v26, 0.0 }
 0x23a   : > { %v5166_v37 = vmax.f32 %v5134_v33, 0.0  ;;  %v6771_v3 = vadd.f32 %v6725_v14, %v6533_v39  ;;  %v2869_v45 = vpop.f32.mrb[25].mxu1  ;;  %v6726_v58 = vpop.f32.mrb[26].mxu0 }
 0x23b   : > { %v5164_v34 = vmax.f32 %v5132_v10, 0.0  ;;  %v6772_v59 = vadd.f32 %v5002_v50, %v2869_v45  ;;  %v6534_v30 = vpop.f32.mrb[26].mxu1  ;;  %v5005_v19 = vpop.f32.mrb[27].mxu0 }
 0x23c   : > { %v6046_v52 = vpack.c.bf16 %v5166_v37, %v5165_v23  ;;  %v5098_v11 = vmul.f32 %v6771_v3, %v9062_v8  ;;  %v6773_v15 = vadd.f32 %v6726_v58, %v6534_v30  ;;  %v2872_v43 = vpop.f32.mrb[27].mxu1 }
 0x23d   : > { %v6041_v38 = vpack.c.bf16 %v5164_v34, %v5163_v22  ;;  %v5096_v56 = vmul.f32 %v6772_v59, %v9062_v8  ;;  %v6774_v1 = vadd.f32 %v5005_v19, %v2872_v43 }
 0x23e   : > { %6078 = vst [vmem:[%s9081_s19 + $0x58] sm:$0xff] %v6046_v52   ;;  %v5137_v31 = vadd.f32 %v9067_v12, %v5098_v11  ;;  %v5099_v63 = vmul.f32 %v6773_v15, %v9062_v8 }
 0x23f   : > { %6077 = vst [vmem:[%s9081_s19 + $0x50] sm:$0xff] %v6041_v38   ;;  %v5135_v20 = vadd.f32 %v9067_v12, %v5096_v56  ;;  %v5097_v29 = vmul.f32 %v6774_v1, %v9062_v8 }
 0x240   : > { %v5138_v44 = vadd.f32 %v9067_v12, %v5099_v63  ;;  %v6729_v35 = vpop.f32.mrb[28].mxu0  ;;  %v5169_v7 = vmax.f32 %v5137_v31, 0.0 }
 0x241   : > { %v5136_v4 = vadd.f32 %v9067_v12, %v5097_v29  ;;  %v6537_v57 = vpop.f32.mrb[28].mxu1  ;;  %v5018_v53 = vpop.f32.mrb[29].mxu0  ;;  %v5167_v60 = vmax.f32 %v5135_v20, 0.0 }
 0x242   : > { %v5170_v25 = vmax.f32 %v5138_v44, 0.0  ;;  %v6775_v16 = vadd.f32 %v6729_v35, %v6537_v57  ;;  %v2885_v54 = vpop.f32.mrb[29].mxu1  ;;  %v6730_v13 = vpop.f32.mrb[30].mxu0 }
 0x243   : > { %v5168_v0 = vmax.f32 %v5136_v4, 0.0  ;;  %v6776_v27 = vadd.f32 %v5018_v53, %v2885_v54  ;;  %v6538_v46 = vpop.f32.mrb[30].mxu1  ;;  %v5021_v2 = vpop.f32.mrb[31].mxu0 }
 0x244   : > { %v6056_v42 = vpack.c.bf16 %v5170_v25, %v5169_v7  ;;  %v5102_v17 = vmul.f32 %v6775_v16, %v9062_v8  ;;  %v6777_v55 = vadd.f32 %v6730_v13, %v6538_v46  ;;  %v2888_v49 = vpop.f32.mrb[31].mxu1 }
 0x245   : > { %v6051_v28 = vpack.c.bf16 %v5168_v0, %v5167_v60  ;;  %v5100_v48 = vmul.f32 %v6776_v27, %v9062_v8  ;;  %v6778_v24 = vadd.f32 %v5021_v2, %v2888_v49 }
 0x246   : > { %6080 = vst [vmem:[%s9081_s19 + $0x68] sm:$0xff] %v6056_v42   ;;  %v5141_v36 = vadd.f32 %v9067_v12, %v5102_v17  ;;  %v5103_v40 = vmul.f32 %v6777_v55, %v9062_v8 }
 0x247   : > { %6079 = vst [vmem:[%s9081_s19 + $0x60] sm:$0xff] %v6051_v28   ;;  %v5139_v47 = vadd.f32 %v9067_v12, %v5100_v48  ;;  %v5101_v21 = vmul.f32 %v6778_v24, %v9062_v8 }
 0x248   : > { %v5142_v51 = vadd.f32 %v9067_v12, %v5103_v40  ;;  %v5173_v5 = vmax.f32 %v5141_v36, 0.0 }
 0x249   : > { %v5140_v32 = vadd.f32 %v9067_v12, %v5101_v21  ;;  %v5171_v62 = vmax.f32 %v5139_v47, 0.0 }
 0x24a   : > { %v5174_v61 = vmax.f32 %v5142_v51, 0.0 }
 0x24b   : > { %v5172_v41 = vmax.f32 %v5140_v32, 0.0 }
 0x24c   : > { %v6066_v6 = vpack.c.bf16 %v5174_v61, %v5173_v5 }
 0x24d   : > { %v6061_v9 = vpack.c.bf16 %v5172_v41, %v5171_v62 }
 0x24e   : > { %6082 = vst [vmem:[%s9081_s19 + $0x78] sm:$0xff] %v6066_v6  }
 0x24f   : > { %6081 = vst [vmem:[%s9081_s19 + $0x70] sm:$0xff] %v6061_v9  }
 0x250 PF: > { %s14_s17 = sadd.s32 1, %s7240_s17   ;;  %s9240_s15 = smov %s7236_s16 }
 0x251   : > { %p11_p5 = scmp.ge.s32.totalorder %s14_s17, 4   ;;  %s9241_s16 = smov %s9243_s18 }
 0x253   :  { %13 = sbr.rel (!%p11_p5) target bundleno = 2 (0x2), region = 77 }

// kernel: _lambda_.36
= control target key start
LH: loop header
LB: loop body
LE: loop exit
PB: predicated region body
PF: predicated region fallthrough
CT: control target
= control target key end

     0   :  { %s2259_s15 = smov 0   ;;  %s2261_s16 = smov 0   ;;  %s2686_s0 = inlined_call_operand.vmem [shape: bf16[2,4,4,128], index: 0, kind: input, shape index: {}]   ;;  %s2687_s1 = inlined_call_operand.vmem [shape: bf16[1152,128], index: 1, kind: input, shape index: {}]   ;;  %s2688_s2 = inlined_call_operand.vmem [shape: f32[1,128], index: 2, kind: input, shape index: {}]   ;;  %s2689_s3 = inlined_call_operand.vmem [shape: f32[1,128], index: 3, kind: input, shape index: {}]   ;;  %s2690_s4 = inlined_call_operand.vmem [shape: bf16[2,2,2,128], index: 4, kind: output, shape index: {}]  }
   0x1   :  { %s2263_s17 = smov 0  }
   0x2 LB: > { %s26_s18 = sadd.s32 1, %s2224_s16  ;;  %p1702_p0 = scmp.ge.s32.totalorder %s2228_s17, 1  ;;  %s2228_s17 = sphi %s2263_s17, %s14_s17   ;;  %s2224_s16 = sphi %s2261_s16, %s2694_s16   ;;  %s2220_s15 = sphi %s2259_s15, %s2693_s15  }
   0x3   : > { %p28_p1 = scmp.ge.s32.totalorder %s26_s18, 2  ;;  %p201_p2 = scmp.lt.s32.totalorder %s2228_s17, 3 }
   0x5   : > { %s2696_s18 = smov (%p28_p1, %s26_s18), 0  ;;  %p202_p3 = pnand %p1702_p0, %p201_p2 }
   0x6   : > { %v2134_v0 = vld [vmem:[%s2687_s1 + $0x40] sm:$0xff] (!%p202_p3)   ;;  %v2230_v1 = vmov (!%p202_p3), 0.0   ;;  %v2136_v3 = vld [vmem:[%s2687_s1 + $0x48] sm:$0xff] (!%p202_p3)   ;;  %vm2231_vm0 = vmmov (!%p202_p3), 0   ;;  %p239_p4 = scmp.lt.s32.totalorder (!%p202_p3), %s2220_s15, 1  ;;  %v2138_v5 = vld [vmem:[%s2687_s1 + $0x50] sm:$0xff] (!%p202_p3)   ;;  %v353_v11 = vlaneseq (!%p202_p3) }
   0x7   : > { %205 = sbr.rel (%p202_p3) target bundleno = 395 (0x18b), region = 36  ;;  %1897 = vmatprep.subr.bf16.mxu1 (!%p202_p3), %v2230_v1  ;;  %1977 = vmatprep.subr.bf16.mxu0 (!%p202_p3), %v2230_v1  ;;  %v2135_v2 = vld [vmem:[%s2687_s1 + $0x100] sm:$0xff] (!%p202_p3)   ;;  %v2137_v4 = vld [vmem:[%s2687_s1 + $0x108] sm:$0xff] (!%p202_p3)   ;;  %v2139_v6 = vld [vmem:[%s2687_s1 + $0x110] sm:$0xff] (!%p202_p3)   ;;  %vm300_vm1 = vsmask.f32 (!%p202_p3), 256 }
   0x8   : > { %1898 = vmatpush3.bf16.msra.mxu1 (!%p202_p3), %v2134_v0  ;;  %1913 = vmatprep.mubr.msk.bf16.mxu1 (!%p202_p3), %vm2231_vm0, %v2230_v1  ;;  %v2140_v7 = vld [vmem:[%s2687_s1 + $0x58] sm:$0xff] (!%p202_p3)   ;;  %v2142_v9 = vld [vmem:[%s2687_s1 + $0x60] sm:$0xff] (!%p202_p3)   ;;  %v2144_v12 = vld [vmem:[%s2687_s1 + $0x68] sm:$0xff] (!%p202_p3)   ;;  %vm301_vm2 = vsmask.f32 (!%p202_p3), 1284  ;;  %v2338_v18 = vshrl.u32 (!%p202_p3), %v353_v11, 7 }
   0x9   : > { %1978 = vmatpush3.bf16.msra.mxu0 (!%p202_p3), %v2135_v2  ;;  %1899 = vmatprep.subr.bf16.mxu1 (!%p202_p3), %v2230_v1  ;;  %v2141_v8 = vld [vmem:[%s2687_s1 + $0x118] sm:$0xff] (!%p202_p3)   ;;  %v2143_v10 = vld [vmem:[%s2687_s1 + $0x120] sm:$0xff] (!%p202_p3)   ;;  %vm302_vm3 = vmor (!%p202_p3), %vm300_vm1, %vm301_vm2  ;;  %vm303_vm4 = vsmask.f32 (!%p202_p3), 2312  ;;  %vm305_vm5 = vsmask.f32 (!%p202_p3), 3340 }
   0xa   : > { %1979 = vmatprep.subr.bf16.mxu0 (!%p202_p3), %v2230_v1  ;;  %1993 = vmatprep.mubr.msk.bf16.mxu0 (!%p202_p3), %vm2231_vm0, %v2230_v1  ;;  %vm307_vm6 = vsmask.f32 (!%p202_p3), 4368  ;;  %v2145_v17 = vld [vmem:[%s2687_s1 + $0x128] sm:$0xff] (!%p202_p3)   ;;  %vm304_vm7 = vmor (!%p202_p3), %vm302_vm3, %vm303_vm4  ;;  %vm309_vm8 = vsmask.f32 (!%p202_p3), 5396  ;;  %v2146_v19 = vld [vmem:[%s2687_s1 + $0x70] sm:$0xff] (!%p202_p3)  }
   0xb   : > { %vm311_vm9 = vsmask.f32 (!%p202_p3), 6424  ;;  %vm306_vm10 = vmor (!%p202_p3), %vm304_vm7, %vm305_vm5  ;;  %vm313_vm11 = vsmask.f32 (!%p202_p3), 7452  ;;  %v2232_v24 = vmov (!%p202_p3), 1966171168  }
   0xc   : > { %1900 = vmatpush3.bf16.msra.mxu1 (!%p202_p3), %v2136_v3  ;;  %vm308_vm12 = vmor (!%p202_p3), %vm306_vm10, %vm307_vm6  ;;  %v351_v25 = vunpack.c.l.s4 (!%p202_p3), %v2232_v24  ;;  %v2147_v27 = vld [vmem:[%s2687_s1 + $0x130] sm:$0xff] (!%p202_p3)   ;;  %v2148_v35 = vld [vmem:[%s2687_s1 + $0x78] sm:$0xff] (!%p202_p3)  }
   0xd   : > { %1980 = vmatpush3.bf16.msra.mxu0 (!%p202_p3), %v2137_v4  ;;  %1901 = vmatprep.subr.bf16.mxu1 (!%p202_p3), %v2230_v1  ;;  %vm310_vm13 = vmor (!%p202_p3), %vm308_vm12, %vm309_vm8  ;;  %v2149_v38 = vld [vmem:[%s2687_s1 + $0x138] sm:$0xff] (!%p202_p3)   ;;  %v2150_v43 = vld [vmem:[%s2687_s1] sm:$0xff] (!%p202_p3)  }
   0xe   : > { %s2698_s15 = smov (!%p239_p4, %s2220_s15), 1  ;;  %1981 = vmatprep.subr.bf16.mxu0 %v2230_v1  ;;  %vm312_vm14 = vmor %vm310_vm13, %vm311_vm9  ;;  %v352_v31 = vunpack.c.0.s8 %v351_v25  ;;  %v2151_v45 = vld [vmem:[%s2687_s1 + $0x140] sm:$0xff]   ;;  %v2152_v47 = vld [vmem:[%s2687_s1 + $0x8] sm:$0xff]  }
   0xf   : > { %s1815_s7 = sshll.u32 %s2698_s15, 3  ;;  %vm2352_vm15 = vmor %vm312_vm14, %vm313_vm11  ;;  %v2153_v48 = vld [vmem:[%s2687_s1 + $0x148] sm:$0xff]   ;;  %v2154_v49 = vld [vmem:[%s2687_s1 + $0x10] sm:$0xff]   ;;  %s1705_s21 = sshll.u32 %s2698_s15, 1 }
  0x10   : > { %1902 = vmatpush3.bf16.msra.mxu1 %v2138_v5  ;;  %s2319_s12 = scalar_lea.vmem %s2686_s0, %s1815_s7  ;;  %v2364_v37 = vsub.s32 %v352_v31, %v2338_v18  ;;  %v2155_v50 = vld [vmem:[%s2687_s1 + $0x150] sm:$0xff]   ;;  %v2156_v51 = vld [vmem:[%s2687_s1 + $0x18] sm:$0xff]   ;;  %v2158_v53 = vld [vmem:[%s2687_s1 + $0x20] sm:$0xff]   ;;  %s260_s24 = scalar_lea.vmem %s2690_s4, %s1705_s21 }
  0x11   : > { %1982 = vmatpush3.bf16.msra.mxu0 %v2139_v6  ;;  %1903 = vmatprep.subr.bf16.mxu1 %v2230_v1  ;;  %v1706_v13 = vld.sshfl [vmem:[%s2319_s12] sm:$0x11 pattern:$0x75316420]  ;;  %v2157_v52 = vld [vmem:[%s2687_s1 + $0x158] sm:$0xff]   ;;  %v2160_v55 = vld [vmem:[%s2687_s1 + $0x28] sm:$0xff]  }
  0x12   : > { %1983 = vmatprep.subr.bf16.mxu0 %v2230_v1  ;;  %v1707_v14 = vld.sshfl [vmem:[%s2319_s12 + $0x2] sm:$0x11 pattern:$0x75316420]  ;;  %v291_v15 = vcombine.high %v1706_v13, %v1706_v13  ;;  %v316_v20 = vshrl.u32 %v1706_v13, 16  ;;  %v2161_v60 = vld [vmem:[%s2687_s1 + $0x168] sm:$0xff]  }
  0x13   : > { %v299_v16 = vcombine.high %v1707_v14, %v1707_v14  ;;  %v325_v22 = vshrl.u32 %v1707_v14, 16  ;;  %v1750_v26 = vld.sshfl [vmem:[%s2319_s12 + $0x4] sm:$0x11 pattern:$0x75316420]  ;;  %v2162_v62 = vld [vmem:[%s2687_s1 + $0x30] sm:$0xff]  }
  0x14   : > { %1904 = vmatpush3.bf16.msra.mxu1 %v2140_v7  ;;  %v321_v21 = vshll.u32 %v291_v15, 16  ;;  %v845_v28 = vcombine.high %v1750_v26, %v1750_v26  ;;  %v856_v29 = vshrl.u32 %v1750_v26, 16  ;;  %v2159_v54 = vld [vmem:[%s2687_s1 + $0x160] sm:$0xff]   ;;  %v2163_v0 = vld [vmem:[%s2687_s1 + $0x170] sm:$0xff]   ;;  %v2164_v3 = vld [vmem:[%s2687_s1 + $0x38] sm:$0xff]  }
  0x15   : > { %1984 = vmatpush3.bf16.msra.mxu0 %v2141_v8  ;;  %1905 = vmatprep.subr.bf16.mxu1 %v2230_v1  ;;  %v330_v23 = vshll.u32 %v299_v16, 16  ;;  %v262_v56 = vld [vmem:[%s2319_s12] sm:$0x1]  ;;  %v263_v59 = vld [vmem:[%s2319_s12 + $0x2] sm:$0x1]  ;;  %v2165_v5 = vld [vmem:[%s2687_s1 + $0x178] sm:$0xff]  }
  0x16   : > { %1985 = vmatprep.subr.bf16.mxu0 %v2230_v1  ;;  %v323_v32 = vsel %vm2352_vm15, %v316_v20, %v321_v21  ;;  %v861_v34 = vshll.u32 %v845_v28, 16  ;;  %v2429_v57 = vld.sshfl [vmem:[%s2319_s12 + $0x2] sm:$0x10 pattern:$0x75316420]  ;;  %v455_v61 = vcombine.low %v262_v56, %v263_v59  ;;  %v2169_v11 = vld [vmem:[%s2687_s1 + $0x188] sm:$0xff]  }
  0x17   : > { %v332_v33 = vsel %vm2352_vm15, %v325_v22, %v330_v23  ;;  %v2432_v58 = vld.sshfl [vmem:[%s2319_s12 + $0x4] sm:$0x10 pattern:$0x75316420]  ;;  %v2171_v13 = vld [vmem:[%s2687_s1 + $0x190] sm:$0xff]   ;;  %v2172_v14 = vld [vmem:[%s2687_s1 + $0x98] sm:$0xff]  }
  0x18   : > { %1906 = vmatpush3.bf16.msra.mxu1 %v2142_v9  ;;  %v349_v36 = vcombine.low %v323_v32, %v332_v33  ;;  %v2372_v39 = vsel %vm2352_vm15, %v856_v29, %v861_v34  ;;  %v1765_v63 = vcombine.high %v2429_v57, %v2432_v58  ;;  %v462_v2 = vrot.slane %v455_v61, %v2364_v37  ;;  %v2166_v7 = vld [vmem:[%s2687_s1 + $0x80] sm:$0xff]   ;;  %v2173_v16 = vld [vmem:[%s2687_s1 + $0x198] sm:$0xff]   ;;  %v2176_v26 = vld [vmem:[%s2687_s1 + $0xa8] sm:$0xff]  }
  0x19   : > { %1986 = vmatpush3.bf16.msra.mxu0 %v2143_v10  ;;  %1907 = vmatprep.subr.bf16.mxu1 %v2230_v1  ;;  %v880_v41 = vcombine.low %v332_v33, %v2372_v39  ;;  %v2167_v9 = vld [vmem:[%s2687_s1 + $0x180] sm:$0xff]   ;;  %v2168_v10 = vld [vmem:[%s2687_s1 + $0x88] sm:$0xff]  }
  0x1a   : > { %1987 = vmatprep.subr.bf16.mxu0 %v2230_v1  ;;  %v356_v40 = vrot.slane %v349_v36, %v2364_v37  ;;  %v1028_v4 = vrot.slane %v1765_v63, %v2364_v37  ;;  %v469_v6 = vrot.slane %v462_v2, %v2364_v37  ;;  %v1787_v15 = vld.sshfl [vmem:[%s2319_s12 + $0x6] sm:$0x11 pattern:$0x75316420]  ;;  %v1774_v28 = vld [vmem:[%s2319_s12 + $0x4] sm:$0x1] }
  0x1b   : > { %v887_v44 = vrot.slane %v880_v41, %v2364_v37  ;;  %v2174_v21 = vld [vmem:[%s2687_s1 + $0xa0] sm:$0xff]   ;;  %v2195_v63 = vld [vmem:[%s2687_s1 + $0x1f0] sm:$0xff]   ;;  %v2196_v2 = vld [vmem:[%s2687_s1 + $0xf8] sm:$0xff]  }
  0x1c   : > { %1908 = vmatpush3.bf16.msra.mxu1 %v2144_v12  ;;  %v363_v42 = vrot.slane %v356_v40, %v2364_v37  ;;  %v1035_v8 = vrot.slane %v1028_v4, %v2364_v37  ;;  %v2170_v12 = vld [vmem:[%s2687_s1 + $0x90] sm:$0xff]   ;;  %v2175_v22 = vld [vmem:[%s2687_s1 + $0x1a0] sm:$0xff]  }
  0x1d   : > { %1988 = vmatpush3.bf16.msra.mxu0 %v2145_v17  ;;  %1909 = vmatprep.subr.bf16.mxu1 %v2230_v1  ;;  %v894_v46 = vrot.slane %v887_v44, %v2364_v37  ;;  %v1271_v17 = vcombine.high %v1787_v15, %v1787_v15  ;;  %v1726_v24 = vld.sshfl [vmem:[%s2319_s12] sm:$0x10 pattern:$0x75316420]  ;;  %v1775_v30 = vld [vmem:[%s2319_s12 + $0x6] sm:$0x1] }
  0x1e   : > { %1989 = vmatprep.subr.bf16.mxu0 %v2230_v1  ;;  %v1801_v31 = vld.sshfl [vmem:[%s2319_s12 + $0x6] sm:$0x10 pattern:$0x75316420]  ;;  %v1728_v34 = vcombine.high %v1726_v24, %v2429_v57  ;;  %v1147_v36 = vcombine.low %v1774_v28, %v1775_v30  ;;  %v2181_v44 = vld [vmem:[%s2687_s1 + $0x1b8] sm:$0xff]   ;;  %v2192_v57 = vld [vmem:[%s2687_s1 + $0xe8] sm:$0xff]  }
  0x1f   : > { %v1287_v20 = vshll.u32 %v1271_v17, 16  ;;  %v1802_v33 = vcombine.high %v2432_v58, %v1801_v31  ;;  %v2191_v56 = vld [vmem:[%s2687_s1 + $0x1e0] sm:$0xff]   ;;  %v2233_v17 = vmov 1983009808  }
  0x20   : > { %1910 = vmatpush3.bf16.msra.mxu1 %v2146_v19  ;;  %v1282_v19 = vshrl.u32 %v1787_v15, 16  ;;  %v602_v41 = vrot.slane %v1728_v34, %v2364_v37  ;;  %v1737_v58 = vld [vmem:[%s2319_s12 + $0x2] sm:$0x1]  ;;  %v1738_v59 = vld [vmem:[%s2319_s12 + $0x4] sm:$0x1] }
  0x21   : > { %1990 = vmatpush3.bf16.msra.mxu0 %v2147_v27  ;;  %1911 = vmatprep.subr.bf16.mxu1 %v2230_v1  ;;  %v2177_v27 = vld [vmem:[%s2687_s1 + $0x1a8] sm:$0xff]   ;;  %v721_v61 = vcombine.low %v1737_v58, %v1738_v59 }
  0x22   : > { %1991 = vmatprep.subr.bf16.mxu0 %v2230_v1  ;;  %v1289_v23 = vsel %vm2352_vm15, %v1282_v19, %v1287_v20  ;;  %v1571_v19 = vunpack.c.l.s4 %v2233_v17 }
  0x23   : > { %v1306_v25 = vcombine.low %v2372_v39, %v1289_v23  ;;  %v2179_v39 = vld [vmem:[%s2687_s1 + $0x1b0] sm:$0xff]  }
  0x24   : > { %1912 = vmatpush3.bf16.msra.mxu1 %v2148_v35  ;;  %v2178_v35 = vld [vmem:[%s2687_s1 + $0xb0] sm:$0xff]   ;;  %v1572_v23 = vunpack.c.0.s8 %v1571_v19 }
  0x25   : > { %1992 = vmatpush3.bf16.msra.mxu0 %v2149_v38  ;;  %1917 = vmatprep.subr.bf16.mxu1 %v2230_v1  ;;  %v2519_v29 = vrot.slane %v1306_v25, %v2364_v37  ;;  %v2533_v38 = vrot.slane %v1802_v33, %v2364_v37 }
  0x26   : > { %1997 = vmatprep.subr.bf16.mxu0 %v2230_v1  ;;  %v1575_v28 = vsub.s32 %v1572_v23, %v2338_v18 }
  0x27   : > { %1914 = vmatmul.mubr.bf16.vlgmr.msra.gmra.mrb[0].mxu1 %v363_v42  ;;  %v1320_v32 = vrot.slane %v2519_v29, %v2364_v37  ;;  %v1461_v40 = vrot.slane %v2533_v38, %v2364_v37  ;;  %v2180_v42 = vld [vmem:[%s2687_s1 + $0xb8] sm:$0xff]  }
  0x28   : > { %1918 = vmatpush3.bf16.msra.mxu1 %v2150_v43  ;;  %1994 = vmatmul.mubr.bf16.vlgmr.msra.gmra.mrb[0].mxu0 %v894_v46  ;;  %v1154_v43 = vrot.slane %v1147_v36, %v2364_v37  ;;  %v2182_v46 = vld [vmem:[%s2687_s1 + $0xc0] sm:$0xff]  }
  0x29   : > { %1998 = vmatpush3.bf16.msra.mxu0 %v2151_v45  ;;  %1919 = vmatprep.subr.bf16.mxu1 %v2230_v1  ;;  %v609_v45 = vrot.slane %v602_v41, %v2364_v37 }
  0x2a   : > { %1999 = vmatprep.subr.bf16.mxu0 %v2230_v1  ;;  %1933 = vmatprep.mubr.msk.bf16.mxu1 %vm2231_vm0, %v2230_v1 }
  0x2b   : > { %2013 = vmatprep.mubr.msk.bf16.mxu0 %vm2231_vm0, %v2230_v1 }
  0x2c   : > { %1920 = vmatpush3.bf16.msra.mxu1 %v2152_v47  ;;  %v1161_v47 = vrot.slane %v1154_v43, %v2364_v37 }
  0x2d   : > { %2000 = vmatpush3.bf16.msra.mxu0 %v2153_v48  ;;  %1921 = vmatprep.subr.bf16.mxu1 %v2230_v1  ;;  %v2183_v48 = vld [vmem:[%s2687_s1 + $0x1c0] sm:$0xff]  }
  0x2e   : > { %2001 = vmatprep.subr.bf16.mxu0 %v2230_v1 }
  0x30   : > { %1922 = vmatpush3.bf16.msra.mxu1 %v2154_v49  ;;  %v2184_v49 = vld [vmem:[%s2687_s1 + $0xc8] sm:$0xff]  }
  0x31   : > { %2002 = vmatpush3.bf16.msra.mxu0 %v2155_v50  ;;  %1923 = vmatprep.subr.bf16.mxu1 %v2230_v1  ;;  %v2185_v50 = vld [vmem:[%s2687_s1 + $0x1c8] sm:$0xff]  }
  0x32   : > { %2003 = vmatprep.subr.bf16.mxu0 %v2230_v1 }
  0x34   : > { %1924 = vmatpush3.bf16.msra.mxu1 %v2156_v51  ;;  %v2186_v51 = vld [vmem:[%s2687_s1 + $0xd0] sm:$0xff]  }
  0x35   : > { %2004 = vmatpush3.bf16.msra.mxu0 %v2157_v52  ;;  %1925 = vmatprep.subr.bf16.mxu1 %v2230_v1  ;;  %v2187_v52 = vld [vmem:[%s2687_s1 + $0x1d0] sm:$0xff]  }
  0x36   : > { %2005 = vmatprep.subr.bf16.mxu0 %v2230_v1 }
  0x38   : > { %1926 = vmatpush3.bf16.msra.mxu1 %v2158_v53  ;;  %v2188_v53 = vld [vmem:[%s2687_s1 + $0xd8] sm:$0xff]  }
  0x39   : > { %2006 = vmatpush3.bf16.msra.mxu0 %v2159_v54  ;;  %1927 = vmatprep.subr.bf16.mxu1 %v2230_v1  ;;  %v2189_v54 = vld [vmem:[%s2687_s1 + $0x1d8] sm:$0xff]  }
  0x3a   : > { %2007 = vmatprep.subr.bf16.mxu0 %v2230_v1 }
  0x3c   : > { %1928 = vmatpush3.bf16.msra.mxu1 %v2160_v55  ;;  %v2190_v55 = vld [vmem:[%s2687_s1 + $0xe0] sm:$0xff]  }
  0x3d   : > { %2008 = vmatpush3.bf16.msra.mxu0 %v2161_v60  ;;  %1929 = vmatprep.subr.bf16.mxu1 %v2230_v1  ;;  %v2193_v60 = vld [vmem:[%s2687_s1 + $0x1e8] sm:$0xff]  }
  0x3e   : > { %2009 = vmatprep.subr.bf16.mxu0 %v2230_v1 }
  0x40   : > { %1930 = vmatpush3.bf16.msra.mxu1 %v2162_v62  ;;  %v2194_v62 = vld [vmem:[%s2687_s1 + $0xf0] sm:$0xff]  }
  0x41   : > { %2010 = vmatpush3.bf16.msra.mxu0 %v2163_v0  ;;  %1931 = vmatprep.subr.bf16.mxu1 %v2230_v1  ;;  %v728_v0 = vrot.slane %v721_v61, %v2364_v37 }
  0x42   : > { %2011 = vmatprep.subr.bf16.mxu0 %v2230_v1 }
  0x43   : > { %v735_v4 = vrot.slane %v728_v0, %v2364_v37  ;;  %v1812_v37 = vld [vmem:[%s2689_s3] ss:$0 sm:$0xff] }
  0x44   : > { %1932 = vmatpush3.bf16.msra.mxu1 %v2164_v3  ;;  %v2197_v3 = vld [vmem:[%s2687_s1 + $0x1f8] sm:$0xff]  }
  0x45   : > { %2012 = vmatpush3.bf16.msra.mxu0 %v2165_v5  ;;  %1937 = vmatprep.subr.bf16.mxu1 %v2230_v1  ;;  %v2198_v5 = vld [vmem:[%s2687_s1 + $0x200] sm:$0xff]  }
  0x46   : > { %2017 = vmatprep.subr.bf16.mxu0 %v2230_v1 }
  0x47   : > { %1934 = vmatmul.mubr.bf16.vlgmr.msra.gmra.mrb[0].mxu1 %v469_v6  ;;  %v2199_v6 = vld [vmem:[%s2687_s1 + $0x208] sm:$0xff]  }
  0x48   : > { %1938 = vmatpush3.bf16.msra.mxu1 %v2166_v7  ;;  %2014 = vmatmul.mubr.bf16.vlgmr.msra.gmra.mrb[0].mxu0 %v1035_v8  ;;  %v2200_v7 = vld [vmem:[%s2687_s1 + $0x210] sm:$0xff]   ;;  %v2201_v8 = vld [vmem:[%s2687_s1 + $0x218] sm:$0xff]  }
  0x49   : > { %2018 = vmatpush3.bf16.msra.mxu0 %v2167_v9  ;;  %1939 = vmatprep.subr.bf16.mxu1 %v2230_v1  ;;  %v2202_v9 = vld [vmem:[%s2687_s1 + $0x220] sm:$0xff]  }
  0x4a   : > { %2019 = vmatprep.subr.bf16.mxu0 %v2230_v1  ;;  %1953 = vmatprep.mubr.msk.bf16.mxu1 %vm2231_vm0, %v2230_v1 }
  0x4b   : > { %2033 = vmatprep.mubr.msk.bf16.mxu0 %vm2231_vm0, %v2230_v1 }
  0x4c   : > { %1940 = vmatpush3.bf16.msra.mxu1 %v2168_v10  ;;  %v2203_v10 = vld [vmem:[%s2687_s1 + $0x228] sm:$0xff]  }
  0x4d   : > { %2020 = vmatpush3.bf16.msra.mxu0 %v2169_v11  ;;  %1941 = vmatprep.subr.bf16.mxu1 %v2230_v1  ;;  %v2204_v11 = vld [vmem:[%s2687_s1 + $0x230] sm:$0xff]  }
  0x4e   : > { %2021 = vmatprep.subr.bf16.mxu0 %v2230_v1 }
  0x50   : > { %1942 = vmatpush3.bf16.msra.mxu1 %v2170_v12  ;;  %v2205_v12 = vld [vmem:[%s2687_s1 + $0x238] sm:$0xff]  }
  0x51   : > { %2022 = vmatpush3.bf16.msra.mxu0 %v2171_v13  ;;  %1943 = vmatprep.subr.bf16.mxu1 %v2230_v1 }
  0x52   : > { %2023 = vmatprep.subr.bf16.mxu0 %v2230_v1 }
  0x54   : > { %1944 = vmatpush3.bf16.msra.mxu1 %v2172_v14 }
  0x55   : > { %2024 = vmatpush3.bf16.msra.mxu0 %v2173_v16  ;;  %1945 = vmatprep.subr.bf16.mxu1 %v2230_v1 }
  0x56   : > { %2025 = vmatprep.subr.bf16.mxu0 %v2230_v1 }
  0x58   : > { %1946 = vmatpush3.bf16.msra.mxu1 %v2174_v21  ;;  %v1811_v21 = vld [vmem:[%s2688_s2] ss:$0 sm:$0xff] }
  0x59   : > { %2026 = vmatpush3.bf16.msra.mxu0 %v2175_v22  ;;  %1947 = vmatprep.subr.bf16.mxu1 %v2230_v1 }
  0x5a   : > { %2027 = vmatprep.subr.bf16.mxu0 %v2230_v1 }
  0x5c   : > { %1948 = vmatpush3.bf16.msra.mxu1 %v2176_v26 }
  0x5d   : > { %2028 = vmatpush3.bf16.msra.mxu0 %v2177_v27  ;;  %1949 = vmatprep.subr.bf16.mxu1 %v2230_v1 }
  0x5e   : > { %2029 = vmatprep.subr.bf16.mxu0 %v2230_v1 }
  0x60   : > { %1950 = vmatpush3.bf16.msra.mxu1 %v2178_v35 }
  0x61   : > { %2030 = vmatpush3.bf16.msra.mxu0 %v2179_v39  ;;  %1951 = vmatprep.subr.bf16.mxu1 %v2230_v1 }
  0x62   : > { %2031 = vmatprep.subr.bf16.mxu0 %v2230_v1 }
  0x64   : > { %1952 = vmatpush3.bf16.msra.mxu1 %v2180_v42 }
  0x65   : > { %2032 = vmatpush3.bf16.msra.mxu0 %v2181_v44  ;;  %1957 = vmatprep.subr.bf16.mxu1 %v2230_v1 }
  0x66   : > { %2037 = vmatprep.subr.bf16.mxu0 %v2230_v1 }
  0x67   : > { %1954 = vmatmul.mubr.bf16.vlgmr.msra.gmra.mrb[0].mxu1 %v609_v45 }
  0x68   : > { %1958 = vmatpush3.bf16.msra.mxu1 %v2182_v46  ;;  %2034 = vmatmul.mubr.bf16.vlgmr.msra.gmra.mrb[0].mxu0 %v1161_v47 }
  0x69   : > { %2038 = vmatpush3.bf16.msra.mxu0 %v2183_v48  ;;  %1959 = vmatprep.subr.bf16.mxu1 %v2230_v1 }
  0x6a   : > { %2039 = vmatprep.subr.bf16.mxu0 %v2230_v1  ;;  %1973 = vmatprep.mubr.msk.bf16.mxu1 %vm2231_vm0, %v2230_v1 }
  0x6b   : > { %2053 = vmatprep.mubr.msk.bf16.mxu0 %vm2231_vm0, %v2230_v1 }
  0x6c   : > { %1960 = vmatpush3.bf16.msra.mxu1 %v2184_v49 }
  0x6d   : > { %2040 = vmatpush3.bf16.msra.mxu0 %v2185_v50  ;;  %1961 = vmatprep.subr.bf16.mxu1 %v2230_v1 }
  0x6e   : > { %2041 = vmatprep.subr.bf16.mxu0 %v2230_v1 }
  0x70   : > { %1962 = vmatpush3.bf16.msra.mxu1 %v2186_v51 }
  0x71   : > { %2042 = vmatpush3.bf16.msra.mxu0 %v2187_v52  ;;  %1963 = vmatprep.subr.bf16.mxu1 %v2230_v1 }
  0x72   : > { %2043 = vmatprep.subr.bf16.mxu0 %v2230_v1 }
  0x74   : > { %1964 = vmatpush3.bf16.msra.mxu1 %v2188_v53 }
  0x75   : > { %2044 = vmatpush3.bf16.msra.mxu0 %v2189_v54  ;;  %1965 = vmatprep.subr.bf16.mxu1 %v2230_v1 }
  0x76   : > { %2045 = vmatprep.subr.bf16.mxu0 %v2230_v1 }
  0x78   : > { %1966 = vmatpush3.bf16.msra.mxu1 %v2190_v55 }
  0x79   : > { %2046 = vmatpush3.bf16.msra.mxu0 %v2191_v56  ;;  %1967 = vmatprep.subr.bf16.mxu1 %v2230_v1 }
  0x7a   : > { %2047 = vmatprep.subr.bf16.mxu0 %v2230_v1 }
  0x7c   : > { %1968 = vmatpush3.bf16.msra.mxu1 %v2192_v57 }
  0x7d   : > { %2048 = vmatpush3.bf16.msra.mxu0 %v2193_v60  ;;  %1969 = vmatprep.subr.bf16.mxu1 %v2230_v1 }
  0x7e   : > { %2049 = vmatprep.subr.bf16.mxu0 %v2230_v1 }
  0x80   : > { %1970 = vmatpush3.bf16.msra.mxu1 %v2194_v62 }
  0x81   : > { %2050 = vmatpush3.bf16.msra.mxu0 %v2195_v63  ;;  %1971 = vmatprep.subr.bf16.mxu1 %v2230_v1 }
  0x82   : > { %2051 = vmatprep.subr.bf16.mxu0 %v2230_v1 }
  0x84   : > { %1972 = vmatpush3.bf16.msra.mxu1 %v2196_v2 }
  0x85   : > { %2052 = vmatpush3.bf16.msra.mxu0 %v2197_v3 }
  0x86   : > { %2057 = vmatprep.subr.bf16.mxu0 %v2230_v1 }
  0x87   : > { %1974 = vmatmul.mubr.bf16.vlgmr.msra.gmra.mrb[0].mxu1 %v735_v4 }
  0x88   : > { %2054 = vmatmul.mubr.bf16.vlgmr.msra.gmra.mrb[0].mxu0 %v1320_v32 }
  0x89   : > { %2058 = vmatpush3.bf16.msra.mxu0 %v2198_v5  ;;  %2073 = vmatprep.mubr.msk.bf16.mxu0 %vm2231_vm0, %v2230_v1 }
  0x8a   : > { %2059 = vmatprep.subr.bf16.mxu0 %v2230_v1 }
  0x8d   : > { %2060 = vmatpush3.bf16.msra.mxu0 %v2199_v6 }
  0x8e   : > { %2061 = vmatprep.subr.bf16.mxu0 %v2230_v1 }
  0x91   : > { %2062 = vmatpush3.bf16.msra.mxu0 %v2200_v7 }
  0x92   : > { %2063 = vmatprep.subr.bf16.mxu0 %v2230_v1 }
  0x95   : > { %2064 = vmatpush3.bf16.msra.mxu0 %v2201_v8 }
  0x96   : > { %2065 = vmatprep.subr.bf16.mxu0 %v2230_v1 }
  0x99   : > { %2066 = vmatpush3.bf16.msra.mxu0 %v2202_v9 }
  0x9a   : > { %2067 = vmatprep.subr.bf16.mxu0 %v2230_v1 }
  0x9d   : > { %2068 = vmatpush3.bf16.msra.mxu0 %v2203_v10 }
  0x9e   : > { %2069 = vmatprep.subr.bf16.mxu0 %v2230_v1 }
  0xa1   : > { %2070 = vmatpush3.bf16.msra.mxu0 %v2204_v11 }
  0xa2   : > { %2071 = vmatprep.subr.bf16.mxu0 %v2230_v1 }
  0xa5   : > { %2072 = vmatpush3.bf16.msra.mxu0 %v2205_v12 }
  0xa8   : > { %2074 = vmatmul.mubr.bf16.vlgmr.msra.gmra.mrb[0].mxu0 %v1461_v40 }
 0x15a   : > { %v819_v13 = vpop.f32.mrb[0].mxu1 }
 0x15b   : > { %v1975_v14 = vpop.f32.mrb[1].mxu1 }
 0x15c   : > { %v822_v15 = vpop.f32.mrb[2].mxu1 }
 0x15d   : > { %v1976_v16 = vpop.f32.mrb[3].mxu1 }
 0x17b   : > { %v1545_v20 = vpop.f32.mrb[0].mxu0 }
 0x17c   : > { %v2077_v22 = vadd.f32 %v1545_v20, %v819_v13  ;;  %v2075_v1 = vpop.f32.mrb[1].mxu0 }
 0x17d   : > { %v1548_v24 = vpop.f32.mrb[2].mxu0 }
 0x17e   : > { %v1559_v25 = vmul.f32 %v2077_v22, %v1811_v21  ;;  %v2076_v26 = vpop.f32.mrb[3].mxu0 }
 0x180   : > { %v1567_v27 = vadd.f32 %v1812_v37, %v1559_v25 }
 0x182   : > { %v1568_v29 = vmax.f32 %v1567_v27, 0.0 }
 0x184   : > { %v1576_v30 = vrot.slane %v1568_v29, %v1575_v28 }
 0x186   : > { %v1577_v31 = vcombine.high %v1576_v30, %v1576_v30  ;;  %v1580_v32 = vpack.c.bf16 %v1576_v30, %v1576_v30 }
 0x188   : > { %v1581_v33 = vpack.c.bf16 %v1577_v31, %v1577_v31  ;;  %1582 = vst [vmem:[%s260_s24] sm:$0x1] %v1580_v32 }
 0x18a   : > { %1583 = vst [vmem:[%s260_s24 + $0x1] sm:$0x1] %v1581_v33 }
 0x18b PF: > { %s14_s17 = sadd.s32 1, %s2228_s17   ;;  %s2693_s15 = smov %s2224_s16 }
 0x18c   : > { %p11_p5 = scmp.ge.s32.totalorder %s14_s17, 4   ;;  %s2694_s16 = smov %s2696_s18 }
 0x18e   :  { %13 = sbr.rel (!%p11_p5) target bundleno = 2 (0x2), region = 77 }

// kernel: _lambda_.41
= control target key start
LH: loop header
LB: loop body
LE: loop exit
PB: predicated region body
PF: predicated region fallthrough
CT: control target
= control target key end

     0   :  { %s839_s12 = smov 0   ;;  %s841_s13 = smov 0   ;;  %s961_s0 = inlined_call_operand.vmem [shape: bf16[2,1,128], index: 0, kind: input, shape index: {}]   ;;  %s962_s1 = inlined_call_operand.vmem [shape: bf16[2,128,256], index: 1, kind: input, shape index: {}]   ;;  %s963_s2 = inlined_call_operand.vmem [shape: f32[1,256], index: 2, kind: input, shape index: {}]   ;;  %s964_s3 = inlined_call_operand.vmem [shape: bf16[2,2,1,256], index: 3, kind: output, shape index: {}]  }
   0x1   :  { %s843_s14 = smov 0   ;;  %s845_s15 = smov 0  }
   0x2   :  { %s847_s16 = smov 0  }
   0x3 LB: > { %s676_s17 = sadd.s32 4294967295, %s815_s16   ;;  %s28_s18 = sadd.s32 1, %s811_s15  ;;  %s815_s16 = sphi %s847_s16, %s13_s16   ;;  %s811_s15 = sphi %s845_s15, %s973_s15   ;;  %s807_s14 = sphi %s843_s14, %s972_s14   ;;  %s803_s13 = sphi %s841_s13, %s971_s13   ;;  %s799_s12 = sphi %s839_s12, %s970_s12  }
   0x4   : > { %p30_p0 = scmp.ge.s32.totalorder %s28_s18, 2  ;;  %s123_s19 = sadd.s32 1, %s803_s13 }
   0x5   : > { %p133_p1 = scmp.ne.s32.totalorder %s803_s13, %s799_s12  ;;  %p134_p2 = scmp.eq.s32.totalorder %s676_s17, 1 }
   0x6   : > { %s975_s18 = smov (%p30_p0, %s28_s18), 0  ;;  %p682_p4 = scmp.ge.s32.totalorder %s815_s16, 1 }
   0x7   : > { %p871_p3 = por %p134_p2, %p133_p1  ;;  %s117_s21 = ssub.s32 %s811_s15, %s975_s18 }
   0x8   : > { %p187_p5 = scmp.lt.s32.totalorder %s815_s16, 3  ;;  %p121_p6 = scmp.eq.s32.totalorder %s117_s21, 0 }
   0xa   : > { %p188_p7 = pnand %p682_p4, %p187_p5 }
   0xb   : > { %s880_s22 = scalar_select %p121_p6, %s803_s13, %s123_s19  }
   0xc   : > { %191 = sbr.rel (%p188_p7) target bundleno = 297 (0x129), region = 32  ;;  %p228_p8 = scmp.lt.s32.totalorder (!%p188_p7), %s807_s14, 1  ;;  %v817_v0 = vmov (!%p188_p7), 0   ;;  %v265_v5 = vlaneseq (!%p188_p7)  ;;  %v818_v6 = vmov (!%p188_p7), 1966171168   ;;  %vm308_vm0 = vcmask (!%p188_p7), 1041409  }
   0xd   : > { %424 = vmatprep.mubr.bf16.mxu0 (!%p188_p7), %v817_v0  ;;  %v285_v7 = vunpack.c.l.s4 (!%p188_p7), %v818_v6  ;;  %v687_v16 = vld.sshfl [vmem:[%s961_s0 + $0x1] sm:$0x1 pattern:$0x75316420] (!%p188_p7)  ;;  %s219_s7 = sand.u32 (!%p188_p7), 1, %s799_s12   ;;  %vm518_vm1 = vcmask (!%p188_p7), 1040384  }
   0xe   : > { %v266_v10 = vshrl.u32 (!%p188_p7), %v265_v5, 7  ;;  %v686_v20 = vld.sshfl [vmem:[%s961_s0] sm:$0x1 pattern:$0x75316420] (!%p188_p7)  ;;  %s683_s8 = sshll.u32 (!%p188_p7), %s219_s7, 2 }
   0xf   : > { %v286_v11 = vunpack.c.0.s8 (!%p188_p7), %v285_v7  ;;  %v263_v33 = vld [vmem:[%s963_s2] sm:$0x3] (!%p188_p7)  ;;  %vm519_vm2 = vsmask.f32 (!%p188_p7), 256  ;;  %vm522_vm3 = vsmask.f32 (!%p188_p7), 1280 }
  0x10   : > { %v267_v32 = vsub.s32 (!%p188_p7), 0, %v266_v10  ;;  %v271_v34 = vsub.s32 (!%p188_p7), 1, %v266_v10  ;;  %vm923_vm4 = vmand (!%p188_p7), %vm518_vm1, %vm519_vm2  ;;  %s221_s9 = scalar_lea.vmem (!%p188_p7), [#allocation2], %s683_s8 }
  0x11   : > { %v897_v14 = vsub.s32 (!%p188_p7), %v286_v11, %v266_v10  ;;  %vm928_vm5 = vmand (!%p188_p7), %vm308_vm0, %vm522_vm3  ;;  %v525_v57 = vld [vmem:[%s221_s9] sm:$0x3] (!%p188_p7)  ;;  %v528_v60 = vld [vmem:[%s221_s9 + $0x2] sm:$0x3] (!%p188_p7) }
  0x12   : > { %v268_v35 = vrot.slane (!%p188_p7), %v263_v33, %v267_v32  ;;  %v272_v36 = vrot.slane (!%p188_p7), %v263_v33, %v271_v34  ;;  %vm524_vm6 = vmor (!%p188_p7), %vm928_vm5, %vm923_vm4 }
  0x13   : > { %s229_s23 = scalar_select %p228_p8, %s807_s14, 1  ;;  %v304_v18 = vrot.slane %v687_v16, %v897_v14  ;;  %v290_v22 = vrot.slane %v686_v20, %v897_v14 }
  0x14   : > { %s707_s10 = sshll.u32 (%p871_p3), %s807_s14, 1 }
  0x15   : > { %s710_s24 = sshll.u32 %s229_s23, 7  ;;  %v306_v23 = vunpack.c.l.b16 %v304_v18  ;;  %v305_v26 = vunpack.c.l.b16 %v290_v22  ;;  %s544_s17 = scalar_lea.vmem (%p871_p3), %s964_s3, %s707_s10 }
  0x16   : > { %s887_s27 = scalar_lea.vmem %s962_s1, %s710_s24 }
  0x17   : > { %v753_v1 = vld [vmem:[%s887_s27 + $0x4] ss:$8 sps:$4 sm:$0xff]   ;;  %v755_v2 = vld [vmem:[%s887_s27] ss:$8 sps:$4 sm:$0xff]   ;;  %v756_v3 = vld [vmem:[%s887_s27 + $0x14] ss:$8 sps:$4 sm:$0xff]  }
  0x18   : > { %392 = vmatprep.subr.bf16.mxu0 %v753_v1  ;;  %v758_v4 = vld [vmem:[%s887_s27 + $0x10] ss:$8 sps:$4 sm:$0xff]   ;;  %v759_v8 = vld [vmem:[%s887_s27 + $0x24] ss:$8 sps:$4 sm:$0xff]   ;;  %v761_v9 = vld [vmem:[%s887_s27 + $0x20] ss:$8 sps:$4 sm:$0xff]  }
  0x19   : > { %393 = vmatpush1.bf16.msra.mxu0 %v755_v2  ;;  %v762_v12 = vld [vmem:[%s887_s27 + $0x34] ss:$8 sps:$4 sm:$0xff]   ;;  %v764_v13 = vld [vmem:[%s887_s27 + $0x30] ss:$8 sps:$4 sm:$0xff]   ;;  %v765_v15 = vld [vmem:[%s887_s27 + $0x44] ss:$8 sps:$4 sm:$0xff]  }
  0x1a   : > { %394 = vmatprep.subr.bf16.mxu0 %v756_v3  ;;  %v767_v17 = vld [vmem:[%s887_s27 + $0x40] ss:$8 sps:$4 sm:$0xff]   ;;  %v768_v19 = vld [vmem:[%s887_s27 + $0x54] ss:$8 sps:$4 sm:$0xff]   ;;  %v770_v21 = vld [vmem:[%s887_s27 + $0x50] ss:$8 sps:$4 sm:$0xff]  }
  0x1b   : > { %v771_v24 = vld [vmem:[%s887_s27 + $0x64] ss:$8 sps:$4 sm:$0xff]   ;;  %v773_v25 = vld [vmem:[%s887_s27 + $0x60] ss:$8 sps:$4 sm:$0xff]   ;;  %v307_v27 = vrot.slane %v306_v23, 7 }
  0x1c   : > { %v774_v28 = vld [vmem:[%s887_s27 + $0x74] ss:$8 sps:$4 sm:$0xff]   ;;  %v776_v29 = vld [vmem:[%s887_s27 + $0x70] ss:$8 sps:$4 sm:$0xff]  }
  0x1d   : > { %395 = vmatpush1.bf16.msra.mxu0 %v758_v4  ;;  %v309_v30 = vsel %vm308_vm0, %v307_v27, %v305_v26 }
  0x1e   : > { %396 = vmatprep.subr.bf16.mxu0 %v759_v8  ;;  %v310_v31 = vpack.c.b16 %v309_v30, %v309_v30 }
  0x21   : > { %397 = vmatpush1.bf16.msra.mxu0 %v761_v9 }
  0x22   : > { %398 = vmatprep.subr.bf16.mxu0 %v762_v12 }
  0x25   : > { %399 = vmatpush1.bf16.msra.mxu0 %v764_v13 }
  0x26   : > { %400 = vmatprep.subr.bf16.mxu0 %v765_v15 }
  0x29   : > { %401 = vmatpush1.bf16.msra.mxu0 %v767_v17 }
  0x2a   : > { %402 = vmatprep.subr.bf16.mxu0 %v768_v19 }
  0x2d   : > { %403 = vmatpush1.bf16.msra.mxu0 %v770_v21 }
  0x2e   : > { %404 = vmatprep.subr.bf16.mxu0 %v771_v24 }
  0x31   : > { %405 = vmatpush1.bf16.msra.mxu0 %v773_v25 }
  0x32   : > { %406 = vmatprep.subr.bf16.mxu0 %v774_v28 }
  0x35   : > { %407 = vmatpush1.bf16.msra.mxu0 %v776_v29 }
  0x38   : > { %425 = vmatmul.mubr.bf16.vlgmr.msra.gmra.mrb[0].mxu0 %v310_v31 }
 0x10b   : > { %v426_v37 = vpop.f32.mrb[0].mxu0 }
 0x10c   : > { %v427_v38 = vadd.f32 %v426_v37, %v268_v35  ;;  %v428_v39 = vpop.f32.mrb[1].mxu0 }
 0x10d   : > { %v429_v40 = vadd.f32 %v428_v39, %v272_v36  ;;  %v430_v41 = vpop.f32.mrb[2].mxu0 }
 0x10e   : > { %v431_v42 = vpop.f32.mrb[3].mxu0 }
 0x10f   : > { %v435_v43 = vcombine.low %v427_v38, %v429_v40 }
 0x111   : > { %v442_v44 = vrot.slane %v435_v43, %v897_v14 }
 0x113   : > { %v443_v45 = vcombine.high %v442_v44, %v442_v44  ;;  %v450_v46 = vrot.slane %v442_v44, %v897_v14 }
 0x115   : > { %v457_v47 = vrot.slane %v443_v45, %v897_v14  ;;  %v461_v48 = vrot.slane %v450_v46, %v267_v32  ;;  %v465_v49 = vrot.slane %v450_v46, %v271_v34 }
 0x117   : > { %v469_v52 = vrot.slane %v457_v47, %v267_v32  ;;  %v473_v53 = vrot.slane %v457_v47, %v271_v34  ;;  %v704_v54 = vpack.c.bf16 %v465_v49, %v461_v48 }
 0x119   : > { %v493_v55 = vrot.slane %v704_v54, %v897_v14  ;;  %v705_v56 = vpack.c.bf16 %v473_v53, %v469_v52 }
 0x11a   : > { %537 = sbr.rel (!%p871_p3) target bundleno = 297 (0x129), region = 36 }
 0x11b   : > { %v500_v58 = vrot.slane %v493_v55, %v897_v14  ;;  %v508_v59 = vrot.slane %v705_v56, %v897_v14 }
 0x11d   : > { %v515_v61 = vrot.slane %v508_v59, %v897_v14  ;;  %v526_v62 = vsel %vm524_vm6, %v500_v58, %v525_v57 }
 0x11e   : > { %527 = vst [vmem:[%s221_s9] sm:$0x3] %v526_v62 }
 0x11f   : > { %v529_v63 = vsel %vm524_vm6, %v515_v61, %v528_v60 }
 0x120   : > { %530 = vst [vmem:[%s221_s9 + $0x2] sm:$0x3] %v529_v63 }
 0x125   : > { %v560_v0 = vld [vmem:[%s221_s9] sm:$0x3] }
 0x126   : > { %561 = vst [vmem:[%s544_s17] sm:$0x3] %v560_v0 }
 0x127   : > { %v562_v1 = vld [vmem:[%s221_s9 + $0x2] sm:$0x3] }
 0x128   : > { %563 = vst [vmem:[%s544_s17 + $0x4] sm:$0x3] %v562_v1 }
 0x129 PF: > { %s13_s16 = sadd.s32 1, %s815_s16   ;;  %s970_s12 = smov %s803_s13 }
 0x12a   : > { %p10_p9 = scmp.ge.s32.totalorder %s13_s16, 4   ;;  %s971_s13 = smov %s880_s22 }
 0x12b   : > { %s972_s14 = smov %s811_s15  ;;  %s973_s15 = smov %s975_s18 }
 0x12c   :  { %12 = sbr.rel (!%p10_p9) target bundleno = 3 (0x3), region = 102 }

// kernel: _lambda_.44
= control target key start
LH: loop header
LB: loop body
LE: loop exit
PB: predicated region body
PF: predicated region fallthrough
CT: control target
= control target key end

     0   :  { %s901_s12 = smov 0   ;;  %s903_s13 = smov 0   ;;  %s1004_s0 = inlined_call_operand.vmem [shape: bf16[4,2,128], index: 0, kind: input, shape index: {}]   ;;  %s1005_s1 = inlined_call_operand.vmem [shape: bf16[2,128,256], index: 1, kind: input, shape index: {}]   ;;  %s1006_s2 = inlined_call_operand.vmem [shape: f32[1,256], index: 2, kind: input, shape index: {}]   ;;  %s1007_s3 = inlined_call_operand.vmem [shape: bf16[4,2,2,256], index: 3, kind: output, shape index: {}]  }
   0x1   :  { %s905_s14 = smov 0   ;;  %s907_s15 = smov 0  }
   0x2   :  { %s909_s16 = smov 0  }
   0x3 LB: > { %s732_s17 = sadd.s32 4294967295, %s876_s16   ;;  %s28_s18 = sadd.s32 1, %s872_s15  ;;  %s876_s16 = sphi %s909_s16, %s13_s16   ;;  %s872_s15 = sphi %s907_s15, %s1012_s15   ;;  %s868_s14 = sphi %s905_s14, %s1011_s14   ;;  %s864_s13 = sphi %s903_s13, %s1010_s13   ;;  %s860_s12 = sphi %s901_s12, %s1009_s12  }
   0x4   : > { %p30_p0 = scmp.ge.s32.totalorder %s28_s18, 2  ;;  %s123_s19 = sadd.s32 1, %s864_s13 }
   0x5   : > { %p133_p1 = scmp.ne.s32.totalorder %s864_s13, %s860_s12  ;;  %p134_p2 = scmp.eq.s32.totalorder %s732_s17, 1 }
   0x6   : > { %s1014_s18 = smov (%p30_p0, %s28_s18), 0  ;;  %p738_p4 = scmp.ge.s32.totalorder %s876_s16, 1 }
   0x7   : > { %p933_p3 = por %p134_p2, %p133_p1  ;;  %s117_s21 = ssub.s32 %s872_s15, %s1014_s18 }
   0x8   : > { %p187_p5 = scmp.lt.s32.totalorder %s876_s16, 3  ;;  %p121_p6 = scmp.eq.s32.totalorder %s117_s21, 0 }
   0xa   : > { %p188_p7 = pnand %p738_p4, %p187_p5 }
   0xb   : > { %s942_s22 = scalar_select %p121_p6, %s864_s13, %s123_s19  }
   0xc   : > { %191 = sbr.rel (%p188_p7) target bundleno = 295 (0x127), region = 32  ;;  %p228_p8 = scmp.lt.s32.totalorder (!%p188_p7), %s868_s14, 1  ;;  %v878_v0 = vmov (!%p188_p7), 0   ;;  %v267_v8 = vlaneseq (!%p188_p7)  ;;  %v879_v9 = vmov (!%p188_p7), 1966171168  }
   0xd   : > { %418 = vmatprep.mubr.bf16.mxu0 (!%p188_p7), %v878_v0  ;;  %v284_v10 = vunpack.c.l.s4 (!%p188_p7), %v879_v9  ;;  %v245_v13 = vld [vmem:[%s1004_s0] sm:$0x1] (!%p188_p7)  ;;  %v246_v14 = vld [vmem:[%s1004_s0 + $0x1] sm:$0x1] (!%p188_p7)  ;;  %v247_v18 = vld [vmem:[%s1004_s0 + $0x2] sm:$0x1] (!%p188_p7) }
   0xe   : > { %v268_v15 = vshrl.u32 (!%p188_p7), %v267_v8, 7  ;;  %v248_v19 = vld [vmem:[%s1004_s0 + $0x3] sm:$0x1] (!%p188_p7)  ;;  %v281_v21 = vcombine.low (!%p188_p7), %v245_v13, %v246_v14  ;;  %v265_v34 = vld [vmem:[%s1006_s2] sm:$0x3] (!%p188_p7)  ;;  %s219_s11 = sand.u32 (!%p188_p7), 1, %s860_s12  }
   0xf   : > { %v285_v16 = vunpack.c.0.s8 (!%p188_p7), %v284_v10  ;;  %v282_v22 = vcombine.low (!%p188_p7), %v247_v18, %v248_v19  ;;  %v880_v36 = vmov (!%p188_p7), 1983009808   ;;  %s739_s17 = sshll.u32 (!%p188_p7), %s219_s11, 3 }
  0x10   : > { %v269_v33 = vsub.s32 (!%p188_p7), 0, %v268_v15  ;;  %v273_v35 = vsub.s32 (!%p188_p7), 1, %v268_v15  ;;  %v432_v37 = vunpack.c.l.s4 (!%p188_p7), %v880_v36  ;;  %s221_s12 = scalar_lea.vmem (!%p188_p7), [#allocation2], %s739_s17 }
  0x11   : > { %v288_v23 = vsub.s32 (!%p188_p7), %v285_v16, %v268_v15 }
  0x12   : > { %v270_v38 = vrot.slane (!%p188_p7), %v265_v34, %v269_v33  ;;  %v274_v39 = vrot.slane (!%p188_p7), %v265_v34, %v273_v35  ;;  %v433_v40 = vunpack.c.0.s8 (!%p188_p7), %v432_v37 }
  0x13   : > { %s229_s23 = scalar_select %p228_p8, %s868_s14, 1  ;;  %v289_v26 = vrot.slane %v281_v21, %v288_v23  ;;  %v296_v27 = vrot.slane %v282_v22, %v288_v23 }
  0x14   : > { %v436_v45 = vsub.s32 %v433_v40, %v268_v15  ;;  %s767_s19 = sshll.u32 (%p933_p3), %s868_s14, 1 }
  0x15   : > { %s770_s24 = sshll.u32 %s229_s23, 7  ;;  %v297_v30 = vcombine.low %v289_v26, %v296_v27 }
  0x16   : > { %s949_s27 = scalar_lea.vmem %s1005_s1, %s770_s24  ;;  %s584_s24 = scalar_lea.vmem (%p933_p3), %s1007_s3, %s767_s19 }
  0x17   : > { %v814_v1 = vld [vmem:[%s949_s27 + $0x4] ss:$8 sps:$4 sm:$0xff]   ;;  %v816_v2 = vld [vmem:[%s949_s27] ss:$8 sps:$4 sm:$0xff]   ;;  %v817_v3 = vld [vmem:[%s949_s27 + $0x14] ss:$8 sps:$4 sm:$0xff]   ;;  %v304_v32 = vrot.slane %v297_v30, %v288_v23 }
  0x18   : > { %386 = vmatprep.subr.bf16.mxu0 %v814_v1  ;;  %v819_v4 = vld [vmem:[%s949_s27 + $0x10] ss:$8 sps:$4 sm:$0xff]   ;;  %v820_v5 = vld [vmem:[%s949_s27 + $0x24] ss:$8 sps:$4 sm:$0xff]   ;;  %v822_v6 = vld [vmem:[%s949_s27 + $0x20] ss:$8 sps:$4 sm:$0xff]  }
  0x19   : > { %387 = vmatpush1.bf16.msra.mxu0 %v816_v2  ;;  %v823_v7 = vld [vmem:[%s949_s27 + $0x34] ss:$8 sps:$4 sm:$0xff]   ;;  %v825_v11 = vld [vmem:[%s949_s27 + $0x30] ss:$8 sps:$4 sm:$0xff]   ;;  %v826_v12 = vld [vmem:[%s949_s27 + $0x44] ss:$8 sps:$4 sm:$0xff]  }
  0x1a   : > { %388 = vmatprep.subr.bf16.mxu0 %v817_v3  ;;  %v828_v17 = vld [vmem:[%s949_s27 + $0x40] ss:$8 sps:$4 sm:$0xff]   ;;  %v829_v20 = vld [vmem:[%s949_s27 + $0x54] ss:$8 sps:$4 sm:$0xff]   ;;  %v831_v24 = vld [vmem:[%s949_s27 + $0x50] ss:$8 sps:$4 sm:$0xff]  }
  0x1b   : > { %v832_v25 = vld [vmem:[%s949_s27 + $0x64] ss:$8 sps:$4 sm:$0xff]   ;;  %v834_v28 = vld [vmem:[%s949_s27 + $0x60] ss:$8 sps:$4 sm:$0xff]   ;;  %v835_v29 = vld [vmem:[%s949_s27 + $0x74] ss:$8 sps:$4 sm:$0xff]  }
  0x1c   : > { %v837_v31 = vld [vmem:[%s949_s27 + $0x70] ss:$8 sps:$4 sm:$0xff]  }
  0x1d   : > { %389 = vmatpush1.bf16.msra.mxu0 %v819_v4 }
  0x1e   : > { %390 = vmatprep.subr.bf16.mxu0 %v820_v5 }
  0x21   : > { %391 = vmatpush1.bf16.msra.mxu0 %v822_v6 }
  0x22   : > { %392 = vmatprep.subr.bf16.mxu0 %v823_v7 }
  0x25   : > { %393 = vmatpush1.bf16.msra.mxu0 %v825_v11 }
  0x26   : > { %394 = vmatprep.subr.bf16.mxu0 %v826_v12 }
  0x29   : > { %395 = vmatpush1.bf16.msra.mxu0 %v828_v17 }
  0x2a   : > { %396 = vmatprep.subr.bf16.mxu0 %v829_v20 }
  0x2d   : > { %397 = vmatpush1.bf16.msra.mxu0 %v831_v24 }
  0x2e   : > { %398 = vmatprep.subr.bf16.mxu0 %v832_v25 }
  0x31   : > { %399 = vmatpush1.bf16.msra.mxu0 %v834_v28 }
  0x32   : > { %400 = vmatprep.subr.bf16.mxu0 %v835_v29 }
  0x35   : > { %401 = vmatpush1.bf16.msra.mxu0 %v837_v31 }
  0x38   : > { %419 = vmatmul.mubr.bf16.vlgmr.msra.gmra.mrb[0].mxu0 %v304_v32 }
 0x10b   : > { %v420_v41 = vpop.f32.mrb[0].mxu0 }
 0x10c   : > { %v421_v42 = vadd.f32 %v420_v41, %v270_v38  ;;  %v422_v43 = vpop.f32.mrb[1].mxu0 }
 0x10d   : > { %v423_v44 = vadd.f32 %v422_v43, %v274_v39  ;;  %v424_v46 = vpop.f32.mrb[2].mxu0 }
 0x10e   : > { %v425_v47 = vpop.f32.mrb[3].mxu0 }
 0x10f   : > { %v429_v48 = vcombine.low %v421_v42, %v423_v44  ;;  %v430_v49 = vcombine.high %v421_v42, %v423_v44 }
 0x111   : > { %v437_v50 = vrot.slane %v429_v48, %v436_v45  ;;  %v444_v51 = vrot.slane %v430_v49, %v436_v45 }
 0x113   : > { %v445_v52 = vcombine.high %v437_v50, %v437_v50  ;;  %v446_v53 = vcombine.high %v444_v51, %v444_v51  ;;  %v453_v54 = vrot.slane %v437_v50, %v436_v45  ;;  %v469_v55 = vrot.slane %v444_v51, %v436_v45 }
 0x115   : > { %v454_v56 = vcombine.high %v453_v54, %v453_v54  ;;  %v461_v57 = vrot.slane %v445_v52, %v436_v45  ;;  %v470_v58 = vcombine.high %v469_v55, %v469_v55  ;;  %v477_v59 = vrot.slane %v446_v53, %v436_v45 }
 0x117   : > { %v462_v60 = vcombine.high %v461_v57, %v461_v57  ;;  %v478_v61 = vcombine.high %v477_v59, %v477_v59  ;;  %v758_v62 = vpack.c.bf16 %v454_v56, %v453_v54  ;;  %v760_v63 = vpack.c.bf16 %v470_v58, %v469_v55 }
 0x118   : > { %577 = sbr.rel (!%p933_p3) target bundleno = 295 (0x127), region = 36 }
 0x119   : > { %v510_v0 = vrot.slane %v758_v62, %v288_v23  ;;  %v759_v1 = vpack.c.bf16 %v462_v60, %v461_v57  ;;  %v540_v2 = vrot.slane %v760_v63, %v288_v23  ;;  %v761_v3 = vpack.c.bf16 %v478_v61, %v477_v59 }
 0x11b   : > { %v525_v4 = vrot.slane %v759_v1, %v288_v23  ;;  %v555_v5 = vrot.slane %v761_v3, %v288_v23  ;;  %762 = vst.sshfl [vmem:[%s221_s12] sm:$0x5 pattern:$0x73625140] %v510_v0 }
 0x11c   : > { %764 = vst.sshfl [vmem:[%s221_s12 + $0x4] sm:$0x5 pattern:$0x73625140] %v540_v2 }
 0x11d   : > { %763 = vst.sshfl [vmem:[%s221_s12 + $0x2] sm:$0x5 pattern:$0x73625140] %v525_v4 }
 0x11e   : > { %765 = vst.sshfl [vmem:[%s221_s12 + $0x6] sm:$0x5 pattern:$0x73625140] %v555_v5 }
 0x122   : > { %v600_v6 = vld [vmem:[%s221_s12] sm:$0x3] }
 0x123   : > { %v604_v8 = vld [vmem:[%s221_s12 + $0x4] sm:$0x3]  ;;  %601 = vst [vmem:[%s584_s24] sm:$0x3] %v600_v6 }
 0x124   : > { %v602_v7 = vld [vmem:[%s221_s12 + $0x2] sm:$0x3]  ;;  %605 = vst [vmem:[%s584_s24 + $0x8] sm:$0x3] %v604_v8 }
 0x125   : > { %v606_v9 = vld [vmem:[%s221_s12 + $0x6] sm:$0x3]  ;;  %603 = vst [vmem:[%s584_s24 + $0x4] sm:$0x3] %v602_v7 }
 0x126   : > { %607 = vst [vmem:[%s584_s24 + $0xc] sm:$0x3] %v606_v9 }
 0x127 PF: > { %s13_s16 = sadd.s32 1, %s876_s16   ;;  %s1009_s12 = smov %s864_s13 }
 0x128   : > { %p10_p9 = scmp.ge.s32.totalorder %s13_s16, 4   ;;  %s1010_s13 = smov %s942_s22 }
 0x129   : > { %s1011_s14 = smov %s872_s15  ;;  %s1012_s15 = smov %s1014_s18 }
 0x12a   :  { %12 = sbr.rel (!%p10_p9) target bundleno = 3 (0x3), region = 109 }

// kernel: _lambda_.39
= control target key start
LH: loop header
LB: loop body
LE: loop exit
PB: predicated region body
PF: predicated region fallthrough
CT: control target
= control target key end

     0   :  { %s1926_s15 = smov 0   ;;  %s1928_s16 = smov 0   ;;  %s2307_s0 = inlined_call_operand.vmem [shape: bf16[2,3,3,128], index: 0, kind: input, shape index: {}]   ;;  %s2308_s1 = inlined_call_operand.vmem [shape: bf16[1152,128], index: 1, kind: input, shape index: {}]   ;;  %s2309_s2 = inlined_call_operand.vmem [shape: f32[1,128], index: 2, kind: input, shape index: {}]   ;;  %s2310_s3 = inlined_call_operand.vmem [shape: f32[1,128], index: 3, kind: input, shape index: {}]   ;;  %s2311_s4 = inlined_call_operand.vmem [shape: bf16[2,1,1,128], index: 4, kind: output, shape index: {}]  }
   0x1   :  { %s1930_s17 = smov 0  }
   0x2 LB: > { %s26_s18 = sadd.s32 1, %s1892_s16  ;;  %p1401_p0 = scmp.ge.s32.totalorder %s1896_s17, 1  ;;  %s1896_s17 = sphi %s1930_s17, %s14_s17   ;;  %s1892_s16 = sphi %s1928_s16, %s2313_s16   ;;  %s1888_s15 = sphi %s1926_s15, %s2312_s15  }
   0x3   : > { %p28_p1 = scmp.ge.s32.totalorder %s26_s18, 2  ;;  %p201_p2 = scmp.lt.s32.totalorder %s1896_s17, 3 }
   0x5   : > { %s2315_s18 = smov (%p28_p1, %s26_s18), 0  ;;  %p202_p3 = pnand %p1401_p0, %p201_p2 }
   0x6   : > { %v1802_v0 = vld [vmem:[%s2308_s1 + $0x40] sm:$0xff] (!%p202_p3)   ;;  %v1898_v1 = vmov (!%p202_p3), 0.0   ;;  %v1804_v3 = vld [vmem:[%s2308_s1 + $0x48] sm:$0xff] (!%p202_p3)   ;;  %vm1899_vm0 = vmmov (!%p202_p3), 0   ;;  %v1806_v5 = vld [vmem:[%s2308_s1 + $0x50] sm:$0xff] (!%p202_p3)   ;;  %p238_p4 = scmp.lt.s32.totalorder (!%p202_p3), %s1888_s15, 1  ;;  %v297_v9 = vlaneseq (!%p202_p3) }
   0x7   : > { %205 = sbr.rel (%p202_p3) target bundleno = 392 (0x188), region = 36  ;;  %1565 = vmatprep.subr.bf16.mxu1 (!%p202_p3), %v1898_v1  ;;  %1645 = vmatprep.subr.bf16.mxu0 (!%p202_p3), %v1898_v1  ;;  %v1803_v2 = vld [vmem:[%s2308_s1 + $0x100] sm:$0xff] (!%p202_p3)   ;;  %v1805_v4 = vld [vmem:[%s2308_s1 + $0x108] sm:$0xff] (!%p202_p3)   ;;  %v1807_v6 = vld [vmem:[%s2308_s1 + $0x110] sm:$0xff] (!%p202_p3)   ;;  %v1900_v12 = vmov (!%p202_p3), 1983009808  }
   0x8   : > { %1566 = vmatpush3.bf16.msra.mxu1 (!%p202_p3), %v1802_v0  ;;  %1581 = vmatprep.mubr.msk.bf16.mxu1 (!%p202_p3), %vm1899_vm0, %v1898_v1  ;;  %v1808_v7 = vld [vmem:[%s2308_s1 + $0x58] sm:$0xff] (!%p202_p3)   ;;  %v1810_v10 = vld [vmem:[%s2308_s1 + $0x60] sm:$0xff] (!%p202_p3)   ;;  %v295_v13 = vunpack.c.l.s4 (!%p202_p3), %v1900_v12  ;;  %v298_v14 = vshrl.u32 (!%p202_p3), %v297_v9, 7  ;;  %v1812_v15 = vld [vmem:[%s2308_s1 + $0x68] sm:$0xff] (!%p202_p3)   ;;  %vm1283_vm1 = vcmask (!%p202_p3), 1040384  }
   0x9   : > { %1646 = vmatpush3.bf16.msra.mxu0 (!%p202_p3), %v1803_v2  ;;  %1567 = vmatprep.subr.bf16.mxu1 (!%p202_p3), %v1898_v1  ;;  %v1809_v8 = vld [vmem:[%s2308_s1 + $0x118] sm:$0xff] (!%p202_p3)   ;;  %v1811_v11 = vld [vmem:[%s2308_s1 + $0x120] sm:$0xff] (!%p202_p3)   ;;  %v1813_v16 = vld [vmem:[%s2308_s1 + $0x128] sm:$0xff] (!%p202_p3)   ;;  %vm1284_vm2 = vsmask.f32 (!%p202_p3), 256 }
   0xa   : > { %1647 = vmatprep.subr.bf16.mxu0 (!%p202_p3), %v1898_v1  ;;  %1661 = vmatprep.mubr.msk.bf16.mxu0 (!%p202_p3), %vm1899_vm0, %v1898_v1  ;;  %v296_v17 = vunpack.c.0.s8 (!%p202_p3), %v295_v13  ;;  %v1814_v18 = vld [vmem:[%s2308_s1 + $0x70] sm:$0xff] (!%p202_p3)   ;;  %v1816_v24 = vld [vmem:[%s2308_s1 + $0x78] sm:$0xff] (!%p202_p3)   ;;  %v1818_v28 = vld [vmem:[%s2308_s1] sm:$0xff] (!%p202_p3)  }
   0xb   : > { %v1815_v19 = vld [vmem:[%s2308_s1 + $0x130] sm:$0xff] (!%p202_p3)   ;;  %v1817_v26 = vld [vmem:[%s2308_s1 + $0x138] sm:$0xff] (!%p202_p3)   ;;  %v1819_v30 = vld [vmem:[%s2308_s1 + $0x140] sm:$0xff] (!%p202_p3)  }
   0xc   : > { %1568 = vmatpush3.bf16.msra.mxu1 (!%p202_p3), %v1804_v3  ;;  %v2014_v20 = vsub.s32 (!%p202_p3), %v296_v17, %v298_v14  ;;  %v1820_v31 = vld [vmem:[%s2308_s1 + $0x8] sm:$0xff] (!%p202_p3)   ;;  %v1822_v33 = vld [vmem:[%s2308_s1 + $0x10] sm:$0xff] (!%p202_p3)   ;;  %v1824_v35 = vld [vmem:[%s2308_s1 + $0x18] sm:$0xff] (!%p202_p3)  }
   0xd   : > { %1648 = vmatpush3.bf16.msra.mxu0 (!%p202_p3), %v1805_v4  ;;  %1569 = vmatprep.subr.bf16.mxu1 (!%p202_p3), %v1898_v1  ;;  %v1821_v32 = vld [vmem:[%s2308_s1 + $0x148] sm:$0xff] (!%p202_p3)   ;;  %v1823_v34 = vld [vmem:[%s2308_s1 + $0x150] sm:$0xff] (!%p202_p3)   ;;  %v1825_v36 = vld [vmem:[%s2308_s1 + $0x158] sm:$0xff] (!%p202_p3)  }
   0xe   : > { %1649 = vmatprep.subr.bf16.mxu0 %v1898_v1  ;;  %s2317_s15 = smov (!%p238_p4, %s1888_s15), 1  ;;  %v1826_v37 = vld [vmem:[%s2308_s1 + $0x20] sm:$0xff]   ;;  %v1828_v39 = vld [vmem:[%s2308_s1 + $0x28] sm:$0xff]   ;;  %v1830_v43 = vld [vmem:[%s2308_s1 + $0x30] sm:$0xff]  }
   0xf   : > { %s1774_s13 = smul.u32 6, %s2317_s15  ;;  %v1827_v38 = vld [vmem:[%s2308_s1 + $0x160] sm:$0xff]   ;;  %v1829_v40 = vld [vmem:[%s2308_s1 + $0x168] sm:$0xff]   ;;  %v1831_v44 = vld [vmem:[%s2308_s1 + $0x170] sm:$0xff]   ;;  %s258_s23 = scalar_lea.vmem %s2311_s4, %s2317_s15 }
  0x10   : > { %1570 = vmatpush3.bf16.msra.mxu1 %v1806_v5  ;;  %v1832_v46 = vld [vmem:[%s2308_s1 + $0x38] sm:$0xff]   ;;  %v1834_v48 = vld [vmem:[%s2308_s1 + $0x80] sm:$0xff]   ;;  %v1836_v51 = vld [vmem:[%s2308_s1 + $0x88] sm:$0xff]  }
  0x11   : > { %1650 = vmatpush3.bf16.msra.mxu0 %v1807_v6  ;;  %1571 = vmatprep.subr.bf16.mxu1 %v1898_v1  ;;  %s2005_s24 = scalar_lea.vmem %s2307_s0, %s1774_s13  ;;  %v1833_v47 = vld [vmem:[%s2308_s1 + $0x178] sm:$0xff]   ;;  %v1835_v50 = vld [vmem:[%s2308_s1 + $0x180] sm:$0xff]   ;;  %v1837_v52 = vld [vmem:[%s2308_s1 + $0x188] sm:$0xff]  }
  0x12   : > { %1651 = vmatprep.subr.bf16.mxu0 %v1898_v1  ;;  %v2017_v21 = vld [vmem:[%s2005_s24] sm:$0x1]  ;;  %v2021_v22 = vld [vmem:[%s2005_s24 + $0x2] sm:$0x1]  ;;  %v2088_v41 = vld [vmem:[%s2005_s24 + $0x4] sm:$0x1] }
  0x13   : > { %v300_v23 = vrot.slane %v2017_v21, %v2014_v20  ;;  %v727_v25 = vrot.slane %v2021_v22, %v2014_v20  ;;  %v1067_v42 = vrot.slane %v2088_v41, %v2014_v20  ;;  %v1446_v45 = vld.sshfl [vmem:[%s2005_s24 + $0x2] sm:$0x2 pattern:$0x76325410]  ;;  %v1838_v53 = vld [vmem:[%s2308_s1 + $0x90] sm:$0xff]   ;;  %v1840_v55 = vld [vmem:[%s2308_s1 + $0x98] sm:$0xff]  }
  0x14   : > { %1572 = vmatpush3.bf16.msra.mxu1 %v1808_v7  ;;  %v846_v49 = vrot.slane %v1446_v45, 1  ;;  %v1839_v54 = vld [vmem:[%s2308_s1 + $0x190] sm:$0xff]   ;;  %v1841_v56 = vld [vmem:[%s2308_s1 + $0x198] sm:$0xff]   ;;  %v1842_v57 = vld [vmem:[%s2308_s1 + $0xa0] sm:$0xff]  }
  0x15   : > { %1652 = vmatpush3.bf16.msra.mxu0 %v1809_v8  ;;  %1573 = vmatprep.subr.bf16.mxu1 %v1898_v1  ;;  %v302_v27 = vshrl.u32 %v300_v23, 16  ;;  %v729_v29 = vshrl.u32 %v727_v25, 16  ;;  %v1843_v58 = vld [vmem:[%s2308_s1 + $0x1a0] sm:$0xff]   ;;  %v1844_v59 = vld [vmem:[%s2308_s1 + $0xa8] sm:$0xff]   ;;  %v1846_v61 = vld [vmem:[%s2308_s1 + $0xb0] sm:$0xff]  }
  0x16   : > { %1653 = vmatprep.subr.bf16.mxu0 %v1898_v1  ;;  %v1845_v60 = vld [vmem:[%s2308_s1 + $0x1a8] sm:$0xff]   ;;  %v1847_v62 = vld [vmem:[%s2308_s1 + $0x1b0] sm:$0xff]   ;;  %v1848_v63 = vld [vmem:[%s2308_s1 + $0xb8] sm:$0xff]  }
  0x17   : > { %v1419_v0 = vld.sshfl [vmem:[%s2005_s24] sm:$0x2 pattern:$0x76325410]  ;;  %v1849_v2 = vld [vmem:[%s2308_s1 + $0x1b8] sm:$0xff]   ;;  %v1852_v6 = vld [vmem:[%s2308_s1 + $0xc8] sm:$0xff]  }
  0x18   : > { %1574 = vmatpush3.bf16.msra.mxu1 %v1810_v10  ;;  %v506_v3 = vrot.slane %v1419_v0, 1  ;;  %v1850_v4 = vld [vmem:[%s2308_s1 + $0xc0] sm:$0xff]   ;;  %v1853_v7 = vld [vmem:[%s2308_s1 + $0x1c8] sm:$0xff]   ;;  %v1854_v8 = vld [vmem:[%s2308_s1 + $0xd0] sm:$0xff]  }
  0x19   : > { %1654 = vmatpush3.bf16.msra.mxu0 %v1811_v11  ;;  %1575 = vmatprep.subr.bf16.mxu1 %v1898_v1  ;;  %v1851_v5 = vld [vmem:[%s2308_s1 + $0x1c0] sm:$0xff]   ;;  %v1855_v9 = vld [vmem:[%s2308_s1 + $0x1d0] sm:$0xff]   ;;  %v1856_v10 = vld [vmem:[%s2308_s1 + $0xd8] sm:$0xff]  }
  0x1a   : > { %1655 = vmatprep.subr.bf16.mxu0 %v1898_v1  ;;  %v1857_v11 = vld [vmem:[%s2308_s1 + $0x1d8] sm:$0xff]   ;;  %v1858_v12 = vld [vmem:[%s2308_s1 + $0xe0] sm:$0xff]   ;;  %v1860_v14 = vld [vmem:[%s2308_s1 + $0xe8] sm:$0xff]  }
  0x1b   : > { %v1859_v13 = vld [vmem:[%s2308_s1 + $0x1e0] sm:$0xff]   ;;  %v1863_v17 = vld [vmem:[%s2308_s1 + $0x1f0] sm:$0xff]   ;;  %vm1285_vm3 = vmand %vm1283_vm1, %vm1284_vm2 }
  0x1c   : > { %1576 = vmatpush3.bf16.msra.mxu1 %v1812_v15  ;;  %v1861_v15 = vld [vmem:[%s2308_s1 + $0x1e8] sm:$0xff]   ;;  %v1866_v23 = vld [vmem:[%s2308_s1 + $0x200] sm:$0xff]   ;;  %v1868_v20 = vld [vmem:[%s2308_s1 + $0x210] sm:$0xff]  }
  0x1d   : > { %1656 = vmatpush3.bf16.msra.mxu0 %v1813_v16  ;;  %1577 = vmatprep.subr.bf16.mxu1 %v1898_v1  ;;  %v1862_v16 = vld [vmem:[%s2308_s1 + $0xf0] sm:$0xff]   ;;  %v1870_v25 = vld [vmem:[%s2308_s1 + $0x220] sm:$0xff]  }
  0x1e   : > { %1657 = vmatprep.subr.bf16.mxu0 %v1898_v1 }
  0x20   : > { %1578 = vmatpush3.bf16.msra.mxu1 %v1814_v18  ;;  %v1864_v18 = vld [vmem:[%s2308_s1 + $0xf8] sm:$0xff]  }
  0x21   : > { %1658 = vmatpush3.bf16.msra.mxu0 %v1815_v19  ;;  %1579 = vmatprep.subr.bf16.mxu1 %v1898_v1  ;;  %v1865_v19 = vld [vmem:[%s2308_s1 + $0x1f8] sm:$0xff]  }
  0x22   : > { %1659 = vmatprep.subr.bf16.mxu0 %v1898_v1 }
  0x24   : > { %1580 = vmatpush3.bf16.msra.mxu1 %v1816_v24  ;;  %v1867_v24 = vld [vmem:[%s2308_s1 + $0x208] sm:$0xff]  }
  0x25   : > { %1660 = vmatpush3.bf16.msra.mxu0 %v1817_v26  ;;  %1585 = vmatprep.subr.bf16.mxu1 %v1898_v1  ;;  %v1871_v26 = vld [vmem:[%s2308_s1 + $0x228] sm:$0xff]  }
  0x26   : > { %1665 = vmatprep.subr.bf16.mxu0 %v1898_v1 }
  0x27   : > { %1582 = vmatmul.mubr.bf16.vlgmr.msra.gmra.mrb[0].mxu1 %v302_v27  ;;  %v1872_v27 = vld [vmem:[%s2308_s1 + $0x230] sm:$0xff]  }
  0x28   : > { %1586 = vmatpush3.bf16.msra.mxu1 %v1818_v28  ;;  %1662 = vmatmul.mubr.bf16.vlgmr.msra.gmra.mrb[0].mxu0 %v729_v29  ;;  %v1873_v28 = vld [vmem:[%s2308_s1 + $0x238] sm:$0xff]   ;;  %v1473_v29 = vld.sshfl [vmem:[%s2005_s24 + $0x4] sm:$0x2 pattern:$0x76325410] }
  0x29   : > { %1666 = vmatpush3.bf16.msra.mxu0 %v1819_v30  ;;  %1587 = vmatprep.subr.bf16.mxu1 %v1898_v1  ;;  %v1186_v30 = vrot.slane %v1473_v29, 1 }
  0x2a   : > { %1667 = vmatprep.subr.bf16.mxu0 %v1898_v1  ;;  %1601 = vmatprep.mubr.msk.bf16.mxu1 %vm1899_vm0, %v1898_v1 }
  0x2b   : > { %1681 = vmatprep.mubr.msk.bf16.mxu0 %vm1899_vm0, %v1898_v1 }
  0x2c   : > { %1588 = vmatpush3.bf16.msra.mxu1 %v1820_v31 }
  0x2d   : > { %1668 = vmatpush3.bf16.msra.mxu0 %v1821_v32  ;;  %1589 = vmatprep.subr.bf16.mxu1 %v1898_v1 }
  0x2e   : > { %1669 = vmatprep.subr.bf16.mxu0 %v1898_v1 }
  0x30   : > { %1590 = vmatpush3.bf16.msra.mxu1 %v1822_v33 }
  0x31   : > { %1670 = vmatpush3.bf16.msra.mxu0 %v1823_v34  ;;  %1591 = vmatprep.subr.bf16.mxu1 %v1898_v1 }
  0x32   : > { %1671 = vmatprep.subr.bf16.mxu0 %v1898_v1 }
  0x34   : > { %1592 = vmatpush3.bf16.msra.mxu1 %v1824_v35 }
  0x35   : > { %1672 = vmatpush3.bf16.msra.mxu0 %v1825_v36  ;;  %1593 = vmatprep.subr.bf16.mxu1 %v1898_v1  ;;  %v1277_v36 = vld [vmem:[%s2309_s2] sm:$0x1] }
  0x36   : > { %1673 = vmatprep.subr.bf16.mxu0 %v1898_v1 }
  0x38   : > { %1594 = vmatpush3.bf16.msra.mxu1 %v1826_v37 }
  0x39   : > { %1674 = vmatpush3.bf16.msra.mxu0 %v1827_v38  ;;  %1595 = vmatprep.subr.bf16.mxu1 %v1898_v1 }
  0x3a   : > { %1675 = vmatprep.subr.bf16.mxu0 %v1898_v1 }
  0x3c   : > { %1596 = vmatpush3.bf16.msra.mxu1 %v1828_v39  ;;  %v1279_v39 = vld [vmem:[%s2310_s3] sm:$0x1] }
  0x3d   : > { %1676 = vmatpush3.bf16.msra.mxu0 %v1829_v40  ;;  %1597 = vmatprep.subr.bf16.mxu1 %v1898_v1 }
  0x3e   : > { %1677 = vmatprep.subr.bf16.mxu0 %v1898_v1 }
  0x40   : > { %1598 = vmatpush3.bf16.msra.mxu1 %v1830_v43 }
  0x41   : > { %1678 = vmatpush3.bf16.msra.mxu0 %v1831_v44  ;;  %1599 = vmatprep.subr.bf16.mxu1 %v1898_v1  ;;  %v1286_v44 = vld [vmem:[%s258_s23] sm:$0x1] }
  0x42   : > { %1679 = vmatprep.subr.bf16.mxu0 %v1898_v1 }
  0x44   : > { %1600 = vmatpush3.bf16.msra.mxu1 %v1832_v46 }
  0x45   : > { %1680 = vmatpush3.bf16.msra.mxu0 %v1833_v47  ;;  %1605 = vmatprep.subr.bf16.mxu1 %v1898_v1 }
  0x46   : > { %1685 = vmatprep.subr.bf16.mxu0 %v1898_v1 }
  0x47   : > { %1602 = vmatmul.mubr.bf16.vlgmr.msra.gmra.mrb[0].mxu1 %v2017_v21  ;;  %v1069_v21 = vshrl.u32 %v1067_v42, 16 }
  0x48   : > { %1606 = vmatpush3.bf16.msra.mxu1 %v1834_v48  ;;  %1682 = vmatmul.mubr.bf16.vlgmr.msra.gmra.mrb[0].mxu0 %v846_v49 }
  0x49   : > { %1686 = vmatpush3.bf16.msra.mxu0 %v1835_v50  ;;  %1607 = vmatprep.subr.bf16.mxu1 %v1898_v1 }
  0x4a   : > { %1687 = vmatprep.subr.bf16.mxu0 %v1898_v1  ;;  %1621 = vmatprep.mubr.msk.bf16.mxu1 %vm1899_vm0, %v1898_v1 }
  0x4b   : > { %1701 = vmatprep.mubr.msk.bf16.mxu0 %vm1899_vm0, %v1898_v1 }
  0x4c   : > { %1608 = vmatpush3.bf16.msra.mxu1 %v1836_v51 }
  0x4d   : > { %1688 = vmatpush3.bf16.msra.mxu0 %v1837_v52  ;;  %1609 = vmatprep.subr.bf16.mxu1 %v1898_v1 }
  0x4e   : > { %1689 = vmatprep.subr.bf16.mxu0 %v1898_v1 }
  0x50   : > { %1610 = vmatpush3.bf16.msra.mxu1 %v1838_v53 }
  0x51   : > { %1690 = vmatpush3.bf16.msra.mxu0 %v1839_v54  ;;  %1611 = vmatprep.subr.bf16.mxu1 %v1898_v1 }
  0x52   : > { %1691 = vmatprep.subr.bf16.mxu0 %v1898_v1 }
  0x54   : > { %1612 = vmatpush3.bf16.msra.mxu1 %v1840_v55 }
  0x55   : > { %1692 = vmatpush3.bf16.msra.mxu0 %v1841_v56  ;;  %1613 = vmatprep.subr.bf16.mxu1 %v1898_v1 }
  0x56   : > { %1693 = vmatprep.subr.bf16.mxu0 %v1898_v1 }
  0x58   : > { %1614 = vmatpush3.bf16.msra.mxu1 %v1842_v57 }
  0x59   : > { %1694 = vmatpush3.bf16.msra.mxu0 %v1843_v58  ;;  %1615 = vmatprep.subr.bf16.mxu1 %v1898_v1 }
  0x5a   : > { %1695 = vmatprep.subr.bf16.mxu0 %v1898_v1 }
  0x5c   : > { %1616 = vmatpush3.bf16.msra.mxu1 %v1844_v59 }
  0x5d   : > { %1696 = vmatpush3.bf16.msra.mxu0 %v1845_v60  ;;  %1617 = vmatprep.subr.bf16.mxu1 %v1898_v1 }
  0x5e   : > { %1697 = vmatprep.subr.bf16.mxu0 %v1898_v1 }
  0x60   : > { %1618 = vmatpush3.bf16.msra.mxu1 %v1846_v61 }
  0x61   : > { %1698 = vmatpush3.bf16.msra.mxu0 %v1847_v62  ;;  %1619 = vmatprep.subr.bf16.mxu1 %v1898_v1 }
  0x62   : > { %1699 = vmatprep.subr.bf16.mxu0 %v1898_v1 }
  0x64   : > { %1620 = vmatpush3.bf16.msra.mxu1 %v1848_v63 }
  0x65   : > { %1700 = vmatpush3.bf16.msra.mxu0 %v1849_v2  ;;  %1625 = vmatprep.subr.bf16.mxu1 %v1898_v1 }
  0x66   : > { %1705 = vmatprep.subr.bf16.mxu0 %v1898_v1 }
  0x67   : > { %1622 = vmatmul.mubr.bf16.vlgmr.msra.gmra.mrb[0].mxu1 %v506_v3 }
  0x68   : > { %1626 = vmatpush3.bf16.msra.mxu1 %v1850_v4  ;;  %1702 = vmatmul.mubr.bf16.vlgmr.msra.gmra.mrb[0].mxu0 %v2088_v41 }
  0x69   : > { %1706 = vmatpush3.bf16.msra.mxu0 %v1851_v5  ;;  %1627 = vmatprep.subr.bf16.mxu1 %v1898_v1 }
  0x6a   : > { %1707 = vmatprep.subr.bf16.mxu0 %v1898_v1  ;;  %1641 = vmatprep.mubr.msk.bf16.mxu1 %vm1899_vm0, %v1898_v1 }
  0x6b   : > { %1721 = vmatprep.mubr.msk.bf16.mxu0 %vm1899_vm0, %v1898_v1 }
  0x6c   : > { %1628 = vmatpush3.bf16.msra.mxu1 %v1852_v6 }
  0x6d   : > { %1708 = vmatpush3.bf16.msra.mxu0 %v1853_v7  ;;  %1629 = vmatprep.subr.bf16.mxu1 %v1898_v1 }
  0x6e   : > { %1709 = vmatprep.subr.bf16.mxu0 %v1898_v1 }
  0x70   : > { %1630 = vmatpush3.bf16.msra.mxu1 %v1854_v8 }
  0x71   : > { %1710 = vmatpush3.bf16.msra.mxu0 %v1855_v9  ;;  %1631 = vmatprep.subr.bf16.mxu1 %v1898_v1 }
  0x72   : > { %1711 = vmatprep.subr.bf16.mxu0 %v1898_v1 }
  0x74   : > { %1632 = vmatpush3.bf16.msra.mxu1 %v1856_v10 }
  0x75   : > { %1712 = vmatpush3.bf16.msra.mxu0 %v1857_v11  ;;  %1633 = vmatprep.subr.bf16.mxu1 %v1898_v1 }
  0x76   : > { %1713 = vmatprep.subr.bf16.mxu0 %v1898_v1 }
  0x78   : > { %1634 = vmatpush3.bf16.msra.mxu1 %v1858_v12 }
  0x79   : > { %1714 = vmatpush3.bf16.msra.mxu0 %v1859_v13  ;;  %1635 = vmatprep.subr.bf16.mxu1 %v1898_v1 }
  0x7a   : > { %1715 = vmatprep.subr.bf16.mxu0 %v1898_v1 }
  0x7c   : > { %1636 = vmatpush3.bf16.msra.mxu1 %v1860_v14 }
  0x7d   : > { %1716 = vmatpush3.bf16.msra.mxu0 %v1861_v15  ;;  %1637 = vmatprep.subr.bf16.mxu1 %v1898_v1 }
  0x7e   : > { %1717 = vmatprep.subr.bf16.mxu0 %v1898_v1 }
  0x80   : > { %1638 = vmatpush3.bf16.msra.mxu1 %v1862_v16 }
  0x81   : > { %1718 = vmatpush3.bf16.msra.mxu0 %v1863_v17  ;;  %1639 = vmatprep.subr.bf16.mxu1 %v1898_v1 }
  0x82   : > { %1719 = vmatprep.subr.bf16.mxu0 %v1898_v1 }
  0x84   : > { %1640 = vmatpush3.bf16.msra.mxu1 %v1864_v18 }
  0x85   : > { %1720 = vmatpush3.bf16.msra.mxu0 %v1865_v19 }
  0x86   : > { %1725 = vmatprep.subr.bf16.mxu0 %v1898_v1 }
  0x87   : > { %1642 = vmatmul.mubr.bf16.vlgmr.msra.gmra.mrb[0].mxu1 %v2021_v22  ;;  %v1869_v22 = vld [vmem:[%s2308_s1 + $0x218] sm:$0xff]  }
  0x88   : > { %1722 = vmatmul.mubr.bf16.vlgmr.msra.gmra.mrb[0].mxu0 %v1069_v21 }
  0x89   : > { %1726 = vmatpush3.bf16.msra.mxu0 %v1866_v23  ;;  %1741 = vmatprep.mubr.msk.bf16.mxu0 %vm1899_vm0, %v1898_v1 }
  0x8a   : > { %1727 = vmatprep.subr.bf16.mxu0 %v1898_v1 }
  0x8d   : > { %1728 = vmatpush3.bf16.msra.mxu0 %v1867_v24 }
  0x8e   : > { %1729 = vmatprep.subr.bf16.mxu0 %v1898_v1 }
  0x91   : > { %1730 = vmatpush3.bf16.msra.mxu0 %v1868_v20 }
  0x92   : > { %1731 = vmatprep.subr.bf16.mxu0 %v1898_v1 }
  0x95   : > { %1732 = vmatpush3.bf16.msra.mxu0 %v1869_v22 }
  0x96   : > { %1733 = vmatprep.subr.bf16.mxu0 %v1898_v1 }
  0x99   : > { %1734 = vmatpush3.bf16.msra.mxu0 %v1870_v25 }
  0x9a   : > { %1735 = vmatprep.subr.bf16.mxu0 %v1898_v1 }
  0x9d   : > { %1736 = vmatpush3.bf16.msra.mxu0 %v1871_v26 }
  0x9e   : > { %1737 = vmatprep.subr.bf16.mxu0 %v1898_v1 }
  0xa1   : > { %1738 = vmatpush3.bf16.msra.mxu0 %v1872_v27 }
  0xa2   : > { %1739 = vmatprep.subr.bf16.mxu0 %v1898_v1 }
  0xa5   : > { %1740 = vmatpush3.bf16.msra.mxu0 %v1873_v28 }
  0xa8   : > { %1742 = vmatmul.mubr.bf16.vlgmr.msra.gmra.mrb[0].mxu0 %v1186_v30 }
 0x15a   : > { %v697_v31 = vpop.f32.mrb[0].mxu1 }
 0x15b   : > { %v1643_v32 = vpop.f32.mrb[1].mxu1 }
 0x15c   : > { %v700_v33 = vpop.f32.mrb[2].mxu1 }
 0x15d   : > { %v1644_v34 = vpop.f32.mrb[3].mxu1 }
 0x17b   : > { %v1270_v35 = vpop.f32.mrb[0].mxu0 }
 0x17c   : > { %v1745_v37 = vadd.f32 %v1270_v35, %v697_v31  ;;  %v1743_v38 = vpop.f32.mrb[1].mxu0 }
 0x17d   : > { %v1273_v1 = vpop.f32.mrb[2].mxu0 }
 0x17e   : > { %v1278_v40 = vmul.f32 %v1745_v37, %v1277_v36  ;;  %v1744_v41 = vpop.f32.mrb[3].mxu0 }
 0x180   : > { %v1280_v42 = vadd.f32 %v1279_v39, %v1278_v40 }
 0x182   : > { %v1281_v43 = vmax.f32 %v1280_v42, 0.0 }
 0x184   : > { %v1282_v45 = vpack.c.bf16 %v1281_v43, %v1281_v43 }
 0x186   : > { %v1287_v46 = vsel %vm1285_vm3, %v1282_v45, %v1286_v44 }
 0x187   : > { %1288 = vst [vmem:[%s258_s23] sm:$0x1] %v1287_v46 }
 0x188 PF: > { %s14_s17 = sadd.s32 1, %s1896_s17   ;;  %s2312_s15 = smov %s1892_s16 }
 0x189   : > { %p11_p5 = scmp.ge.s32.totalorder %s14_s17, 4   ;;  %s2313_s16 = smov %s2315_s18 }
 0x18b   :  { %13 = sbr.rel (!%p11_p5) target bundleno = 2 (0x2), region = 77 }

// kernel: _lambda_.47
= control target key start
LH: loop header
LB: loop body
LE: loop exit
PB: predicated region body
PF: predicated region fallthrough
CT: control target
= control target key end

     0   :  { %s996_s12 = smov 0   ;;  %s998_s13 = smov 0   ;;  %s1129_s0 = inlined_call_operand.vmem [shape: bf16[8,4,128], index: 0, kind: input, shape index: {}]   ;;  %s1130_s1 = inlined_call_operand.vmem [shape: bf16[2,128,256], index: 1, kind: input, shape index: {}]   ;;  %s1131_s2 = inlined_call_operand.vmem [shape: f32[1,256], index: 2, kind: input, shape index: {}]   ;;  %s1132_s3 = inlined_call_operand.vmem [shape: bf16[8,2,4,256], index: 3, kind: output, shape index: {}]  }
   0x1   :  { %s1000_s14 = smov 0   ;;  %s1002_s15 = smov 0  }
   0x2   :  { %s1004_s16 = smov 0  }
   0x3 LB: > { %s795_s17 = sadd.s32 4294967295, %s972_s16   ;;  %s28_s18 = sadd.s32 1, %s968_s15  ;;  %s972_s16 = sphi %s1004_s16, %s13_s16   ;;  %s968_s15 = sphi %s1002_s15, %s1137_s15   ;;  %s964_s14 = sphi %s1000_s14, %s1136_s14   ;;  %s960_s13 = sphi %s998_s13, %s1135_s13   ;;  %s956_s12 = sphi %s996_s12, %s1134_s12  }
   0x4   : > { %p30_p0 = scmp.ge.s32.totalorder %s28_s18, 2  ;;  %s123_s19 = sadd.s32 1, %s960_s13 }
   0x5   : > { %p133_p1 = scmp.ne.s32.totalorder %s960_s13, %s956_s12  ;;  %p134_p2 = scmp.eq.s32.totalorder %s795_s17, 1 }
   0x6   : > { %s1139_s18 = smov (%p30_p0, %s28_s18), 0  ;;  %p801_p4 = scmp.ge.s32.totalorder %s972_s16, 1 }
   0x7   : > { %p1028_p3 = por %p134_p2, %p133_p1  ;;  %s117_s21 = ssub.s32 %s968_s15, %s1139_s18 }
   0x8   : > { %p188_p5 = scmp.lt.s32.totalorder %s972_s16, 3  ;;  %p121_p6 = scmp.eq.s32.totalorder %s117_s21, 0 }
   0xa   : > { %p189_p7 = pnand %p801_p4, %p188_p5 }
   0xb   : > { %s1037_s22 = scalar_select %p121_p6, %s960_s13, %s123_s19  }
   0xc   : > { %192 = sbr.rel (%p189_p7) target bundleno = 291 (0x123), region = 32  ;;  %p231_p8 = scmp.lt.s32.totalorder (!%p189_p7), %s964_s14, 1  ;;  %v974_v0 = vmov (!%p189_p7), 0   ;;  %v274_v10 = vlaneseq (!%p189_p7)  ;;  %v975_v11 = vmov (!%p189_p7), 1983009808  }
   0xd   : > { %440 = vmatprep.mubr.bf16.mxu0 (!%p189_p7), %v974_v0  ;;  %450 = vmatprep.mubr.bf16.mxu1 (!%p189_p7), %v974_v0  ;;  %v295_v12 = vunpack.c.l.s4 (!%p189_p7), %v975_v11  ;;  %v248_v15 = vld [vmem:[%s1129_s0] sm:$0x3] (!%p189_p7)  ;;  %v249_v16 = vld [vmem:[%s1129_s0 + $0x2] sm:$0x3] (!%p189_p7)  ;;  %v250_v17 = vld [vmem:[%s1129_s0 + $0x4] sm:$0x3] (!%p189_p7) }
   0xe   : > { %v251_v18 = vld [vmem:[%s1129_s0 + $0x6] sm:$0x3] (!%p189_p7)  ;;  %v275_v19 = vshrl.u32 (!%p189_p7), %v274_v10, 7  ;;  %v252_v21 = vld [vmem:[%s1129_s0 + $0x8] sm:$0x3] (!%p189_p7)  ;;  %v292_v27 = vcombine.low (!%p189_p7), %v248_v15, %v249_v16  ;;  %s221_s28 = sand.u32 (!%p189_p7), 1, %s956_s12  }
   0xf   : > { %v296_v20 = vunpack.c.0.s8 (!%p189_p7), %v295_v12  ;;  %v253_v22 = vld [vmem:[%s1129_s0 + $0xa] sm:$0x3] (!%p189_p7)  ;;  %v254_v24 = vld [vmem:[%s1129_s0 + $0xc] sm:$0x3] (!%p189_p7)  ;;  %v255_v25 = vld [vmem:[%s1129_s0 + $0xe] sm:$0x3] (!%p189_p7)  ;;  %v293_v28 = vcombine.low (!%p189_p7), %v250_v17, %v251_v18 }
  0x10   : > { %v309_v30 = vcombine.low (!%p189_p7), %v252_v21, %v253_v22  ;;  %v310_v31 = vcombine.low (!%p189_p7), %v254_v24, %v255_v25  ;;  %v276_v41 = vsub.s32 (!%p189_p7), 0, %v275_v19  ;;  %v272_v42 = vld [vmem:[%s1131_s2] sm:$0x3] (!%p189_p7)  ;;  %v280_v43 = vsub.s32 (!%p189_p7), 1, %v275_v19 }
  0x11   : > { %v299_v29 = vsub.s32 (!%p189_p7), %v296_v20, %v275_v19 }
  0x12   : > { %v277_v44 = vrot.slane (!%p189_p7), %v272_v42, %v276_v41  ;;  %v281_v45 = vrot.slane (!%p189_p7), %v272_v42, %v280_v43 }
  0x13   : > { %s232_s23 = scalar_select %p231_p8, %s964_s14, 1  ;;  %v300_v34 = vrot.slane %v292_v27, %v299_v29  ;;  %v307_v35 = vrot.slane %v293_v28, %v299_v29  ;;  %v317_v36 = vrot.slane %v309_v30, %v299_v29  ;;  %v324_v37 = vrot.slane %v310_v31, %v299_v29 }
  0x14   : > { %s851_s29 = sshll.u32 (%p1028_p3), %s964_s14, 2 }
  0x15   : > { %s850_s24 = sshll.u32 %s232_s23, 7  ;;  %v308_v39 = vcombine.low %v300_v34, %v307_v35  ;;  %v325_v40 = vcombine.low %v317_v36, %v324_v37  ;;  %s627_s5 = scalar_lea.vmem (%p1028_p3), %s1132_s3, %s851_s29 }
  0x16   : > { %s1044_s27 = scalar_lea.vmem %s1130_s1, %s850_s24 }
  0x17   : > { %v910_v1 = vld [vmem:[%s1044_s27 + $0x4] ss:$8 sps:$4 sm:$0xff]   ;;  %v912_v2 = vld [vmem:[%s1044_s27] ss:$8 sps:$4 sm:$0xff]   ;;  %v913_v3 = vld [vmem:[%s1044_s27 + $0x14] ss:$8 sps:$4 sm:$0xff]  }
  0x18   : > { %408 = vmatprep.subr.bf16.mxu0 %v910_v1  ;;  %852 = vmatprep.subr.bf16.mxu1 %v910_v1  ;;  %v915_v4 = vld [vmem:[%s1044_s27 + $0x10] ss:$8 sps:$4 sm:$0xff]   ;;  %v916_v5 = vld [vmem:[%s1044_s27 + $0x24] ss:$8 sps:$4 sm:$0xff]   ;;  %v918_v6 = vld [vmem:[%s1044_s27 + $0x20] ss:$8 sps:$4 sm:$0xff]  }
  0x19   : > { %409 = vmatpush1.bf16.msra.mxu0 %v912_v2  ;;  %860 = vmatpush1.bf16.msra.mxu1 %v912_v2  ;;  %v919_v7 = vld [vmem:[%s1044_s27 + $0x34] ss:$8 sps:$4 sm:$0xff]   ;;  %v921_v8 = vld [vmem:[%s1044_s27 + $0x30] ss:$8 sps:$4 sm:$0xff]   ;;  %v922_v9 = vld [vmem:[%s1044_s27 + $0x44] ss:$8 sps:$4 sm:$0xff]  }
  0x1a   : > { %410 = vmatprep.subr.bf16.mxu0 %v913_v3  ;;  %853 = vmatprep.subr.bf16.mxu1 %v913_v3  ;;  %v924_v13 = vld [vmem:[%s1044_s27 + $0x40] ss:$8 sps:$4 sm:$0xff]   ;;  %v925_v14 = vld [vmem:[%s1044_s27 + $0x54] ss:$8 sps:$4 sm:$0xff]   ;;  %v927_v23 = vld [vmem:[%s1044_s27 + $0x50] ss:$8 sps:$4 sm:$0xff]  }
  0x1b   : > { %v928_v26 = vld [vmem:[%s1044_s27 + $0x64] ss:$8 sps:$4 sm:$0xff]   ;;  %v930_v32 = vld [vmem:[%s1044_s27 + $0x60] ss:$8 sps:$4 sm:$0xff]   ;;  %v931_v33 = vld [vmem:[%s1044_s27 + $0x74] ss:$8 sps:$4 sm:$0xff]  }
  0x1c   : > { %v933_v38 = vld [vmem:[%s1044_s27 + $0x70] ss:$8 sps:$4 sm:$0xff]   ;;  %s802_s27 = sshll.u32 %s221_s28, 5 }
  0x1d   : > { %411 = vmatpush1.bf16.msra.mxu0 %v915_v4  ;;  %861 = vmatpush1.bf16.msra.mxu1 %v915_v4  ;;  %s1090_s12 = scalar_lea.vmem [#allocation2], %s802_s27 }
  0x1e   : > { %412 = vmatprep.subr.bf16.mxu0 %v916_v5  ;;  %854 = vmatprep.subr.bf16.mxu1 %v916_v5 }
  0x21   : > { %413 = vmatpush1.bf16.msra.mxu0 %v918_v6  ;;  %862 = vmatpush1.bf16.msra.mxu1 %v918_v6 }
  0x22   : > { %414 = vmatprep.subr.bf16.mxu0 %v919_v7  ;;  %855 = vmatprep.subr.bf16.mxu1 %v919_v7 }
  0x25   : > { %415 = vmatpush1.bf16.msra.mxu0 %v921_v8  ;;  %863 = vmatpush1.bf16.msra.mxu1 %v921_v8 }
  0x26   : > { %416 = vmatprep.subr.bf16.mxu0 %v922_v9  ;;  %856 = vmatprep.subr.bf16.mxu1 %v922_v9 }
  0x29   : > { %417 = vmatpush1.bf16.msra.mxu0 %v924_v13  ;;  %864 = vmatpush1.bf16.msra.mxu1 %v924_v13 }
  0x2a   : > { %418 = vmatprep.subr.bf16.mxu0 %v925_v14  ;;  %857 = vmatprep.subr.bf16.mxu1 %v925_v14 }
  0x2d   : > { %419 = vmatpush1.bf16.msra.mxu0 %v927_v23  ;;  %865 = vmatpush1.bf16.msra.mxu1 %v927_v23 }
  0x2e   : > { %420 = vmatprep.subr.bf16.mxu0 %v928_v26  ;;  %858 = vmatprep.subr.bf16.mxu1 %v928_v26 }
  0x31   : > { %421 = vmatpush1.bf16.msra.mxu0 %v930_v32  ;;  %866 = vmatpush1.bf16.msra.mxu1 %v930_v32 }
  0x32   : > { %422 = vmatprep.subr.bf16.mxu0 %v931_v33  ;;  %859 = vmatprep.subr.bf16.mxu1 %v931_v33 }
  0x35   : > { %423 = vmatpush1.bf16.msra.mxu0 %v933_v38  ;;  %867 = vmatpush1.bf16.msra.mxu1 %v933_v38 }
  0x38   : > { %441 = vmatmul.mubr.bf16.vlgmr.msra.gmra.mrb[0].mxu0 %v308_v39  ;;  %451 = vmatmul.mubr.bf16.vlgmr.msra.gmra.mrb[0].mxu1 %v325_v40 }
 0x10b   : > { %v442_v46 = vpop.f32.mrb[0].mxu0  ;;  %v452_v47 = vpop.f32.mrb[0].mxu1 }
 0x10c   : > { %v443_v48 = vadd.f32 %v442_v46, %v277_v44  ;;  %v453_v49 = vadd.f32 %v452_v47, %v277_v44  ;;  %v444_v50 = vpop.f32.mrb[1].mxu0  ;;  %v454_v51 = vpop.f32.mrb[1].mxu1 }
 0x10d   : > { %v445_v52 = vadd.f32 %v444_v50, %v281_v45  ;;  %v455_v53 = vadd.f32 %v454_v51, %v281_v45  ;;  %v446_v54 = vpop.f32.mrb[2].mxu0  ;;  %v456_v55 = vpop.f32.mrb[2].mxu1 }
 0x10e   : > { %v447_v56 = vadd.f32 %v446_v54, %v277_v44  ;;  %v457_v57 = vadd.f32 %v456_v55, %v277_v44  ;;  %v448_v58 = vpop.f32.mrb[3].mxu0  ;;  %v458_v59 = vpop.f32.mrb[3].mxu1 }
 0x10f   : > { %v469_v60 = vcombine.low %v443_v48, %v445_v52  ;;  %v470_v61 = vcombine.high %v443_v48, %v445_v52  ;;  %v821_v62 = vcombine.low %v445_v52, %v445_v52  ;;  %v822_v63 = vcombine.high %v445_v52, %v445_v52 }
 0x110   : > { %v473_v0 = vcombine.low %v453_v49, %v455_v53  ;;  %v474_v1 = vcombine.high %v453_v49, %v455_v53  ;;  %v825_v2 = vcombine.low %v455_v53, %v455_v53  ;;  %v826_v3 = vcombine.high %v455_v53, %v455_v53 }
 0x111   : > { %v829_v4 = vpack.c.bf16 %v821_v62, %v469_v60  ;;  %v830_v5 = vpack.c.bf16 %v822_v63, %v470_v61  ;;  %v449_v6 = vadd.f32 %v448_v58, %v281_v45  ;;  %v459_v7 = vadd.f32 %v458_v59, %v281_v45 }
 0x112   : > { %v833_v8 = vpack.c.bf16 %v825_v2, %v473_v0  ;;  %v834_v9 = vpack.c.bf16 %v826_v3, %v474_v1 }
 0x113   : > { %837 = vst.sshfl [vmem:[%s1090_s12] sm:$0x33 pattern:$0x76325410] %v829_v4  ;;  %v471_v10 = vcombine.low %v447_v56, %v449_v6  ;;  %v472_v11 = vcombine.high %v447_v56, %v449_v6  ;;  %v823_v12 = vcombine.low %v449_v6, %v449_v6  ;;  %v824_v13 = vcombine.high %v449_v6, %v449_v6 }
 0x114   : > { %838 = vst.sshfl [vmem:[%s1090_s12 + $0x4] sm:$0x33 pattern:$0x76325410] %v830_v5  ;;  %v475_v14 = vcombine.low %v457_v57, %v459_v7  ;;  %v476_v15 = vcombine.high %v457_v57, %v459_v7  ;;  %v827_v16 = vcombine.low %v459_v7, %v459_v7  ;;  %v828_v17 = vcombine.high %v459_v7, %v459_v7  ;;  %619 = sbr.rel (!%p1028_p3) target bundleno = 291 (0x123), region = 36 }
 0x115   : > { %841 = vst.sshfl [vmem:[%s1090_s12 + $0x10] sm:$0x33 pattern:$0x76325410] %v833_v8  ;;  %v831_v18 = vpack.c.bf16 %v823_v12, %v471_v10  ;;  %v832_v19 = vpack.c.bf16 %v824_v13, %v472_v11 }
 0x116   : > { %842 = vst.sshfl [vmem:[%s1090_s12 + $0x14] sm:$0x33 pattern:$0x76325410] %v834_v9  ;;  %v835_v20 = vpack.c.bf16 %v827_v16, %v475_v14  ;;  %v836_v21 = vpack.c.bf16 %v828_v17, %v476_v15 }
 0x117   : > { %839 = vst.sshfl [vmem:[%s1090_s12 + $0x8] sm:$0x33 pattern:$0x76325410] %v831_v18 }
 0x118   : > { %840 = vst.sshfl [vmem:[%s1090_s12 + $0xc] sm:$0x33 pattern:$0x76325410] %v832_v19 }
 0x119   : > { %843 = vst.sshfl [vmem:[%s1090_s12 + $0x18] sm:$0x33 pattern:$0x76325410] %v835_v20 }
 0x11a   : > { %844 = vst.sshfl [vmem:[%s1090_s12 + $0x1c] sm:$0x33 pattern:$0x76325410] %v836_v21  ;;  %v643_v22 = vld [vmem:[%s1090_s12] sm:$0xf] (%p1028_p3) }
 0x11b   : > { %v645_v23 = vld [vmem:[%s1090_s12 + $0x4] sm:$0xf]  ;;  %644 = vst [vmem:[%s627_s5] sm:$0xf] %v643_v22 }
 0x11c   : > { %v651_v26 = vld [vmem:[%s1090_s12 + $0x10] sm:$0xf]  ;;  %646 = vst [vmem:[%s627_s5 + $0x8] sm:$0xf] %v645_v23 }
 0x11d   : > { %652 = vst [vmem:[%s627_s5 + $0x20] sm:$0xf] %v651_v26  ;;  %v653_v27 = vld [vmem:[%s1090_s12 + $0x14] sm:$0xf] }
 0x11e   : > { %v647_v24 = vld [vmem:[%s1090_s12 + $0x8] sm:$0xf]  ;;  %654 = vst [vmem:[%s627_s5 + $0x28] sm:$0xf] %v653_v27 }
 0x11f   : > { %v649_v25 = vld [vmem:[%s1090_s12 + $0xc] sm:$0xf]  ;;  %648 = vst [vmem:[%s627_s5 + $0x10] sm:$0xf] %v647_v24 }
 0x120   : > { %650 = vst [vmem:[%s627_s5 + $0x18] sm:$0xf] %v649_v25  ;;  %v655_v28 = vld [vmem:[%s1090_s12 + $0x18] sm:$0xf] }
 0x121   : > { %v657_v29 = vld [vmem:[%s1090_s12 + $0x1c] sm:$0xf]  ;;  %656 = vst [vmem:[%s627_s5 + $0x30] sm:$0xf] %v655_v28 }
 0x122   : > { %658 = vst [vmem:[%s627_s5 + $0x38] sm:$0xf] %v657_v29 }
 0x123 PF: > { %s13_s16 = sadd.s32 1, %s972_s16   ;;  %s1134_s12 = smov %s960_s13 }
 0x124   : > { %p10_p9 = scmp.ge.s32.totalorder %s13_s16, 4   ;;  %s1135_s13 = smov %s1037_s22 }
 0x125   : > { %s1136_s14 = smov %s968_s15  ;;  %s1137_s15 = smov %s1139_s18 }
 0x126   :  { %12 = sbr.rel (!%p10_p9) target bundleno = 3 (0x3), region = 109 }

// kernel: _lambda_.50
= control target key start
LH: loop header
LB: loop body
LE: loop exit
PB: predicated region body
PF: predicated region fallthrough
CT: control target
= control target key end

     0   :  { %s1107_s12 = smov 0   ;;  %s1109_s13 = smov 0   ;;  %s1300_s0 = inlined_call_operand.vmem [shape: bf16[16,8,128], index: 0, kind: input, shape index: {}]   ;;  %s1301_s1 = inlined_call_operand.vmem [shape: bf16[2,128,256], index: 1, kind: input, shape index: {}]   ;;  %s1302_s2 = inlined_call_operand.vmem [shape: f32[1,256], index: 2, kind: input, shape index: {}]   ;;  %s1303_s3 = inlined_call_operand.vmem [shape: bf16[16,2,8,256], index: 3, kind: output, shape index: {}]  }
   0x1   :  { %s1111_s14 = smov 0   ;;  %s1113_s15 = smov 0  }
   0x2   :  { %s1115_s16 = smov 0  }
   0x3 LB: > { %s884_s17 = sadd.s32 4294967295, %s1084_s16   ;;  %s28_s18 = sadd.s32 1, %s1080_s15  ;;  %s1084_s16 = sphi %s1115_s16, %s13_s16   ;;  %s1080_s15 = sphi %s1113_s15, %s1308_s15   ;;  %s1076_s14 = sphi %s1111_s14, %s1307_s14   ;;  %s1072_s13 = sphi %s1109_s13, %s1306_s13   ;;  %s1068_s12 = sphi %s1107_s12, %s1305_s12  }
   0x4   : > { %p30_p0 = scmp.ge.s32.totalorder %s28_s18, 2  ;;  %s123_s19 = sadd.s32 1, %s1072_s13 }
   0x5   : > { %p133_p1 = scmp.ne.s32.totalorder %s1072_s13, %s1068_s12  ;;  %p134_p2 = scmp.eq.s32.totalorder %s884_s17, 1 }
   0x6   : > { %s1310_s18 = smov (%p30_p0, %s28_s18), 0  ;;  %p890_p4 = scmp.ge.s32.totalorder %s1084_s16, 1 }
   0x7   : > { %p1139_p3 = por %p134_p2, %p133_p1  ;;  %s117_s21 = ssub.s32 %s1080_s15, %s1310_s18 }
   0x8   : > { %p188_p5 = scmp.lt.s32.totalorder %s1084_s16, 3  ;;  %p121_p6 = scmp.eq.s32.totalorder %s117_s21, 0 }
   0xa   : > { %p189_p7 = pnand %p890_p4, %p188_p5 }
   0xb   : > { %s1148_s22 = scalar_select %p121_p6, %s1072_s13, %s123_s19  }
   0xc   : > { %192 = sbr.rel (%p189_p7) target bundleno = 309 (0x135), region = 32  ;;  %p231_p8 = scmp.lt.s32.totalorder (!%p189_p7), %s1076_s14, 1  ;;  %v1086_v0 = vmov (!%p189_p7), 0   ;;  %v1038_v17 = vld [vmem:[%s1300_s0] sm:$0xff] (!%p189_p7)   ;;  %v1040_v19 = vld [vmem:[%s1300_s0 + $0x8] sm:$0xff] (!%p189_p7)   ;;  %v1042_v21 = vld [vmem:[%s1300_s0 + $0x10] sm:$0xff] (!%p189_p7)   ;;  %v282_v25 = vlaneseq (!%p189_p7) }
   0xd   : > { %452 = vmatprep.mubr.bf16.mxu0 (!%p189_p7), %v1086_v0  ;;  %492 = vmatprep.mubr.bf16.mxu1 (!%p189_p7), %v1086_v0  ;;  %v1039_v18 = vld [vmem:[%s1300_s0 + $0x20] sm:$0xff] (!%p189_p7)   ;;  %v1041_v20 = vld [vmem:[%s1300_s0 + $0x28] sm:$0xff] (!%p189_p7)   ;;  %v1043_v22 = vld [vmem:[%s1300_s0 + $0x30] sm:$0xff] (!%p189_p7)  }
   0xe   : > { %v1044_v23 = vld [vmem:[%s1300_s0 + $0x18] sm:$0xff] (!%p189_p7)   ;;  %v283_v26 = vshrl.u32 (!%p189_p7), %v282_v25, 7  ;;  %v280_v28 = vld [vmem:[%s1302_s2] sm:$0x3] (!%p189_p7) }
   0xf   : > { %v1045_v24 = vld [vmem:[%s1300_s0 + $0x38] sm:$0xff] (!%p189_p7)  }
  0x10   : > { %v284_v27 = vsub.s32 (!%p189_p7), 0, %v283_v26  ;;  %v288_v29 = vsub.s32 (!%p189_p7), 1, %v283_v26 }
  0x12   : > { %v1208_v30 = vrot.slane (!%p189_p7), %v280_v28, %v284_v27  ;;  %v1211_v31 = vrot.slane (!%p189_p7), %v280_v28, %v288_v29 }
  0x13   : > { %s232_s23 = scalar_select %p231_p8, %s1076_s14, 1 }
  0x14   : > { %s956_s29 = sshll.u32 (%p1139_p3), %s1076_s14, 3 }
  0x15   : > { %s939_s24 = sshll.u32 %s232_s23, 7  ;;  %s691_s5 = scalar_lea.vmem (%p1139_p3), %s1303_s3, %s956_s29 }
  0x16   : > { %s1157_s27 = scalar_lea.vmem %s1301_s1, %s939_s24 }
  0x17   : > { %v1014_v1 = vld [vmem:[%s1157_s27 + $0x4] ss:$8 sps:$4 sm:$0xff]   ;;  %v1016_v2 = vld [vmem:[%s1157_s27] ss:$8 sps:$4 sm:$0xff]   ;;  %v1017_v3 = vld [vmem:[%s1157_s27 + $0x14] ss:$8 sps:$4 sm:$0xff]  }
  0x18   : > { %420 = vmatprep.subr.bf16.mxu0 %v1014_v1  ;;  %957 = vmatprep.subr.bf16.mxu1 %v1014_v1  ;;  %v1019_v4 = vld [vmem:[%s1157_s27 + $0x10] ss:$8 sps:$4 sm:$0xff]   ;;  %v1020_v5 = vld [vmem:[%s1157_s27 + $0x24] ss:$8 sps:$4 sm:$0xff]   ;;  %v1022_v6 = vld [vmem:[%s1157_s27 + $0x20] ss:$8 sps:$4 sm:$0xff]  }
  0x19   : > { %421 = vmatpush1.bf16.msra.mxu0 %v1016_v2  ;;  %965 = vmatpush1.bf16.msra.mxu1 %v1016_v2  ;;  %v1023_v7 = vld [vmem:[%s1157_s27 + $0x34] ss:$8 sps:$4 sm:$0xff]   ;;  %v1025_v8 = vld [vmem:[%s1157_s27 + $0x30] ss:$8 sps:$4 sm:$0xff]   ;;  %v1026_v9 = vld [vmem:[%s1157_s27 + $0x44] ss:$8 sps:$4 sm:$0xff]  }
  0x1a   : > { %422 = vmatprep.subr.bf16.mxu0 %v1017_v3  ;;  %958 = vmatprep.subr.bf16.mxu1 %v1017_v3  ;;  %v1028_v10 = vld [vmem:[%s1157_s27 + $0x40] ss:$8 sps:$4 sm:$0xff]   ;;  %v1029_v11 = vld [vmem:[%s1157_s27 + $0x54] ss:$8 sps:$4 sm:$0xff]   ;;  %v1031_v12 = vld [vmem:[%s1157_s27 + $0x50] ss:$8 sps:$4 sm:$0xff]  }
  0x1b   : > { %v1032_v13 = vld [vmem:[%s1157_s27 + $0x64] ss:$8 sps:$4 sm:$0xff]   ;;  %v1034_v14 = vld [vmem:[%s1157_s27 + $0x60] ss:$8 sps:$4 sm:$0xff]   ;;  %v1035_v15 = vld [vmem:[%s1157_s27 + $0x74] ss:$8 sps:$4 sm:$0xff]  }
  0x1c   : > { %v1037_v16 = vld [vmem:[%s1157_s27 + $0x70] ss:$8 sps:$4 sm:$0xff]   ;;  %s221_s27 = sand.u32 1, %s1068_s12  }
  0x1d   : > { %423 = vmatpush1.bf16.msra.mxu0 %v1019_v4  ;;  %966 = vmatpush1.bf16.msra.mxu1 %v1019_v4  ;;  %s891_s28 = sshll.u32 %s221_s27, 7 }
  0x1e   : > { %424 = vmatprep.subr.bf16.mxu0 %v1020_v5  ;;  %959 = vmatprep.subr.bf16.mxu1 %v1020_v5  ;;  %s1221_s12 = scalar_lea.vmem [#allocation2], %s891_s28 }
  0x21   : > { %425 = vmatpush1.bf16.msra.mxu0 %v1022_v6  ;;  %967 = vmatpush1.bf16.msra.mxu1 %v1022_v6 }
  0x22   : > { %426 = vmatprep.subr.bf16.mxu0 %v1023_v7  ;;  %960 = vmatprep.subr.bf16.mxu1 %v1023_v7 }
  0x25   : > { %427 = vmatpush1.bf16.msra.mxu0 %v1025_v8  ;;  %968 = vmatpush1.bf16.msra.mxu1 %v1025_v8 }
  0x26   : > { %428 = vmatprep.subr.bf16.mxu0 %v1026_v9  ;;  %961 = vmatprep.subr.bf16.mxu1 %v1026_v9 }
  0x29   : > { %429 = vmatpush1.bf16.msra.mxu0 %v1028_v10  ;;  %969 = vmatpush1.bf16.msra.mxu1 %v1028_v10 }
  0x2a   : > { %430 = vmatprep.subr.bf16.mxu0 %v1029_v11  ;;  %962 = vmatprep.subr.bf16.mxu1 %v1029_v11 }
  0x2d   : > { %431 = vmatpush1.bf16.msra.mxu0 %v1031_v12  ;;  %970 = vmatpush1.bf16.msra.mxu1 %v1031_v12 }
  0x2e   : > { %432 = vmatprep.subr.bf16.mxu0 %v1032_v13  ;;  %963 = vmatprep.subr.bf16.mxu1 %v1032_v13 }
  0x31   : > { %433 = vmatpush1.bf16.msra.mxu0 %v1034_v14  ;;  %971 = vmatpush1.bf16.msra.mxu1 %v1034_v14 }
  0x32   : > { %434 = vmatprep.subr.bf16.mxu0 %v1035_v15  ;;  %964 = vmatprep.subr.bf16.mxu1 %v1035_v15 }
  0x35   : > { %435 = vmatpush1.bf16.msra.mxu0 %v1037_v16  ;;  %972 = vmatpush1.bf16.msra.mxu1 %v1037_v16 }
  0x38   : > { %453 = vmatmul.mubr.bf16.vlgmr.msra.gmra.mrb[0].mxu0 %v1038_v17  ;;  %493 = vmatmul.mubr.bf16.vlgmr.msra.gmra.mrb[0].mxu1 %v1039_v18 }
  0x39   : > { %462 = vmatprep.mubr.bf16.mxu0 %v1086_v0  ;;  %502 = vmatprep.mubr.bf16.mxu1 %v1086_v0 }
  0x40   : > { %463 = vmatmul.mubr.bf16.gmra.mrb[4].mxu0 %v1040_v19  ;;  %503 = vmatmul.mubr.bf16.gmra.mrb[4].mxu1 %v1041_v20 }
  0x41   : > { %472 = vmatprep.mubr.bf16.mxu0 %v1086_v0  ;;  %512 = vmatprep.mubr.bf16.mxu1 %v1086_v0 }
  0x48   : > { %473 = vmatmul.mubr.bf16.gmra.mrb[8].mxu0 %v1042_v21  ;;  %513 = vmatmul.mubr.bf16.gmra.mrb[8].mxu1 %v1043_v22 }
  0x49   : > { %482 = vmatprep.mubr.bf16.mxu0 %v1086_v0  ;;  %522 = vmatprep.mubr.bf16.mxu1 %v1086_v0 }
  0x50   : > { %483 = vmatmul.mubr.bf16.gmra.mrb[12].mxu0 %v1044_v23  ;;  %523 = vmatmul.mubr.bf16.gmra.mrb[12].mxu1 %v1045_v24 }
 0x10b   : > { %v454_v32 = vpop.f32.mrb[0].mxu0  ;;  %v494_v33 = vpop.f32.mrb[0].mxu1 }
 0x10c   : > { %v455_v34 = vadd.f32 %v454_v32, %v1208_v30  ;;  %v495_v35 = vadd.f32 %v494_v33, %v1208_v30  ;;  %v456_v36 = vpop.f32.mrb[1].mxu0  ;;  %v496_v37 = vpop.f32.mrb[1].mxu1 }
 0x10d   : > { %v457_v38 = vadd.f32 %v456_v36, %v1211_v31  ;;  %v497_v39 = vadd.f32 %v496_v37, %v1211_v31  ;;  %v458_v40 = vpop.f32.mrb[2].mxu0  ;;  %v498_v41 = vpop.f32.mrb[2].mxu1 }
 0x10e   : > { %v459_v42 = vadd.f32 %v458_v40, %v1208_v30  ;;  %v499_v43 = vadd.f32 %v498_v41, %v1208_v30  ;;  %v460_v44 = vpop.f32.mrb[3].mxu0  ;;  %v500_v45 = vpop.f32.mrb[3].mxu1 }
 0x10f   : > { %v940_v46 = vpack.c.bf16 %v457_v38, %v455_v34  ;;  %v948_v47 = vpack.c.bf16 %v497_v39, %v495_v35  ;;  %v461_v48 = vadd.f32 %v460_v44, %v1211_v31  ;;  %v501_v49 = vadd.f32 %v500_v45, %v1211_v31 }
 0x111   : > { %661 = vst [vmem:[%s1221_s12] sm:$0xff] %v940_v46  ;;  %669 = vst [vmem:[%s1221_s12 + $0x40] sm:$0xff] %v948_v47  ;;  %v941_v50 = vpack.c.bf16 %v461_v48, %v459_v42  ;;  %v949_v51 = vpack.c.bf16 %v501_v49, %v499_v43 }
 0x113   : > { %662 = vst [vmem:[%s1221_s12 + $0x8] sm:$0xff] %v941_v50  ;;  %670 = vst [vmem:[%s1221_s12 + $0x48] sm:$0xff] %v949_v51  ;;  %v464_v52 = vpop.f32.mrb[4].mxu0  ;;  %v504_v53 = vpop.f32.mrb[4].mxu1 }
 0x114   : > { %v465_v54 = vadd.f32 %v464_v52, %v1208_v30  ;;  %v505_v55 = vadd.f32 %v504_v53, %v1208_v30  ;;  %v466_v56 = vpop.f32.mrb[5].mxu0  ;;  %v506_v57 = vpop.f32.mrb[5].mxu1 }
 0x115   : > { %v467_v58 = vadd.f32 %v466_v56, %v1211_v31  ;;  %v507_v59 = vadd.f32 %v506_v57, %v1211_v31  ;;  %v468_v60 = vpop.f32.mrb[6].mxu0  ;;  %v508_v61 = vpop.f32.mrb[6].mxu1 }
 0x116   : > { %v469_v62 = vadd.f32 %v468_v60, %v1208_v30  ;;  %v509_v63 = vadd.f32 %v508_v61, %v1208_v30  ;;  %v470_v0 = vpop.f32.mrb[7].mxu0  ;;  %v510_v1 = vpop.f32.mrb[7].mxu1 }
 0x117   : > { %v942_v2 = vpack.c.bf16 %v467_v58, %v465_v54  ;;  %v950_v3 = vpack.c.bf16 %v507_v59, %v505_v55  ;;  %v471_v4 = vadd.f32 %v470_v0, %v1211_v31  ;;  %v511_v5 = vadd.f32 %v510_v1, %v1211_v31 }
 0x118   : > { %v765_v56 = vld [vmem:[%s1221_s12 + $0x40] sm:$0xff] (%p1139_p3) }
 0x119   : > { %663 = vst [vmem:[%s1221_s12 + $0x10] sm:$0xff] %v942_v2  ;;  %671 = vst [vmem:[%s1221_s12 + $0x50] sm:$0xff] %v950_v3  ;;  %v943_v6 = vpack.c.bf16 %v471_v4, %v469_v62  ;;  %v951_v7 = vpack.c.bf16 %v511_v5, %v509_v63 }
 0x11a   : > { %766 = vst [vmem:[%s691_s5 + $0x80] sm:$0xff] (%p1139_p3), %v765_v56  ;;  %v767_v57 = vld [vmem:[%s1221_s12 + $0x48] sm:$0xff] (%p1139_p3) }
 0x11b   : > { %664 = vst [vmem:[%s1221_s12 + $0x18] sm:$0xff] %v943_v6  ;;  %672 = vst [vmem:[%s1221_s12 + $0x58] sm:$0xff] %v951_v7  ;;  %v474_v8 = vpop.f32.mrb[8].mxu0  ;;  %v514_v9 = vpop.f32.mrb[8].mxu1 }
 0x11c   : > { %v475_v10 = vadd.f32 %v474_v8, %v1208_v30  ;;  %v515_v11 = vadd.f32 %v514_v9, %v1208_v30  ;;  %v476_v12 = vpop.f32.mrb[9].mxu0  ;;  %v516_v13 = vpop.f32.mrb[9].mxu1  ;;  %768 = vst [vmem:[%s691_s5 + $0x90] sm:$0xff] (%p1139_p3), %v767_v57 }
 0x11d   : > { %v477_v14 = vadd.f32 %v476_v12, %v1211_v31  ;;  %v517_v15 = vadd.f32 %v516_v13, %v1211_v31  ;;  %v478_v16 = vpop.f32.mrb[10].mxu0  ;;  %v518_v17 = vpop.f32.mrb[10].mxu1 }
 0x11e   : > { %v479_v18 = vadd.f32 %v478_v16, %v1208_v30  ;;  %v519_v19 = vadd.f32 %v518_v17, %v1208_v30  ;;  %v480_v20 = vpop.f32.mrb[11].mxu0  ;;  %v520_v21 = vpop.f32.mrb[11].mxu1 }
 0x11f   : > { %v944_v22 = vpack.c.bf16 %v477_v14, %v475_v10  ;;  %v952_v23 = vpack.c.bf16 %v517_v15, %v515_v11  ;;  %v481_v24 = vadd.f32 %v480_v20, %v1211_v31  ;;  %v521_v25 = vadd.f32 %v520_v21, %v1211_v31 }
 0x120   : > { %v753_v50 = vld [vmem:[%s1221_s12 + $0x10] sm:$0xff] (%p1139_p3) }
 0x121   : > { %665 = vst [vmem:[%s1221_s12 + $0x20] sm:$0xff] %v944_v22  ;;  %673 = vst [vmem:[%s1221_s12 + $0x60] sm:$0xff] %v952_v23  ;;  %v945_v26 = vpack.c.bf16 %v481_v24, %v479_v18  ;;  %v953_v27 = vpack.c.bf16 %v521_v25, %v519_v19  ;;  %v769_v58 = vld [vmem:[%s1221_s12 + $0x50] sm:$0xff] (%p1139_p3) }
 0x122   : > { %v755_v51 = vld [vmem:[%s1221_s12 + $0x18] sm:$0xff] (%p1139_p3)  ;;  %754 = vst [vmem:[%s691_s5 + $0x20] sm:$0xff] (%p1139_p3), %v753_v50  ;;  %770 = vst [vmem:[%s691_s5 + $0xa0] sm:$0xff] (%p1139_p3), %v769_v58 }
 0x123   : > { %666 = vst [vmem:[%s1221_s12 + $0x28] sm:$0xff] %v945_v26  ;;  %674 = vst [vmem:[%s1221_s12 + $0x68] sm:$0xff] %v953_v27  ;;  %v484_v28 = vpop.f32.mrb[12].mxu0  ;;  %v524_v29 = vpop.f32.mrb[12].mxu1  ;;  %v771_v59 = vld [vmem:[%s1221_s12 + $0x58] sm:$0xff] (%p1139_p3) }
 0x124   : > { %v485_v32 = vadd.f32 %v484_v28, %v1208_v30  ;;  %v525_v33 = vadd.f32 %v524_v29, %v1208_v30  ;;  %v486_v34 = vpop.f32.mrb[13].mxu0  ;;  %v526_v35 = vpop.f32.mrb[13].mxu1  ;;  %756 = vst [vmem:[%s691_s5 + $0x30] sm:$0xff] (%p1139_p3), %v755_v51  ;;  %772 = vst [vmem:[%s691_s5 + $0xb0] sm:$0xff] (%p1139_p3), %v771_v59 }
 0x125   : > { %v487_v36 = vadd.f32 %v486_v34, %v1211_v31  ;;  %v527_v37 = vadd.f32 %v526_v35, %v1211_v31  ;;  %v488_v38 = vpop.f32.mrb[14].mxu0  ;;  %v528_v39 = vpop.f32.mrb[14].mxu1  ;;  %683 = sbr.rel (!%p1139_p3) target bundleno = 309 (0x135), region = 36 }
 0x126   : > { %v489_v40 = vadd.f32 %v488_v38, %v1208_v30  ;;  %v529_v41 = vadd.f32 %v528_v39, %v1208_v30  ;;  %v490_v42 = vpop.f32.mrb[15].mxu0  ;;  %v530_v43 = vpop.f32.mrb[15].mxu1  ;;  %v749_v30 = vld [vmem:[%s1221_s12] sm:$0xff] (%p1139_p3) }
 0x127   : > { %v946_v44 = vpack.c.bf16 %v487_v36, %v485_v32  ;;  %v954_v45 = vpack.c.bf16 %v527_v37, %v525_v33  ;;  %v491_v46 = vadd.f32 %v490_v42, %v1211_v31  ;;  %v531_v47 = vadd.f32 %v530_v43, %v1211_v31  ;;  %v751_v31 = vld [vmem:[%s1221_s12 + $0x8] sm:$0xff] (%p1139_p3)  ;;  %750 = vst [vmem:[%s691_s5] sm:$0xff] (%p1139_p3), %v749_v30 }
 0x128   : > { %v757_v52 = vld [vmem:[%s1221_s12 + $0x20] sm:$0xff] (%p1139_p3)  ;;  %752 = vst [vmem:[%s691_s5 + $0x10] sm:$0xff] (%p1139_p3), %v751_v31 }
 0x129   : > { %667 = vst [vmem:[%s1221_s12 + $0x30] sm:$0xff] %v946_v44  ;;  %675 = vst [vmem:[%s1221_s12 + $0x70] sm:$0xff] %v954_v45  ;;  %v947_v48 = vpack.c.bf16 %v491_v46, %v489_v40  ;;  %v955_v49 = vpack.c.bf16 %v531_v47, %v529_v41  ;;  %v773_v60 = vld [vmem:[%s1221_s12 + $0x60] sm:$0xff] (%p1139_p3) }
 0x12a   : > { %v759_v53 = vld [vmem:[%s1221_s12 + $0x28] sm:$0xff] (%p1139_p3)  ;;  %758 = vst [vmem:[%s691_s5 + $0x40] sm:$0xff] (%p1139_p3), %v757_v52  ;;  %774 = vst [vmem:[%s691_s5 + $0xc0] sm:$0xff] (%p1139_p3), %v773_v60 }
 0x12b   : > { %668 = vst [vmem:[%s1221_s12 + $0x38] sm:$0xff] %v947_v48  ;;  %676 = vst [vmem:[%s1221_s12 + $0x78] sm:$0xff] %v955_v49  ;;  %v775_v61 = vld [vmem:[%s1221_s12 + $0x68] sm:$0xff] (%p1139_p3) }
 0x12c   : > { %760 = vst [vmem:[%s691_s5 + $0x50] sm:$0xff] %v759_v53  ;;  %776 = vst [vmem:[%s691_s5 + $0xd0] sm:$0xff] %v775_v61 }
 0x130   : > { %v761_v54 = vld [vmem:[%s1221_s12 + $0x30] sm:$0xff] }
 0x131   : > { %762 = vst [vmem:[%s691_s5 + $0x60] sm:$0xff] %v761_v54  ;;  %v777_v62 = vld [vmem:[%s1221_s12 + $0x70] sm:$0xff] }
 0x132   : > { %v763_v55 = vld [vmem:[%s1221_s12 + $0x38] sm:$0xff]  ;;  %778 = vst [vmem:[%s691_s5 + $0xe0] sm:$0xff] %v777_v62 }
 0x133   : > { %764 = vst [vmem:[%s691_s5 + $0x70] sm:$0xff] %v763_v55  ;;  %v779_v63 = vld [vmem:[%s1221_s12 + $0x78] sm:$0xff] }
 0x134   : > { %780 = vst [vmem:[%s691_s5 + $0xf0] sm:$0xff] %v779_v63 }
 0x135 PF: > { %s13_s16 = sadd.s32 1, %s1084_s16   ;;  %s1305_s12 = smov %s1072_s13 }
 0x136   : > { %p10_p9 = scmp.ge.s32.totalorder %s13_s16, 4   ;;  %s1306_s13 = smov %s1148_s22 }
 0x137   : > { %s1307_s14 = smov %s1080_s15  ;;  %s1308_s15 = smov %s1310_s18 }
 0x138   :  { %12 = sbr.rel (!%p10_p9) target bundleno = 3 (0x3), region = 106 }

// kernel: _lambda_.53
= control target key start
LH: loop header
LB: loop body
LE: loop exit
PB: predicated region body
PF: predicated region fallthrough
CT: control target
= control target key end

     0   :  { %s938_s12 = smov 0   ;;  %s940_s13 = smov 0   ;;  %s1088_s0 = inlined_call_operand.vmem [shape: bf16[512,128], index: 0, kind: input, shape index: {}]   ;;  %s1089_s1 = inlined_call_operand.vmem [shape: bf16[128,128], index: 1, kind: input, shape index: {}]   ;;  %s1090_s2 = inlined_call_operand.vmem [shape: f32[1,128], index: 2, kind: input, shape index: {}]   ;;  %s1091_s3 = inlined_call_operand.vmem [shape: f32[512,128], index: 3, kind: output, shape index: {}]  }
   0x1   :  { %s942_s14 = smov 0  }
   0x2 LB: > { %s25_s15 = sadd.s32 1, %s912_s13  ;;  %p726_p0 = scmp.ge.s32.totalorder %s916_s14, 1  ;;  %s916_s14 = sphi %s942_s14, %s13_s14   ;;  %s912_s13 = sphi %s940_s13, %s1093_s13   ;;  %s908_s12 = sphi %s938_s12, %s1092_s12  }
   0x3   : > { %p27_p1 = scmp.ge.s32.totalorder %s25_s15, 2  ;;  %p169_p2 = scmp.lt.s32.totalorder %s916_s14, 3 }
   0x5   : > { %s1095_s15 = smov (%p27_p1, %s25_s15), 0  ;;  %p170_p3 = pnand %p726_p0, %p169_p2 }
   0x6   : > { %v870_v0 = vld [vmem:[%s1089_s1] sm:$0xff] (!%p170_p3)   ;;  %s727_s18 = sshll.u32 (!%p170_p3), %s908_s12, 5  ;;  %v871_v1 = vld [vmem:[%s1089_s1 + $0x8] sm:$0xff] (!%p170_p3)   ;;  %v872_v2 = vld [vmem:[%s1089_s1 + $0x10] sm:$0xff] (!%p170_p3)  }
   0x7   : > { %173 = sbr.rel (%p170_p3) target bundleno = 281 (0x119), region = 32  ;;  %p204_p4 = scmp.lt.s32.totalorder (!%p170_p3), %s727_s18, 63  ;;  %782 = vmatprep.subr.bf16.mxu0 (!%p170_p3), %v870_v0  ;;  %830 = vmatprep.subr.bf16.mxu1 (!%p170_p3), %v870_v0  ;;  %v873_v3 = vld [vmem:[%s1089_s1 + $0x18] sm:$0xff] (!%p170_p3)   ;;  %v874_v6 = vld [vmem:[%s1089_s1 + $0x20] sm:$0xff] (!%p170_p3)   ;;  %v875_v7 = vld [vmem:[%s1089_s1 + $0x28] sm:$0xff] (!%p170_p3)  }
   0x8   : > { %783 = vmatpush3.bf16.msra.mxu0 (!%p170_p3), %v870_v0  ;;  %838 = vmatpush3.bf16.msra.mxu1 (!%p170_p3), %v870_v0  ;;  %v876_v8 = vld [vmem:[%s1089_s1 + $0x30] sm:$0xff] (!%p170_p3)   ;;  %v877_v9 = vld [vmem:[%s1089_s1 + $0x38] sm:$0xff] (!%p170_p3)   ;;  %v1008_v24 = vld [vmem:[%s1090_s2] ss:$0 sm:$0xff] (!%p170_p3) }
   0x9   : > { %784 = vmatprep.subr.bf16.mxu0 (!%p170_p3), %v871_v1  ;;  %831 = vmatprep.subr.bf16.mxu1 (!%p170_p3), %v871_v1 }
   0xc   : > { %785 = vmatpush3.bf16.msra.mxu0 (!%p170_p3), %v871_v1  ;;  %839 = vmatpush3.bf16.msra.mxu1 (!%p170_p3), %v871_v1 }
   0xd   : > { %786 = vmatprep.subr.bf16.mxu0 (!%p170_p3), %v872_v2  ;;  %832 = vmatprep.subr.bf16.mxu1 (!%p170_p3), %v872_v2 }
   0xe   : > { %s1097_s18 = smov (!%p204_p4, %s727_s18), 63 }
   0xf   : > { %s728_s23 = sshll.u32 %s1097_s18, 2  ;;  %s730_s10 = sshll.u32 %s1097_s18, 3 }
  0x10   : > { %s971_s26 = scalar_lea.vmem %s1088_s0, %s728_s23  ;;  %787 = vmatpush3.bf16.msra.mxu0 %v872_v2  ;;  %840 = vmatpush3.bf16.msra.mxu1 %v872_v2  ;;  %s1013_s19 = scalar_lea.vmem %s1091_s3, %s730_s10 }
  0x11   : > { %v878_v4 = vld [vmem:[%s971_s26] sm:$0xff]   ;;  %788 = vmatprep.subr.bf16.mxu0 %v873_v3  ;;  %833 = vmatprep.subr.bf16.mxu1 %v873_v3  ;;  %v880_v10 = vld [vmem:[%s971_s26 + $0x8] sm:$0xff]   ;;  %v882_v12 = vld [vmem:[%s971_s26 + $0x10] sm:$0xff]  }
  0x12   : > { %v879_v5 = vld [vmem:[%s971_s26 + $0x40] sm:$0xff]   ;;  %798 = vmatprep.mubr.bf16.mxu0 %v878_v4  ;;  %v881_v11 = vld [vmem:[%s971_s26 + $0x48] sm:$0xff]   ;;  %v883_v13 = vld [vmem:[%s971_s26 + $0x50] sm:$0xff]  }
  0x13   : > { %814 = vmatprep.mubr.bf16.mxu1 %v879_v5  ;;  %v884_v14 = vld [vmem:[%s971_s26 + $0x18] sm:$0xff]   ;;  %v886_v16 = vld [vmem:[%s971_s26 + $0x20] sm:$0xff]   ;;  %v888_v18 = vld [vmem:[%s971_s26 + $0x28] sm:$0xff]  }
  0x14   : > { %789 = vmatpush3.bf16.msra.mxu0 %v873_v3  ;;  %841 = vmatpush3.bf16.msra.mxu1 %v873_v3  ;;  %v885_v15 = vld [vmem:[%s971_s26 + $0x58] sm:$0xff]   ;;  %v887_v17 = vld [vmem:[%s971_s26 + $0x60] sm:$0xff]   ;;  %v889_v19 = vld [vmem:[%s971_s26 + $0x68] sm:$0xff]  }
  0x15   : > { %790 = vmatprep.subr.bf16.mxu0 %v874_v6  ;;  %834 = vmatprep.subr.bf16.mxu1 %v874_v6  ;;  %v890_v20 = vld [vmem:[%s971_s26 + $0x30] sm:$0xff]   ;;  %v892_v22 = vld [vmem:[%s971_s26 + $0x38] sm:$0xff]  }
  0x16   : > { %v891_v21 = vld [vmem:[%s971_s26 + $0x70] sm:$0xff]   ;;  %v893_v23 = vld [vmem:[%s971_s26 + $0x78] sm:$0xff]  }
  0x18   : > { %791 = vmatpush3.bf16.msra.mxu0 %v874_v6  ;;  %842 = vmatpush3.bf16.msra.mxu1 %v874_v6 }
  0x19   : > { %792 = vmatprep.subr.bf16.mxu0 %v875_v7  ;;  %835 = vmatprep.subr.bf16.mxu1 %v875_v7 }
  0x1c   : > { %793 = vmatpush3.bf16.msra.mxu0 %v875_v7  ;;  %843 = vmatpush3.bf16.msra.mxu1 %v875_v7 }
  0x1d   : > { %794 = vmatprep.subr.bf16.mxu0 %v876_v8  ;;  %836 = vmatprep.subr.bf16.mxu1 %v876_v8 }
  0x20   : > { %795 = vmatpush3.bf16.msra.mxu0 %v876_v8  ;;  %844 = vmatpush3.bf16.msra.mxu1 %v876_v8 }
  0x21   : > { %796 = vmatprep.subr.bf16.mxu0 %v877_v9  ;;  %837 = vmatprep.subr.bf16.mxu1 %v877_v9 }
  0x24   : > { %797 = vmatpush3.bf16.msra.mxu0 %v877_v9  ;;  %845 = vmatpush3.bf16.msra.mxu1 %v877_v9 }
  0x27   : > { %799 = vmatmul.mubr.bf16.vlgmr.msra.gmra.mrb[0].mxu0 %v880_v10  ;;  %815 = vmatmul.mubr.bf16.vlgmr.msra.gmra.mrb[0].mxu1 %v881_v11 }
  0x28   : > { %802 = vmatprep.mubr.bf16.mxu0 %v882_v12  ;;  %818 = vmatprep.mubr.bf16.mxu1 %v883_v13 }
  0x2f   : > { %803 = vmatmul.mubr.bf16.gmra.mrb[4].mxu0 %v884_v14  ;;  %819 = vmatmul.mubr.bf16.gmra.mrb[4].mxu1 %v885_v15 }
  0x30   : > { %806 = vmatprep.mubr.bf16.mxu0 %v886_v16  ;;  %822 = vmatprep.mubr.bf16.mxu1 %v887_v17 }
  0x37   : > { %807 = vmatmul.mubr.bf16.gmra.mrb[8].mxu0 %v888_v18  ;;  %823 = vmatmul.mubr.bf16.gmra.mrb[8].mxu1 %v889_v19 }
  0x38   : > { %810 = vmatprep.mubr.bf16.mxu0 %v890_v20  ;;  %826 = vmatprep.mubr.bf16.mxu1 %v891_v21 }
  0x3f   : > { %811 = vmatmul.mubr.bf16.gmra.mrb[12].mxu0 %v892_v22  ;;  %827 = vmatmul.mubr.bf16.gmra.mrb[12].mxu1 %v893_v23 }
  0xfa   : > { %v800_v25 = vpop.f32.mrb[0].mxu0  ;;  %v816_v26 = vpop.f32.mrb[0].mxu1 }
  0xfb   : > { %v468_v27 = vadd.f32 %v800_v25, %v1008_v24  ;;  %v532_v28 = vadd.f32 %v816_v26, %v1008_v24  ;;  %v459_v29 = vpop.f32.mrb[1].mxu0  ;;  %v523_v30 = vpop.f32.mrb[1].mxu1 }
  0xfc   : > { %v460_v31 = vadd.f32 %v1008_v24, %v459_v29  ;;  %v524_v32 = vadd.f32 %v1008_v24, %v523_v30  ;;  %v801_v33 = vpop.f32.mrb[2].mxu0  ;;  %v817_v34 = vpop.f32.mrb[2].mxu1 }
  0xfd   : > { %588 = vst [vmem:[%s1013_s19 + $0x10] sm:$0xff] %v468_v27  ;;  %604 = vst [vmem:[%s1013_s19 + $0x90] sm:$0xff] %v532_v28  ;;  %v471_v35 = vadd.f32 %v801_v33, %v1008_v24  ;;  %v535_v36 = vadd.f32 %v817_v34, %v1008_v24  ;;  %v462_v37 = vpop.f32.mrb[3].mxu0  ;;  %v526_v38 = vpop.f32.mrb[3].mxu1 }
  0xfe   : > { %586 = vst [vmem:[%s1013_s19] sm:$0xff] %v460_v31  ;;  %602 = vst [vmem:[%s1013_s19 + $0x80] sm:$0xff] %v524_v32  ;;  %v463_v39 = vadd.f32 %v1008_v24, %v462_v37  ;;  %v527_v40 = vadd.f32 %v1008_v24, %v526_v38 }
  0xff   : > { %589 = vst [vmem:[%s1013_s19 + $0x18] sm:$0xff] %v471_v35  ;;  %605 = vst [vmem:[%s1013_s19 + $0x98] sm:$0xff] %v535_v36 }
 0x100   : > { %587 = vst [vmem:[%s1013_s19 + $0x8] sm:$0xff] %v463_v39  ;;  %603 = vst [vmem:[%s1013_s19 + $0x88] sm:$0xff] %v527_v40 }
 0x102   : > { %v804_v41 = vpop.f32.mrb[4].mxu0  ;;  %v820_v42 = vpop.f32.mrb[4].mxu1 }
 0x103   : > { %v484_v43 = vadd.f32 %v804_v41, %v1008_v24  ;;  %v548_v44 = vadd.f32 %v820_v42, %v1008_v24  ;;  %v475_v45 = vpop.f32.mrb[5].mxu0  ;;  %v539_v46 = vpop.f32.mrb[5].mxu1 }
 0x104   : > { %v476_v47 = vadd.f32 %v1008_v24, %v475_v45  ;;  %v540_v48 = vadd.f32 %v1008_v24, %v539_v46  ;;  %v805_v49 = vpop.f32.mrb[6].mxu0  ;;  %v821_v50 = vpop.f32.mrb[6].mxu1 }
 0x105   : > { %592 = vst [vmem:[%s1013_s19 + $0x30] sm:$0xff] %v484_v43  ;;  %608 = vst [vmem:[%s1013_s19 + $0xb0] sm:$0xff] %v548_v44  ;;  %v487_v51 = vadd.f32 %v805_v49, %v1008_v24  ;;  %v551_v52 = vadd.f32 %v821_v50, %v1008_v24  ;;  %v478_v53 = vpop.f32.mrb[7].mxu0  ;;  %v542_v54 = vpop.f32.mrb[7].mxu1 }
 0x106   : > { %590 = vst [vmem:[%s1013_s19 + $0x20] sm:$0xff] %v476_v47  ;;  %606 = vst [vmem:[%s1013_s19 + $0xa0] sm:$0xff] %v540_v48  ;;  %v479_v55 = vadd.f32 %v1008_v24, %v478_v53  ;;  %v543_v56 = vadd.f32 %v1008_v24, %v542_v54 }
 0x107   : > { %593 = vst [vmem:[%s1013_s19 + $0x38] sm:$0xff] %v487_v51  ;;  %609 = vst [vmem:[%s1013_s19 + $0xb8] sm:$0xff] %v551_v52 }
 0x108   : > { %591 = vst [vmem:[%s1013_s19 + $0x28] sm:$0xff] %v479_v55  ;;  %607 = vst [vmem:[%s1013_s19 + $0xa8] sm:$0xff] %v543_v56 }
 0x10a   : > { %v808_v57 = vpop.f32.mrb[8].mxu0  ;;  %v824_v58 = vpop.f32.mrb[8].mxu1 }
 0x10b   : > { %v500_v59 = vadd.f32 %v808_v57, %v1008_v24  ;;  %v564_v60 = vadd.f32 %v824_v58, %v1008_v24  ;;  %v491_v61 = vpop.f32.mrb[9].mxu0  ;;  %v555_v62 = vpop.f32.mrb[9].mxu1 }
 0x10c   : > { %v492_v63 = vadd.f32 %v1008_v24, %v491_v61  ;;  %v556_v0 = vadd.f32 %v1008_v24, %v555_v62  ;;  %v809_v1 = vpop.f32.mrb[10].mxu0  ;;  %v825_v2 = vpop.f32.mrb[10].mxu1 }
 0x10d   : > { %596 = vst [vmem:[%s1013_s19 + $0x50] sm:$0xff] %v500_v59  ;;  %612 = vst [vmem:[%s1013_s19 + $0xd0] sm:$0xff] %v564_v60  ;;  %v503_v3 = vadd.f32 %v809_v1, %v1008_v24  ;;  %v567_v4 = vadd.f32 %v825_v2, %v1008_v24  ;;  %v494_v5 = vpop.f32.mrb[11].mxu0  ;;  %v558_v6 = vpop.f32.mrb[11].mxu1 }
 0x10e   : > { %594 = vst [vmem:[%s1013_s19 + $0x40] sm:$0xff] %v492_v63  ;;  %610 = vst [vmem:[%s1013_s19 + $0xc0] sm:$0xff] %v556_v0  ;;  %v495_v7 = vadd.f32 %v1008_v24, %v494_v5  ;;  %v559_v8 = vadd.f32 %v1008_v24, %v558_v6 }
 0x10f   : > { %597 = vst [vmem:[%s1013_s19 + $0x58] sm:$0xff] %v503_v3  ;;  %613 = vst [vmem:[%s1013_s19 + $0xd8] sm:$0xff] %v567_v4 }
 0x110   : > { %595 = vst [vmem:[%s1013_s19 + $0x48] sm:$0xff] %v495_v7  ;;  %611 = vst [vmem:[%s1013_s19 + $0xc8] sm:$0xff] %v559_v8 }
 0x112   : > { %v812_v9 = vpop.f32.mrb[12].mxu0  ;;  %v828_v10 = vpop.f32.mrb[12].mxu1 }
 0x113   : > { %v516_v11 = vadd.f32 %v812_v9, %v1008_v24  ;;  %v580_v12 = vadd.f32 %v828_v10, %v1008_v24  ;;  %v507_v13 = vpop.f32.mrb[13].mxu0  ;;  %v571_v14 = vpop.f32.mrb[13].mxu1 }
 0x114   : > { %v508_v15 = vadd.f32 %v1008_v24, %v507_v13  ;;  %v572_v16 = vadd.f32 %v1008_v24, %v571_v14  ;;  %v813_v17 = vpop.f32.mrb[14].mxu0  ;;  %v829_v18 = vpop.f32.mrb[14].mxu1 }
 0x115   : > { %600 = vst [vmem:[%s1013_s19 + $0x70] sm:$0xff] %v516_v11  ;;  %616 = vst [vmem:[%s1013_s19 + $0xf0] sm:$0xff] %v580_v12  ;;  %v519_v19 = vadd.f32 %v813_v17, %v1008_v24  ;;  %v583_v20 = vadd.f32 %v829_v18, %v1008_v24  ;;  %v510_v21 = vpop.f32.mrb[15].mxu0  ;;  %v574_v22 = vpop.f32.mrb[15].mxu1 }
 0x116   : > { %598 = vst [vmem:[%s1013_s19 + $0x60] sm:$0xff] %v508_v15  ;;  %614 = vst [vmem:[%s1013_s19 + $0xe0] sm:$0xff] %v572_v16  ;;  %v511_v23 = vadd.f32 %v1008_v24, %v510_v21  ;;  %v575_v25 = vadd.f32 %v1008_v24, %v574_v22 }
 0x117   : > { %601 = vst [vmem:[%s1013_s19 + $0x78] sm:$0xff] %v519_v19  ;;  %617 = vst [vmem:[%s1013_s19 + $0xf8] sm:$0xff] %v583_v20 }
 0x118   : > { %599 = vst [vmem:[%s1013_s19 + $0x68] sm:$0xff] %v511_v23  ;;  %615 = vst [vmem:[%s1013_s19 + $0xe8] sm:$0xff] %v575_v25 }
 0x119 PF: > { %s13_s14 = sadd.s32 1, %s916_s14   ;;  %s1092_s12 = smov %s912_s13 }
 0x11a   : > { %p10_p5 = scmp.ge.s32.totalorder %s13_s14, 4   ;;  %s1093_s13 = smov %s1095_s15 }
 0x11c   :  { %12 = sbr.rel (!%p10_p5) target bundleno = 2 (0x2), region = 68 }

</bundles_post_ra>
